<compile_context>
chip_gen: v7x
topology: tpu7x:2x2x1
jax: 0.10.0
libtpu: 0.0.40
codegen_flags: <defaults>
</compile_context>

<pallas_src>
import functools

import numpy as np
import jax
import jax.numpy as jnp
from jax.experimental import pallas as pl
from jax.experimental.pallas import tpu as pltpu

_LANES = 128


# --------------------------------------------------------------------------- #
# Fused kernel (Bt samples per program, everything in (Bt*P, ch) row layout)   #
# --------------------------------------------------------------------------- #
def _fused_forward_kernel(xh_ref, xf_ref, xs_ref, wp_ref, fp_ref,
                          mh_ref, mt_ref, o_ref, *,
                          woff, foff, Bt, P, H, FF):
    R = Bt * P                                  # rows = (batch, pred-step)

    def ldw(name):                              # bf16 weight slice (static)
        o, r, c = woff[name]
        return wp_ref[o:o + r, :c]

    def ldf(name):                              # f32 bias / LN slice (static)
        o, r, c = foff[name]
        return fp_ref[o:o + r, :c]

    def mm(a, b):
        # bf16 operands (weights already bf16 -> no convert), f32 accumulation.
        return jnp.dot(a.astype(jnp.bfloat16), b.astype(jnp.bfloat16),
                       preferred_element_type=jnp.float32)

    def brows(a):                               # (Bt, W) -> (Bt*P, W)
        w = a.shape[-1]
        return jnp.broadcast_to(a[:, None, :], (Bt, P, w)).reshape(R, w)

    def prows(a):                               # (P, W)  -> (Bt*P, W)
        w = a.shape[-1]
        return jnp.broadcast_to(a[None, :, :], (Bt, P, w)).reshape(R, w)

    def ln_seg(x_rows, g, b, eps=1e-5):
        # Per-sample nn.LayerNorm((P, ch)) on a (Bt*P, ch) row-layout array.
        ch = x_rows.shape[-1]
        x3 = x_rows.reshape(Bt, P, ch)
        m = jnp.mean(jnp.mean(x3, axis=2, keepdims=True), axis=1, keepdims=True)
        d = x3 - m
        v = jnp.mean(jnp.mean(d * d, axis=2, keepdims=True), axis=1,
                     keepdims=True)
        y = d * jax.lax.rsqrt(v + eps) * g[None] + b[None]
        return y.reshape(R, ch)

    def cfm(x_rows, v_b, pre):
        # ConditionalFeatureMixing: single merged first-stage matmul
        # [x | v] @ [W1 | Wproj]  ->  (R, FF + H).
        xc = jnp.concatenate([x_rows, brows(v_b)], axis=-1)
        y = mm(xc, ldw(pre + "_w1p")) + ldf(pre + "_b1p")
        h = jnp.maximum(y[:, :FF], 0.0)
        xp = y[:, FF:FF + H]
        h2 = mm(h, ldw(pre + "_w2")) + ldf(pre + "_b2")
        return xp + ln_seg(h2, ldf(pre + "_g"), ldf(pre + "_bt"))

    # 0) Fused static projections for all three CFMs (one matmul).
    xs = xs_ref[...]                                        # (Bt, Cs)
    v_all = mm(xs, ldw("frw_all")) + ldf("frb_all")         # (Bt, 3H)

    # 1) SparseAutoEncoder residual on x_extra_future (rows = (b, p)).
    xf = xf_ref[...]                                        # (R, Ce)
    henc = mm(xf, ldw("sae_we")) + ldf("sae_be")
    xf = xf + mm(henc, ldw("sae_wd")) + ldf("sae_bd")

    # 2) fc_hist along the time axis: one block-diagonal left-multiply,
    #    rows stay (b, p) -> no transposes.
    xh = mm(mh_ref[...], xh_ref[...]) + prows(ldf("hist_b"))  # (R, Ci+Ce)

    # 3) Conditional feature mixing (hist / future).
    x_hm = cfm(xh, v_all[:, :H], "cfmh")                    # (R, H)
    x_fm = cfm(xf, v_all[:, H:2 * H], "cfmf")               # (R, H)

    # 4) Mixer layer TimeMixing on [x_hm | x_fm]: one block-diagonal matmul
    #    plus a plain (segmented) LayerNorm.
    x_cat = jnp.concatenate([x_hm, x_fm], axis=-1)          # (R, 2H)
    r = jnp.maximum(mm(mt_ref[...], x_cat) + prows(ldf("tm_b")), 0.0)
    x_t = ln_seg(x_cat + r, ldf("tm_g"), ldf("tm_be"))      # (R, 2H)

    # 5) Mixer CFM (2H -> H).
    x_mix = cfm(x_t, v_all[:, 2 * H:3 * H], "cfmm")         # (R, H)

    # 6) fc_presigma + softplus (stable formulation).
    y = mm(x_mix, ldw("sig_w")) + ldf("sig_b")              # (R, Cout)
    o_ref[...] = jnp.maximum(y, 0.0) + jnp.log(1.0 + jnp.exp(-jnp.abs(y)))


# --------------------------------------------------------------------------- #
# Pallas wrapper                                                               #
# --------------------------------------------------------------------------- #
def tsmixer_sae_forward(wpack, woff, fpack, foff, m_hist, m_time,
                        x_hist, x_extra_hist, x_extra_future, x_static, *,
                        Bt, H, FF, Cout):
    B, S, Ci = x_hist.shape
    Ce = x_extra_hist.shape[-1]
    P = x_extra_future.shape[1]
    Cs = x_static.shape[-1]
    C = Ci + Ce
    assert B % Bt == 0, (B, Bt)
    nb = B // Bt

    # Host-side layout plumbing (free reshapes / one tiny concat in XLA):
    xh_rows = jnp.concatenate([x_hist, x_extra_hist], axis=-1).reshape(B * S, C)
    xf_rows = x_extra_future.reshape(B * P, Ce)

    Rw = wpack.shape[0]
    Rf = fpack.shape[0]
    kernel = functools.partial(_fused_forward_kernel, woff=woff, foff=foff,
                               Bt=Bt, P=P, H=H, FF=FF)
    out = pl.pallas_call(
        kernel,
        out_shape=jax.ShapeDtypeStruct((B * P, Cout), jnp.float32),
        grid=(nb,),
        in_specs=[
            pl.BlockSpec((Bt * S, C), lambda i: (i, 0)),       # hist rows
            pl.BlockSpec((Bt * P, Ce), lambda i: (i, 0)),      # future rows
            pl.BlockSpec((Bt, Cs), lambda i: (i, 0)),          # static
            pl.BlockSpec((Rw, _LANES), lambda i: (0, 0)),      # bf16 weights
            pl.BlockSpec((Rf, _LANES), lambda i: (0, 0)),      # f32 bias/LN
            pl.BlockSpec((Bt * P, Bt * S), lambda i: (0, 0)),  # block-diag fc_hist
            pl.BlockSpec((Bt * P, Bt * P), lambda i: (0, 0)),  # block-diag time-mix
        ],
        out_specs=pl.BlockSpec((Bt * P, Cout), lambda i: (i, 0)),
        compiler_params=pltpu.CompilerParams(
            dimension_semantics=("parallel",)),                # v7x megacore
    )(xh_rows, xf_rows, x_static, wpack, fpack, m_hist, m_time)
    return out.reshape(B, P, Cout)


# --------------------------------------------------------------------------- #
# Parameters (deterministic, PyTorch-style uniform init; LayerNorm = 1/0)      #
# --------------------------------------------------------------------------- #
def _linear_init(key, fan_in, fan_out):
    kw, kb = jax.random.split(key)
    bound = 1.0 / float(np.sqrt(fan_in))
    w = jax.random.uniform(kw, (fan_in, fan_out), jnp.float32, -bound, bound)
    b = jax.random.uniform(kb, (1, fan_out), jnp.float32, -bound, bound)
    return w, b


def init_params(key, *, S, P, Ci, Ce, Cs, H, FF, Cout, sae_hidden=64):
    keys = iter(jax.random.split(key, 32))

    def cfm_init(Cx):
        frw, frb = _linear_init(next(keys), Cs, H)
        w1, b1 = _linear_init(next(keys), Cx + H, FF)
        w2, b2 = _linear_init(next(keys), FF, H)
        wp, bp = _linear_init(next(keys), Cx + H, H)
        return dict(frw=frw, frb=frb,
                    w1x=w1[:Cx], w1v=w1[Cx:], b1=b1,
                    w2=w2, b2=b2,
                    wpx=wp[:Cx], wpv=wp[Cx:], bp=bp,
                    gamma=jnp.ones((P, H), jnp.float32),
                    beta=jnp.zeros((P, H), jnp.float32))

    p = {}
    we, be = _linear_init(next(keys), Ce, sae_hidden)
    wd, bd = _linear_init(next(keys), sae_hidden, Ce)
    p["sae_future"] = dict(we=we, be=be, wd=wd, bd=bd)
    p["fc_hist_w"], p["fc_hist_b"] = _linear_init(next(keys), S, P)
    p["cfm_hist"] = cfm_init(Ci + Ce)
    p["cfm_future"] = cfm_init(Ce)
    wt, bt = _linear_init(next(keys), P, P)                  # TimeMixing fc
    p["mixer_time"] = dict(wt=wt, bt=bt,
                           gamma=jnp.ones((P, 2 * H), jnp.float32),
                           beta=jnp.zeros((P, 2 * H), jnp.float32))
    p["cfm_mixer"] = cfm_init(2 * H)
    p["fc_presigma_w"], p["fc_presigma_b"] = _linear_init(next(keys), H, Cout)
    # fc_out (mu) and sae_hist exist in the torch module but never affect sigma.
    return p


def pack_params(params, *, Bt):
    """Flatten all weights into one (Rw, 128) bf16 pack and all biases /
    LayerNorm params into one (Rf, 128) f32 pack, plus static offset tables.
    Also builds the two block-diagonal time-axis matrices (bf16)."""
    wentries, fentries = [], []

    def addw(name, arr):
        a = np.asarray(arr, np.float32)
        assert a.ndim == 2 and a.shape[1] <= _LANES, (name, a.shape)
        wentries.append((name, a))

    def addf(name, arr):
        a = np.asarray(arr, np.float32)
        assert a.ndim == 2 and a.shape[1] <= _LANES, (name, a.shape)
        fentries.append((name, a))

    sf = params["sae_future"]
    addw("sae_we", sf["we"]); addf("sae_be", sf["be"])
    addw("sae_wd", sf["wd"]); addf("sae_bd", sf["bd"])
    addf("hist_b", np.asarray(params["fc_hist_b"]).reshape(-1, 1))   # (P, 1)

    cfms = [("cfmh", params["cfm_hist"]),
            ("cfmf", params["cfm_future"]),
            ("cfmm", params["cfm_mixer"])]

    # Fused static projections (one matmul in-kernel).
    addw("frw_all", np.concatenate([np.asarray(p["frw"]) for _, p in cfms], 1))
    addf("frb_all", np.concatenate([np.asarray(p["frb"]) for _, p in cfms], 1))

    for pre, p in cfms:
        # Merged first-stage weight: rows [x-part; v-part], cols [W1 | Wproj].
        w1p = np.block([[np.asarray(p["w1x"]), np.asarray(p["wpx"])],
                        [np.asarray(p["w1v"]), np.asarray(p["wpv"])]])
        addw(pre + "_w1p", w1p)
        addf(pre + "_b1p",
             np.concatenate([np.asarray(p["b1"]), np.asarray(p["bp"])], 1))
        addw(pre + "_w2", p["w2"]); addf(pre + "_b2", p["b2"])
        addf(pre + "_g", p["gamma"]); addf(pre + "_bt", p["beta"])

    mt = params["mixer_time"]
    addf("tm_b", np.asarray(mt["bt"]).reshape(-1, 1))                # (P, 1)
    addf("tm_g", mt["gamma"]); addf("tm_be", mt["beta"])             # (P, 2H)

    addw("sig_w", params["fc_presigma_w"]); addf("sig_b", params["fc_presigma_b"])

    def build(entries, align, dtype):
        blocks, offsets, cur = [], {}, 0
        for name, a in entries:
            r, c = a.shape
            ra = ((r + align - 1) // align) * align
            buf = np.zeros((ra, _LANES), np.float32)
            buf[:r, :c] = a
            blocks.append(buf)
            offsets[name] = (cur, r, c)
            cur += ra
        return jnp.asarray(np.concatenate(blocks, 0), dtype=dtype), offsets

    wpack, woff = build(wentries, 16, jnp.bfloat16)   # bf16 tile-aligned rows
    fpack, foff = build(fentries, 8, jnp.float32)

    def block_diag(w, n):
        r, c = w.shape
        out = np.zeros((n * r, n * c), np.float32)
        for i in range(n):
            out[i * r:(i + 1) * r, i * c:(i + 1) * c] = w
        return out

    # Per-sample left matrices for the time-axis linears, tiled Bt times on
    # the diagonal so the whole batch block is one matmul in row layout.
    m_hist = block_diag(np.asarray(params["fc_hist_w"]).T, Bt)  # (Bt*P, Bt*S)
    m_time = block_diag(np.asarray(mt["wt"]).T, Bt)             # (Bt*P, Bt*P)
    return (wpack, woff, fpack, foff,
            jnp.asarray(m_hist, jnp.bfloat16), jnp.asarray(m_time, jnp.bfloat16))


# --------------------------------------------------------------------------- #
# Pure-JAX reference (mirrors the torch forward; same bf16 operand quant)      #
# --------------------------------------------------------------------------- #
def _mm_ref(a, b):
    return jnp.dot(a.astype(jnp.bfloat16), b.astype(jnp.bfloat16),
                   preferred_element_type=jnp.float32)


def _ln2d_ref(x, g, b, eps=1e-5):
    m = jnp.mean(x, axis=(-2, -1), keepdims=True)
    v = jnp.mean((x - m) ** 2, axis=(-2, -1), keepdims=True)
    return (x - m) * jax.lax.rsqrt(v + eps) * g + b


def _softplus_ref(y):
    return jnp.maximum(y, 0.0) + jnp.log1p(jnp.exp(-jnp.abs(y)))


def _cfm_ref(x, xs, p):
    v = _mm_ref(xs, p["frw"]) + p["frb"]
    v = jnp.broadcast_to(v[:, None, :], x.shape[:2] + (v.shape[-1],))
    xc = jnp.concatenate([x, v], axis=-1)
    w1 = jnp.concatenate([p["w1x"], p["w1v"]], axis=0)
    wp = jnp.concatenate([p["wpx"], p["wpv"]], axis=0)
    x_proj = _mm_ref(xc, wp) + p["bp"]
    h = jnp.maximum(_mm_ref(xc, w1) + p["b1"], 0.0)
    h2 = _mm_ref(h, p["w2"]) + p["b2"]
    return x_proj + _ln2d_ref(h2, p["gamma"], p["beta"])


def reference_forward(params, x_hist, x_extra_hist, x_extra_future, x_static):
    sf = params["sae_future"]
    h = _mm_ref(x_extra_future, sf["we"]) + sf["be"]
    xf = x_extra_future + _mm_ref(h, sf["wd"]) + sf["bd"]
    xc = jnp.concatenate([x_hist, x_extra_hist], axis=-1)
    xt = jnp.swapaxes(xc, 1, 2)
    xt = _mm_ref(xt, params["fc_hist_w"]) + params["fc_hist_b"]
    xh = jnp.swapaxes(xt, 1, 2)
    a = _cfm_ref(xh, x_static, params["cfm_hist"])
    b = _cfm_ref(xf, x_static, params["cfm_future"])
    x = jnp.concatenate([a, b], axis=-1)
    mt = params["mixer_time"]
    xt = jnp.swapaxes(x, 1, 2)
    r = jnp.maximum(_mm_ref(xt, mt["wt"]) + mt["bt"], 0.0)
    x = _ln2d_ref(x + jnp.swapaxes(r, 1, 2), mt["gamma"], mt["beta"])
    x = _cfm_ref(x, x_static, params["cfm_mixer"])
    pre = _mm_ref(x, params["fc_presigma_w"]) + params["fc_presigma_b"]
    return _softplus_ref(pre)


# --------------------------------------------------------------------------- #
if __name__ == "__main__":
    S, P = 16, 8                  # sequence_length, prediction_length
    Ci, Ce, Cs = 4, 4, 4          # input / extra / static channels
    H, FF = 32, 32                # hidden_channels, ff_dim
    Cout = Ci                     # output_channels defaults to input_channels
    Bt = 32                       # samples per grid step -> 256-row matmuls
    B = 2 * Bt                    # >= 2 grid steps (v7x megacore); still tiny data

    root = jax.random.PRNGKey(0)
    k_in, k_par = jax.random.split(root)
    k1, k2, k3, k4 = jax.random.split(k_in, 4)
    x_hist = jax.random.normal(k1, (B, S, Ci), jnp.float32)
    x_extra_hist = jax.random.normal(k2, (B, S, Ce), jnp.float32)
    x_extra_future = jax.random.normal(k3, (B, P, Ce), jnp.float32)
    x_static = jax.random.normal(k4, (B, Cs), jnp.float32)

    params = init_params(k_par, S=S, P=P, Ci=Ci, Ce=Ce, Cs=Cs, H=H, FF=FF,
                         Cout=Cout)
    wpack, woff, fpack, foff, m_hist, m_time = pack_params(params, Bt=Bt)

    sigma = tsmixer_sae_forward(wpack, woff, fpack, foff, m_hist, m_time,
                                x_hist, x_extra_hist, x_extra_future, x_static,
                                Bt=Bt, H=H, FF=FF, Cout=Cout)
    sigma = jax.block_until_ready(sigma)
    assert sigma.shape == (B, P, Cout), sigma.shape

    ref = reference_forward(params, x_hist, x_extra_hist, x_extra_future,
                            x_static)
    np.testing.assert_allclose(np.asarray(sigma), np.asarray(ref),
                               rtol=2e-2, atol=2e-2)

    print("KERNEL_OK")
</pallas_src>

<mosaic_0001>
module attributes {stable_mosaic.version = 11 : i64} {
  func.func @_fused_forward_kernel(%arg0: i32, %arg1: memref<512x8xf32, #tpu.memory_space<vmem>>, %arg2: memref<256x4xf32, #tpu.memory_space<vmem>>, %arg3: memref<32x4xf32, #tpu.memory_space<vmem>>, %arg4: memref<416x128xbf16, #tpu.memory_space<vmem>>, %arg5: memref<160x128xf32, #tpu.memory_space<vmem>>, %arg6: memref<256x512xbf16, #tpu.memory_space<vmem>>, %arg7: memref<256x256xbf16, #tpu.memory_space<vmem>>, %arg8: memref<256x4xf32, #tpu.memory_space<vmem>>) attributes {dimension_semantics = [#tpu.dimension_semantics<parallel>], iteration_bounds = array<i64: 2>, scalar_prefetch = 0 : i64, scratch_operands = 0 : i64, tpu.core_type = #tpu.core_type<tc>, window_params = [{transform_indices = @transform_0, window_bounds = array<i64: 512, 8>}, {transform_indices = @transform_1, window_bounds = array<i64: 256, 4>}, {transform_indices = @transform_2, window_bounds = array<i64: 32, 4>}, {pipeline_mode = #tpu.pipeline_mode<synchronous>, transform_indices = @transform_3, window_bounds = array<i64: 416, 128>}, {pipeline_mode = #tpu.pipeline_mode<synchronous>, transform_indices = @transform_4, window_bounds = array<i64: 160, 128>}, {pipeline_mode = #tpu.pipeline_mode<synchronous>, transform_indices = @transform_5, window_bounds = array<i64: 256, 512>}, {pipeline_mode = #tpu.pipeline_mode<synchronous>, transform_indices = @transform_6, window_bounds = array<i64: 256, 256>}, {transform_indices = @transform_7, window_bounds = array<i64: 256, 4>}]} {
    %c0 = arith.constant 0 : index
    %c0_0 = arith.constant 0 : index
    %0 = vector.load %arg3[%c0, %c0_0] : memref<32x4xf32, #tpu.memory_space<vmem>>, vector<32x4xf32>
    %c80 = arith.constant 80 : index
    %c0_1 = arith.constant 0 : index
    %1 = vector.load %arg4[%c80, %c0_1] : memref<416x128xbf16, #tpu.memory_space<vmem>>, vector<4x96xbf16>
    %2 = arith.truncf %0 : vector<32x4xf32> to vector<32x4xbf16>
    %cst = arith.constant dense<0.000000e+00> : vector<32x96xf32>
    %3 = tpu.matmul %2, %1, %cst {dimension_numbers = #tpu.dot_dimension_numbers<[1], [0], [0], [1], [0, 0, 1, 1], [], []>} : vector<32x4xbf16>, vector<4x96xbf16>, vector<32x96xf32> -> vector<32x96xf32>
    %c24 = arith.constant 24 : index
    %c0_2 = arith.constant 0 : index
    %4 = vector.load %arg5[%c24, %c0_2] : memref<160x128xf32, #tpu.memory_space<vmem>>, vector<1x96xf32>
    %5 = vector.broadcast %4 : vector<1x96xf32> to vector<32x96xf32>
    %6 = arith.addf %3, %5 : vector<32x96xf32>
    %c0_3 = arith.constant 0 : index
    %c0_4 = arith.constant 0 : index
    %7 = vector.load %arg2[%c0_3, %c0_4] : memref<256x4xf32, #tpu.memory_space<vmem>>, vector<256x4xf32>
    %c0_5 = arith.constant 0 : index
    %c0_6 = arith.constant 0 : index
    %8 = vector.load %arg4[%c0_5, %c0_6] : memref<416x128xbf16, #tpu.memory_space<vmem>>, vector<4x64xbf16>
    %9 = arith.truncf %7 : vector<256x4xf32> to vector<256x4xbf16>
    %cst_7 = arith.constant dense<0.000000e+00> : vector<256x64xf32>
    %10 = tpu.matmul %9, %8, %cst_7 {dimension_numbers = #tpu.dot_dimension_numbers<[1], [0], [0], [1], [0, 0, 1, 1], [], []>} : vector<256x4xbf16>, vector<4x64xbf16>, vector<256x64xf32> -> vector<256x64xf32>
    %c0_8 = arith.constant 0 : index
    %c0_9 = arith.constant 0 : index
    %11 = vector.load %arg5[%c0_8, %c0_9] : memref<160x128xf32, #tpu.memory_space<vmem>>, vector<1x64xf32>
    %12 = vector.broadcast %11 : vector<1x64xf32> to vector<256x64xf32>
    %13 = arith.addf %10, %12 : vector<256x64xf32>
    %c16 = arith.constant 16 : index
    %c0_10 = arith.constant 0 : index
    %14 = vector.load %arg4[%c16, %c0_10] : memref<416x128xbf16, #tpu.memory_space<vmem>>, vector<64x4xbf16>
    %15 = arith.truncf %13 : vector<256x64xf32> to vector<256x64xbf16>
    %cst_11 = arith.constant dense<0.000000e+00> : vector<256x4xf32>
    %16 = tpu.matmul %15, %14, %cst_11 {dimension_numbers = #tpu.dot_dimension_numbers<[1], [0], [0], [1], [0, 0, 1, 1], [], []>} : vector<256x64xbf16>, vector<64x4xbf16>, vector<256x4xf32> -> vector<256x4xf32>
    %17 = arith.addf %7, %16 : vector<256x4xf32>
    %c8 = arith.constant 8 : index
    %c0_12 = arith.constant 0 : index
    %18 = vector.load %arg5[%c8, %c0_12] : memref<160x128xf32, #tpu.memory_space<vmem>>, vector<1x4xf32>
    %19 = vector.broadcast %18 : vector<1x4xf32> to vector<256x4xf32>
    %20 = arith.addf %17, %19 : vector<256x4xf32>
    %c0_13 = arith.constant 0 : index
    %c0_14 = arith.constant 0 : index
    %21 = vector.load %arg6[%c0_13, %c0_14] : memref<256x512xbf16, #tpu.memory_space<vmem>>, vector<256x512xbf16>
    %c0_15 = arith.constant 0 : index
    %c0_16 = arith.constant 0 : index
    %22 = vector.load %arg1[%c0_15, %c0_16] : memref<512x8xf32, #tpu.memory_space<vmem>>, vector<512x8xf32>
    %23 = arith.truncf %22 : vector<512x8xf32> to vector<512x8xbf16>
    %cst_17 = arith.constant dense<0.000000e+00> : vector<256x8xf32>
    %24 = tpu.matmul %21, %23, %cst_17 {dimension_numbers = #tpu.dot_dimension_numbers<[1], [0], [0], [1], [0, 0, 1, 1], [], []>} : vector<256x512xbf16>, vector<512x8xbf16>, vector<256x8xf32> -> vector<256x8xf32>
    %c16_18 = arith.constant 16 : index
    %c0_19 = arith.constant 0 : index
    %25 = vector.load %arg5[%c16_18, %c0_19] : memref<160x128xf32, #tpu.memory_space<vmem>>, vector<8x1xf32>
    %26 = vector.shape_cast %25 : vector<8x1xf32> to vector<1x8x1xf32>
    %27 = vector.shape_cast %26 : vector<1x8x1xf32> to vector<1x8x1xf32>
    %28 = vector.broadcast %27 : vector<1x8x1xf32> to vector<32x8x1xf32>
    %29 = vector.shape_cast %28 : vector<32x8x1xf32> to vector<256x1xf32>
    %30 = vector.broadcast %29 : vector<256x1xf32> to vector<256x8xf32>
    %31 = arith.addf %24, %30 : vector<256x8xf32>
    %32 = vector.extract_strided_slice %6 {offsets = [0, 0], sizes = [32, 32], strides = [1, 1]} : vector<32x96xf32> to vector<32x32xf32>
    %33 = vector.shape_cast %32 : vector<32x32xf32> to vector<32x1x32xf32>
    %34 = vector.shape_cast %33 : vector<32x1x32xf32> to vector<32x1x32xf32>
    %35 = vector.broadcast %34 : vector<32x1x32xf32> to vector<32x8x32xf32>
    %36 = vector.shape_cast %35 : vector<32x8x32xf32> to vector<256x32xf32>
    %37 = tpu.concatenate %31, %36 in 1 : vector<256x8xf32>, vector<256x32xf32> -> vector<256x40xf32>
    %c96 = arith.constant 96 : index
    %c0_20 = arith.constant 0 : index
    %38 = vector.load %arg4[%c96, %c0_20] : memref<416x128xbf16, #tpu.memory_space<vmem>>, vector<40x64xbf16>
    %39 = arith.truncf %37 : vector<256x40xf32> to vector<256x40xbf16>
    %cst_21 = arith.constant dense<0.000000e+00> : vector<256x64xf32>
    %40 = tpu.matmul %39, %38, %cst_21 {dimension_numbers = #tpu.dot_dimension_numbers<[1], [0], [0], [1], [0, 0, 1, 1], [], []>} : vector<256x40xbf16>, vector<40x64xbf16>, vector<256x64xf32> -> vector<256x64xf32>
    %c32 = arith.constant 32 : index
    %c0_22 = arith.constant 0 : index
    %41 = vector.load %arg5[%c32, %c0_22] : memref<160x128xf32, #tpu.memory_space<vmem>>, vector<1x64xf32>
    %42 = vector.broadcast %41 : vector<1x64xf32> to vector<256x64xf32>
    %43 = arith.addf %40, %42 : vector<256x64xf32>
    %44 = vector.extract_strided_slice %43 {offsets = [0, 0], sizes = [256, 32], strides = [1, 1]} : vector<256x64xf32> to vector<256x32xf32>
    %cst_23 = arith.constant 0.000000e+00 : f32
    %45 = vector.broadcast %cst_23 : f32 to vector<256x32xf32>
    %46 = arith.maximumf %44, %45 : vector<256x32xf32>
    %47 = vector.extract_strided_slice %43 {offsets = [0, 32], sizes = [256, 32], strides = [1, 1]} : vector<256x64xf32> to vector<256x32xf32>
    %c144 = arith.constant 144 : index
    %c0_24 = arith.constant 0 : index
    %48 = vector.load %arg4[%c144, %c0_24] : memref<416x128xbf16, #tpu.memory_space<vmem>>, vector<32x32xbf16>
    %49 = arith.truncf %46 : vector<256x32xf32> to vector<256x32xbf16>
    %cst_25 = arith.constant dense<0.000000e+00> : vector<256x32xf32>
    %50 = tpu.matmul %49, %48, %cst_25 {dimension_numbers = #tpu.dot_dimension_numbers<[1], [0], [0], [1], [0, 0, 1, 1], [], []>} : vector<256x32xbf16>, vector<32x32xbf16>, vector<256x32xf32> -> vector<256x32xf32>
    %c40 = arith.constant 40 : index
    %c0_26 = arith.constant 0 : index
    %51 = vector.load %arg5[%c40, %c0_26] : memref<160x128xf32, #tpu.memory_space<vmem>>, vector<1x32xf32>
    %52 = vector.broadcast %51 : vector<1x32xf32> to vector<256x32xf32>
    %53 = arith.addf %50, %52 : vector<256x32xf32>
    %c48 = arith.constant 48 : index
    %c0_27 = arith.constant 0 : index
    %54 = vector.load %arg5[%c48, %c0_27] : memref<160x128xf32, #tpu.memory_space<vmem>>, vector<8x32xf32>
    %c56 = arith.constant 56 : index
    %c0_28 = arith.constant 0 : index
    %55 = vector.load %arg5[%c56, %c0_28] : memref<160x128xf32, #tpu.memory_space<vmem>>, vector<8x32xf32>
    %56 = vector.shape_cast %53 : vector<256x32xf32> to vector<32x8x32xf32>
    %cst_29 = arith.constant dense<0.000000e+00> : vector<32x8xf32>
    %57 = vector.multi_reduction <add>, %56, %cst_29 [2] : vector<32x8x32xf32> to vector<32x8xf32>
    %58 = vector.shape_cast %57 : vector<32x8xf32> to vector<32x8x1xf32>
    %cst_30 = arith.constant 3.200000e+01 : f32
    %59 = vector.broadcast %cst_30 : f32 to vector<32x8x1xf32>
    %60 = arith.divf %58, %59 : vector<32x8x1xf32>
    %cst_31 = arith.constant dense<0.000000e+00> : vector<32x1xf32>
    %61 = vector.multi_reduction <add>, %60, %cst_31 [1] : vector<32x8x1xf32> to vector<32x1xf32>
    %62 = vector.shape_cast %61 : vector<32x1xf32> to vector<32x1x1xf32>
    %cst_32 = arith.constant 8.000000e+00 : f32
    %63 = vector.broadcast %cst_32 : f32 to vector<32x1x1xf32>
    %64 = arith.divf %62, %63 : vector<32x1x1xf32>
    %65 = vector.broadcast %64 : vector<32x1x1xf32> to vector<32x8x32xf32>
    %66 = arith.subf %56, %65 : vector<32x8x32xf32>
    %67 = arith.mulf %66, %66 : vector<32x8x32xf32>
    %cst_33 = arith.constant dense<0.000000e+00> : vector<32x8xf32>
    %68 = vector.multi_reduction <add>, %67, %cst_33 [2] : vector<32x8x32xf32> to vector<32x8xf32>
    %69 = vector.shape_cast %68 : vector<32x8xf32> to vector<32x8x1xf32>
    %cst_34 = arith.constant 3.200000e+01 : f32
    %70 = vector.broadcast %cst_34 : f32 to vector<32x8x1xf32>
    %71 = arith.divf %69, %70 : vector<32x8x1xf32>
    %cst_35 = arith.constant dense<0.000000e+00> : vector<32x1xf32>
    %72 = vector.multi_reduction <add>, %71, %cst_35 [1] : vector<32x8x1xf32> to vector<32x1xf32>
    %73 = vector.shape_cast %72 : vector<32x1xf32> to vector<32x1x1xf32>
    %cst_36 = arith.constant 8.000000e+00 : f32
    %74 = vector.broadcast %cst_36 : f32 to vector<32x1x1xf32>
    %75 = arith.divf %73, %74 : vector<32x1x1xf32>
    %cst_37 = arith.constant 9.99999974E-6 : f32
    %76 = vector.broadcast %cst_37 : f32 to vector<32x1x1xf32>
    %77 = arith.addf %75, %76 : vector<32x1x1xf32>
    %78 = math.rsqrt %77 : vector<32x1x1xf32>
    %79 = vector.broadcast %78 : vector<32x1x1xf32> to vector<32x8x32xf32>
    %80 = arith.mulf %66, %79 : vector<32x8x32xf32>
    %81 = vector.shape_cast %54 : vector<8x32xf32> to vector<1x8x32xf32>
    %82 = vector.broadcast %81 : vector<1x8x32xf32> to vector<32x8x32xf32>
    %83 = arith.mulf %80, %82 : vector<32x8x32xf32>
    %84 = vector.shape_cast %55 : vector<8x32xf32> to vector<1x8x32xf32>
    %85 = vector.broadcast %84 : vector<1x8x32xf32> to vector<32x8x32xf32>
    %86 = arith.addf %83, %85 : vector<32x8x32xf32>
    %87 = vector.shape_cast %86 : vector<32x8x32xf32> to vector<256x32xf32>
    %88 = arith.addf %47, %87 : vector<256x32xf32>
    %89 = vector.extract_strided_slice %6 {offsets = [0, 32], sizes = [32, 32], strides = [1, 1]} : vector<32x96xf32> to vector<32x32xf32>
    %90 = vector.shape_cast %89 : vector<32x32xf32> to vector<32x1x32xf32>
    %91 = vector.shape_cast %90 : vector<32x1x32xf32> to vector<32x1x32xf32>
    %92 = vector.broadcast %91 : vector<32x1x32xf32> to vector<32x8x32xf32>
    %93 = vector.shape_cast %92 : vector<32x8x32xf32> to vector<256x32xf32>
    %94 = tpu.concatenate %20, %93 in 1 : vector<256x4xf32>, vector<256x32xf32> -> vector<256x36xf32>
    %c176 = arith.constant 176 : index
    %c0_38 = arith.constant 0 : index
    %95 = vector.load %arg4[%c176, %c0_38] : memref<416x128xbf16, #tpu.memory_space<vmem>>, vector<36x64xbf16>
    %96 = arith.truncf %94 : vector<256x36xf32> to vector<256x36xbf16>
    %cst_39 = arith.constant dense<0.000000e+00> : vector<256x64xf32>
    %97 = tpu.matmul %96, %95, %cst_39 {dimension_numbers = #tpu.dot_dimension_numbers<[1], [0], [0], [1], [0, 0, 1, 1], [], []>} : vector<256x36xbf16>, vector<36x64xbf16>, vector<256x64xf32> -> vector<256x64xf32>
    %c64 = arith.constant 64 : index
    %c0_40 = arith.constant 0 : index
    %98 = vector.load %arg5[%c64, %c0_40] : memref<160x128xf32, #tpu.memory_space<vmem>>, vector<1x64xf32>
    %99 = vector.broadcast %98 : vector<1x64xf32> to vector<256x64xf32>
    %100 = arith.addf %97, %99 : vector<256x64xf32>
    %101 = vector.extract_strided_slice %100 {offsets = [0, 0], sizes = [256, 32], strides = [1, 1]} : vector<256x64xf32> to vector<256x32xf32>
    %cst_41 = arith.constant 0.000000e+00 : f32
    %102 = vector.broadcast %cst_41 : f32 to vector<256x32xf32>
    %103 = arith.maximumf %101, %102 : vector<256x32xf32>
    %104 = vector.extract_strided_slice %100 {offsets = [0, 32], sizes = [256, 32], strides = [1, 1]} : vector<256x64xf32> to vector<256x32xf32>
    %c224 = arith.constant 224 : index
    %c0_42 = arith.constant 0 : index
    %105 = vector.load %arg4[%c224, %c0_42] : memref<416x128xbf16, #tpu.memory_space<vmem>>, vector<32x32xbf16>
    %106 = arith.truncf %103 : vector<256x32xf32> to vector<256x32xbf16>
    %cst_43 = arith.constant dense<0.000000e+00> : vector<256x32xf32>
    %107 = tpu.matmul %106, %105, %cst_43 {dimension_numbers = #tpu.dot_dimension_numbers<[1], [0], [0], [1], [0, 0, 1, 1], [], []>} : vector<256x32xbf16>, vector<32x32xbf16>, vector<256x32xf32> -> vector<256x32xf32>
    %c72 = arith.constant 72 : index
    %c0_44 = arith.constant 0 : index
    %108 = vector.load %arg5[%c72, %c0_44] : memref<160x128xf32, #tpu.memory_space<vmem>>, vector<1x32xf32>
    %109 = vector.broadcast %108 : vector<1x32xf32> to vector<256x32xf32>
    %110 = arith.addf %107, %109 : vector<256x32xf32>
    %c80_45 = arith.constant 80 : index
    %c0_46 = arith.constant 0 : index
    %111 = vector.load %arg5[%c80_45, %c0_46] : memref<160x128xf32, #tpu.memory_space<vmem>>, vector<8x32xf32>
    %c88 = arith.constant 88 : index
    %c0_47 = arith.constant 0 : index
    %112 = vector.load %arg5[%c88, %c0_47] : memref<160x128xf32, #tpu.memory_space<vmem>>, vector<8x32xf32>
    %113 = vector.shape_cast %110 : vector<256x32xf32> to vector<32x8x32xf32>
    %cst_48 = arith.constant dense<0.000000e+00> : vector<32x8xf32>
    %114 = vector.multi_reduction <add>, %113, %cst_48 [2] : vector<32x8x32xf32> to vector<32x8xf32>
    %115 = vector.shape_cast %114 : vector<32x8xf32> to vector<32x8x1xf32>
    %cst_49 = arith.constant 3.200000e+01 : f32
    %116 = vector.broadcast %cst_49 : f32 to vector<32x8x1xf32>
    %117 = arith.divf %115, %116 : vector<32x8x1xf32>
    %cst_50 = arith.constant dense<0.000000e+00> : vector<32x1xf32>
    %118 = vector.multi_reduction <add>, %117, %cst_50 [1] : vector<32x8x1xf32> to vector<32x1xf32>
    %119 = vector.shape_cast %118 : vector<32x1xf32> to vector<32x1x1xf32>
    %cst_51 = arith.constant 8.000000e+00 : f32
    %120 = vector.broadcast %cst_51 : f32 to vector<32x1x1xf32>
    %121 = arith.divf %119, %120 : vector<32x1x1xf32>
    %122 = vector.broadcast %121 : vector<32x1x1xf32> to vector<32x8x32xf32>
    %123 = arith.subf %113, %122 : vector<32x8x32xf32>
    %124 = arith.mulf %123, %123 : vector<32x8x32xf32>
    %cst_52 = arith.constant dense<0.000000e+00> : vector<32x8xf32>
    %125 = vector.multi_reduction <add>, %124, %cst_52 [2] : vector<32x8x32xf32> to vector<32x8xf32>
    %126 = vector.shape_cast %125 : vector<32x8xf32> to vector<32x8x1xf32>
    %cst_53 = arith.constant 3.200000e+01 : f32
    %127 = vector.broadcast %cst_53 : f32 to vector<32x8x1xf32>
    %128 = arith.divf %126, %127 : vector<32x8x1xf32>
    %cst_54 = arith.constant dense<0.000000e+00> : vector<32x1xf32>
    %129 = vector.multi_reduction <add>, %128, %cst_54 [1] : vector<32x8x1xf32> to vector<32x1xf32>
    %130 = vector.shape_cast %129 : vector<32x1xf32> to vector<32x1x1xf32>
    %cst_55 = arith.constant 8.000000e+00 : f32
    %131 = vector.broadcast %cst_55 : f32 to vector<32x1x1xf32>
    %132 = arith.divf %130, %131 : vector<32x1x1xf32>
    %cst_56 = arith.constant 9.99999974E-6 : f32
    %133 = vector.broadcast %cst_56 : f32 to vector<32x1x1xf32>
    %134 = arith.addf %132, %133 : vector<32x1x1xf32>
    %135 = math.rsqrt %134 : vector<32x1x1xf32>
    %136 = vector.broadcast %135 : vector<32x1x1xf32> to vector<32x8x32xf32>
    %137 = arith.mulf %123, %136 : vector<32x8x32xf32>
    %138 = vector.shape_cast %111 : vector<8x32xf32> to vector<1x8x32xf32>
    %139 = vector.broadcast %138 : vector<1x8x32xf32> to vector<32x8x32xf32>
    %140 = arith.mulf %137, %139 : vector<32x8x32xf32>
    %141 = vector.shape_cast %112 : vector<8x32xf32> to vector<1x8x32xf32>
    %142 = vector.broadcast %141 : vector<1x8x32xf32> to vector<32x8x32xf32>
    %143 = arith.addf %140, %142 : vector<32x8x32xf32>
    %144 = vector.shape_cast %143 : vector<32x8x32xf32> to vector<256x32xf32>
    %145 = arith.addf %104, %144 : vector<256x32xf32>
    %146 = tpu.concatenate %88, %145 in 1 : vector<256x32xf32>, vector<256x32xf32> -> vector<256x64xf32>
    %c0_57 = arith.constant 0 : index
    %c0_58 = arith.constant 0 : index
    %147 = vector.load %arg7[%c0_57, %c0_58] : memref<256x256xbf16, #tpu.memory_space<vmem>>, vector<256x256xbf16>
    %148 = arith.truncf %146 : vector<256x64xf32> to vector<256x64xbf16>
    %cst_59 = arith.constant dense<0.000000e+00> : vector<256x64xf32>
    %149 = tpu.matmul %147, %148, %cst_59 {dimension_numbers = #tpu.dot_dimension_numbers<[1], [0], [0], [1], [0, 0, 1, 1], [], []>} : vector<256x256xbf16>, vector<256x64xbf16>, vector<256x64xf32> -> vector<256x64xf32>
    %c128 = arith.constant 128 : index
    %c0_60 = arith.constant 0 : index
    %150 = vector.load %arg5[%c128, %c0_60] : memref<160x128xf32, #tpu.memory_space<vmem>>, vector<8x1xf32>
    %151 = vector.shape_cast %150 : vector<8x1xf32> to vector<1x8x1xf32>
    %152 = vector.shape_cast %151 : vector<1x8x1xf32> to vector<1x8x1xf32>
    %153 = vector.broadcast %152 : vector<1x8x1xf32> to vector<32x8x1xf32>
    %154 = vector.shape_cast %153 : vector<32x8x1xf32> to vector<256x1xf32>
    %155 = vector.broadcast %154 : vector<256x1xf32> to vector<256x64xf32>
    %156 = arith.addf %149, %155 : vector<256x64xf32>
    %cst_61 = arith.constant 0.000000e+00 : f32
    %157 = vector.broadcast %cst_61 : f32 to vector<256x64xf32>
    %158 = arith.maximumf %156, %157 : vector<256x64xf32>
    %159 = arith.addf %146, %158 : vector<256x64xf32>
    %c136 = arith.constant 136 : index
    %c0_62 = arith.constant 0 : index
    %160 = vector.load %arg5[%c136, %c0_62] : memref<160x128xf32, #tpu.memory_space<vmem>>, vector<8x64xf32>
    %c144_63 = arith.constant 144 : index
    %c0_64 = arith.constant 0 : index
    %161 = vector.load %arg5[%c144_63, %c0_64] : memref<160x128xf32, #tpu.memory_space<vmem>>, vector<8x64xf32>
    %162 = vector.shape_cast %159 : vector<256x64xf32> to vector<32x8x64xf32>
    %cst_65 = arith.constant dense<0.000000e+00> : vector<32x8xf32>
    %163 = vector.multi_reduction <add>, %162, %cst_65 [2] : vector<32x8x64xf32> to vector<32x8xf32>
    %164 = vector.shape_cast %163 : vector<32x8xf32> to vector<32x8x1xf32>
    %cst_66 = arith.constant 6.400000e+01 : f32
    %165 = vector.broadcast %cst_66 : f32 to vector<32x8x1xf32>
    %166 = arith.divf %164, %165 : vector<32x8x1xf32>
    %cst_67 = arith.constant dense<0.000000e+00> : vector<32x1xf32>
    %167 = vector.multi_reduction <add>, %166, %cst_67 [1] : vector<32x8x1xf32> to vector<32x1xf32>
    %168 = vector.shape_cast %167 : vector<32x1xf32> to vector<32x1x1xf32>
    %cst_68 = arith.constant 8.000000e+00 : f32
    %169 = vector.broadcast %cst_68 : f32 to vector<32x1x1xf32>
    %170 = arith.divf %168, %169 : vector<32x1x1xf32>
    %171 = vector.broadcast %170 : vector<32x1x1xf32> to vector<32x8x64xf32>
    %172 = arith.subf %162, %171 : vector<32x8x64xf32>
    %173 = arith.mulf %172, %172 : vector<32x8x64xf32>
    %cst_69 = arith.constant dense<0.000000e+00> : vector<32x8xf32>
    %174 = vector.multi_reduction <add>, %173, %cst_69 [2] : vector<32x8x64xf32> to vector<32x8xf32>
    %175 = vector.shape_cast %174 : vector<32x8xf32> to vector<32x8x1xf32>
    %cst_70 = arith.constant 6.400000e+01 : f32
    %176 = vector.broadcast %cst_70 : f32 to vector<32x8x1xf32>
    %177 = arith.divf %175, %176 : vector<32x8x1xf32>
    %cst_71 = arith.constant dense<0.000000e+00> : vector<32x1xf32>
    %178 = vector.multi_reduction <add>, %177, %cst_71 [1] : vector<32x8x1xf32> to vector<32x1xf32>
    %179 = vector.shape_cast %178 : vector<32x1xf32> to vector<32x1x1xf32>
    %cst_72 = arith.constant 8.000000e+00 : f32
    %180 = vector.broadcast %cst_72 : f32 to vector<32x1x1xf32>
    %181 = arith.divf %179, %180 : vector<32x1x1xf32>
    %cst_73 = arith.constant 9.99999974E-6 : f32
    %182 = vector.broadcast %cst_73 : f32 to vector<32x1x1xf32>
    %183 = arith.addf %181, %182 : vector<32x1x1xf32>
    %184 = math.rsqrt %183 : vector<32x1x1xf32>
    %185 = vector.broadcast %184 : vector<32x1x1xf32> to vector<32x8x64xf32>
    %186 = arith.mulf %172, %185 : vector<32x8x64xf32>
    %187 = vector.shape_cast %160 : vector<8x64xf32> to vector<1x8x64xf32>
    %188 = vector.broadcast %187 : vector<1x8x64xf32> to vector<32x8x64xf32>
    %189 = arith.mulf %186, %188 : vector<32x8x64xf32>
    %190 = vector.shape_cast %161 : vector<8x64xf32> to vector<1x8x64xf32>
    %191 = vector.broadcast %190 : vector<1x8x64xf32> to vector<32x8x64xf32>
    %192 = arith.addf %189, %191 : vector<32x8x64xf32>
    %193 = vector.shape_cast %192 : vector<32x8x64xf32> to vector<256x64xf32>
    %194 = vector.extract_strided_slice %6 {offsets = [0, 64], sizes = [32, 32], strides = [1, 1]} : vector<32x96xf32> to vector<32x32xf32>
    %195 = vector.shape_cast %194 : vector<32x32xf32> to vector<32x1x32xf32>
    %196 = vector.shape_cast %195 : vector<32x1x32xf32> to vector<32x1x32xf32>
    %197 = vector.broadcast %196 : vector<32x1x32xf32> to vector<32x8x32xf32>
    %198 = vector.shape_cast %197 : vector<32x8x32xf32> to vector<256x32xf32>
    %199 = tpu.concatenate %193, %198 in 1 : vector<256x64xf32>, vector<256x32xf32> -> vector<256x96xf32>
    %c256 = arith.constant 256 : index
    %c0_74 = arith.constant 0 : index
    %200 = vector.load %arg4[%c256, %c0_74] : memref<416x128xbf16, #tpu.memory_space<vmem>>, vector<96x64xbf16>
    %201 = arith.truncf %199 : vector<256x96xf32> to vector<256x96xbf16>
    %cst_75 = arith.constant dense<0.000000e+00> : vector<256x64xf32>
    %202 = tpu.matmul %201, %200, %cst_75 {dimension_numbers = #tpu.dot_dimension_numbers<[1], [0], [0], [1], [0, 0, 1, 1], [], []>} : vector<256x96xbf16>, vector<96x64xbf16>, vector<256x64xf32> -> vector<256x64xf32>
    %c96_76 = arith.constant 96 : index
    %c0_77 = arith.constant 0 : index
    %203 = vector.load %arg5[%c96_76, %c0_77] : memref<160x128xf32, #tpu.memory_space<vmem>>, vector<1x64xf32>
    %204 = vector.broadcast %203 : vector<1x64xf32> to vector<256x64xf32>
    %205 = arith.addf %202, %204 : vector<256x64xf32>
    %206 = vector.extract_strided_slice %205 {offsets = [0, 0], sizes = [256, 32], strides = [1, 1]} : vector<256x64xf32> to vector<256x32xf32>
    %cst_78 = arith.constant 0.000000e+00 : f32
    %207 = vector.broadcast %cst_78 : f32 to vector<256x32xf32>
    %208 = arith.maximumf %206, %207 : vector<256x32xf32>
    %209 = vector.extract_strided_slice %205 {offsets = [0, 32], sizes = [256, 32], strides = [1, 1]} : vector<256x64xf32> to vector<256x32xf32>
    %c352 = arith.constant 352 : index
    %c0_79 = arith.constant 0 : index
    %210 = vector.load %arg4[%c352, %c0_79] : memref<416x128xbf16, #tpu.memory_space<vmem>>, vector<32x32xbf16>
    %211 = arith.truncf %208 : vector<256x32xf32> to vector<256x32xbf16>
    %cst_80 = arith.constant dense<0.000000e+00> : vector<256x32xf32>
    %212 = tpu.matmul %211, %210, %cst_80 {dimension_numbers = #tpu.dot_dimension_numbers<[1], [0], [0], [1], [0, 0, 1, 1], [], []>} : vector<256x32xbf16>, vector<32x32xbf16>, vector<256x32xf32> -> vector<256x32xf32>
    %c104 = arith.constant 104 : index
    %c0_81 = arith.constant 0 : index
    %213 = vector.load %arg5[%c104, %c0_81] : memref<160x128xf32, #tpu.memory_space<vmem>>, vector<1x32xf32>
    %214 = vector.broadcast %213 : vector<1x32xf32> to vector<256x32xf32>
    %215 = arith.addf %212, %214 : vector<256x32xf32>
    %c112 = arith.constant 112 : index
    %c0_82 = arith.constant 0 : index
    %216 = vector.load %arg5[%c112, %c0_82] : memref<160x128xf32, #tpu.memory_space<vmem>>, vector<8x32xf32>
    %c120 = arith.constant 120 : index
    %c0_83 = arith.constant 0 : index
    %217 = vector.load %arg5[%c120, %c0_83] : memref<160x128xf32, #tpu.memory_space<vmem>>, vector<8x32xf32>
    %218 = vector.shape_cast %215 : vector<256x32xf32> to vector<32x8x32xf32>
    %cst_84 = arith.constant dense<0.000000e+00> : vector<32x8xf32>
    %219 = vector.multi_reduction <add>, %218, %cst_84 [2] : vector<32x8x32xf32> to vector<32x8xf32>
    %220 = vector.shape_cast %219 : vector<32x8xf32> to vector<32x8x1xf32>
    %cst_85 = arith.constant 3.200000e+01 : f32
    %221 = vector.broadcast %cst_85 : f32 to vector<32x8x1xf32>
    %222 = arith.divf %220, %221 : vector<32x8x1xf32>
    %cst_86 = arith.constant dense<0.000000e+00> : vector<32x1xf32>
    %223 = vector.multi_reduction <add>, %222, %cst_86 [1] : vector<32x8x1xf32> to vector<32x1xf32>
    %224 = vector.shape_cast %223 : vector<32x1xf32> to vector<32x1x1xf32>
    %cst_87 = arith.constant 8.000000e+00 : f32
    %225 = vector.broadcast %cst_87 : f32 to vector<32x1x1xf32>
    %226 = arith.divf %224, %225 : vector<32x1x1xf32>
    %227 = vector.broadcast %226 : vector<32x1x1xf32> to vector<32x8x32xf32>
    %228 = arith.subf %218, %227 : vector<32x8x32xf32>
    %229 = arith.mulf %228, %228 : vector<32x8x32xf32>
    %cst_88 = arith.constant dense<0.000000e+00> : vector<32x8xf32>
    %230 = vector.multi_reduction <add>, %229, %cst_88 [2] : vector<32x8x32xf32> to vector<32x8xf32>
    %231 = vector.shape_cast %230 : vector<32x8xf32> to vector<32x8x1xf32>
    %cst_89 = arith.constant 3.200000e+01 : f32
    %232 = vector.broadcast %cst_89 : f32 to vector<32x8x1xf32>
    %233 = arith.divf %231, %232 : vector<32x8x1xf32>
    %cst_90 = arith.constant dense<0.000000e+00> : vector<32x1xf32>
    %234 = vector.multi_reduction <add>, %233, %cst_90 [1] : vector<32x8x1xf32> to vector<32x1xf32>
    %235 = vector.shape_cast %234 : vector<32x1xf32> to vector<32x1x1xf32>
    %cst_91 = arith.constant 8.000000e+00 : f32
    %236 = vector.broadcast %cst_91 : f32 to vector<32x1x1xf32>
    %237 = arith.divf %235, %236 : vector<32x1x1xf32>
    %cst_92 = arith.constant 9.99999974E-6 : f32
    %238 = vector.broadcast %cst_92 : f32 to vector<32x1x1xf32>
    %239 = arith.addf %237, %238 : vector<32x1x1xf32>
    %240 = math.rsqrt %239 : vector<32x1x1xf32>
    %241 = vector.broadcast %240 : vector<32x1x1xf32> to vector<32x8x32xf32>
    %242 = arith.mulf %228, %241 : vector<32x8x32xf32>
    %243 = vector.shape_cast %216 : vector<8x32xf32> to vector<1x8x32xf32>
    %244 = vector.broadcast %243 : vector<1x8x32xf32> to vector<32x8x32xf32>
    %245 = arith.mulf %242, %244 : vector<32x8x32xf32>
    %246 = vector.shape_cast %217 : vector<8x32xf32> to vector<1x8x32xf32>
    %247 = vector.broadcast %246 : vector<1x8x32xf32> to vector<32x8x32xf32>
    %248 = arith.addf %245, %247 : vector<32x8x32xf32>
    %249 = vector.shape_cast %248 : vector<32x8x32xf32> to vector<256x32xf32>
    %250 = arith.addf %209, %249 : vector<256x32xf32>
    %c384 = arith.constant 384 : index
    %c0_93 = arith.constant 0 : index
    %251 = vector.load %arg4[%c384, %c0_93] : memref<416x128xbf16, #tpu.memory_space<vmem>>, vector<32x4xbf16>
    %252 = arith.truncf %250 : vector<256x32xf32> to vector<256x32xbf16>
    %cst_94 = arith.constant dense<0.000000e+00> : vector<256x4xf32>
    %253 = tpu.matmul %252, %251, %cst_94 {dimension_numbers = #tpu.dot_dimension_numbers<[1], [0], [0], [1], [0, 0, 1, 1], [], []>} : vector<256x32xbf16>, vector<32x4xbf16>, vector<256x4xf32> -> vector<256x4xf32>
    %c152 = arith.constant 152 : index
    %c0_95 = arith.constant 0 : index
    %254 = vector.load %arg5[%c152, %c0_95] : memref<160x128xf32, #tpu.memory_space<vmem>>, vector<1x4xf32>
    %255 = vector.broadcast %254 : vector<1x4xf32> to vector<256x4xf32>
    %256 = arith.addf %253, %255 : vector<256x4xf32>
    %cst_96 = arith.constant 0.000000e+00 : f32
    %257 = vector.broadcast %cst_96 : f32 to vector<256x4xf32>
    %258 = arith.maximumf %256, %257 : vector<256x4xf32>
    %259 = math.absf %256 : vector<256x4xf32>
    %cst_97 = arith.constant 0.000000e+00 : f32
    %260 = vector.broadcast %cst_97 : f32 to vector<256x4xf32>
    %261 = arith.subf %260, %259 : vector<256x4xf32>
    %262 = math.exp %261 : vector<256x4xf32>
    %cst_98 = arith.constant 1.000000e+00 : f32
    %263 = vector.broadcast %cst_98 : f32 to vector<256x4xf32>
    %264 = arith.addf %263, %262 : vector<256x4xf32>
    %265 = math.log %264 : vector<256x4xf32>
    %266 = arith.addf %258, %265 : vector<256x4xf32>
    %c0_99 = arith.constant 0 : index
    %c0_100 = arith.constant 0 : index
    %267 = vector.load %arg8[%c0_99, %c0_100] : memref<256x4xf32, #tpu.memory_space<vmem>>, vector<256x4xf32>
    tpu.vector_store %arg8[%c0_99, %c0_100], %266 {strides = array<i32>} : memref<256x4xf32, #tpu.memory_space<vmem>>, vector<256x4xf32>,
    return
  }
  func.func @transform_0(%arg0: i32) -> (i32, i32) {
    %c0_i32 = arith.constant 0 : i32
    %c0_i32_0 = arith.constant 0 : i32
    return %arg0, %c0_i32 : i32, i32
  }
  func.func @transform_1(%arg0: i32) -> (i32, i32) {
    %c0_i32 = arith.constant 0 : i32
    %c0_i32_0 = arith.constant 0 : i32
    return %arg0, %c0_i32 : i32, i32
  }
  func.func @transform_2(%arg0: i32) -> (i32, i32) {
    %c0_i32 = arith.constant 0 : i32
    %c0_i32_0 = arith.constant 0 : i32
    return %arg0, %c0_i32 : i32, i32
  }
  func.func @transform_3(%arg0: i32) -> (i32, i32) {
    %c0_i32 = arith.constant 0 : i32
    %c0_i32_0 = arith.constant 0 : i32
    %c0_i32_1 = arith.constant 0 : i32
    return %c0_i32, %c0_i32_0 : i32, i32
  }
  func.func @transform_4(%arg0: i32) -> (i32, i32) {
    %c0_i32 = arith.constant 0 : i32
    %c0_i32_0 = arith.constant 0 : i32
    %c0_i32_1 = arith.constant 0 : i32
    return %c0_i32, %c0_i32_0 : i32, i32
  }
  func.func @transform_5(%arg0: i32) -> (i32, i32) {
    %c0_i32 = arith.constant 0 : i32
    %c0_i32_0 = arith.constant 0 : i32
    %c0_i32_1 = arith.constant 0 : i32
    return %c0_i32, %c0_i32_0 : i32, i32
  }
  func.func @transform_6(%arg0: i32) -> (i32, i32) {
    %c0_i32 = arith.constant 0 : i32
    %c0_i32_0 = arith.constant 0 : i32
    %c0_i32_1 = arith.constant 0 : i32
    return %c0_i32, %c0_i32_0 : i32, i32
  }
  func.func @transform_7(%arg0: i32) -> (i32, i32) {
    %c0_i32 = arith.constant 0 : i32
    %c0_i32_0 = arith.constant 0 : i32
    return %arg0, %c0_i32 : i32, i32
  }
}

</mosaic_0001>

<bundles_post_ra>
// kernel: tpu_custom_call.1
= control target key start
LH: loop header
LB: loop body
LE: loop exit
PB: predicated region body
PF: predicated region fallthrough
CT: control target
= control target key end

     0   :  { %s11535_s24 = smov 0   ;;  %s16410_s0 = inlined_call_operand.vmem [shape: f32[1024,8], index: 0, kind: input, shape index: {}]   ;;  %s16411_s1 = inlined_call_operand.vmem [shape: f32[512,4], index: 1, kind: input, shape index: {}]   ;;  %s16412_s2 = inlined_call_operand.vmem [shape: f32[64,4], index: 2, kind: input, shape index: {}]   ;;  %s16413_s3 = inlined_call_operand.vmem [shape: bf16[416,128], index: 3, kind: input, shape index: {}]   ;;  %s16414_s4 = inlined_call_operand.vmem [shape: f32[160,128], index: 4, kind: input, shape index: {}]   ;;  %s16415_s5 = inlined_call_operand.vmem [shape: bf16[256,512], index: 5, kind: input, shape index: {}]   ;;  %s16416_s6 = inlined_call_operand.vmem [shape: bf16[256,256], index: 6, kind: input, shape index: {}]   ;;  %s16417_s7 = inlined_call_operand.vmem [shape: f32[512,4], index: 7, kind: output, shape index: {}]  }
   0x1 LB: > { %s11541_s25 = sadd.s32 4294967295, %s11487_s24   ;;  %p9572_p0 = scmp.ge.s32.totalorder %s11487_s24, 1  ;;  %s11487_s24 = sphi %s11535_s24, %s17_s24  }
   0x2   : > { %p260_p1 = scmp.lt.s32.totalorder %s11487_s24, 3 }
   0x4   : > { %p261_p2 = pnand %p9572_p0, %p260_p1 }
   0x6   : > { %264 = sbr.rel (%p261_p2) target bundleno = 3784 (0xec8), region = 48 }
   0xd   : > { %v331_v0 = vld [vmem:[%s16413_s3 + $0x28] sm:$0x3]  ;;  %vm346_vm0 = vcmask 1041408   ;;  %s9577_s28 = sshll.u32 %s11541_s25, 2  ;;  %s9575_s29 = sshll.u32 %s11541_s25, 5  ;;  %v11489_v4 = vmov 0  }
   0xe   : > { %10713 = vmatprep.subr.msk.bf16.mxu0 %vm346_vm0, %v331_v0  ;;  %v348_v1 = vsel %vm346_vm0, %v331_v0, 0  ;;  %p315_p3 = scmp.lt.s32.totalorder %s9577_s28, 7  ;;  %v431_v2 = vld [vmem:[%s16413_s3] sm:$0x3]  ;;  %p309_p4 = scmp.lt.s32.totalorder %s9575_s29, 63  ;;  %10732 = vset.pattern.permute.xlu0 %v11489_v4  ;;  %vm339_vm1 = vcmask 31744  }
   0xf   : > { %10368 = vmatpush3.bf16.msra.mxu0 %v348_v1  ;;  %v502_v3 = vsel %vm346_vm0, %v431_v2, 0  ;;  %10715 = vmatprep.subr.msk.bf16.mxu1 %vm346_vm0, %v431_v2  ;;  %s9573_s9 = sshll.u32 %s11541_s25, 6  ;;  %vm713_vm2 = vcmask 523264   ;;  %s11491_s8 = smov 8   ;;  %vm2347_vm3 = vcmask 1043456   ;;  %vm2224_vm4 = vcmask 64512  }
  0x10   : > { %s17142_s28 = smov (!%p315_p3, %s9577_s28), 7  ;;  %10714 = vmatprep.subr.msk.bf16.mxu0 %vm346_vm0, %v431_v2  ;;  %10712 = vmatpush3.bf16.msra.mxu1 %v502_v3  ;;  %s17144_s29 = smov (!%p309_p4, %s9575_s29), 63  ;;  %vm2298_vm5 = vcmask 326656   ;;  %vm4052_vm6 = vcmask 293888   ;;  %vm2581_vm7 = vcmask 261120   ;;  %vm7296_vm8 = vcmask 785408  }
  0x11   : > { %s9578_s10 = sshll.u32 %s17142_s28, 3  ;;  %p11561_p5 = scmp.lt.s32.totalorder %s9573_s9, 127  ;;  %10893 = vset.pattern.permute.xlu1 %v11489_v4 }
  0x12   : > { %s318_s14 = scalar_lea.vmem %s16412_s2, %s9578_s10  ;;  %s9576_s15 = sshll.u32 %s17144_s29, 3 }
  0x13   : > { %v327_v5 = vld [vmem:[%s318_s14] sm:$0xff]  ;;  %v328_v6 = vld [vmem:[%s318_s14 + $0x8] sm:$0xff]  ;;  %v329_v7 = vld [vmem:[%s318_s14 + $0x10] sm:$0xff]  ;;  %s11574_s18 = scalar_lea.vmem %s16411_s1, %s9576_s15  ;;  %s17146_s9 = smov (!%p11561_p5, %s9573_s9), 127 }
  0x14   : > { %v332_v8 = vpack.c.bf16 %v328_v6, %v327_v5  ;;  %v330_v9 = vld [vmem:[%s318_s14 + $0x18] sm:$0xff]  ;;  %v399_v10 = vld [vmem:[%s11574_s18] sm:$0xff]  ;;  %v400_v11 = vld [vmem:[%s11574_s18 + $0x8] sm:$0xff]  ;;  %s9574_s19 = sshll.u32 %s17146_s9, 3  ;;  %s11493_s10 = smov 32  }
  0x15   : > { %v333_v12 = vpack.c.bf16 %v330_v9, %v329_v7  ;;  %v432_v13 = vpack.c.bf16 %v400_v11, %v399_v10  ;;  %v401_v14 = vld [vmem:[%s11574_s18 + $0x10] sm:$0xff]  ;;  %v402_v15 = vld [vmem:[%s11574_s18 + $0x18] sm:$0xff]  ;;  %v403_v16 = vld [vmem:[%s11574_s18 + $0x20] sm:$0xff]  ;;  %s11596_s22 = scalar_lea.vmem %s16410_s0, %s9574_s19  ;;  %s11494_s16 = smov 96  }
  0x16   : > { %10369 = vmatprep.mubr.msk.bf16.mxu0 %vm339_vm1, %v332_v8  ;;  %v404_v17 = vld [vmem:[%s11574_s18 + $0x28] sm:$0xff]  ;;  %v415_v18 = vld [vmem:[%s11574_s18 + $0x80] sm:$0xff]  ;;  %v417_v20 = vld [vmem:[%s11574_s18 + $0x90] sm:$0xff]  ;;  %v433_v22 = vpack.c.bf16 %v402_v15, %v401_v14  ;;  %s16217_s13 = scalar_lea.vmem %s16417_s7, %s9576_s15 }
  0x17   : > { %10370 = vmatmul.mubr.msk.bf16.vlgmr.msra.gmra.mrb[0].mxu0 %vm339_vm1, %v333_v12  ;;  %v416_v19 = vld [vmem:[%s11574_s18 + $0x88] sm:$0xff]  ;;  %v418_v21 = vld [vmem:[%s11574_s18 + $0x98] sm:$0xff]  ;;  %v419_v25 = vld [vmem:[%s11574_s18 + $0xa0] sm:$0xff]  ;;  %v434_v27 = vpack.c.bf16 %v404_v17, %v403_v16 }
  0x18   : > { %10374 = vmatpush3.bf16.msra.mxu0 %v502_v3  ;;  %10375 = vmatprep.mubr.msk.bf16.mxu0 %vm339_vm1, %v432_v13  ;;  %v440_v23 = vpack.c.bf16 %v416_v19, %v415_v18  ;;  %v441_v24 = vpack.c.bf16 %v418_v21, %v417_v20  ;;  %v420_v26 = vld [vmem:[%s11574_s18 + $0xa8] sm:$0xff]  ;;  %v421_v29 = vld [vmem:[%s11574_s18 + $0xb0] sm:$0xff]  ;;  %v406_v31 = vld [vmem:[%s11574_s18 + $0x38] sm:$0xff] }
  0x19   : > { %v442_v28 = vpack.c.bf16 %v420_v26, %v419_v25  ;;  %v405_v30 = vld [vmem:[%s11574_s18 + $0x30] sm:$0xff]  ;;  %v422_v32 = vld [vmem:[%s11574_s18 + $0xb8] sm:$0xff]  ;;  %v423_v33 = vld [vmem:[%s11574_s18 + $0xc0] sm:$0xff] }
  0x1a   : > { %10391 = vmatprep.mubr.msk.bf16.mxu1 %vm339_vm1, %v440_v23  ;;  %v424_v34 = vld [vmem:[%s11574_s18 + $0xc8] sm:$0xff]  ;;  %v407_v35 = vld [vmem:[%s11574_s18 + $0x40] sm:$0xff]  ;;  %v1074_v41 = vld [vmem:[%s11596_s22 + $0x90] sm:$0xff]  ;;  %v443_v48 = vpack.c.bf16 %v422_v32, %v421_v29  ;;  %v435_v51 = vpack.c.bf16 %v406_v31, %v405_v30 }
  0x1b   : > { %10392 = vmatmul.mubr.msk.bf16.vlgmr.msra.gmra.mrb[0].mxu1 %vm339_vm1, %v441_v24  ;;  %v1072_v36 = vld [vmem:[%s11596_s22 + $0x80] sm:$0xff]  ;;  %v1073_v37 = vld [vmem:[%s11596_s22 + $0x88] sm:$0xff]  ;;  %v1075_v42 = vld [vmem:[%s11596_s22 + $0x98] sm:$0xff]  ;;  %v444_v52 = vpack.c.bf16 %v424_v34, %v423_v33 }
  0x1c   : > { %10395 = vmatprep.mubr.msk.bf16.mxu1 %vm339_vm1, %v442_v28  ;;  %v1056_v38 = vld [vmem:[%s11596_s22] sm:$0xff]  ;;  %v1128_v39 = vpack.c.bf16 %v1073_v37, %v1072_v36  ;;  %v1057_v40 = vld [vmem:[%s11596_s22 + $0x8] sm:$0xff]  ;;  %v1129_v45 = vpack.c.bf16 %v1075_v42, %v1074_v41  ;;  %v1058_v46 = vld [vmem:[%s11596_s22 + $0x10] sm:$0xff] }
  0x1d   : > { %v408_v43 = vld [vmem:[%s11574_s18 + $0x48] sm:$0xff]  ;;  %v1120_v44 = vpack.c.bf16 %v1057_v40, %v1056_v38  ;;  %v1059_v47 = vld [vmem:[%s11596_s22 + $0x18] sm:$0xff]  ;;  %v1076_v49 = vld [vmem:[%s11596_s22 + $0xa0] sm:$0xff] }
  0x1e   : > { %9899 = vmatprep.subr.bf16.mxu1 %v1128_v39  ;;  %v1077_v50 = vld [vmem:[%s11596_s22 + $0xa8] sm:$0xff]  ;;  %v436_v53 = vpack.c.bf16 %v408_v43, %v407_v35  ;;  %v1121_v54 = vpack.c.bf16 %v1059_v47, %v1058_v46  ;;  %v1060_v56 = vld [vmem:[%s11596_s22 + $0x20] sm:$0xff]  ;;  %v409_v58 = vld [vmem:[%s11574_s18 + $0x50] sm:$0xff] }
  0x1f   : > { %10376 = vmatmul.mubr.msk.bf16.vlgmr.msra.gmra.mrb[4].mxu0 %vm339_vm1, %v433_v22  ;;  %9900 = vmatpush3.bf16.msra.mxu1 %v1120_v44  ;;  %v1130_v55 = vpack.c.bf16 %v1077_v50, %v1076_v49  ;;  %v1061_v57 = vld [vmem:[%s11596_s22 + $0x28] sm:$0xff]  ;;  %v410_v59 = vld [vmem:[%s11574_s18 + $0x58] sm:$0xff]  ;;  %v1078_v60 = vld [vmem:[%s11596_s22 + $0xb0] sm:$0xff] }
  0x20   : > { %10379 = vmatprep.mubr.msk.bf16.mxu0 %vm339_vm1, %v434_v27  ;;  %9901 = vmatprep.subr.bf16.mxu1 %v1129_v45  ;;  %v1079_v61 = vld [vmem:[%s11596_s22 + $0xb8] sm:$0xff]  ;;  %v411_v62 = vld [vmem:[%s11574_s18 + $0x60] sm:$0xff]  ;;  %v412_v63 = vld [vmem:[%s11574_s18 + $0x68] sm:$0xff]  ;;  %v1122_v4 = vpack.c.bf16 %v1061_v57, %v1060_v56  ;;  %v437_v12 = vpack.c.bf16 %v410_v59, %v409_v58 }
  0x21   : > { %v425_v0 = vld [vmem:[%s11574_s18 + $0xd0] sm:$0xff]  ;;  %v426_v1 = vld [vmem:[%s11574_s18 + $0xd8] sm:$0xff]  ;;  %v427_v2 = vld [vmem:[%s11574_s18 + $0xe0] sm:$0xff]  ;;  %v1131_v6 = vpack.c.bf16 %v1079_v61, %v1078_v60  ;;  %v438_v16 = vpack.c.bf16 %v412_v63, %v411_v62 }
  0x22   : > { %v428_v3 = vld [vmem:[%s11574_s18 + $0xe8] sm:$0xff]  ;;  %v1062_v5 = vld [vmem:[%s11596_s22 + $0x30] sm:$0xff]  ;;  %v1063_v7 = vld [vmem:[%s11596_s22 + $0x38] sm:$0xff]  ;;  %v445_v10 = vpack.c.bf16 %v426_v1, %v425_v0 }
  0x23   : > { %10396 = vmatmul.mubr.msk.bf16.gmra.mrb[4].mxu1 %vm339_vm1, %v443_v48  ;;  %v1080_v8 = vld [vmem:[%s11596_s22 + $0xc0] sm:$0xff]  ;;  %v1081_v9 = vld [vmem:[%s11596_s22 + $0xc8] sm:$0xff]  ;;  %v1152_v11 = vld [vmem:[%s16414_s4 + $0x10] sm:$0xff]  ;;  %v446_v13 = vpack.c.bf16 %v428_v3, %v427_v2  ;;  %v1123_v17 = vpack.c.bf16 %v1063_v7, %v1062_v5 }
  0x24   : > { %10399 = vmatprep.mubr.msk.bf16.mxu1 %vm339_vm1, %v444_v52  ;;  %9902 = vmatpush3.bf16.msra.mxu1 %v1121_v54  ;;  %v1064_v14 = vld [vmem:[%s11596_s22 + $0x40] sm:$0xff]  ;;  %v1065_v15 = vld [vmem:[%s11596_s22 + $0x48] sm:$0xff]  ;;  %v1082_v18 = vld [vmem:[%s11596_s22 + $0xd0] sm:$0xff]  ;;  %v1132_v22 = vpack.c.bf16 %v1081_v9, %v1080_v8 }
  0x25   : > { %9903 = vmatprep.subr.bf16.mxu1 %v1130_v55  ;;  %1155 = vperm.xlu0 %10732, %v1152_v11   ;;  %v1083_v19 = vld [vmem:[%s11596_s22 + $0xd8] sm:$0xff]  ;;  %v429_v20 = vld [vmem:[%s11574_s18 + $0xf0] sm:$0xff]  ;;  %v1124_v27 = vpack.c.bf16 %v1065_v15, %v1064_v14  ;;  %v1084_v28 = vld [vmem:[%s11596_s22 + $0xe0] sm:$0xff] }
  0x26   : > { %v430_v21 = vld [vmem:[%s11574_s18 + $0xf8] sm:$0xff]  ;;  %v413_v23 = vld [vmem:[%s11574_s18 + $0x70] sm:$0xff]  ;;  %v1085_v29 = vld [vmem:[%s11596_s22 + $0xe8] sm:$0xff]  ;;  %v1133_v30 = vpack.c.bf16 %v1083_v19, %v1082_v18  ;;  %v11490_v19 = vmov 1966171168  }
  0x27   : > { %10380 = vmatmul.mubr.msk.bf16.gmra.mrb[8].mxu0 %vm339_vm1, %v435_v51  ;;  %v414_v24 = vld [vmem:[%s11574_s18 + $0x78] sm:$0xff]  ;;  %v1066_v25 = vld [vmem:[%s11596_s22 + $0x50] sm:$0xff]  ;;  %v447_v32 = vpack.c.bf16 %v430_v21, %v429_v20  ;;  %v1068_v34 = vld [vmem:[%s11596_s22 + $0x60] sm:$0xff]  ;;  %v1134_v39 = vpack.c.bf16 %v1085_v29, %v1084_v28  ;;  %v1806_v20 = vunpack.c.l.s4 %v11490_v19  ;;  %v1808_v21 = vlaneseq }
  0x28   : > { %10383 = vmatprep.mubr.msk.bf16.mxu0 %vm339_vm1, %v436_v53  ;;  %9904 = vmatpush3.bf16.msra.mxu1 %v1122_v4  ;;  %v1067_v26 = vld [vmem:[%s11596_s22 + $0x58] sm:$0xff]  ;;  %v10896_v31 = vld [vmem:[%s16415_s5 + $0x4] ss:$16 sps:$4 sm:$0xff]   ;;  %v439_v33 = vpack.c.bf16 %v414_v24, %v413_v23  ;;  %v1069_v35 = vld [vmem:[%s11596_s22 + $0x68] sm:$0xff] }
  0x29   : > { %9905 = vmatprep.subr.bf16.mxu1 %v1131_v6  ;;  %v1125_v36 = vpack.c.bf16 %v1067_v26, %v1066_v25  ;;  %v1086_v37 = vld [vmem:[%s11596_s22 + $0xf0] sm:$0xff]  ;;  %v1087_v38 = vld [vmem:[%s11596_s22 + $0xf8] sm:$0xff]  ;;  %v1126_v42 = vpack.c.bf16 %v1069_v35, %v1068_v34  ;;  %v10908_v53 = vld [vmem:[%s16413_s3 + $0x8] sm:$0xff]   ;;  %v1809_v23 = vshrl.u32 %v1808_v21, 7 }
  0x2a   : > { %v1070_v40 = vld [vmem:[%s11596_s22 + $0x70] sm:$0xff]  ;;  %v1071_v41 = vld [vmem:[%s11596_s22 + $0x78] sm:$0xff]  ;;  %v1135_v43 = vpack.c.bf16 %v1087_v38, %v1086_v37  ;;  %10407 = vmatprep.subr.bf16.mxu0 %v10908_v53  ;;  %v10915_v59 = vld [vmem:[%s16413_s3 + $0x20] sm:$0xff]  }
  0x2b   : > { %10400 = vmatmul.mubr.msk.bf16.gmra.mrb[8].mxu1 %vm339_vm1, %v445_v10  ;;  %v1127_v44 = vpack.c.bf16 %v1071_v41, %v1070_v40  ;;  %v10894_v45 = vld [vmem:[%s16415_s5] ss:$16 sps:$4 sm:$0xff]   ;;  %v10897_v46 = vld [vmem:[%s16415_s5 + $0x24] ss:$16 sps:$4 sm:$0xff]   ;;  %10408 = vmatpush3.bf16.msra.mxu0 %v10908_v53  ;;  %v10913_v57 = vld [vmem:[%s16413_s3 + $0x18] sm:$0xff]  }
  0x2c   : > { %10403 = vmatprep.mubr.msk.bf16.mxu1 %vm339_vm1, %v446_v13  ;;  %9906 = vmatpush3.bf16.msra.mxu1 %v1123_v17  ;;  %v10899_v47 = vld [vmem:[%s16415_s5 + $0x20] ss:$16 sps:$4 sm:$0xff]   ;;  %v10900_v48 = vld [vmem:[%s16415_s5 + $0x44] ss:$16 sps:$4 sm:$0xff]   ;;  %v1105_v5 = vld [vmem:[%s11596_s22 + $0x188] sm:$0xff] }
  0x2d   : > { %9907 = vmatprep.subr.bf16.mxu1 %v1132_v22  ;;  %v10902_v49 = vld [vmem:[%s16415_s5 + $0x40] ss:$16 sps:$4 sm:$0xff]   ;;  %v10903_v50 = vld [vmem:[%s16415_s5 + $0x64] ss:$16 sps:$4 sm:$0xff]   ;;  %v1807_v22 = vunpack.c.0.s8 %v1806_v20  ;;  %v9581_v24 = vld [vmem:[%s16414_s4 + $0x18] ss:$0 sm:$0xff] }
  0x2e   : > { %v10905_v51 = vld [vmem:[%s16415_s5 + $0x60] ss:$16 sps:$4 sm:$0xff]   ;;  %v10906_v52 = vld [vmem:[%s16415_s5 + $0x84] ss:$16 sps:$4 sm:$0xff]   ;;  %v11785_v26 = vld [vmem:[%s11596_s22 + $0x108] sm:$0xff] }
  0x2f   : > { %10384 = vmatmul.mubr.msk.bf16.gmra.mrb[12].mxu0 %vm339_vm1, %v437_v12  ;;  %v10909_v54 = vld [vmem:[%s16415_s5 + $0x80] ss:$16 sps:$4 sm:$0xff]   ;;  %v10911_v56 = vld [vmem:[%s16415_s5 + $0xa4] ss:$16 sps:$4 sm:$0xff]   ;;  %v11787_v28 = vsub.s32 %v1807_v22, %v1809_v23  ;;  %v11811_v40 = vld [vmem:[%s11596_s22 + $0x128] sm:$0xff] }
  0x30   : > { %10387 = vmatprep.mubr.msk.bf16.mxu0 %vm339_vm1, %v438_v16  ;;  %9908 = vmatpush3.bf16.msra.mxu1 %v1124_v27  ;;  %v10910_v55 = vld [vmem:[%s16413_s3 + $0x10] sm:$0xff]   ;;  %v1104_v4 = vld [vmem:[%s11596_s22 + $0x180] sm:$0xff]  ;;  %v11898_v19 = vld [vmem:[%s11596_s22 + $0x1f8] sm:$0xff] }
  0x31   : > { %9909 = vmatprep.subr.bf16.mxu1 %v1133_v30  ;;  %10409 = vmatprep.subr.bf16.mxu0 %v10910_v55  ;;  %v10914_v58 = vld [vmem:[%s16415_s5 + $0xa0] ss:$16 sps:$4 sm:$0xff]   ;;  %v10916_v60 = vld [vmem:[%s16415_s5 + $0xc4] ss:$16 sps:$4 sm:$0xff]   ;;  %v1144_v6 = vpack.c.bf16 %v1105_v5, %v1104_v4  ;;  %v11793_v30 = vld [vmem:[%s11596_s22 + $0x198] sm:$0xff]  ;;  %16652 = vst [vmem:[#allocation9_spill] sm:$0xff] %v11898_v19 }
  0x32   : > { %10410 = vmatpush3.bf16.msra.mxu0 %v10910_v55  ;;  %v10918_v61 = vld [vmem:[%s16415_s5 + $0xc0] ss:$16 sps:$4 sm:$0xff]   ;;  %v10919_v62 = vld [vmem:[%s16415_s5 + $0xe4] ss:$16 sps:$4 sm:$0xff]   ;;  %v11871_v4 = vld [vmem:[%s11596_s22 + $0x1e8] sm:$0xff] }
  0x33   : > { %10404 = vmatmul.mubr.msk.bf16.gmra.mrb[12].mxu1 %vm339_vm1, %v447_v32  ;;  %10411 = vmatprep.subr.bf16.mxu0 %v10913_v57  ;;  %v10921_v63 = vld [vmem:[%s16415_s5 + $0xe0] ss:$16 sps:$4 sm:$0xff]   ;;  %v10922_v0 = vld [vmem:[%s16415_s5 + $0x104] ss:$16 sps:$4 sm:$0xff]   ;;  %v11799_v32 = vld [vmem:[%s11596_s22 + $0x118] sm:$0xff]  ;;  %16648 = vst [vmem:[#allocation5_spill] sm:$0xff] %v11871_v4 }
  0x34   : > { %1510 = vmatprep.mubr.bf16.mxu1 %v10896_v31  ;;  %9910 = vmatpush3.bf16.msra.mxu1 %v1125_v36  ;;  %v10924_v1 = vld [vmem:[%s16415_s5 + $0x100] ss:$16 sps:$4 sm:$0xff]   ;;  %v10925_v2 = vld [vmem:[%s16415_s5 + $0x124] ss:$16 sps:$4 sm:$0xff]   ;;  %v11805_v36 = vld [vmem:[%s11596_s22 + $0x1a8] sm:$0xff] }
  0x35   : > { %9911 = vmatprep.subr.bf16.mxu1 %v1134_v39  ;;  %v10927_v3 = vld [vmem:[%s16415_s5 + $0x120] ss:$16 sps:$4 sm:$0xff]   ;;  %v10928_v7 = vld [vmem:[%s16415_s5 + $0x144] ss:$16 sps:$4 sm:$0xff]  }
  0x36   : > { %10412 = vmatpush3.bf16.msra.mxu0 %v10913_v57  ;;  %v10930_v8 = vld [vmem:[%s16415_s5 + $0x140] ss:$16 sps:$4 sm:$0xff]   ;;  %v10931_v9 = vld [vmem:[%s16415_s5 + $0x164] ss:$16 sps:$4 sm:$0xff]  }
  0x37   : > { %10388 = vmatmul.mubr.msk.bf16.gmra.mrb[16].mxu0 %vm339_vm1, %v439_v33  ;;  %10413 = vmatprep.subr.bf16.mxu0 %v10915_v59  ;;  %v10933_v10 = vld [vmem:[%s16415_s5 + $0x160] ss:$16 sps:$4 sm:$0xff]   ;;  %v10934_v11 = vld [vmem:[%s16415_s5 + $0x184] ss:$16 sps:$4 sm:$0xff]  }
  0x38   : > { %9912 = vmatpush3.bf16.msra.mxu1 %v1126_v42  ;;  %v10936_v12 = vld [vmem:[%s16415_s5 + $0x180] ss:$16 sps:$4 sm:$0xff]   ;;  %v10937_v13 = vld [vmem:[%s16415_s5 + $0x1a4] ss:$16 sps:$4 sm:$0xff]   ;;  %v11817_v42 = vld [vmem:[%s11596_s22 + $0x1b8] sm:$0xff] }
  0x39   : > { %9913 = vmatprep.subr.bf16.mxu1 %v1135_v43  ;;  %v10939_v14 = vld [vmem:[%s16415_s5 + $0x1a0] ss:$16 sps:$4 sm:$0xff]   ;;  %v10940_v15 = vld [vmem:[%s16415_s5 + $0x1c4] ss:$16 sps:$4 sm:$0xff]  }
  0x3a   : > { %10414 = vmatpush3.bf16.msra.mxu0 %v10915_v59  ;;  %v10945_v16 = vld [vmem:[%s16415_s5 + $0x1c0] ss:$16 sps:$4 sm:$0xff]   ;;  %v10946_v17 = vld [vmem:[%s16415_s5 + $0x1e4] ss:$16 sps:$4 sm:$0xff]  }
  0x3b   : > { %10011 = vmatprep.subr.bf16.mxu0 %v1144_v6  ;;  %v10950_v18 = vld [vmem:[%s16415_s5 + $0x1e0] ss:$16 sps:$4 sm:$0xff]  }
  0x3c   : > { %9914 = vmatpush3.bf16.msra.mxu1 %v1127_v44  ;;  %v11782_v25 = vld [vmem:[%s11596_s22 + $0x100] sm:$0xff]  ;;  %v11790_v29 = vld [vmem:[%s11596_s22 + $0x190] sm:$0xff] }
  0x3d   : > { %v11796_v31 = vld [vmem:[%s11596_s22 + $0x110] sm:$0xff]  ;;  %v11802_v35 = vld [vmem:[%s11596_s22 + $0x1a0] sm:$0xff] }
  0x3e   : > { %v11808_v37 = vld [vmem:[%s11596_s22 + $0x120] sm:$0xff]  ;;  %v11814_v41 = vld [vmem:[%s11596_s22 + $0x1b0] sm:$0xff] }
  0x3f   : > { %1511 = vmatmul.mubr.bf16.vlgmr.msra.gmra.mrb[16].mxu1 %v10894_v45  ;;  %v11820_v45 = vld [vmem:[%s11596_s22 + $0x130] sm:$0xff]  ;;  %v11837_v53 = vld [vmem:[%s11596_s22 + $0x140] sm:$0xff] }
  0x40   : > { %1518 = vmatprep.mubr.bf16.mxu1 %v10897_v46  ;;  %v11823_v46 = vld [vmem:[%s11596_s22 + $0x138] sm:$0xff]  ;;  %v11849_v59 = vld [vmem:[%s11596_s22 + $0x1d0] sm:$0xff] }
  0x47   : > { %1519 = vmatmul.mubr.bf16.gmra.mrb[20].mxu1 %v10899_v47  ;;  %v11826_v47 = vld [vmem:[%s11596_s22 + $0x1c0] sm:$0xff] }
  0x48   : > { %1526 = vmatprep.mubr.bf16.mxu1 %v10900_v48 }
  0x4f   : > { %1527 = vmatmul.mubr.bf16.gmra.mrb[24].mxu1 %v10902_v49  ;;  %v11829_v49 = vsub.s32 0, %v1809_v23 }
  0x50   : > { %1534 = vmatprep.mubr.bf16.mxu1 %v10903_v50 }
  0x57   : > { %1535 = vmatmul.mubr.bf16.gmra.mrb[28].mxu1 %v10905_v51 }
  0x58   : > { %1542 = vmatprep.mubr.bf16.mxu1 %v10906_v52  ;;  %v11834_v52 = vld [vmem:[%s11596_s22 + $0x1c8] sm:$0xff] }
  0x5f   : > { %1543 = vmatmul.mubr.bf16.gmra.mrb[32].mxu1 %v10909_v54  ;;  %v11840_v54 = vld [vmem:[%s11596_s22 + $0x148] sm:$0xff] }
  0x60   : > { %1550 = vmatprep.mubr.bf16.mxu1 %v10911_v56 }
  0x67   : > { %1551 = vmatmul.mubr.bf16.gmra.mrb[36].mxu1 %v10914_v58 }
  0x68   : > { %1558 = vmatprep.mubr.bf16.mxu1 %v10916_v60  ;;  %v11852_v60 = vld [vmem:[%s11596_s22 + $0x1d8] sm:$0xff] }
  0x6f   : > { %1559 = vmatmul.mubr.bf16.gmra.mrb[40].mxu1 %v10918_v61  ;;  %v11855_v61 = vld [vmem:[%s11596_s22 + $0x150] sm:$0xff] }
  0x70   : > { %1566 = vmatprep.mubr.bf16.mxu1 %v10919_v62  ;;  %16645 = vst [vmem:[#allocation2_spill] sm:$0xff] %v11855_v61 }
  0x77   : > { %1567 = vmatmul.mubr.bf16.gmra.mrb[44].mxu1 %v10921_v63 }
  0x78   : > { %1574 = vmatprep.mubr.bf16.mxu1 %v10922_v0 }
  0x7f   : > { %1575 = vmatmul.mubr.bf16.gmra.mrb[48].mxu1 %v10924_v1 }
  0x80   : > { %1582 = vmatprep.mubr.bf16.mxu1 %v10925_v2  ;;  %v11865_v2 = vld [vmem:[%s11596_s22 + $0x158] sm:$0xff] }
  0x81   : > { %16646 = vst [vmem:[#allocation3_spill] sm:$0xff] %v11865_v2 }
  0x87   : > { %1583 = vmatmul.mubr.bf16.gmra.mrb[52].mxu1 %v10927_v3  ;;  %v11868_v3 = vld [vmem:[%s11596_s22 + $0x1e0] sm:$0xff] }
  0x88   : > { %1590 = vmatprep.mubr.bf16.mxu1 %v10928_v7  ;;  %16647 = vst [vmem:[#allocation4_spill] sm:$0xff] %v11868_v3 }
  0x8f   : > { %1591 = vmatmul.mubr.bf16.gmra.mrb[56].mxu1 %v10930_v8 }
  0x90   : > { %1598 = vmatprep.mubr.bf16.mxu1 %v10931_v9 }
  0x97   : > { %1599 = vmatmul.mubr.bf16.gmra.mrb[60].mxu1 %v10933_v10  ;;  %v11880_v10 = vld [vmem:[%s11596_s22 + $0x160] sm:$0xff] }
  0x98   : > { %1606 = vmatprep.mubr.bf16.mxu1 %v10934_v11  ;;  %16649 = vst [vmem:[#allocation6_spill] sm:$0xff] %v11880_v10  ;;  %v11883_v11 = vld [vmem:[%s11596_s22 + $0x168] sm:$0xff] }
  0x99   : > { %16650 = vst [vmem:[#allocation7_spill] sm:$0xff] %v11883_v11 }
  0x9f   : > { %1607 = vmatmul.mubr.bf16.gmra.mrb[64].mxu1 %v10936_v12 }
  0xa0   : > { %1614 = vmatprep.mubr.bf16.mxu1 %v10937_v13 }
  0xa7   : > { %1615 = vmatmul.mubr.bf16.gmra.mrb[68].mxu1 %v10939_v14 }
  0xa8   : > { %1622 = vmatprep.mubr.bf16.mxu1 %v10940_v15 }
  0xaf   : > { %1623 = vmatmul.mubr.bf16.gmra.mrb[72].mxu1 %v10945_v16 }
  0xb0   : > { %1630 = vmatprep.mubr.bf16.mxu1 %v10946_v17 }
  0xb7   : > { %1631 = vmatmul.mubr.bf16.gmra.mrb[76].mxu1 %v10950_v18  ;;  %v11895_v18 = vld [vmem:[%s11596_s22 + $0x1f0] sm:$0xff] }
  0xb8   : > { %16651 = vst [vmem:[#allocation8_spill] sm:$0xff] %v11895_v18 }
  0xea   : > { %v10371_v27 = vpop.f32.mrb[0].mxu0 }
  0xeb   : > { %v393_v33 = vadd.f32 %v10371_v27, %v9581_v24  ;;  %v384_v34 = vpop.f32.mrb[1].mxu0 }
  0xec   : > { %v385_v38 = vadd.f32 %v9581_v24, %v384_v34  ;;  %v10372_v39 = vpop.f32.mrb[2].mxu0 }
  0xed   : > { %v1902_v43 = vcombine.high %v393_v33, %v393_v33  ;;  %v387_v44 = vpop.f32.mrb[3].mxu0  ;;  %v1909_v48 = vrot.slane %v393_v33, %v11787_v28  ;;  %v396_v5 = vadd.f32 %v10372_v39, %v9581_v24 }
  0xee   : > { %v1804_v50 = vcombine.high %v385_v38, %v385_v38  ;;  %v1811_v56 = vrot.slane %v385_v38, %v11787_v28  ;;  %v388_v6 = vadd.f32 %v9581_v24, %v387_v44  ;;  %v11873_v7 = vpop.f32.mrb[0].mxu1 }
  0xef   : > { %v1916_v55 = vrot.slane %v1902_v43, %v11787_v28  ;;  %v1917_v12 = vcombine.high %v1909_v48, %v1909_v48  ;;  %v11886_v13 = vrot.slane %v1909_v48, %v11787_v28  ;;  %v11888_v15 = vpop.f32.mrb[1].mxu1  ;;  %v1951_v48 = vcombine.high %v396_v5, %v396_v5 }
  0xf0   : > { %v1818_v62 = vrot.slane %v1804_v50, %v11787_v28  ;;  %v1819_v21 = vcombine.high %v1811_v56, %v1811_v56  ;;  %v11900_v23 = vpop.f32.mrb[2].mxu1  ;;  %v1827_v34 = vrot.slane %v1811_v56, %v11787_v28  ;;  %v1853_v50 = vcombine.high %v388_v6, %v388_v6 }
  0xf1   : > { %v1918_v20 = vcombine.high %v1916_v55, %v1916_v55  ;;  %v11910_v43 = vpop.f32.mrb[3].mxu1  ;;  %v1860_v17 = vrot.slane %v388_v6, %v11787_v28  ;;  %v11918_v16 = vrot.slane %v1916_v55, %v11787_v28  ;;  %v11921_v56 = vrot.slane %v1917_v12, %v11787_v28  ;;  %v11931_v6 = vld [vmem:[%s16414_s4] ss:$0 sm:$0xff] }
  0xf2   : > { %v10377_v14 = vpop.f32.mrb[4].mxu0  ;;  %v1820_v33 = vcombine.high %v1818_v62, %v1818_v62  ;;  %v11908_v38 = vrot.slane %v1818_v62, %v11787_v28  ;;  %v11926_v9 = vrot.slane %v396_v5, %v11787_v28  ;;  %v11938_v55 = vrot.slane %v11886_v13, %v11829_v49 }
  0xf3   : > { %v538_v22 = vpop.f32.mrb[5].mxu0  ;;  %v11934_v44 = vrot.slane %v1918_v20, %v11787_v28  ;;  %v1841_v12 = vrot.slane %v1819_v21, %v11787_v28  ;;  %v1867_v27 = vrot.slane %v1853_v50, %v11787_v28  ;;  %v1849_v5 = vcombine.high %v1827_v34, %v1827_v34 }
  0xf4   : > { %v10378_v39 = vpop.f32.mrb[6].mxu0  ;;  %16653 = vst [vmem:[#allocation10_spill] sm:$0xff] %v11938_v55  ;;  %v1848_v8 = vrot.slane %v1820_v33, %v11787_v28  ;;  %v1850_v62 = vcombine.high %v11908_v38, %v11908_v38  ;;  %v1868_v1 = vcombine.high %v1860_v17, %v1860_v17  ;;  %v11946_v0 = vrot.slane %v1827_v34, %v11829_v49 }
  0xf5   : > { %v541_v24 = vpop.f32.mrb[7].mxu0  ;;  %v1869_v20 = vcombine.high %v1867_v27, %v1867_v27  ;;  %v547_v63 = vadd.f32 %v10377_v14, %v11931_v6  ;;  %v550_v58 = vadd.f32 %v10378_v39, %v11931_v6  ;;  %v11953_v21 = vrot.slane %v1951_v48, %v11787_v28 }
  0xf6   : > { %16654 = vst [vmem:[#allocation11_spill] sm:$0xff] %v11946_v0  ;;  %v11950_v57 = vpop.f32.mrb[4].mxu1  ;;  %v1890_v33 = vrot.slane %v1868_v1, %v11787_v28  ;;  %v539_v50 = vadd.f32 %v11931_v6, %v538_v22  ;;  %v542_v51 = vadd.f32 %v11931_v6, %v541_v24  ;;  %v1876_v34 = vrot.slane %v1860_v17, %v11787_v28 }
  0xf7   : > { %v11958_v19 = vpop.f32.mrb[5].mxu1  ;;  %v11962_v14 = vrot.slane %v1867_v27, %v11787_v28  ;;  %v674_v39 = vpack.c.bf16 %v550_v58, %v547_v63  ;;  %v11965_v10 = vrot.slane %v1841_v12, %v11829_v49  ;;  %v11970_v1 = vrot.slane %v1869_v20, %v11787_v28 }
  0xf8   : > { %v11967_v11 = vpop.f32.mrb[6].mxu1  ;;  %v1900_v22 = vcombine.high %v1890_v33, %v1890_v33  ;;  %v673_v24 = vpack.c.bf16 %v542_v51, %v539_v50  ;;  %v1851_v3 = vcombine.high %v1841_v12, %v1841_v12  ;;  %v11979_v58 = vrot.slane %v1849_v5, %v11829_v49 }
  0xf9   : > { %16655 = vst [vmem:[#allocation12_spill] sm:$0xff] %v11965_v10  ;;  %v11972_v61 = vpop.f32.mrb[7].mxu1  ;;  %v11976_v17 = vpack.i.bf16 %v11965_v10, %v11946_v0  ;;  %v1852_v27 = vcombine.high %v1848_v8, %v1848_v8  ;;  %v1898_v10 = vcombine.high %v1876_v34, %v1876_v34 }
  0xfa   : > { %v10381_v18 = vpop.f32.mrb[8].mxu0  ;;  %16656 = vst [vmem:[#allocation13_spill] sm:$0xff] %v11979_v58  ;;  %v11983_v20 = vrot.slane %v1851_v3, %v11829_v49  ;;  %10415 = vmatprep.mubr.msk.bf16.mxu0 %vm713_vm2, %v673_v24  ;;  %v16661_v24 = vpack.c.bf16 %v11785_v26, %v11782_v25  ;;  %v12026_v25 = vrot.slane %v11926_v9, %v11787_v28 }
  0xfb   : > { %v554_v48 = vpop.f32.mrb[9].mxu0  ;;  %v563_v63 = vadd.f32 %v10381_v18, %v11931_v6  ;;  %10734 = vrot.lane.b32.xlu0 %v11976_v17, %s11491_s8  ;;  %10416 = vmatmul.mubr.msk.bf16.vlgmr.msra.gmra.mrb[20].mxu0 %vm713_vm2, %v674_v39  ;;  %v11993_v18 = vrot.slane %v1850_v62, %v11829_v49  ;;  %v11996_v3 = vrot.slane %v1852_v27, %v11829_v49 }
  0xfc   : > { %v10382_v4 = vpop.f32.mrb[10].mxu0  ;;  %16657 = vst [vmem:[#allocation14_spill] sm:$0xff] %v11983_v20  ;;  %v555_v51 = vadd.f32 %v11931_v6, %v554_v48  ;;  %v12000_v5 = vpack.i.bf16 %v11983_v20, %v11979_v58  ;;  %10012 = vmatpush3.bf16.msra.mxu0 %v16661_v24  ;;  %v1966_v39 = vcombine.high %v11926_v9, %v11926_v9 }
  0xfd   : > { %v557_v2 = vpop.f32.mrb[11].mxu0  ;;  %v566_v12 = vadd.f32 %v10382_v4, %v11931_v6  ;;  %16658 = vst [vmem:[#allocation15_spill] sm:$0xff] %v11993_v18  ;;  %16659 = vst [vmem:[#allocation16_spill] sm:$0xff] %v11996_v3  ;;  %v12014_v27 = vpack.i.bf16 %v11996_v3, %v11993_v18  ;;  %v12032_v26 = vrot.slane %v11908_v38, %v11829_v49 }
  0xfe   : > { %v558_v50 = vadd.f32 %v11931_v6, %v557_v2  ;;  %v12003_v2 = vrot.slane %v1848_v8, %v11829_v49  ;;  %v16663_v8 = vpack.c.bf16 %v11793_v30, %v11790_v29  ;;  %10739 = vrot.lane.b32.xlu1 %v12000_v5, %s11491_s8  ;;  %v1949_v29 = vcombine.high %v11921_v56, %v11921_v56 }
  0xff   : > { %v676_v4 = vpack.c.bf16 %v566_v12, %v563_v63  ;;  %v12017_v63 = vrot.slane %v1900_v22, %v11829_v49  ;;  %16664 = vst [vmem:[#allocation19_spill] sm:$0xff] %v12032_v26  ;;  %v1901_v22 = vcombine.high %v11970_v1, %v11970_v1  ;;  %v1899_v30 = vcombine.high %v11962_v14, %v11962_v14 }
 0x100   : > { %v675_v48 = vpack.c.bf16 %v558_v50, %v555_v51  ;;  %16660 = vst [vmem:[#allocation17_spill] sm:$0xff] %v12003_v2  ;;  %v12019_v51 = vpop.f32.mrb[8].mxu1  ;;  %10013 = vmatprep.subr.bf16.mxu0 %v16663_v8  ;;  %10749 = vrot.lane.b32.xlu0 %v12014_v27, %s11491_s8  ;;  %v12046_v9 = vrot.slane %v1898_v10, %v11829_v49 }
 0x101   : > { %16662 = vst [vmem:[#allocation18_spill] sm:$0xff] %v12017_v63  ;;  %v12037_v50 = vpop.f32.mrb[9].mxu1  ;;  %v12049_v38 = vrot.slane %v1890_v33, %v11829_v49  ;;  %v1967_v8 = vcombine.high %v11953_v21, %v11953_v21  ;;  %v12057_v62 = vrot.slane %v11953_v21, %v11787_v28  ;;  %v12060_v3 = vrot.slane %v1876_v34, %v11829_v49 }
 0x102   : > { %v10385_v12 = vpop.f32.mrb[12].mxu0  ;;  %10419 = vmatprep.mubr.msk.bf16.mxu0 %vm713_vm2, %v675_v48  ;;  %16665 = vst [vmem:[#allocation20_spill] sm:$0xff] %v12046_v9  ;;  %v12051_v24 = vpop.f32.mrb[10].mxu1  ;;  %v12064_v10 = vpack.i.bf16 %v12003_v2, %v12032_v26  ;;  %v16668_v33 = vpack.c.bf16 %v11799_v32, %v11796_v31  ;;  %v12073_v58 = vpack.i.bf16 %v12017_v63, %v12046_v9  ;;  %v11448_v63 = vld [vmem:[%s11574_s18 + $0x18] sm:$0xff] }
 0x103   : > { %16666 = vst [vmem:[#allocation21_spill] sm:$0xff] %v12049_v38  ;;  %v570_v48 = vpop.f32.mrb[13].mxu0  ;;  %16667 = vst [vmem:[#allocation22_spill] sm:$0xff] %v12060_v3  ;;  %v12069_v20 = vpop.f32.mrb[11].mxu1  ;;  %v579_v21 = vadd.f32 %v10385_v12, %v11931_v6  ;;  %v12077_v34 = vrot.slane %v1901_v22, %v11829_v49  ;;  %v16670_v26 = vpack.c.bf16 %v11805_v36, %v11802_v35  ;;  %10420 = vmatmul.mubr.msk.bf16.gmra.mrb[24].mxu0 %vm713_vm2, %v676_v4 }
 0x104   : > { %v10386_v18 = vpop.f32.mrb[14].mxu0  ;;  %10014 = vmatpush3.bf16.msra.mxu0 %v16668_v33  ;;  %v12084_v31 = vrot.slane %v1966_v39, %v11787_v28  ;;  %10744 = vrot.lane.b32.xlu1 %v12064_v10, %s11491_s8  ;;  %v571_v12 = vadd.f32 %v11931_v6, %v570_v48  ;;  %v12096_v35 = vpack.i.bf16 %v12049_v38, %v12060_v3 }
 0x105   : > { %16669 = vst [vmem:[#allocation23_spill] sm:$0xff] %v12077_v34  ;;  %v582_v0 = vadd.f32 %v10386_v18, %v11931_v6  ;;  %v573_v2 = vpop.f32.mrb[15].mxu0  ;;  %10015 = vmatprep.subr.bf16.mxu0 %v16670_v26  ;;  %10759 = vrot.lane.b32.xlu0 %v12073_v58, %s11491_s8  ;;  %v12100_v36 = vrot.slane %v1899_v30, %v11829_v49 }
 0x106   : > { %v574_v22 = vadd.f32 %v11931_v6, %v573_v2  ;;  %v12104_v26 = vrot.slane %v11970_v1, %v11829_v49  ;;  %v12107_v2 = vrot.slane %v1949_v29, %v11829_v49  ;;  %v12111_v48 = vadd.f32 %v11873_v7, %v11931_v6  ;;  %v10405_v7 = vpop.f32.mrb[12].mxu1 }
 0x107   : > { %16671 = vst [vmem:[#allocation24_spill] sm:$0xff] %v12100_v36  ;;  %v678_v18 = vpack.c.bf16 %v582_v0, %v579_v21  ;;  %v16674_v33 = vpack.c.bf16 %v11811_v40, %v11808_v37  ;;  %v12118_v4 = vpack.i.bf16 %v12077_v34, %v12100_v36  ;;  %v12122_v0 = vrot.slane %v11962_v14, %v11829_v49 }
 0x108   : > { %v677_v39 = vpack.c.bf16 %v574_v22, %v571_v12  ;;  %16672 = vst [vmem:[#allocation25_spill] sm:$0xff] %v12104_v26  ;;  %16673 = vst [vmem:[#allocation26_spill] sm:$0xff] %v12107_v2  ;;  %v1950_v1 = vcombine.high %v11934_v44, %v11934_v44  ;;  %v12128_v29 = vadd.f32 %v11931_v6, %v11888_v15  ;;  %10754 = vrot.lane.b32.xlu1 %v12096_v35, %s11491_s8 }
 0x109   : > { %10016 = vmatpush3.bf16.msra.mxu0 %v16674_v33  ;;  %16675 = vst [vmem:[#allocation27_spill] sm:$0xff] %v12122_v0  ;;  %v16676_v37 = vpack.c.bf16 %v11817_v42, %v11814_v41  ;;  %v16677_v40 = vcombine.high %v11886_v13, %v11886_v13  ;;  %v12143_v30 = vrot.slane %v11921_v56, %v11829_v49  ;;  %v650_v42 = vpop.f32.mrb[13].mxu1 }
 0x10a   : > { %v10389_v15 = vpop.f32.mrb[16].mxu0  ;;  %10423 = vmatprep.mubr.msk.bf16.mxu0 %vm713_vm2, %v677_v39  ;;  %v12148_v41 = vadd.f32 %v11900_v23, %v11931_v6  ;;  %v12151_v21 = vrot.slane %v1967_v8, %v11787_v28  ;;  %v1998_v12 = vcombine.high %v12084_v31, %v12084_v31  ;;  %10769 = vrot.lane.b32.xlu0 %v12118_v4, %s11491_s8  ;;  %v10406_v23 = vpop.f32.mrb[14].mxu1 }
 0x10b   : > { %10017 = vmatprep.subr.bf16.mxu0 %v16676_v37  ;;  %v12139_v14 = vrot.slane %v16677_v40, %v11829_v49  ;;  %16679 = vst [vmem:[#allocation29_spill] sm:$0xff] %v12143_v30  ;;  %v586_v56 = vpop.f32.mrb[17].mxu0  ;;  %v12161_v22 = vadd.f32 %v11931_v6, %v11910_v43  ;;  %v12165_v39 = vpack.i.bf16 %v12104_v26, %v12122_v0  ;;  %v653_v13 = vpop.f32.mrb[15].mxu1 }
 0x10c   : > { %v16680_v8 = vcombine.high %v11918_v16, %v11918_v16  ;;  %v10390_v37 = vpop.f32.mrb[18].mxu0  ;;  %v682_v43 = vpack.c.bf16 %v12148_v41, %v12111_v48  ;;  %v16682_v40 = vpack.c.bf16 %v11823_v46, %v11820_v45  ;;  %v595_v32 = vadd.f32 %v10389_v15, %v11931_v6  ;;  %10424 = vmatmul.mubr.msk.bf16.gmra.mrb[28].mxu0 %vm713_vm2, %v678_v18  ;;  %v10957_v48 = vld [vmem:[%s16415_s5 + $0x68] ss:$16 sps:$4 sm:$0xff]  }
 0x10d   : > { %16678 = vst [vmem:[#allocation28_spill] sm:$0xff] %v12139_v14  ;;  %v12169_v28 = vpack.i.bf16 %v12107_v2, %v12139_v14  ;;  %v12184_v2 = vrot.slane %v1950_v1, %v11829_v49  ;;  %v598_v14 = vadd.f32 %v10390_v37, %v11931_v6  ;;  %v589_v34 = vpop.f32.mrb[19].mxu0  ;;  %v16684_v36 = vpack.c.bf16 %v11834_v52, %v11826_v47  ;;  %v10960_v41 = vld [vmem:[%s16415_s5 + $0x88] ss:$16 sps:$4 sm:$0xff]  }
 0x10e   : > { %v12175_v33 = vrot.slane %v16680_v8, %v11829_v49  ;;  %10018 = vmatpush3.bf16.msra.mxu0 %v16682_v40  ;;  %v681_v8 = vpack.c.bf16 %v12161_v22, %v12128_v29  ;;  %10764 = vrot.lane.b32.xlu1 %v12165_v39, %s11491_s8  ;;  %v12196_v45 = vpack.i.bf16 %v12143_v30, %v11938_v55 }
 0x10f   : > { %16683 = vst [vmem:[#allocation31_spill] sm:$0xff] %v12184_v2  ;;  %10019 = vmatprep.subr.bf16.mxu0 %v16684_v36  ;;  %v587_v46 = vadd.f32 %v11931_v6, %v586_v56  ;;  %v590_v1 = vadd.f32 %v11931_v6, %v589_v34  ;;  %v12202_v15 = vadd.f32 %v11950_v57, %v11931_v6 }
 0x110   : > { %16681 = vst [vmem:[#allocation30_spill] sm:$0xff] %v12175_v33  ;;  %10779 = vrot.lane.b32.xlu0 %v12169_v28, %s11491_s8  ;;  %v680_v47 = vpack.c.bf16 %v598_v14, %v595_v32  ;;  %v12209_v52 = vrot.slane %v11934_v44, %v11829_v49  ;;  %v619_v36 = vadd.f32 %v11931_v6, %v11958_v19 }
 0x111   : > { %v679_v29 = vpack.c.bf16 %v590_v1, %v587_v46  ;;  %v12214_v34 = vrot.slane %v1998_v12, %v11829_v49  ;;  %v1999_v57 = vcombine.high %v12151_v21, %v12151_v21  ;;  %v630_v56 = vadd.f32 %v11967_v11, %v11931_v6  ;;  %v16694_v46 = vld [vmem:[#allocation3_spill] sm:$0xff]  ;;  %v16695_v1 = vld [vmem:[#allocation2_spill] sm:$0xff] }
 0x112   : > { %16685 = vst [vmem:[#allocation32_spill] sm:$0xff] %v12209_v52  ;;  %v16687_v32 = vpack.c.bf16 %v11840_v54, %v11837_v53  ;;  %v12225_v44 = vpack.i.bf16 %v12184_v2, %v12175_v33  ;;  %v12229_v19 = vrot.slane %v11918_v16, %v11829_v49  ;;  %v622_v18 = vadd.f32 %v11931_v6, %v11972_v61 }
 0x113   : > { %16686 = vst [vmem:[#allocation33_spill] sm:$0xff] %v12214_v34  ;;  %v643_v14 = vadd.f32 %v12019_v51, %v11931_v6  ;;  %v16689_v11 = vpack.c.bf16 %v11852_v60, %v11849_v59  ;;  %10774 = vrot.lane.b32.xlu1 %v12196_v45, %s11491_s8  ;;  %v16690_v53 = vcombine.high %v12026_v25, %v12026_v25 }
 0x114   : > { %10020 = vmatpush3.bf16.msra.mxu0 %v16687_v32  ;;  %16688 = vst [vmem:[#allocation34_spill] sm:$0xff] %v12229_v19  ;;  %10427 = vmatprep.mubr.msk.bf16.mxu0 %vm713_vm2, %v679_v29  ;;  %v684_v61 = vpack.c.bf16 %v630_v56, %v12202_v15  ;;  %v635_v16 = vadd.f32 %v11931_v6, %v12037_v50 }
 0x115   : > { %10021 = vmatprep.subr.bf16.mxu0 %v16689_v11  ;;  %v12244_v54 = vrot.slane %v16690_v53, %v11829_v49  ;;  %10789 = vrot.lane.b32.xlu0 %v12225_v44, %s11491_s8  ;;  %v10783_v59 = vpack.i.bf16 %v12209_v52, %v12229_v19  ;;  %v683_v60 = vpack.c.bf16 %v622_v18, %v619_v36  ;;  %v1103_v36 = vld [vmem:[%s11596_s22 + $0x178] sm:$0xff]  ;;  %v11447_v19 = vld [vmem:[%s11574_s18] sm:$0xff] }
 0x116   : > { %v646_v51 = vadd.f32 %v12051_v24, %v11931_v6  ;;  %v638_v12 = vadd.f32 %v11931_v6, %v12069_v20  ;;  %v12262_v37 = vrot.slane %v12084_v31, %v11829_v49  ;;  %v12265_v50 = vrot.slane %v1999_v57, %v11829_v49  ;;  %v1102_v24 = vld [vmem:[%s11596_s22 + $0x170] sm:$0xff]  ;;  %v16697_v18 = vld [vmem:[#allocation5_spill] sm:$0xff]  ;;  %10428 = vmatmul.mubr.msk.bf16.gmra.mrb[32].mxu0 %vm713_vm2, %v680_v47  ;;  %v16705_v47 = vld [vmem:[#allocation6_spill] sm:$0xff]  ;;  %s11492_s22 = smov 100  }
 0x117   : > { %16691 = vst [vmem:[#allocation35_spill] sm:$0xff] %v12244_v54  ;;  %v10798_v22 = vpack.i.bf16 %v12214_v34, %v12244_v54  ;;  %v659_v40 = vadd.f32 %v10405_v7, %v11931_v6  ;;  %v16696_v15 = vpack.c.bf16 %v16694_v46, %v16695_v1  ;;  %v651_v56 = vadd.f32 %v11931_v6, %v650_v42  ;;  %v16698_v31 = vld [vmem:[#allocation4_spill] sm:$0xff]  ;;  %v16707_v46 = vld [vmem:[#allocation9_spill] sm:$0xff] }
 0x118   : > { %16692 = vst [vmem:[#allocation36_spill] sm:$0xff] %v12262_v37  ;;  %16693 = vst [vmem:[#allocation37_spill] sm:$0xff] %v12265_v50  ;;  %v686_v29 = vpack.c.bf16 %v646_v51, %v643_v14  ;;  %v685_v20 = vpack.c.bf16 %v638_v12, %v635_v16  ;;  %v662_v32 = vadd.f32 %v10406_v23, %v11931_v6  ;;  %10784 = vrot.lane.b32.xlu1 %v10783_v59, %s11491_s8 }
 0x119   : > { %10022 = vmatpush3.bf16.msra.mxu0 %v16696_v15  ;;  %v16699_v11 = vpack.c.bf16 %v16697_v18, %v16698_v31  ;;  %v12280_v57 = vrot.slane %v12026_v25, %v11829_v49  ;;  %v654_v7 = vadd.f32 %v11931_v6, %v653_v13  ;;  %10799 = vrot.lane.b32.xlu0 %v10798_v22, %s11491_s8  ;;  %v16704_v13 = vld [vmem:[#allocation7_spill] sm:$0xff] }
 0x11a   : > { %v16701_v42 = vcombine.high %v12057_v62, %v12057_v62  ;;  %v688_v14 = vpack.c.bf16 %v662_v32, %v659_v40  ;;  %v1143_v53 = vpack.c.bf16 %v1103_v36, %v1102_v24  ;;  %v12296_v16 = vrot.slane %v12151_v21, %v11829_v49  ;;  %10431 = vmatprep.mubr.msk.bf16.mxu0 %vm713_vm2, %v681_v8  ;;  %v16708_v40 = vld [vmem:[#allocation8_spill] sm:$0xff]  ;;  %v10967_v31 = vld [vmem:[%s16415_s5 + $0xec] ss:$16 sps:$4 sm:$0xff]  }
 0x11b   : > { %10023 = vmatprep.subr.bf16.mxu0 %v16699_v11  ;;  %16700 = vst [vmem:[#allocation3_spill] sm:$0xff] %v12280_v57  ;;  %v10793_v25 = vpack.i.bf16 %v12262_v37, %v12280_v57  ;;  %v687_v6 = vpack.c.bf16 %v654_v7, %v651_v56  ;;  %v16706_v51 = vpack.c.bf16 %v16704_v13, %v16705_v47  ;;  %v10966_v56 = vld [vmem:[%s16415_s5 + $0xc8] ss:$16 sps:$4 sm:$0xff]   ;;  %v11446_v57 = vld [vmem:[%s11574_s18 + $0x10] sm:$0xff] }
 0x11c   : > { %v12290_v23 = vrot.slane %v16701_v42, %v11829_v49  ;;  %16703 = vst [vmem:[#allocation5_spill] sm:$0xff] %v12296_v16  ;;  %v16709_v1 = vpack.c.bf16 %v16707_v46, %v16708_v40  ;;  %v12310_v21 = vrot.slane %v12057_v62, %v11829_v49  ;;  %v10944_v49 = vld [vmem:[%s16415_s5 + $0xc] ss:$16 sps:$4 sm:$0xff]   ;;  %v10951_v62 = vld [vmem:[%s16415_s5 + $0x28] ss:$16 sps:$4 sm:$0xff]  }
 0x11d   : > { %10024 = vmatpush3.bf16.msra.mxu0 %v16706_v51  ;;  %10794 = vrot.lane.b32.xlu1 %v10793_v25, %s11491_s8 }
 0x11e   : > { %16702 = vst [vmem:[#allocation2_spill] sm:$0xff] %v12290_v23  ;;  %v10808_v12 = vpack.i.bf16 %v12265_v50, %v12290_v23  ;;  %10025 = vmatprep.subr.bf16.mxu0 %v16709_v1  ;;  %16710 = vst [vmem:[#allocation4_spill] sm:$0xff] %v12310_v21  ;;  %v10803_v8 = vpack.i.bf16 %v12296_v16, %v12310_v21  ;;  %10432 = vmatmul.mubr.msk.bf16.gmra.mrb[36].mxu0 %vm713_vm2, %v682_v43  ;;  %v10963_v43 = vld [vmem:[%s16415_s5 + $0xa8] ss:$16 sps:$4 sm:$0xff]   ;;  %v10970_v1 = vld [vmem:[%s16415_s5 + $0x10c] ss:$16 sps:$4 sm:$0xff]  }
 0x11f   : > { %10435 = vmatprep.mubr.msk.bf16.mxu0 %vm713_vm2, %v683_v60 }
 0x120   : > { %10809 = vrot.lane.b32.xlu0 %v10808_v12, %s11491_s8 }
 0x121   : > { %10026 = vmatpush3.bf16.msra.mxu0 %v1143_v53  ;;  %10804 = vrot.lane.b32.xlu1 %v10803_v8, %s11491_s8 }
 0x124   : > { %10819 = vrot.lane.b32.xlu0 %v12000_v5, %s11492_s22  ;;  %v10948_v5 = vld [vmem:[%s16415_s5 + $0x2c] ss:$16 sps:$4 sm:$0xff]  }
 0x125   : > { %10814 = vrot.lane.b32.xlu1 %v11976_v17, %s11492_s22  ;;  %v10994_v17 = vld [vmem:[%s16413_s3 + $0x30] sm:$0xff]  }
 0x126   : > { %10436 = vmatmul.mubr.msk.bf16.gmra.mrb[40].mxu0 %vm713_vm2, %v684_v61  ;;  %10447 = vmatprep.subr.bf16.mxu1 %v10994_v17 }
 0x127   : > { %10439 = vmatprep.mubr.msk.bf16.mxu0 %vm713_vm2, %v685_v20  ;;  %10448 = vmatpush3.bf16.msra.mxu1 %v10994_v17 }
 0x128   : > { %10829 = vrot.lane.b32.xlu0 %v12014_v27, %s11492_s22  ;;  %v10952_v27 = vld [vmem:[%s16415_s5 + $0x4c] ss:$16 sps:$4 sm:$0xff]  }
 0x129   : > { %10824 = vrot.lane.b32.xlu1 %v12064_v10, %s11492_s22  ;;  %v10954_v10 = vld [vmem:[%s16415_s5 + $0x48] ss:$16 sps:$4 sm:$0xff]  }
 0x12c   : > { %10839 = vrot.lane.b32.xlu0 %v12073_v58, %s11492_s22  ;;  %v10942_v58 = vld [vmem:[%s16415_s5 + $0x8] ss:$16 sps:$4 sm:$0xff]  }
 0x12d   : > { %10834 = vrot.lane.b32.xlu1 %v12096_v35, %s11492_s22  ;;  %v10955_v35 = vld [vmem:[%s16415_s5 + $0x6c] ss:$16 sps:$4 sm:$0xff]  }
 0x12e   : > { %10440 = vmatmul.mubr.msk.bf16.gmra.mrb[44].mxu0 %vm713_vm2, %v686_v29 }
 0x12f   : > { %10443 = vmatprep.mubr.msk.bf16.mxu0 %vm713_vm2, %v687_v6 }
 0x130   : > { %10849 = vrot.lane.b32.xlu0 %v12118_v4, %s11492_s22  ;;  %v10958_v4 = vld [vmem:[%s16415_s5 + $0x8c] ss:$16 sps:$4 sm:$0xff]  }
 0x131   : > { %10844 = vrot.lane.b32.xlu1 %v12165_v39, %s11492_s22  ;;  %v10961_v39 = vld [vmem:[%s16415_s5 + $0xac] ss:$16 sps:$4 sm:$0xff]  }
 0x134   : > { %10859 = vrot.lane.b32.xlu0 %v12169_v28, %s11492_s22  ;;  %v9915_v28 = vpop.f32.mrb[16].mxu1 }
 0x135   : > { %10854 = vrot.lane.b32.xlu1 %v12196_v45, %s11492_s22  ;;  %v9916_v45 = vpop.f32.mrb[17].mxu1 }
 0x136   : > { %10444 = vmatmul.mubr.msk.bf16.gmra.mrb[48].mxu0 %vm713_vm2, %v688_v14  ;;  %v12395_v61 = vadd.f32 %v9916_v45, %v9915_v28 }
 0x137   : > { %1671 = vmatprep.mubr.bf16.mxu0 %v10944_v49 }
 0x138   : > { %10869 = vrot.lane.b32.xlu0 %v12225_v44, %s11492_s22  ;;  %v10964_v44 = vld [vmem:[%s16415_s5 + $0xcc] ss:$16 sps:$4 sm:$0xff]  }
 0x139   : > { %10864 = vrot.lane.b32.xlu1 %v10783_v59, %s11492_s22  ;;  %v9918_v59 = vpop.f32.mrb[18].mxu1 }
 0x13a   : > { %v9919_v60 = vpop.f32.mrb[19].mxu1 }
 0x13b   : > { %v9921_v15 = vpop.f32.mrb[20].mxu1 }
 0x13c   : > { %10879 = vrot.lane.b32.xlu0 %v10798_v22, %s11492_s22  ;;  %v12397_v22 = vadd.f32 %v9919_v60, %v9918_v59  ;;  %v9922_v24 = vpop.f32.mrb[21].mxu1 }
 0x13d   : > { %10874 = vrot.lane.b32.xlu1 %v10793_v25, %s11492_s22  ;;  %v12399_v36 = vadd.f32 %v9922_v24, %v9921_v15  ;;  %v9924_v29 = vpop.f32.mrb[22].mxu1 }
 0x13e   : > { %1672 = vmatmul.mubr.bf16.vlgmr.msra.gmra.mrb[52].mxu0 %v10942_v58  ;;  %v9925_v20 = vpop.f32.mrb[23].mxu1 }
 0x13f   : > { %1679 = vmatprep.mubr.bf16.mxu0 %v10948_v5  ;;  %v12404_v32 = vadd.f32 %v9925_v20, %v9924_v29  ;;  %v9927_v18 = vpop.f32.mrb[24].mxu1 }
 0x140   : > { %10889 = vrot.lane.b32.xlu0 %v10808_v12, %s11492_s22  ;;  %v9928_v11 = vpop.f32.mrb[25].mxu1  ;;  %v10969_v12 = vld [vmem:[%s16415_s5 + $0xe8] ss:$16 sps:$4 sm:$0xff]  }
 0x141   : > { %10884 = vrot.lane.b32.xlu1 %v10803_v8, %s11492_s22  ;;  %v12409_v7 = vadd.f32 %v9928_v11, %v9927_v18  ;;  %v9930_v42 = vpop.f32.mrb[26].mxu1 }
 0x142   : > { %v9931_v14 = vpop.f32.mrb[27].mxu1 }
 0x143   : > { %v12411_v53 = vadd.f32 %v9931_v14, %v9930_v42  ;;  %v9933_v25 = vpop.f32.mrb[28].mxu1  ;;  %v10976_v14 = vld [vmem:[%s16415_s5 + $0x14c] ss:$16 sps:$4 sm:$0xff]  }
 0x144   : > { %v9934_v6 = vpop.f32.mrb[29].mxu1 }
 0x145   : > { %v12413_v13 = vadd.f32 %v9934_v6, %v9933_v25  ;;  %v9936_v47 = vpop.f32.mrb[30].mxu1 }
 0x146   : > { %1680 = vmatmul.mubr.bf16.gmra.mrb[56].mxu0 %v10951_v62  ;;  %v9937_v51 = vpop.f32.mrb[31].mxu1 }
 0x147   : > { %1687 = vmatprep.mubr.bf16.mxu0 %v10952_v27  ;;  %v12418_v46 = vadd.f32 %v9937_v51, %v9936_v47  ;;  %v9939_v40 = vpop.f32.mrb[32].mxu1  ;;  %v10995_v27 = vld [vmem:[%s16413_s3 + $0x38] sm:$0xff]  }
 0x148   : > { %v9940_v8 = vpop.f32.mrb[33].mxu1  ;;  %10449 = vmatprep.subr.bf16.mxu1 %v10995_v27 }
 0x149   : > { %v12423_v49 = vadd.f32 %v9940_v8, %v9939_v40  ;;  %v9942_v17 = vpop.f32.mrb[34].mxu1  ;;  %10450 = vmatpush3.bf16.msra.mxu1 %v10995_v27 }
 0x14a   : > { %v9943_v58 = vpop.f32.mrb[35].mxu1 }
 0x14b   : > { %v12425_v5 = vadd.f32 %v9943_v58, %v9942_v17  ;;  %v9945_v62 = vpop.f32.mrb[36].mxu1 }
 0x14e   : > { %1688 = vmatmul.mubr.bf16.gmra.mrb[60].mxu0 %v10954_v10  ;;  %v9946_v10 = vpop.f32.mrb[37].mxu1 }
 0x14f   : > { %1695 = vmatprep.mubr.bf16.mxu0 %v10955_v35  ;;  %v12430_v35 = vadd.f32 %v9946_v10, %v9945_v62  ;;  %v10978_v62 = vld [vmem:[%s16415_s5 + $0x148] ss:$16 sps:$4 sm:$0xff]  }
 0x156   : > { %1696 = vmatmul.mubr.bf16.gmra.mrb[64].mxu0 %v10957_v48  ;;  %v9948_v48 = vpop.f32.mrb[38].mxu1 }
 0x157   : > { %1703 = vmatprep.mubr.bf16.mxu0 %v10958_v4  ;;  %v9949_v4 = vpop.f32.mrb[39].mxu1 }
 0x158   : > { %v9951_v28 = vpop.f32.mrb[40].mxu1 }
 0x159   : > { %v9952_v45 = vpop.f32.mrb[41].mxu1 }
 0x15a   : > { %v9954_v59 = vpop.f32.mrb[42].mxu1 }
 0x15b   : > { %v9955_v60 = vpop.f32.mrb[43].mxu1 }
 0x15c   : > { %v12442_v15 = vadd.f32 %v9955_v60, %v9954_v59  ;;  %v9957_v24 = vpop.f32.mrb[44].mxu1 }
 0x15d   : > { %v9958_v29 = vpop.f32.mrb[45].mxu1 }
 0x15e   : > { %1704 = vmatmul.mubr.bf16.gmra.mrb[68].mxu0 %v10960_v41  ;;  %v10972_v41 = vld [vmem:[%s16415_s5 + $0x108] ss:$16 sps:$4 sm:$0xff]   ;;  %v12444_v20 = vadd.f32 %v9958_v29, %v9957_v24 }
 0x15f   : > { %1711 = vmatprep.mubr.bf16.mxu0 %v10961_v39  ;;  %v12435_v39 = vadd.f32 %v9949_v4, %v9948_v48  ;;  %v10979_v48 = vld [vmem:[%s16415_s5 + $0x16c] ss:$16 sps:$4 sm:$0xff]  }
 0x166   : > { %1712 = vmatmul.mubr.bf16.gmra.mrb[72].mxu0 %v10963_v43  ;;  %v10973_v43 = vld [vmem:[%s16415_s5 + $0x12c] ss:$16 sps:$4 sm:$0xff]  }
 0x167   : > { %1719 = vmatprep.mubr.bf16.mxu0 %v10964_v44  ;;  %v12440_v44 = vadd.f32 %v9952_v45, %v9951_v28 }
 0x16e   : > { %1720 = vmatmul.mubr.bf16.gmra.mrb[76].mxu0 %v10966_v56  ;;  %v9960_v56 = vpop.f32.mrb[46].mxu1 }
 0x16f   : > { %1727 = vmatprep.mubr.bf16.mxu0 %v10967_v31  ;;  %v9961_v18 = vpop.f32.mrb[47].mxu1  ;;  %v10975_v31 = vld [vmem:[%s16415_s5 + $0x128] ss:$16 sps:$4 sm:$0xff]  }
 0x170   : > { %v12449_v11 = vadd.f32 %v9961_v18, %v9960_v56  ;;  %v9963_v42 = vpop.f32.mrb[48].mxu1  ;;  %v10981_v18 = vld [vmem:[%s16415_s5 + $0x168] ss:$16 sps:$4 sm:$0xff]  }
 0x171   : > { %v9964_v25 = vpop.f32.mrb[49].mxu1 }
 0x172   : > { %v12454_v6 = vadd.f32 %v9964_v25, %v9963_v42  ;;  %v9966_v47 = vpop.f32.mrb[50].mxu1 }
 0x173   : > { %v9967_v51 = vpop.f32.mrb[51].mxu1 }
 0x174   : > { %v9969_v40 = vpop.f32.mrb[52].mxu1 }
 0x176   : > { %1728 = vmatmul.mubr.bf16.gmra.mrb[80].mxu0 %v10969_v12  ;;  %v12456_v12 = vadd.f32 %v9967_v51, %v9966_v47 }
 0x177   : > { %1735 = vmatprep.mubr.bf16.mxu0 %v10970_v1  ;;  %v9970_v1 = vpop.f32.mrb[53].mxu1 }
 0x178   : > { %v12458_v8 = vadd.f32 %v9970_v1, %v9969_v40  ;;  %v9972_v17 = vpop.f32.mrb[54].mxu1 }
 0x179   : > { %v9973_v58 = vpop.f32.mrb[55].mxu1 }
 0x17a   : > { %v12463_v27 = vadd.f32 %v9973_v58, %v9972_v17  ;;  %v9975_v10 = vpop.f32.mrb[56].mxu1 }
 0x17b   : > { %v9976_v4 = vpop.f32.mrb[57].mxu1 }
 0x17c   : > { %v9978_v28 = vpop.f32.mrb[58].mxu1 }
 0x17e   : > { %1736 = vmatmul.mubr.bf16.gmra.mrb[84].mxu0 %v10972_v41  ;;  %v12468_v41 = vadd.f32 %v9976_v4, %v9975_v10  ;;  %v10984_v4 = vld [vmem:[%s16415_s5 + $0x188] ss:$16 sps:$4 sm:$0xff]  }
 0x17f   : > { %1743 = vmatprep.mubr.bf16.mxu0 %v10973_v43  ;;  %v9979_v43 = vpop.f32.mrb[59].mxu1 }
 0x180   : > { %v12470_v45 = vadd.f32 %v9979_v43, %v9978_v28  ;;  %v9981_v59 = vpop.f32.mrb[60].mxu1 }
 0x181   : > { %v9982_v60 = vpop.f32.mrb[61].mxu1 }
 0x182   : > { %v12472_v24 = vadd.f32 %v9982_v60, %v9981_v59  ;;  %v9984_v29 = vpop.f32.mrb[62].mxu1  ;;  %v10985_v59 = vld [vmem:[%s16415_s5 + $0x1ac] ss:$16 sps:$4 sm:$0xff]  }
 0x183   : > { %v9985_v56 = vpop.f32.mrb[63].mxu1 }
 0x184   : > { %v9987_v42 = vpop.f32.mrb[64].mxu1 }
 0x185   : > { %v9988_v25 = vpop.f32.mrb[65].mxu1 }
 0x186   : > { %1744 = vmatmul.mubr.bf16.gmra.mrb[88].mxu0 %v10975_v31  ;;  %v12477_v31 = vadd.f32 %v9985_v56, %v9984_v29  ;;  %v12482_v47 = vadd.f32 %v9988_v25, %v9987_v42  ;;  %v9990_v51 = vpop.f32.mrb[66].mxu1 }
 0x187   : > { %1751 = vmatprep.mubr.bf16.mxu0 %v10976_v14  ;;  %v10982_v14 = vld [vmem:[%s16415_s5 + $0x18c] ss:$16 sps:$4 sm:$0xff]   ;;  %v9991_v40 = vpop.f32.mrb[67].mxu1 }
 0x188   : > { %v12484_v1 = vadd.f32 %v9991_v40, %v9990_v51  ;;  %v9993_v17 = vpop.f32.mrb[68].mxu1 }
 0x189   : > { %v9994_v58 = vpop.f32.mrb[69].mxu1 }
 0x18a   : > { %v9996_v10 = vpop.f32.mrb[70].mxu1 }
 0x18e   : > { %1752 = vmatmul.mubr.bf16.gmra.mrb[92].mxu0 %v10978_v62  ;;  %v12486_v62 = vadd.f32 %v9994_v58, %v9993_v17  ;;  %v10987_v58 = vld [vmem:[%s16415_s5 + $0x1a8] ss:$16 sps:$4 sm:$0xff]  }
 0x18f   : > { %1759 = vmatprep.mubr.bf16.mxu0 %v10979_v48  ;;  %v9997_v48 = vpop.f32.mrb[71].mxu1 }
 0x190   : > { %v12491_v28 = vadd.f32 %v9997_v48, %v9996_v10  ;;  %v9999_v43 = vpop.f32.mrb[72].mxu1  ;;  %v10996_v48 = vld [vmem:[%s16413_s3 + $0x40] ss:$0 sps:$4 sm:$0xff]  }
 0x191   : > { %v10000_v60 = vpop.f32.mrb[73].mxu1  ;;  %10716 = vmatprep.subr.msk.bf16.mxu1 %vm2347_vm3, %v10996_v48 }
 0x192   : > { %16711 = vst [vmem:[#allocation7_spill] sm:$0xff] %v12491_v28  ;;  %v12496_v29 = vadd.f32 %v10000_v60, %v9999_v43  ;;  %v10002_v56 = vpop.f32.mrb[74].mxu1  ;;  %v12517_v60 = vpop.permute.xlu1 %10739  ;;  %v11477_v28 = vld [vmem:[%s11574_s18 + $0xe8] sm:$0xff] }
 0x193   : > { %v10003_v42 = vpop.f32.mrb[75].mxu1 }
 0x194   : > { %16712 = vst [vmem:[#allocation6_spill] sm:$0xff] %v12496_v29  ;;  %v10005_v25 = vpop.f32.mrb[76].mxu1 }
 0x195   : > { %v10006_v51 = vpop.f32.mrb[77].mxu1 }
 0x196   : > { %1760 = vmatmul.mubr.bf16.gmra.mrb[96].mxu0 %v10981_v18  ;;  %v12498_v18 = vpop.permute.xlu0 %1155  ;;  %v12502_v40 = vadd.f32 %v10006_v51, %v10005_v25  ;;  %v10008_v17 = vpop.f32.mrb[78].mxu1  ;;  %v10990_v51 = vld [vmem:[%s16415_s5 + $0x1c8] ss:$16 sps:$4 sm:$0xff]  }
 0x197   : > { %1767 = vmatprep.mubr.bf16.mxu0 %v10982_v14  ;;  %v12500_v14 = vadd.f32 %v10003_v42, %v10002_v56  ;;  %v10009_v10 = vpop.f32.mrb[79].mxu1  ;;  %v2349_v56 = vsel %vm2347_vm3, %v10996_v48, 0  ;;  %v12521_v25 = vpop.permute.xlu1 %10744 }
 0x198   : > { %16714 = vst [vmem:[#allocation8_spill] sm:$0xff] %v12502_v40  ;;  %10452 = vmatpush3.bf16.msra.mxu1 %v2349_v56 }
 0x199   : > { %16713 = vst [vmem:[#allocation9_spill] sm:$0xff] %v12500_v14 }
 0x19a   : > { %v12510_v43 = vpop.permute.xlu0 %10734 }
 0x19b   : > { %v12531_v48 = vpop.permute.xlu1 %10754 }
 0x19e   : > { %1768 = vmatmul.mubr.bf16.gmra.mrb[100].mxu0 %v10984_v4  ;;  %v10988_v4 = vld [vmem:[%s16415_s5 + $0x1cc] ss:$16 sps:$4 sm:$0xff]   ;;  %v12519_v42 = vpop.permute.xlu0 %10749 }
 0x19f   : > { %1775 = vmatprep.mubr.bf16.mxu0 %v10985_v59  ;;  %v12515_v59 = vadd.f32 %v10009_v10, %v10008_v17  ;;  %v10991_v17 = vld [vmem:[%s16415_s5 + $0x1ec] ss:$16 sps:$4 sm:$0xff]   ;;  %v12538_v56 = vpop.permute.xlu1 %10764 }
 0x1a1   : > { %16715 = vst [vmem:[#allocation38_spill] sm:$0xff] %v12515_v59 }
 0x1a2   : > { %v12529_v10 = vpop.permute.xlu0 %10759 }
 0x1a3   : > { %v12542_v23 = vpop.permute.xlu1 %10774 }
 0x1a6   : > { %1776 = vmatmul.mubr.bf16.gmra.mrb[104].mxu0 %v10987_v58  ;;  %v10993_v58 = vld [vmem:[%s16415_s5 + $0x1e8] ss:$16 sps:$4 sm:$0xff]  }
 0x1a7   : > { %1783 = vmatprep.mubr.bf16.mxu0 %v10988_v4  ;;  %v12536_v4 = vpop.permute.xlu0 %10769 }
 0x1ab   : > { %v12540_v50 = vpop.permute.xlu0 %10779 }
 0x1ae   : > { %1784 = vmatmul.mubr.bf16.gmra.mrb[108].mxu0 %v10990_v51 }
 0x1af   : > { %1791 = vmatprep.mubr.bf16.mxu0 %v10991_v17  ;;  %v12544_v51 = vpop.permute.xlu0 %10789  ;;  %v12546_v17 = vpop.permute.xlu1 %10784 }
 0x1b3   : > { %v12548_v16 = vpop.permute.xlu0 %10799  ;;  %v12550_v21 = vpop.permute.xlu1 %10794 }
 0x1b4   : > { %16716 = vst [vmem:[#allocation39_spill] sm:$0xff] %v12548_v16 }
 0x1b6   : > { %1792 = vmatmul.mubr.bf16.gmra.mrb[112].mxu0 %v10993_v58  ;;  %v12559_v58 = vld [vmem:[%s16414_s4 + $0x8] ss:$0 sm:$0xff] }
 0x1b7   : > { %v12552_v34 = vpop.permute.xlu0 %10809  ;;  %v12554_v54 = vpop.permute.xlu1 %10804 }
 0x1b8   : > { %16717 = vst [vmem:[#allocation40_spill] sm:$0xff] %v12552_v34  ;;  %16718 = vst [vmem:[#allocation41_spill] sm:$0xff] %v12554_v54  ;;  %v11449_v34 = vld [vmem:[%s11574_s18 + $0x8] sm:$0xff] }
 0x1bb   : > { %v10820_v52 = vpop.permute.xlu0 %10819  ;;  %v10815_v26 = vpop.permute.xlu1 %10814 }
 0x1bc   : > { %v10822_v40 = vunpack.i.h.bf16 %v10820_v52  ;;  %v10821_v54 = vunpack.i.l.bf16 %v10820_v52  ;;  %v10816_v14 = vunpack.i.l.bf16 %v10815_v26 }
 0x1ce   : > { %v10417_v37 = vpop.f32.mrb[20].mxu0 }
 0x1cf   : > { %v925_v2 = vadd.f32 %v11446_v57, %v10417_v37  ;;  %v796_v33 = vpop.f32.mrb[21].mxu0  ;;  %v10817_v57 = vunpack.i.h.bf16 %v10815_v26  ;;  %v11450_v26 = vld [vmem:[%s11574_s18 + $0x30] sm:$0xff] }
 0x1d0   : > { %v923_v30 = vadd.f32 %v11447_v19, %v796_v33  ;;  %v10418_v55 = vpop.f32.mrb[22].mxu0 }
 0x1d1   : > { %v962_v0 = vadd.f32 %v12559_v58, %v925_v2  ;;  %v926_v9 = vadd.f32 %v11448_v63, %v10418_v55  ;;  %v799_v38 = vpop.f32.mrb[23].mxu0 }
 0x1d2   : > { %v960_v3 = vadd.f32 %v12559_v58, %v923_v30  ;;  %v924_v59 = vadd.f32 %v11449_v34, %v799_v38  ;;  %v10830_v34 = vpop.permute.xlu0 %10829 }
 0x1d3   : > { %v963_v37 = vadd.f32 %v12559_v58, %v926_v9  ;;  %v12570_v19 = vsel %vm339_vm1, %v962_v0, %v10821_v54  ;;  %v11451_v54 = vld [vmem:[%s11574_s18 + $0x20] sm:$0xff] }
 0x1d4   : > { %v961_v33 = vadd.f32 %v12559_v58, %v924_v59  ;;  %16719 = vst [vmem:[#allocation42_spill] sm:$0xff] %v12570_v19  ;;  %v12576_v63 = vsel %vm339_vm1, %v960_v3, %v10816_v14  ;;  %v10825_v3 = vpop.permute.xlu1 %10824 }
 0x1d5   : > { %v12573_v55 = vsel %vm339_vm1, %v963_v37, %v10822_v40  ;;  %16721 = vst [vmem:[#allocation44_spill] sm:$0xff] %v12576_v63  ;;  %v11452_v37 = vld [vmem:[%s11574_s18 + $0x38] sm:$0xff]  ;;  %v10827_v63 = vunpack.i.h.bf16 %v10825_v3 }
 0x1d6   : > { %16720 = vst [vmem:[#allocation43_spill] sm:$0xff] %v12573_v55  ;;  %v12581_v2 = vsel %vm339_vm1, %v961_v33, %v10817_v57  ;;  %v10421_v9 = vpop.f32.mrb[24].mxu0  ;;  %v11453_v33 = vld [vmem:[%s11574_s18 + $0x28] sm:$0xff] }
 0x1d7   : > { %16722 = vst [vmem:[#allocation45_spill] sm:$0xff] %v12581_v2  ;;  %v929_v30 = vadd.f32 %v11450_v26, %v10421_v9  ;;  %v812_v52 = vpop.f32.mrb[25].mxu0  ;;  %v10832_v9 = vunpack.i.h.bf16 %v10830_v34  ;;  %v10831_v26 = vunpack.i.l.bf16 %v10830_v34  ;;  %v10826_v2 = vunpack.i.l.bf16 %v10825_v3 }
 0x1d8   : > { %v927_v40 = vadd.f32 %v11451_v54, %v812_v52  ;;  %v10422_v59 = vpop.f32.mrb[26].mxu0 }
 0x1d9   : > { %v966_v14 = vadd.f32 %v12559_v58, %v929_v30  ;;  %v930_v38 = vadd.f32 %v11452_v37, %v10422_v59  ;;  %v815_v19 = vpop.f32.mrb[27].mxu0  ;;  %v11454_v59 = vld [vmem:[%s11574_s18 + $0x50] sm:$0xff]  ;;  %v10840_v37 = vpop.permute.xlu0 %10839 }
 0x1da   : > { %v964_v57 = vadd.f32 %v12559_v58, %v927_v40  ;;  %v928_v55 = vadd.f32 %v11453_v33, %v815_v19 }
 0x1db   : > { %v967_v0 = vadd.f32 %v12559_v58, %v930_v38  ;;  %v12594_v54 = vsel %vm339_vm1, %v966_v14, %v10831_v26  ;;  %v11457_v38 = vld [vmem:[%s11574_s18 + $0x48] sm:$0xff] }
 0x1dc   : > { %v965_v52 = vadd.f32 %v12559_v58, %v928_v55  ;;  %16723 = vst [vmem:[#allocation46_spill] sm:$0xff] %v12594_v54  ;;  %v12600_v40 = vsel %vm339_vm1, %v964_v57, %v10826_v2  ;;  %v10835_v2 = vpop.permute.xlu1 %10834 }
 0x1dd   : > { %v12597_v30 = vsel %vm339_vm1, %v967_v0, %v10832_v9  ;;  %16725 = vst [vmem:[#allocation48_spill] sm:$0xff] %v12600_v40  ;;  %v11455_v0 = vld [vmem:[%s11574_s18 + $0x40] sm:$0xff]  ;;  %v10836_v40 = vunpack.i.l.bf16 %v10835_v2 }
 0x1de   : > { %16724 = vst [vmem:[#allocation47_spill] sm:$0xff] %v12597_v30  ;;  %v12603_v19 = vsel %vm339_vm1, %v965_v52, %v10827_v63  ;;  %v11456_v63 = vld [vmem:[%s11574_s18 + $0x58] sm:$0xff]  ;;  %v10837_v30 = vunpack.i.h.bf16 %v10835_v2  ;;  %v11458_v2 = vld [vmem:[%s11574_s18 + $0x70] sm:$0xff] }
 0x1df   : > { %16726 = vst [vmem:[#allocation49_spill] sm:$0xff] %v12603_v19  ;;  %v10425_v34 = vpop.f32.mrb[28].mxu0 }
 0x1e0   : > { %v933_v55 = vadd.f32 %v11454_v59, %v10425_v34  ;;  %v828_v3 = vpop.f32.mrb[29].mxu0  ;;  %v10842_v34 = vunpack.i.h.bf16 %v10840_v37  ;;  %v10841_v59 = vunpack.i.l.bf16 %v10840_v37 }
 0x1e1   : > { %v931_v33 = vadd.f32 %v11455_v0, %v828_v3  ;;  %v10426_v9 = vpop.f32.mrb[30].mxu0 }
 0x1e2   : > { %v970_v57 = vadd.f32 %v12559_v58, %v933_v55  ;;  %v934_v26 = vadd.f32 %v11456_v63, %v10426_v9  ;;  %v831_v52 = vpop.f32.mrb[31].mxu0  ;;  %v11461_v9 = vld [vmem:[%s11574_s18 + $0x68] sm:$0xff] }
 0x1e3   : > { %v968_v29 = vadd.f32 %v12559_v58, %v931_v33  ;;  %v932_v54 = vadd.f32 %v11457_v38, %v831_v52 }
 0x1e4   : > { %v971_v14 = vadd.f32 %v12559_v58, %v934_v26  ;;  %v12618_v0 = vsel %vm339_vm1, %v970_v57, %v10841_v59  ;;  %v10850_v26 = vpop.permute.xlu0 %10849 }
 0x1e5   : > { %v969_v3 = vadd.f32 %v12559_v58, %v932_v54  ;;  %16727 = vst [vmem:[#allocation50_spill] sm:$0xff] %v12618_v0  ;;  %v12624_v33 = vsel %vm339_vm1, %v968_v29, %v10836_v40  ;;  %v10845_v29 = vpop.permute.xlu1 %10844 }
 0x1e6   : > { %v12621_v55 = vsel %vm339_vm1, %v971_v14, %v10842_v34  ;;  %16729 = vst [vmem:[#allocation52_spill] sm:$0xff] %v12624_v33  ;;  %v11459_v14 = vld [vmem:[%s11574_s18 + $0x60] sm:$0xff]  ;;  %v10846_v33 = vunpack.i.l.bf16 %v10845_v29 }
 0x1e7   : > { %16728 = vst [vmem:[#allocation51_spill] sm:$0xff] %v12621_v55  ;;  %v12627_v38 = vsel %vm339_vm1, %v969_v3, %v10837_v30  ;;  %v11460_v30 = vld [vmem:[%s11574_s18 + $0x78] sm:$0xff]  ;;  %v10847_v55 = vunpack.i.h.bf16 %v10845_v29  ;;  %v11462_v29 = vld [vmem:[%s11574_s18 + $0x90] sm:$0xff] }
 0x1e8   : > { %16730 = vst [vmem:[#allocation53_spill] sm:$0xff] %v12627_v38 }
 0x1e9   : > { %v10429_v37 = vpop.f32.mrb[32].mxu0 }
 0x1ea   : > { %v937_v54 = vadd.f32 %v11458_v2, %v10429_v37  ;;  %v844_v63 = vpop.f32.mrb[33].mxu0  ;;  %v10852_v37 = vunpack.i.h.bf16 %v10850_v26  ;;  %v10851_v2 = vunpack.i.l.bf16 %v10850_v26 }
 0x1eb   : > { %v935_v52 = vadd.f32 %v11459_v14, %v844_v63  ;;  %v10430_v34 = vpop.f32.mrb[34].mxu0 }
 0x1ec   : > { %v974_v40 = vadd.f32 %v12559_v58, %v937_v54  ;;  %v938_v59 = vadd.f32 %v11460_v30, %v10430_v34  ;;  %v847_v3 = vpop.f32.mrb[35].mxu0  ;;  %v11465_v34 = vld [vmem:[%s11574_s18 + $0x88] sm:$0xff] }
 0x1ed   : > { %v972_v19 = vadd.f32 %v12559_v58, %v935_v52  ;;  %v936_v0 = vadd.f32 %v11461_v9, %v847_v3 }
 0x1ee   : > { %v975_v57 = vadd.f32 %v12559_v58, %v938_v59  ;;  %v12642_v14 = vsel %vm339_vm1, %v974_v40, %v10851_v2  ;;  %v10860_v59 = vpop.permute.xlu0 %10859 }
 0x1ef   : > { %v973_v63 = vadd.f32 %v12559_v58, %v936_v0  ;;  %16731 = vst [vmem:[#allocation54_spill] sm:$0xff] %v12642_v14  ;;  %v12648_v52 = vsel %vm339_vm1, %v972_v19, %v10846_v33  ;;  %v10855_v19 = vpop.permute.xlu1 %10854 }
 0x1f0   : > { %v12645_v54 = vsel %vm339_vm1, %v975_v57, %v10852_v37  ;;  %16733 = vst [vmem:[#allocation56_spill] sm:$0xff] %v12648_v52  ;;  %v11463_v57 = vld [vmem:[%s11574_s18 + $0x80] sm:$0xff]  ;;  %v10857_v40 = vunpack.i.h.bf16 %v10855_v19  ;;  %v10856_v52 = vunpack.i.l.bf16 %v10855_v19  ;;  %v11466_v19 = vld [vmem:[%s11574_s18 + $0xb0] sm:$0xff] }
 0x1f1   : > { %16732 = vst [vmem:[#allocation55_spill] sm:$0xff] %v12645_v54  ;;  %v12651_v9 = vsel %vm339_vm1, %v973_v63, %v10847_v55  ;;  %v10433_v26 = vpop.f32.mrb[36].mxu0  ;;  %v11464_v55 = vld [vmem:[%s11574_s18 + $0x98] sm:$0xff] }
 0x1f2   : > { %16734 = vst [vmem:[#allocation57_spill] sm:$0xff] %v12651_v9  ;;  %v941_v0 = vadd.f32 %v11462_v29, %v10433_v26  ;;  %v860_v30 = vpop.f32.mrb[37].mxu0  ;;  %v10862_v26 = vunpack.i.h.bf16 %v10860_v59  ;;  %v10861_v29 = vunpack.i.l.bf16 %v10860_v59 }
 0x1f3   : > { %v939_v3 = vadd.f32 %v11463_v57, %v860_v30  ;;  %v10434_v37 = vpop.f32.mrb[38].mxu0 }
 0x1f4   : > { %v978_v33 = vadd.f32 %v12559_v58, %v941_v0  ;;  %v942_v2 = vadd.f32 %v11464_v55, %v10434_v37  ;;  %v863_v63 = vpop.f32.mrb[39].mxu0  ;;  %v12680_v37 = vld [vmem:[%s16413_s3 + $0x58] sm:$0xff]   ;;  %v11467_v55 = vld [vmem:[%s11574_s18 + $0xa0] sm:$0xff] }
 0x1f5   : > { %v976_v38 = vadd.f32 %v12559_v58, %v939_v3  ;;  %v940_v14 = vadd.f32 %v11465_v34, %v863_v63  ;;  %10521 = vmatprep.subr.bf16.mxu1 %v12680_v37  ;;  %v10865_v63 = vpop.permute.xlu1 %10864 }
 0x1f6   : > { %v979_v54 = vadd.f32 %v12559_v58, %v942_v2  ;;  %v12666_v57 = vsel %vm339_vm1, %v978_v33, %v10861_v29  ;;  %v11468_v29 = vld [vmem:[%s11574_s18 + $0xb8] sm:$0xff] }
 0x1f7   : > { %v977_v30 = vadd.f32 %v12559_v58, %v940_v14  ;;  %16735 = vst [vmem:[#allocation58_spill] sm:$0xff] %v12666_v57  ;;  %v12672_v3 = vsel %vm339_vm1, %v976_v38, %v10856_v52  ;;  %v10870_v52 = vpop.permute.xlu0 %10869 }
 0x1f8   : > { %v12669_v0 = vsel %vm339_vm1, %v979_v54, %v10862_v26  ;;  %16737 = vst [vmem:[#allocation60_spill] sm:$0xff] %v12672_v3  ;;  %v10872_v57 = vunpack.i.h.bf16 %v10870_v52 }
 0x1f9   : > { %16736 = vst [vmem:[#allocation59_spill] sm:$0xff] %v12669_v0  ;;  %v12675_v34 = vsel %vm339_vm1, %v977_v30, %v10857_v40  ;;  %v10437_v59 = vpop.f32.mrb[40].mxu0  ;;  %v10871_v0 = vunpack.i.l.bf16 %v10870_v52 }
 0x1fa   : > { %16738 = vst [vmem:[#allocation61_spill] sm:$0xff] %v12675_v34  ;;  %v945_v54 = vadd.f32 %v11466_v19, %v10437_v59  ;;  %v876_v33 = vpop.f32.mrb[41].mxu0  ;;  %v11469_v59 = vld [vmem:[%s11574_s18 + $0xa8] sm:$0xff] }
 0x1fb   : > { %v943_v40 = vadd.f32 %v11467_v55, %v876_v33  ;;  %v10438_v2 = vpop.f32.mrb[42].mxu0  ;;  %v10867_v33 = vunpack.i.h.bf16 %v10865_v63  ;;  %v10866_v55 = vunpack.i.l.bf16 %v10865_v63  ;;  %v11470_v63 = vld [vmem:[%s11574_s18 + $0xd0] sm:$0xff] }
 0x1fc   : > { %v982_v26 = vadd.f32 %v12559_v58, %v945_v54  ;;  %v946_v30 = vadd.f32 %v11468_v29, %v10438_v2  ;;  %v879_v9 = vpop.f32.mrb[43].mxu0  ;;  %v11473_v2 = vld [vmem:[%s11574_s18 + $0xc8] sm:$0xff] }
 0x1fd   : > { %v980_v14 = vadd.f32 %v12559_v58, %v943_v40  ;;  %v944_v19 = vadd.f32 %v11469_v59, %v879_v9 }
 0x1fe   : > { %v983_v38 = vadd.f32 %v12559_v58, %v946_v30  ;;  %v12696_v34 = vsel %vm339_vm1, %v982_v26, %v10871_v0  ;;  %v10880_v26 = vpop.permute.xlu0 %10879 }
 0x1ff   : > { %v981_v3 = vadd.f32 %v12559_v58, %v944_v19  ;;  %16739 = vst [vmem:[#allocation62_spill] sm:$0xff] %v12696_v34  ;;  %v12702_v40 = vsel %vm339_vm1, %v980_v14, %v10866_v55  ;;  %v10875_v14 = vpop.permute.xlu1 %10874 }
 0x200   : > { %v12699_v54 = vsel %vm339_vm1, %v983_v38, %v10872_v57  ;;  %16741 = vst [vmem:[#allocation64_spill] sm:$0xff] %v12702_v40  ;;  %v11471_v57 = vld [vmem:[%s11574_s18 + $0xc0] sm:$0xff]  ;;  %v10876_v40 = vunpack.i.l.bf16 %v10875_v14 }
 0x201   : > { %16740 = vst [vmem:[#allocation63_spill] sm:$0xff] %v12699_v54  ;;  %v12705_v9 = vsel %vm339_vm1, %v981_v3, %v10867_v33  ;;  %v10441_v52 = vpop.f32.mrb[44].mxu0  ;;  %v11472_v3 = vld [vmem:[%s11574_s18 + $0xd8] sm:$0xff]  ;;  %v10877_v54 = vunpack.i.h.bf16 %v10875_v14  ;;  %v11474_v14 = vld [vmem:[%s11574_s18 + $0xf0] sm:$0xff] }
 0x202   : > { %16742 = vst [vmem:[#allocation65_spill] sm:$0xff] %v12705_v9  ;;  %v949_v29 = vadd.f32 %v11470_v63, %v10441_v52  ;;  %v892_v30 = vpop.f32.mrb[45].mxu0  ;;  %v10882_v52 = vunpack.i.h.bf16 %v10880_v26  ;;  %v10881_v63 = vunpack.i.l.bf16 %v10880_v26 }
 0x203   : > { %v947_v38 = vadd.f32 %v11471_v57, %v892_v30  ;;  %v10442_v59 = vpop.f32.mrb[46].mxu0 }
 0x204   : > { %v986_v19 = vadd.f32 %v12559_v58, %v949_v29  ;;  %v950_v33 = vadd.f32 %v11472_v3, %v10442_v59  ;;  %v895_v55 = vpop.f32.mrb[47].mxu0 }
 0x205   : > { %v984_v16 = vadd.f32 %v12559_v58, %v947_v38  ;;  %v948_v34 = vadd.f32 %v11473_v2, %v895_v55 }
 0x206   : > { %v987_v0 = vadd.f32 %v12559_v58, %v950_v33  ;;  %v12720_v57 = vsel %vm339_vm1, %v986_v19, %v10881_v63  ;;  %v10890_v33 = vpop.permute.xlu0 %10889 }
 0x207   : > { %v985_v30 = vadd.f32 %v12559_v58, %v948_v34  ;;  %16743 = vst [vmem:[#allocation66_spill] sm:$0xff] %v12720_v57  ;;  %v12726_v38 = vsel %vm339_vm1, %v984_v16, %v10876_v40  ;;  %v10885_v16 = vpop.permute.xlu1 %10884  ;;  %v10892_v57 = vunpack.i.h.bf16 %v10890_v33 }
 0x208   : > { %v12723_v29 = vsel %vm339_vm1, %v987_v0, %v10882_v52  ;;  %16745 = vst [vmem:[#allocation68_spill] sm:$0xff] %v12726_v38  ;;  %v11475_v0 = vld [vmem:[%s11574_s18 + $0xe0] sm:$0xff]  ;;  %v10886_v19 = vunpack.i.l.bf16 %v10885_v16 }
 0x209   : > { %16744 = vst [vmem:[#allocation67_spill] sm:$0xff] %v12723_v29  ;;  %v12729_v2 = vsel %vm339_vm1, %v985_v30, %v10877_v54  ;;  %v10445_v26 = vpop.f32.mrb[48].mxu0  ;;  %v11476_v54 = vld [vmem:[%s11574_s18 + $0xf8] sm:$0xff]  ;;  %v10887_v29 = vunpack.i.h.bf16 %v10885_v16 }
 0x20a   : > { %v953_v34 = vadd.f32 %v11474_v14, %v10445_v26  ;;  %v908_v3 = vpop.f32.mrb[49].mxu0  ;;  %v10891_v26 = vunpack.i.l.bf16 %v10890_v33 }
 0x20b   : > { %v951_v55 = vadd.f32 %v11475_v0, %v908_v3  ;;  %v10446_v52 = vpop.f32.mrb[50].mxu0  ;;  %v1513_v0 = vadd.f32 %v12395_v61, %v12498_v18  ;;  %v1516_v61 = vadd.f32 %v12397_v22, %v12498_v18 }
 0x20c   : > { %v990_v40 = vadd.f32 %v12559_v58, %v953_v34  ;;  %v954_v63 = vadd.f32 %v11476_v54, %v10446_v52  ;;  %v911_v30 = vpop.f32.mrb[51].mxu0 }
 0x20d   : > { %v988_v9 = vadd.f32 %v12559_v58, %v951_v55  ;;  %v952_v59 = vadd.f32 %v11477_v28, %v911_v30 }
 0x20e   : > { %v991_v14 = vadd.f32 %v12559_v58, %v954_v63  ;;  %v12744_v3 = vsel %vm339_vm1, %v990_v40, %v10891_v26  ;;  %v1521_v63 = vadd.f32 %v12399_v36, %v12498_v18  ;;  %v11000_v36 = vld [vmem:[%s16413_s3 + $0x48] sm:$0xff]  }
 0x20f   : > { %v989_v38 = vadd.f32 %v12559_v58, %v952_v59  ;;  %v12752_v55 = vsel %vm339_vm1, %v988_v9, %v10886_v19  ;;  %10485 = vmatprep.subr.bf16.mxu0 %v11000_v36 }
 0x210   : > { %v12747_v34 = vsel %vm339_vm1, %v991_v14, %v10892_v57  ;;  %10486 = vmatpush3.bf16.msra.mxu0 %v11000_v36 }
 0x211   : > { %v12755_v28 = vsel %vm339_vm1, %v989_v38, %v10887_v29  ;;  %v10027_v33 = vpop.f32.mrb[52].mxu0  ;;  %v4031_v52 = vpack.c.bf16 %v12747_v34, %v12744_v3  ;;  %v10737_v29 = vunpack.i.h.bf16 %v12510_v43  ;;  %v10736_v38 = vunpack.i.l.bf16 %v12510_v43 }
 0x212   : > { %v10028_v58 = vpop.f32.mrb[53].mxu0  ;;  %v4030_v59 = vpack.c.bf16 %v12755_v28, %v12752_v55  ;;  %v1524_v43 = vadd.f32 %v12404_v32, %v12498_v18 }
 0x213   : > { %v10029_v16 = vadd.f32 %v10028_v58, %v10027_v33  ;;  %v10030_v57 = vpop.f32.mrb[54].mxu0 }
 0x214   : > { %v10031_v40 = vpop.f32.mrb[55].mxu0 }
 0x215   : > { %v1674_v54 = vadd.f32 %v10029_v16, %v1513_v0  ;;  %v10032_v9 = vadd.f32 %v10031_v40, %v10030_v57 }
 0x217   : > { %v1677_v19 = vadd.f32 %v10032_v9, %v1516_v61  ;;  %v2225_v30 = vsel %vm2224_vm4, %v1674_v54, %v10736_v38  ;;  %v10742_v61 = vunpack.i.h.bf16 %v12517_v60  ;;  %v10741_v54 = vunpack.i.l.bf16 %v12517_v60 }
 0x219   : > { %v2226_v26 = vsel %vm2224_vm4, %v1677_v19, %v10737_v29  ;;  %v10033_v14 = vpop.f32.mrb[56].mxu0 }
 0x21a   : > { %v10034_v33 = vpop.f32.mrb[57].mxu0  ;;  %v2262_v58 = vpack.c.bf16 %v2226_v26, %v2225_v30  ;;  %v1529_v26 = vadd.f32 %v12409_v7, %v12498_v18  ;;  %v10746_v7 = vunpack.i.l.bf16 %v12521_v25 }
 0x21b   : > { %v10035_v22 = vadd.f32 %v10034_v33, %v10033_v14  ;;  %v10036_v0 = vpop.f32.mrb[58].mxu0 }
 0x21c   : > { %v10037_v16 = vpop.f32.mrb[59].mxu0  ;;  %10453 = vmatprep.mubr.msk.bf16.mxu1 %vm2298_vm5, %v2262_v58  ;;  %v1532_v58 = vadd.f32 %v12411_v53, %v12498_v18 }
 0x21d   : > { %v1682_v57 = vadd.f32 %v10035_v22, %v1521_v63  ;;  %v10038_v40 = vadd.f32 %v10037_v16, %v10036_v0  ;;  %v10998_v63 = vld [vmem:[%s16413_s3 + $0x60] sm:$0xff]   ;;  %v10999_v16 = vld [vmem:[%s16413_s3 + $0x68] ss:$0 sps:$4 sm:$0x33]  }
 0x21f   : > { %v1685_v9 = vadd.f32 %v10038_v40, %v1524_v43  ;;  %v2227_v29 = vsel %vm2224_vm4, %v1682_v57, %v10741_v54  ;;  %v10747_v43 = vunpack.i.h.bf16 %v12521_v25  ;;  %v1540_v25 = vadd.f32 %v12418_v46, %v12498_v18 }
 0x221   : > { %v2228_v38 = vsel %vm2224_vm4, %v1685_v9, %v10742_v61  ;;  %v10039_v19 = vpop.f32.mrb[60].mxu0  ;;  %v1537_v9 = vadd.f32 %v12413_v13, %v12498_v18 }
 0x222   : > { %v2263_v30 = vpack.c.bf16 %v2228_v38, %v2227_v29  ;;  %v10040_v32 = vpop.f32.mrb[61].mxu0 }
 0x223   : > { %v10041_v14 = vadd.f32 %v10040_v32, %v10039_v19  ;;  %v10042_v33 = vpop.f32.mrb[62].mxu0 }
 0x224   : > { %v10043_v60 = vpop.f32.mrb[63].mxu0  ;;  %10454 = vmatmul.mubr.msk.bf16.vlgmr.msra.gmra.mrb[80].mxu1 %vm2298_vm5, %v2263_v30 }
 0x225   : > { %v1690_v22 = vadd.f32 %v10041_v14, %v1529_v26  ;;  %v10044_v0 = vadd.f32 %v10043_v60, %v10042_v33  ;;  %10522 = vmatpush3.bf16.msra.mxu1 %v12680_v37  ;;  %v4102_v37 = vsel %vm346_vm0, %v10999_v16, 0  ;;  %v10751_v26 = vunpack.i.l.bf16 %v12519_v42 }
 0x226   : > { %10523 = vmatprep.subr.bf16.mxu1 %v10998_v63 }
 0x227   : > { %v1693_v57 = vadd.f32 %v10044_v0, %v1532_v58  ;;  %v2229_v40 = vsel %vm2224_vm4, %v1690_v22, %v10746_v7  ;;  %v1545_v0 = vadd.f32 %v12423_v49, %v12498_v18  ;;  %v1548_v7 = vadd.f32 %v12425_v5, %v12498_v18 }
 0x229   : > { %v2230_v36 = vsel %vm2224_vm4, %v1693_v57, %v10747_v43  ;;  %v10045_v61 = vpop.f32.mrb[64].mxu0  ;;  %10524 = vmatpush3.bf16.msra.mxu1 %v10998_v63  ;;  %v10752_v63 = vunpack.i.h.bf16 %v12519_v42 }
 0x22a   : > { %v10046_v53 = vpop.f32.mrb[65].mxu0  ;;  %v2264_v54 = vpack.c.bf16 %v2230_v36, %v2229_v40  ;;  %10717 = vmatprep.subr.msk.bf16.mxu1 %vm346_vm0, %v10999_v16  ;;  %v10757_v40 = vunpack.i.h.bf16 %v12531_v48  ;;  %v10756_v36 = vunpack.i.l.bf16 %v12531_v48 }
 0x22b   : > { %v10047_v29 = vadd.f32 %v10046_v53, %v10045_v61  ;;  %v10048_v38 = vpop.f32.mrb[66].mxu0 }
 0x22c   : > { %v10049_v19 = vpop.f32.mrb[67].mxu0  ;;  %10457 = vmatprep.mubr.msk.bf16.mxu1 %vm2298_vm5, %v2264_v54 }
 0x22d   : > { %v1698_v30 = vadd.f32 %v10047_v29, %v1537_v9  ;;  %v10050_v32 = vadd.f32 %v10049_v19, %v10048_v38  ;;  %10526 = vmatpush3.bf16.msra.mxu1 %v4102_v37  ;;  %v1553_v29 = vadd.f32 %v12430_v35, %v12498_v18 }
 0x22f   : > { %v1701_v14 = vadd.f32 %v10050_v32, %v1540_v25  ;;  %v2231_v33 = vsel %vm2224_vm4, %v1698_v30, %v10751_v26  ;;  %v1556_v25 = vadd.f32 %v12435_v39, %v12498_v18  ;;  %v10762_v32 = vunpack.i.h.bf16 %v12529_v10 }
 0x231   : > { %v2232_v13 = vsel %vm2224_vm4, %v1701_v14, %v10752_v63  ;;  %v10051_v60 = vpop.f32.mrb[68].mxu0  ;;  %v10761_v63 = vunpack.i.l.bf16 %v12529_v10 }
 0x232   : > { %v10052_v58 = vpop.f32.mrb[69].mxu0  ;;  %v2265_v22 = vpack.c.bf16 %v2232_v13, %v2231_v33 }
 0x233   : > { %v10053_v16 = vadd.f32 %v10052_v58, %v10051_v60  ;;  %v10054_v46 = vpop.f32.mrb[70].mxu0  ;;  %v1561_v58 = vadd.f32 %v12440_v44, %v12498_v18 }
 0x234   : > { %v10055_v43 = vpop.f32.mrb[71].mxu0  ;;  %10458 = vmatmul.mubr.msk.bf16.gmra.mrb[84].mxu1 %vm2298_vm5, %v2265_v22 }
 0x235   : > { %v1706_v42 = vadd.f32 %v10053_v16, %v1545_v0  ;;  %v10056_v57 = vadd.f32 %v10055_v43, %v10054_v46  ;;  %v1564_v16 = vadd.f32 %v12442_v15, %v12498_v18  ;;  %v10767_v43 = vunpack.i.h.bf16 %v12538_v56 }
 0x237   : > { %v1709_v61 = vadd.f32 %v10056_v57, %v1548_v7  ;;  %v2233_v53 = vsel %vm2224_vm4, %v1706_v42, %v10756_v36  ;;  %v10766_v7 = vunpack.i.l.bf16 %v12538_v56 }
 0x239   : > { %v2234_v54 = vsel %vm2224_vm4, %v1709_v61, %v10757_v40  ;;  %v10057_v49 = vpop.f32.mrb[72].mxu0 }
 0x23a   : > { %v10058_v37 = vpop.f32.mrb[73].mxu0  ;;  %v2266_v9 = vpack.c.bf16 %v2234_v54, %v2233_v53  ;;  %v1569_v53 = vadd.f32 %v12444_v20, %v12498_v18 }
 0x23b   : > { %v10059_v38 = vadd.f32 %v10058_v37, %v10057_v49  ;;  %v10060_v19 = vpop.f32.mrb[74].mxu0  ;;  %v1572_v37 = vadd.f32 %v12449_v11, %v12498_v18 }
 0x23c   : > { %v10061_v5 = vpop.f32.mrb[75].mxu0  ;;  %10461 = vmatprep.mubr.msk.bf16.mxu1 %vm2298_vm5, %v2266_v9 }
 0x23d   : > { %v1714_v48 = vadd.f32 %v10059_v38, %v1553_v29  ;;  %v10062_v30 = vadd.f32 %v10061_v5, %v10060_v19  ;;  %v10772_v29 = vunpack.i.h.bf16 %v12536_v4  ;;  %v10771_v38 = vunpack.i.l.bf16 %v12536_v4  ;;  %v11001_v4 = vld [vmem:[%s16413_s3 + $0x50] sm:$0xff]  }
 0x23e   : > { %10487 = vmatprep.subr.bf16.mxu0 %v11001_v4 }
 0x23f   : > { %v1717_v26 = vadd.f32 %v10062_v30, %v1556_v25  ;;  %v2235_v14 = vsel %vm2224_vm4, %v1714_v48, %v10761_v63  ;;  %10488 = vmatpush3.bf16.msra.mxu0 %v11001_v4  ;;  %v10792_v4 = vunpack.i.h.bf16 %v12544_v51 }
 0x241   : > { %v2236_v33 = vsel %vm2224_vm4, %v1717_v26, %v10762_v32  ;;  %v10063_v35 = vpop.f32.mrb[76].mxu0  ;;  %v1577_v32 = vadd.f32 %v12454_v6, %v12498_v18 }
 0x242   : > { %v10064_v13 = vpop.f32.mrb[77].mxu0  ;;  %v2267_v60 = vpack.c.bf16 %v2236_v33, %v2235_v14  ;;  %v1580_v14 = vadd.f32 %v12456_v12, %v12498_v18 }
 0x243   : > { %v10065_v22 = vadd.f32 %v10064_v13, %v10063_v35  ;;  %v10066_v0 = vpop.f32.mrb[78].mxu0  ;;  %v10777_v13 = vunpack.i.h.bf16 %v12542_v23 }
 0x244   : > { %v10067_v39 = vpop.f32.mrb[79].mxu0  ;;  %10462 = vmatmul.mubr.msk.bf16.gmra.mrb[88].mxu1 %vm2298_vm5, %v2267_v60  ;;  %v10776_v60 = vunpack.i.l.bf16 %v12542_v23  ;;  %v1588_v23 = vadd.f32 %v12463_v27, %v12498_v18 }
 0x245   : > { %v1722_v10 = vadd.f32 %v10065_v22, %v1561_v58  ;;  %v10068_v46 = vadd.f32 %v10067_v39, %v10066_v0 }
 0x247   : > { %v1725_v42 = vadd.f32 %v10068_v46, %v1564_v16  ;;  %v2237_v57 = vsel %vm2224_vm4, %v1722_v10, %v10766_v7  ;;  %v1585_v10 = vadd.f32 %v12458_v8, %v12498_v18 }
 0x249   : > { %v2238_v40 = vsel %vm2224_vm4, %v1725_v42, %v10767_v43  ;;  %v10069_v44 = vpop.f32.mrb[80].mxu0 }
 0x24a   : > { %v10070_v36 = vpop.f32.mrb[81].mxu0  ;;  %v2268_v61 = vpack.c.bf16 %v2238_v40, %v2237_v57  ;;  %v10782_v57 = vunpack.i.h.bf16 %v12540_v50  ;;  %v10781_v40 = vunpack.i.l.bf16 %v12540_v50 }
 0x24b   : > { %v10071_v54 = vadd.f32 %v10070_v36, %v10069_v44  ;;  %v10072_v49 = vpop.f32.mrb[82].mxu0 }
 0x24c   : > { %v10073_v15 = vpop.f32.mrb[83].mxu0  ;;  %10465 = vmatprep.mubr.msk.bf16.mxu1 %vm2298_vm5, %v2268_v61 }
 0x24d   : > { %v1730_v56 = vadd.f32 %v10071_v54, %v1569_v53  ;;  %v10074_v9 = vadd.f32 %v10073_v15, %v10072_v49  ;;  %v1593_v49 = vadd.f32 %v12468_v41, %v12498_v18 }
 0x24f   : > { %v1733_v19 = vadd.f32 %v10074_v9, %v1572_v37  ;;  %v2239_v5 = vsel %vm2224_vm4, %v1730_v56, %v10771_v38  ;;  %v1596_v56 = vadd.f32 %v12470_v45, %v12498_v18  ;;  %v10786_v38 = vunpack.i.l.bf16 %v12546_v17 }
 0x251   : > { %v2240_v25 = vsel %vm2224_vm4, %v1733_v19, %v10772_v29  ;;  %v10075_v20 = vpop.f32.mrb[84].mxu0  ;;  %v10787_v29 = vunpack.i.h.bf16 %v12546_v17 }
 0x252   : > { %v10076_v48 = vpop.f32.mrb[85].mxu0  ;;  %v2269_v30 = vpack.c.bf16 %v2240_v25, %v2239_v5 }
 0x253   : > { %v10077_v63 = vadd.f32 %v10076_v48, %v10075_v20  ;;  %v10078_v26 = vpop.f32.mrb[86].mxu0 }
 0x254   : > { %v10079_v11 = vpop.f32.mrb[87].mxu0  ;;  %10466 = vmatmul.mubr.msk.bf16.gmra.mrb[92].mxu1 %vm2298_vm5, %v2269_v30  ;;  %v1601_v30 = vadd.f32 %v12472_v24, %v12498_v18 }
 0x255   : > { %v1738_v33 = vadd.f32 %v10077_v63, %v1577_v32  ;;  %v10080_v35 = vadd.f32 %v10079_v11, %v10078_v26  ;;  %v1604_v26 = vadd.f32 %v12477_v31, %v12498_v18 }
 0x257   : > { %v1741_v6 = vadd.f32 %v10080_v35, %v1580_v14  ;;  %v2241_v58 = vsel %vm2224_vm4, %v1738_v33, %v10776_v60  ;;  %v10791_v14 = vunpack.i.l.bf16 %v12544_v51 }
 0x259   : > { %v2242_v22 = vsel %vm2224_vm4, %v1741_v6, %v10777_v13  ;;  %v10081_v0 = vpop.f32.mrb[88].mxu0 }
 0x25a   : > { %v10082_v39 = vpop.f32.mrb[89].mxu0  ;;  %v2270_v16 = vpack.c.bf16 %v2242_v22, %v2241_v58  ;;  %v1609_v58 = vadd.f32 %v12482_v47, %v12498_v18 }
 0x25b   : > { %v10083_v12 = vadd.f32 %v10082_v39, %v10081_v0  ;;  %v10084_v46 = vpop.f32.mrb[90].mxu0  ;;  %v1612_v39 = vadd.f32 %v12484_v1, %v12498_v18 }
 0x25c   : > { %v10085_v43 = vpop.f32.mrb[91].mxu0  ;;  %10469 = vmatprep.mubr.msk.bf16.mxu1 %vm2298_vm5, %v2270_v16 }
 0x25d   : > { %v1746_v7 = vadd.f32 %v10083_v12, %v1585_v10  ;;  %v10086_v42 = vadd.f32 %v10085_v43, %v10084_v46  ;;  %v10797_v10 = vunpack.i.h.bf16 %v12550_v21  ;;  %v10796_v12 = vunpack.i.l.bf16 %v12550_v21 }
 0x25f   : > { %v1749_v44 = vadd.f32 %v10086_v42, %v1588_v23  ;;  %v2243_v36 = vsel %vm2224_vm4, %v1746_v7, %v10781_v40 }
 0x261   : > { %v2244_v61 = vsel %vm2224_vm4, %v1749_v44, %v10782_v57  ;;  %v10087_v8 = vpop.f32.mrb[92].mxu0  ;;  %v1617_v57 = vadd.f32 %v12486_v62, %v12498_v18 }
 0x262   : > { %v10088_v53 = vpop.f32.mrb[93].mxu0  ;;  %v2271_v54 = vpack.c.bf16 %v2244_v61, %v2243_v36  ;;  %v16746_v36 = vld [vmem:[#allocation7_spill] sm:$0xff] }
 0x263   : > { %v10089_v15 = vadd.f32 %v10088_v53, %v10087_v8  ;;  %v10090_v37 = vpop.f32.mrb[94].mxu0  ;;  %v1620_v61 = vadd.f32 %v16746_v36, %v12498_v18  ;;  %v16747_v53 = vld [vmem:[#allocation39_spill] sm:$0xff]  ;;  %v16764_v36 = vld [vmem:[#allocation46_spill] sm:$0xff] }
 0x264   : > { %v10091_v27 = vpop.f32.mrb[95].mxu0  ;;  %10470 = vmatmul.mubr.msk.bf16.gmra.mrb[96].mxu1 %vm2298_vm5, %v2271_v54  ;;  %v10802_v54 = vunpack.i.h.bf16 %v16747_v53 }
 0x265   : > { %v1754_v50 = vadd.f32 %v10089_v15, %v1593_v49  ;;  %v10092_v9 = vadd.f32 %v10091_v27, %v10090_v37  ;;  %v10801_v49 = vunpack.i.l.bf16 %v16747_v53 }
 0x267   : > { %v1757_v19 = vadd.f32 %v10092_v9, %v1596_v56  ;;  %v2245_v5 = vsel %vm2224_vm4, %v1754_v50, %v10786_v38  ;;  %v16748_v9 = vld [vmem:[#allocation6_spill] sm:$0xff] }
 0x269   : > { %v2246_v25 = vsel %vm2224_vm4, %v1757_v19, %v10787_v29  ;;  %v10093_v41 = vpop.f32.mrb[96].mxu0  ;;  %v1625_v29 = vadd.f32 %v16748_v9, %v12498_v18 }
 0x26a   : > { %v10094_v20 = vpop.f32.mrb[97].mxu0  ;;  %v2272_v48 = vpack.c.bf16 %v2246_v25, %v2245_v5  ;;  %v16749_v25 = vld [vmem:[#allocation9_spill] sm:$0xff] }
 0x26b   : > { %v10095_v32 = vadd.f32 %v10094_v20, %v10093_v41  ;;  %v10096_v63 = vpop.f32.mrb[98].mxu0  ;;  %v1628_v41 = vadd.f32 %v16749_v25, %v12498_v18  ;;  %v16782_v25 = vld [vmem:[#allocation58_spill] sm:$0xff] }
 0x26c   : > { %v10097_v45 = vpop.f32.mrb[99].mxu0  ;;  %10473 = vmatprep.mubr.msk.bf16.mxu1 %vm2298_vm5, %v2272_v48 }
 0x26d   : > { %v1762_v17 = vadd.f32 %v10095_v32, %v1601_v30  ;;  %v10098_v11 = vadd.f32 %v10097_v45, %v10096_v63  ;;  %v16750_v30 = vld [vmem:[#allocation41_spill] sm:$0xff] }
 0x26e   : > { %v10807_v32 = vunpack.i.h.bf16 %v16750_v30  ;;  %v10806_v63 = vunpack.i.l.bf16 %v16750_v30 }
 0x26f   : > { %v1765_v33 = vadd.f32 %v10098_v11, %v1604_v26  ;;  %v2247_v35 = vsel %vm2224_vm4, %v1762_v17, %v10791_v14 }
 0x271   : > { %v2248_v13 = vsel %vm2224_vm4, %v1765_v33, %v10792_v4  ;;  %v10099_v24 = vpop.f32.mrb[100].mxu0  ;;  %v16751_v33 = vld [vmem:[#allocation8_spill] sm:$0xff] }
 0x272   : > { %v10100_v60 = vpop.f32.mrb[101].mxu0  ;;  %v2273_v6 = vpack.c.bf16 %v2248_v13, %v2247_v35  ;;  %v1633_v35 = vadd.f32 %v16751_v33, %v12498_v18  ;;  %v12988_v33 = vld [vmem:[%s16414_s4 + $0x20] ss:$0 sm:$0xff] }
 0x273   : > { %v10101_v22 = vadd.f32 %v10100_v60, %v10099_v24  ;;  %v10102_v0 = vpop.f32.mrb[102].mxu0 }
 0x274   : > { %v10103_v31 = vpop.f32.mrb[103].mxu0  ;;  %10474 = vmatmul.mubr.msk.bf16.gmra.mrb[100].mxu1 %vm2298_vm5, %v2273_v6  ;;  %v16752_v6 = vld [vmem:[#allocation38_spill] sm:$0xff] }
 0x275   : > { %v1770_v51 = vadd.f32 %v10101_v22, %v1609_v58  ;;  %v10104_v16 = vadd.f32 %v10103_v31, %v10102_v0  ;;  %v1636_v58 = vadd.f32 %v16752_v6, %v12498_v18  ;;  %v16753_v31 = vld [vmem:[#allocation40_spill] sm:$0xff]  ;;  %v16757_v18 = vld [vmem:[#allocation43_spill] sm:$0xff] }
 0x277   : > { %v1773_v46 = vadd.f32 %v10104_v16, %v1612_v39  ;;  %v2249_v43 = vsel %vm2224_vm4, %v1770_v51, %v10796_v12  ;;  %v10812_v39 = vunpack.i.h.bf16 %v16753_v31  ;;  %v10811_v51 = vunpack.i.l.bf16 %v16753_v31  ;;  %v11003_v31 = vld [vmem:[%s16413_s3 + $0x78] sm:$0xff]  }
 0x279   : > { %v2250_v23 = vsel %vm2224_vm4, %v1773_v46, %v10797_v10  ;;  %v10105_v47 = vpop.f32.mrb[104].mxu0 }
 0x27a   : > { %v10106_v7 = vpop.f32.mrb[105].mxu0  ;;  %v2274_v42 = vpack.c.bf16 %v2250_v23, %v2249_v43  ;;  %v16754_v43 = vld [vmem:[#allocation45_spill] sm:$0xff]  ;;  %v16755_v23 = vld [vmem:[#allocation44_spill] sm:$0xff] }
 0x27b   : > { %v10107_v40 = vadd.f32 %v10106_v7, %v10105_v47  ;;  %v10108_v44 = vpop.f32.mrb[106].mxu0  ;;  %v16756_v47 = vpack.c.bf16 %v16754_v43, %v16755_v23  ;;  %v16758_v7 = vld [vmem:[#allocation42_spill] sm:$0xff] }
 0x27c   : > { %v10109_v1 = vpop.f32.mrb[107].mxu0  ;;  %10477 = vmatprep.mubr.msk.bf16.mxu1 %vm2298_vm5, %v2274_v42  ;;  %v16759_v42 = vpack.c.bf16 %v16757_v18, %v16758_v7 }
 0x27d   : > { %v1778_v21 = vadd.f32 %v10107_v40, %v1617_v57  ;;  %v10110_v8 = vadd.f32 %v10109_v1, %v10108_v44  ;;  %v16760_v57 = vld [vmem:[#allocation49_spill] sm:$0xff]  ;;  %v16761_v40 = vld [vmem:[#allocation48_spill] sm:$0xff]  ;;  %v16763_v1 = vld [vmem:[#allocation47_spill] sm:$0xff] }
 0x27e   : > { %v16762_v44 = vpack.c.bf16 %v16760_v57, %v16761_v40 }
 0x27f   : > { %v1781_v15 = vadd.f32 %v10110_v8, %v1620_v61  ;;  %v2251_v37 = vsel %vm2224_vm4, %v1778_v21, %v10801_v49  ;;  %v16765_v61 = vpack.c.bf16 %v16763_v1, %v16764_v36  ;;  %v16766_v21 = vld [vmem:[#allocation53_spill] sm:$0xff]  ;;  %v16767_v8 = vld [vmem:[#allocation52_spill] sm:$0xff]  ;;  %v16770_v49 = vld [vmem:[#allocation50_spill] sm:$0xff] }
 0x280   : > { %v16768_v53 = vpack.c.bf16 %v16766_v21, %v16767_v8 }
 0x281   : > { %v2252_v27 = vsel %vm2224_vm4, %v1781_v15, %v10802_v54  ;;  %v10111_v62 = vpop.f32.mrb[108].mxu0  ;;  %v16769_v54 = vld [vmem:[#allocation51_spill] sm:$0xff] }
 0x282   : > { %v10112_v56 = vpop.f32.mrb[109].mxu0  ;;  %v2275_v50 = vpack.c.bf16 %v2252_v27, %v2251_v37  ;;  %v16771_v15 = vpack.c.bf16 %v16769_v54, %v16770_v49  ;;  %v16772_v37 = vld [vmem:[#allocation57_spill] sm:$0xff]  ;;  %v16773_v27 = vld [vmem:[#allocation56_spill] sm:$0xff] }
 0x283   : > { %v10113_v38 = vadd.f32 %v10112_v56, %v10111_v62  ;;  %v10114_v19 = vpop.f32.mrb[110].mxu0  ;;  %v16774_v62 = vpack.c.bf16 %v16772_v37, %v16773_v27  ;;  %v16775_v56 = vld [vmem:[#allocation55_spill] sm:$0xff] }
 0x284   : > { %v10115_v5 = vpop.f32.mrb[111].mxu0  ;;  %10478 = vmatmul.mubr.msk.bf16.gmra.mrb[104].mxu1 %vm2298_vm5, %v2275_v50  ;;  %v16776_v50 = vld [vmem:[#allocation54_spill] sm:$0xff] }
 0x285   : > { %v1786_v20 = vadd.f32 %v10113_v38, %v1625_v29  ;;  %v10116_v48 = vadd.f32 %v10115_v5, %v10114_v19  ;;  %v16777_v9 = vpack.c.bf16 %v16775_v56, %v16776_v50  ;;  %v16778_v29 = vld [vmem:[#allocation61_spill] sm:$0xff]  ;;  %v16779_v38 = vld [vmem:[#allocation60_spill] sm:$0xff]  ;;  %v16781_v5 = vld [vmem:[#allocation59_spill] sm:$0xff] }
 0x286   : > { %v16780_v19 = vpack.c.bf16 %v16778_v29, %v16779_v38 }
 0x287   : > { %v1789_v45 = vadd.f32 %v10116_v48, %v1628_v41  ;;  %v2253_v26 = vsel %vm2224_vm4, %v1786_v20, %v10806_v63  ;;  %v16783_v41 = vpack.c.bf16 %v16781_v5, %v16782_v25  ;;  %v16784_v20 = vld [vmem:[#allocation65_spill] sm:$0xff]  ;;  %v16785_v48 = vld [vmem:[#allocation64_spill] sm:$0xff]  ;;  %v16788_v63 = vld [vmem:[#allocation62_spill] sm:$0xff] }
 0x288   : > { %v16786_v30 = vpack.c.bf16 %v16784_v20, %v16785_v48 }
 0x289   : > { %v2254_v17 = vsel %vm2224_vm4, %v1789_v45, %v10807_v32  ;;  %v10117_v11 = vpop.f32.mrb[112].mxu0  ;;  %v16787_v32 = vld [vmem:[#allocation63_spill] sm:$0xff] }
 0x28a   : > { %v10118_v4 = vpop.f32.mrb[113].mxu0  ;;  %v2276_v14 = vpack.c.bf16 %v2254_v17, %v2253_v26  ;;  %v16789_v45 = vpack.c.bf16 %v16787_v32, %v16788_v63  ;;  %v16790_v26 = vld [vmem:[#allocation68_spill] sm:$0xff] }
 0x28b   : > { %v10119_v13 = vadd.f32 %v10118_v4, %v10117_v11  ;;  %v10120_v24 = vpop.f32.mrb[114].mxu0  ;;  %v16791_v17 = vpack.c.bf16 %v12729_v2, %v16790_v26  ;;  %v16792_v11 = vld [vmem:[#allocation67_spill] sm:$0xff]  ;;  %v16793_v4 = vld [vmem:[#allocation66_spill] sm:$0xff]  ;;  %v11002_v2 = vld [vmem:[%s16413_s3 + $0x70] sm:$0xff]  }
 0x28c   : > { %v10121_v60 = vpop.f32.mrb[115].mxu0  ;;  %10481 = vmatprep.mubr.msk.bf16.mxu1 %vm2298_vm5, %v2276_v14  ;;  %v16794_v14 = vpack.c.bf16 %v16792_v11, %v16793_v4  ;;  %10559 = vmatprep.subr.bf16.mxu0 %v11002_v2 }
 0x28d   : > { %v1794_v22 = vadd.f32 %v10119_v13, %v1633_v35  ;;  %v10122_v0 = vadd.f32 %v10121_v60, %v10120_v24 }
 0x28f   : > { %v1797_v16 = vadd.f32 %v10122_v0, %v1636_v58  ;;  %v2255_v10 = vsel %vm2224_vm4, %v1794_v22, %v10811_v51 }
 0x291   : > { %v2256_v12 = vsel %vm2224_vm4, %v1797_v16, %v10812_v39 }
 0x292   : > { %v2277_v46 = vpack.c.bf16 %v2256_v12, %v2255_v10 }
 0x294   : > { %10482 = vmatmul.mubr.msk.bf16.gmra.mrb[108].mxu1 %vm2298_vm5, %v2277_v46 }
 0x295   : > { %10527 = vmatprep.mubr.msk.bf16.mxu1 %vm4052_vm6, %v16756_v47 }
 0x29c   : > { %10528 = vmatmul.mubr.msk.bf16.vlgmr.msra.gmra.mrb[112].mxu1 %vm4052_vm6, %v16759_v42 }
 0x29d   : > { %10531 = vmatprep.mubr.msk.bf16.mxu1 %vm4052_vm6, %v16762_v44 }
 0x2a4   : > { %10532 = vmatmul.mubr.msk.bf16.gmra.mrb[116].mxu1 %vm4052_vm6, %v16765_v61 }
 0x2a5   : > { %10535 = vmatprep.mubr.msk.bf16.mxu1 %vm4052_vm6, %v16768_v53 }
 0x2ac   : > { %10536 = vmatmul.mubr.msk.bf16.gmra.mrb[120].mxu1 %vm4052_vm6, %v16771_v15 }
 0x2ad   : > { %10539 = vmatprep.mubr.msk.bf16.mxu1 %vm4052_vm6, %v16774_v62 }
 0x2b4   : > { %10540 = vmatmul.mubr.msk.bf16.gmra.mrb[124].mxu1 %vm4052_vm6, %v16777_v9 }
 0x2b5   : > { %10543 = vmatprep.mubr.msk.bf16.mxu1 %vm4052_vm6, %v16780_v19 }
 0x2bc   : > { %10544 = vmatmul.mubr.msk.bf16.gmra.mrb[128].mxu1 %vm4052_vm6, %v16783_v41 }
 0x2bd   : > { %10547 = vmatprep.mubr.msk.bf16.mxu1 %vm4052_vm6, %v16786_v30 }
 0x2c4   : > { %10548 = vmatmul.mubr.msk.bf16.gmra.mrb[132].mxu1 %vm4052_vm6, %v16789_v45 }
 0x2c5   : > { %10551 = vmatprep.mubr.msk.bf16.mxu1 %vm4052_vm6, %v16791_v17 }
 0x2cc   : > { %10552 = vmatmul.mubr.msk.bf16.gmra.mrb[136].mxu1 %vm4052_vm6, %v16794_v14 }
 0x2cd   : > { %10555 = vmatprep.mubr.msk.bf16.mxu1 %vm4052_vm6, %v4030_v59 }
 0x2d4   : > { %10556 = vmatmul.mubr.msk.bf16.gmra.mrb[140].mxu1 %vm4052_vm6, %v4031_v52 }
 0x2f7   : > { %v10455_v35 = vpop.f32.mrb[80].mxu1 }
 0x2f8   : > { %v2385_v13 = vpop.f32.mrb[81].mxu1  ;;  %v12994_v3 = vadd.f32 %v10455_v35, %v12988_v33 }
 0x2f9   : > { %v12991_v55 = vadd.f32 %v12988_v33, %v2385_v13  ;;  %v10456_v28 = vpop.f32.mrb[82].mxu1 }
 0x2fa   : > { %16796 = vst [vmem:[#allocation39_spill] sm:$0xff] %v12994_v3  ;;  %v12997_v34 = vadd.f32 %v10456_v28, %v12988_v33  ;;  %v2388_v52 = vpop.f32.mrb[83].mxu1  ;;  %v2514_v58 = vmax.f32 %v12994_v3, 0.0 }
 0x2fb   : > { %16795 = vst [vmem:[#allocation7_spill] sm:$0xff] %v12991_v55  ;;  %v13000_v59 = vadd.f32 %v12988_v33, %v2388_v52  ;;  %v2512_v60 = vmax.f32 %v12991_v55, 0.0 }
 0x2fc   : > { %16797 = vst [vmem:[#allocation6_spill] sm:$0xff] %v12997_v34  ;;  %v2515_v24 = vmax.f32 %v12997_v34, 0.0 }
 0x2fd   : > { %16798 = vst [vmem:[#allocation9_spill] sm:$0xff] %v13000_v59  ;;  %v2513_v6 = vmax.f32 %v13000_v59, 0.0 }
 0x2fe   : > { %v2549_v0 = vpack.c.bf16 %v2515_v24, %v2514_v58 }
 0x2ff   : > { %v2548_v22 = vpack.c.bf16 %v2513_v6, %v2512_v60 }
 0x301   : > { %10489 = vmatprep.mubr.msk.bf16.mxu0 %vm2581_vm7, %v2548_v22 }
 0x302   : > { %10490 = vmatmul.mubr.msk.bf16.vlgmr.msra.gmra.mrb[116].mxu0 %vm2581_vm7, %v2549_v0 }
 0x303   : > { %10560 = vmatpush3.bf16.msra.mxu0 %v11002_v2 }
 0x304   : > { %10561 = vmatprep.subr.bf16.mxu0 %v11003_v31 }
 0x307   : > { %v10459_v39 = vpop.f32.mrb[84].mxu1  ;;  %10562 = vmatpush3.bf16.msra.mxu0 %v11003_v31 }
 0x308   : > { %v2401_v51 = vpop.f32.mrb[85].mxu1  ;;  %v13015_v12 = vadd.f32 %v10459_v39, %v12988_v33 }
 0x309   : > { %v13012_v16 = vadd.f32 %v12988_v33, %v2401_v51  ;;  %v10460_v10 = vpop.f32.mrb[86].mxu1 }
 0x30a   : > { %16800 = vst [vmem:[#allocation8_spill] sm:$0xff] %v13015_v12  ;;  %v13018_v46 = vadd.f32 %v10460_v10, %v12988_v33  ;;  %v2404_v43 = vpop.f32.mrb[87].mxu1  ;;  %v2518_v42 = vmax.f32 %v13015_v12, 0.0 }
 0x30b   : > { %16799 = vst [vmem:[#allocation41_spill] sm:$0xff] %v13012_v16  ;;  %v13021_v23 = vadd.f32 %v12988_v33, %v2404_v43  ;;  %v2516_v18 = vmax.f32 %v13012_v16, 0.0 }
 0x30c   : > { %16801 = vst [vmem:[#allocation38_spill] sm:$0xff] %v13018_v46  ;;  %v2519_v47 = vmax.f32 %v13018_v46, 0.0 }
 0x30d   : > { %16802 = vst [vmem:[#allocation40_spill] sm:$0xff] %v13021_v23  ;;  %v2517_v7 = vmax.f32 %v13021_v23, 0.0 }
 0x30e   : > { %v2551_v40 = vpack.c.bf16 %v2519_v47, %v2518_v42 }
 0x30f   : > { %v2550_v57 = vpack.c.bf16 %v2517_v7, %v2516_v18 }
 0x311   : > { %10493 = vmatprep.mubr.msk.bf16.mxu0 %vm2581_vm7, %v2550_v57 }
 0x312   : > { %10494 = vmatmul.mubr.msk.bf16.gmra.mrb[120].mxu0 %vm2581_vm7, %v2551_v40 }
 0x317   : > { %v10463_v44 = vpop.f32.mrb[88].mxu1 }
 0x318   : > { %v2417_v1 = vpop.f32.mrb[89].mxu1  ;;  %v13033_v21 = vadd.f32 %v10463_v44, %v12988_v33 }
 0x319   : > { %v13030_v36 = vadd.f32 %v12988_v33, %v2417_v1  ;;  %v10464_v61 = vpop.f32.mrb[90].mxu1 }
 0x31a   : > { %16804 = vst [vmem:[#allocation44_spill] sm:$0xff] %v13033_v21  ;;  %v13036_v8 = vadd.f32 %v10464_v61, %v12988_v33  ;;  %v2420_v53 = vpop.f32.mrb[91].mxu1  ;;  %v2522_v27 = vmax.f32 %v13033_v21, 0.0 }
 0x31b   : > { %16803 = vst [vmem:[#allocation45_spill] sm:$0xff] %v13030_v36  ;;  %v13039_v54 = vadd.f32 %v12988_v33, %v2420_v53  ;;  %v2520_v15 = vmax.f32 %v13030_v36, 0.0 }
 0x31c   : > { %16805 = vst [vmem:[#allocation43_spill] sm:$0xff] %v13036_v8  ;;  %v2523_v49 = vmax.f32 %v13036_v8, 0.0 }
 0x31d   : > { %16806 = vst [vmem:[#allocation42_spill] sm:$0xff] %v13039_v54  ;;  %v2521_v37 = vmax.f32 %v13039_v54, 0.0 }
 0x31e   : > { %v2553_v56 = vpack.c.bf16 %v2523_v49, %v2522_v27 }
 0x31f   : > { %v2552_v62 = vpack.c.bf16 %v2521_v37, %v2520_v15 }
 0x321   : > { %10497 = vmatprep.mubr.msk.bf16.mxu0 %vm2581_vm7, %v2552_v62 }
 0x322   : > { %10498 = vmatmul.mubr.msk.bf16.gmra.mrb[124].mxu0 %vm2581_vm7, %v2553_v56 }
 0x327   : > { %v10467_v50 = vpop.f32.mrb[92].mxu1 }
 0x328   : > { %v2433_v9 = vpop.f32.mrb[93].mxu1  ;;  %v13051_v19 = vadd.f32 %v10467_v50, %v12988_v33 }
 0x329   : > { %v13048_v29 = vadd.f32 %v12988_v33, %v2433_v9  ;;  %v10468_v38 = vpop.f32.mrb[94].mxu1 }
 0x32a   : > { %16808 = vst [vmem:[#allocation48_spill] sm:$0xff] %v13051_v19  ;;  %v13054_v5 = vadd.f32 %v10468_v38, %v12988_v33  ;;  %v2436_v25 = vpop.f32.mrb[95].mxu1  ;;  %v2526_v32 = vmax.f32 %v13051_v19, 0.0 }
 0x32b   : > { %16807 = vst [vmem:[#allocation49_spill] sm:$0xff] %v13048_v29  ;;  %v13057_v41 = vadd.f32 %v12988_v33, %v2436_v25  ;;  %v2524_v48 = vmax.f32 %v13048_v29, 0.0 }
 0x32c   : > { %16809 = vst [vmem:[#allocation47_spill] sm:$0xff] %v13054_v5  ;;  %v2527_v20 = vmax.f32 %v13054_v5, 0.0 }
 0x32d   : > { %16810 = vst [vmem:[#allocation46_spill] sm:$0xff] %v13057_v41  ;;  %v2525_v30 = vmax.f32 %v13057_v41, 0.0 }
 0x32e   : > { %v2555_v45 = vpack.c.bf16 %v2527_v20, %v2526_v32 }
 0x32f   : > { %v2554_v63 = vpack.c.bf16 %v2525_v30, %v2524_v48 }
 0x331   : > { %10501 = vmatprep.mubr.msk.bf16.mxu0 %vm2581_vm7, %v2554_v63 }
 0x332   : > { %10502 = vmatmul.mubr.msk.bf16.gmra.mrb[128].mxu0 %vm2581_vm7, %v2555_v45 }
 0x337   : > { %v10471_v26 = vpop.f32.mrb[96].mxu1 }
 0x338   : > { %v2449_v17 = vpop.f32.mrb[97].mxu1  ;;  %v13069_v14 = vadd.f32 %v10471_v26, %v12988_v33 }
 0x339   : > { %v13066_v11 = vadd.f32 %v12988_v33, %v2449_v17  ;;  %v10472_v4 = vpop.f32.mrb[98].mxu1 }
 0x33a   : > { %16812 = vst [vmem:[#allocation52_spill] sm:$0xff] %v13069_v14  ;;  %v13072_v2 = vadd.f32 %v10472_v4, %v12988_v33  ;;  %v2452_v35 = vpop.f32.mrb[99].mxu1  ;;  %v2530_v60 = vmax.f32 %v13069_v14, 0.0 }
 0x33b   : > { %16811 = vst [vmem:[#allocation53_spill] sm:$0xff] %v13066_v11  ;;  %v13075_v13 = vadd.f32 %v12988_v33, %v2452_v35  ;;  %v2528_v52 = vmax.f32 %v13066_v11, 0.0 }
 0x33c   : > { %16813 = vst [vmem:[#allocation51_spill] sm:$0xff] %v13072_v2  ;;  %v2531_v28 = vmax.f32 %v13072_v2, 0.0 }
 0x33d   : > { %16814 = vst [vmem:[#allocation50_spill] sm:$0xff] %v13075_v13  ;;  %v2529_v24 = vmax.f32 %v13075_v13, 0.0 }
 0x33e   : > { %v2557_v58 = vpack.c.bf16 %v2531_v28, %v2530_v60  ;;  %v13138_v60 = vld [vmem:[%s16414_s4 + $0x40] ss:$0 sm:$0xff] }
 0x33f   : > { %v2556_v6 = vpack.c.bf16 %v2529_v24, %v2528_v52 }
 0x341   : > { %10505 = vmatprep.mubr.msk.bf16.mxu0 %vm2581_vm7, %v2556_v6 }
 0x342   : > { %10506 = vmatmul.mubr.msk.bf16.gmra.mrb[132].mxu0 %vm2581_vm7, %v2557_v58 }
 0x347   : > { %v10475_v22 = vpop.f32.mrb[100].mxu1 }
 0x348   : > { %v2465_v0 = vpop.f32.mrb[101].mxu1  ;;  %v13087_v51 = vadd.f32 %v10475_v22, %v12988_v33 }
 0x349   : > { %v13084_v31 = vadd.f32 %v12988_v33, %v2465_v0  ;;  %v10476_v39 = vpop.f32.mrb[102].mxu1 }
 0x34a   : > { %16816 = vst [vmem:[#allocation56_spill] sm:$0xff] %v13087_v51  ;;  %v13090_v10 = vadd.f32 %v10476_v39, %v12988_v33  ;;  %v2468_v43 = vpop.f32.mrb[103].mxu1  ;;  %v2534_v57 = vmax.f32 %v13087_v51, 0.0 }
 0x34b   : > { %16815 = vst [vmem:[#allocation57_spill] sm:$0xff] %v13084_v31  ;;  %v13093_v47 = vadd.f32 %v12988_v33, %v2468_v43  ;;  %v2532_v7 = vmax.f32 %v13084_v31, 0.0 }
 0x34c   : > { %16817 = vst [vmem:[#allocation55_spill] sm:$0xff] %v13090_v10  ;;  %v2535_v18 = vmax.f32 %v13090_v10, 0.0 }
 0x34d   : > { %16818 = vst [vmem:[#allocation54_spill] sm:$0xff] %v13093_v47  ;;  %v2533_v42 = vmax.f32 %v13093_v47, 0.0 }
 0x34e   : > { %v2559_v44 = vpack.c.bf16 %v2535_v18, %v2534_v57 }
 0x34f   : > { %v2558_v40 = vpack.c.bf16 %v2533_v42, %v2532_v7 }
 0x351   : > { %10509 = vmatprep.mubr.msk.bf16.mxu0 %vm2581_vm7, %v2558_v40 }
 0x352   : > { %10510 = vmatmul.mubr.msk.bf16.gmra.mrb[136].mxu0 %vm2581_vm7, %v2559_v44 }
 0x357   : > { %v10479_v1 = vpop.f32.mrb[104].mxu1 }
 0x358   : > { %v2481_v61 = vpop.f32.mrb[105].mxu1  ;;  %v13105_v15 = vadd.f32 %v10479_v1, %v12988_v33 }
 0x359   : > { %v13102_v53 = vadd.f32 %v12988_v33, %v2481_v61  ;;  %v10480_v49 = vpop.f32.mrb[106].mxu1 }
 0x35a   : > { %16820 = vst [vmem:[#allocation60_spill] sm:$0xff] %v13105_v15  ;;  %v13108_v37 = vadd.f32 %v10480_v49, %v12988_v33  ;;  %v2484_v27 = vpop.f32.mrb[107].mxu1  ;;  %v2538_v38 = vmax.f32 %v13105_v15, 0.0 }
 0x35b   : > { %16819 = vst [vmem:[#allocation61_spill] sm:$0xff] %v13102_v53  ;;  %v13111_v62 = vadd.f32 %v12988_v33, %v2484_v27  ;;  %v2536_v50 = vmax.f32 %v13102_v53, 0.0 }
 0x35c   : > { %16821 = vst [vmem:[#allocation59_spill] sm:$0xff] %v13108_v37  ;;  %v2539_v56 = vmax.f32 %v13108_v37, 0.0 }
 0x35d   : > { %16822 = vst [vmem:[#allocation58_spill] sm:$0xff] %v13111_v62  ;;  %v2537_v9 = vmax.f32 %v13111_v62, 0.0 }
 0x35e   : > { %v2561_v20 = vpack.c.bf16 %v2539_v56, %v2538_v38 }
 0x35f   : > { %v2560_v25 = vpack.c.bf16 %v2537_v9, %v2536_v50 }
 0x361   : > { %10513 = vmatprep.mubr.msk.bf16.mxu0 %vm2581_vm7, %v2560_v25 }
 0x362   : > { %10514 = vmatmul.mubr.msk.bf16.gmra.mrb[140].mxu0 %vm2581_vm7, %v2561_v20 }
 0x367   : > { %v10483_v48 = vpop.f32.mrb[108].mxu1 }
 0x368   : > { %v2497_v30 = vpop.f32.mrb[109].mxu1  ;;  %v13123_v45 = vadd.f32 %v10483_v48, %v12988_v33 }
 0x369   : > { %v13120_v32 = vadd.f32 %v12988_v33, %v2497_v30  ;;  %v10484_v63 = vpop.f32.mrb[110].mxu1 }
 0x36a   : > { %16824 = vst [vmem:[#allocation64_spill] sm:$0xff] %v13123_v45  ;;  %v13126_v26 = vadd.f32 %v10484_v63, %v12988_v33  ;;  %v2500_v17 = vpop.f32.mrb[111].mxu1  ;;  %v2542_v24 = vmax.f32 %v13123_v45, 0.0 }
 0x36b   : > { %16823 = vst [vmem:[#allocation65_spill] sm:$0xff] %v13120_v32  ;;  %v13129_v4 = vadd.f32 %v12988_v33, %v2500_v17  ;;  %v2540_v28 = vmax.f32 %v13120_v32, 0.0 }
 0x36c   : > { %16825 = vst [vmem:[#allocation63_spill] sm:$0xff] %v13126_v26  ;;  %v2543_v35 = vmax.f32 %v13126_v26, 0.0 }
 0x36d   : > { %16826 = vst [vmem:[#allocation62_spill] sm:$0xff] %v13129_v4  ;;  %v2541_v52 = vmax.f32 %v13129_v4, 0.0 }
 0x36e   : > { %v2563_v22 = vpack.c.bf16 %v2543_v35, %v2542_v24 }
 0x36f   : > { %v2562_v6 = vpack.c.bf16 %v2541_v52, %v2540_v28  ;;  %v10529_v58 = vpop.f32.mrb[112].mxu1 }
 0x370   : > { %v4138_v0 = vpop.f32.mrb[113].mxu1  ;;  %v13145_v43 = vadd.f32 %v10529_v58, %v13138_v60 }
 0x371   : > { %v13141_v33 = vadd.f32 %v13138_v60, %v4138_v0  ;;  %10517 = vmatprep.mubr.msk.bf16.mxu0 %vm2581_vm7, %v2562_v6  ;;  %v10530_v39 = vpop.f32.mrb[114].mxu1 }
 0x372   : > { %16828 = vst [vmem:[#allocation67_spill] sm:$0xff] %v13145_v43  ;;  %v13148_v18 = vadd.f32 %v10530_v39, %v13138_v60  ;;  %10518 = vmatmul.mubr.msk.bf16.gmra.mrb[144].mxu0 %vm2581_vm7, %v2563_v22  ;;  %v4141_v7 = vpop.f32.mrb[115].mxu1  ;;  %v4267_v1 = vmax.f32 %v13145_v43, 0.0 }
 0x373   : > { %16827 = vst [vmem:[#allocation68_spill] sm:$0xff] %v13141_v33  ;;  %v13152_v42 = vadd.f32 %v13138_v60, %v4141_v7  ;;  %v4265_v40 = vmax.f32 %v13141_v33, 0.0 }
 0x374   : > { %16829 = vst [vmem:[#allocation66_spill] sm:$0xff] %v13148_v18  ;;  %v4268_v57 = vmax.f32 %v13148_v18, 0.0 }
 0x375   : > { %16830 = vst [vmem:[#allocation69_spill] sm:$0xff] %v13152_v42  ;;  %v4266_v44 = vmax.f32 %v13152_v42, 0.0 }
 0x376   : > { %v4302_v27 = vpack.c.bf16 %v4268_v57, %v4267_v1 }
 0x377   : > { %v4301_v61 = vpack.c.bf16 %v4266_v44, %v4265_v40  ;;  %v10533_v49 = vpop.f32.mrb[116].mxu1 }
 0x378   : > { %v4154_v56 = vpop.f32.mrb[117].mxu1  ;;  %v13163_v38 = vadd.f32 %v10533_v49, %v13138_v60 }
 0x379   : > { %v13159_v50 = vadd.f32 %v13138_v60, %v4154_v56  ;;  %v10534_v9 = vpop.f32.mrb[118].mxu1  ;;  %10563 = vmatprep.mubr.msk.bf16.mxu0 %vm2581_vm7, %v4301_v61 }
 0x37a   : > { %16832 = vst [vmem:[#allocation71_spill] sm:$0xff] %v13163_v38  ;;  %v13166_v25 = vadd.f32 %v10534_v9, %v13138_v60  ;;  %v4157_v20 = vpop.f32.mrb[119].mxu1  ;;  %10564 = vmatmul.mubr.msk.bf16.vlgmr.msra.gmra.mrb[148].mxu0 %vm2581_vm7, %v4302_v27  ;;  %v4271_v35 = vmax.f32 %v13163_v38, 0.0 }
 0x37b   : > { %16831 = vst [vmem:[#allocation70_spill] sm:$0xff] %v13159_v50  ;;  %v13170_v48 = vadd.f32 %v13138_v60, %v4157_v20  ;;  %v4269_v63 = vmax.f32 %v13159_v50, 0.0 }
 0x37c   : > { %16833 = vst [vmem:[#allocation72_spill] sm:$0xff] %v13166_v25  ;;  %v4272_v30 = vmax.f32 %v13166_v25, 0.0 }
 0x37d   : > { %16834 = vst [vmem:[#allocation73_spill] sm:$0xff] %v13170_v48  ;;  %v4270_v17 = vmax.f32 %v13170_v48, 0.0 }
 0x37e   : > { %v4304_v24 = vpack.c.bf16 %v4272_v30, %v4271_v35 }
 0x37f   : > { %v4303_v28 = vpack.c.bf16 %v4270_v17, %v4269_v63  ;;  %v10537_v52 = vpop.f32.mrb[120].mxu1 }
 0x380   : > { %v4170_v6 = vpop.f32.mrb[121].mxu1  ;;  %v13181_v0 = vadd.f32 %v10537_v52, %v13138_v60 }
 0x381   : > { %v13177_v58 = vadd.f32 %v13138_v60, %v4170_v6  ;;  %v10538_v22 = vpop.f32.mrb[122].mxu1  ;;  %10567 = vmatprep.mubr.msk.bf16.mxu0 %vm2581_vm7, %v4303_v28 }
 0x382   : > { %16836 = vst [vmem:[#allocation75_spill] sm:$0xff] %v13181_v0  ;;  %v13184_v39 = vadd.f32 %v10538_v22, %v13138_v60  ;;  %v4173_v7 = vpop.f32.mrb[123].mxu1  ;;  %10568 = vmatmul.mubr.msk.bf16.gmra.mrb[152].mxu0 %vm2581_vm7, %v4304_v24  ;;  %v4275_v61 = vmax.f32 %v13181_v0, 0.0 }
 0x383   : > { %16835 = vst [vmem:[#allocation74_spill] sm:$0xff] %v13177_v58  ;;  %v13188_v57 = vadd.f32 %v13138_v60, %v4173_v7  ;;  %v4273_v44 = vmax.f32 %v13177_v58, 0.0 }
 0x384   : > { %16837 = vst [vmem:[#allocation76_spill] sm:$0xff] %v13184_v39  ;;  %v4276_v40 = vmax.f32 %v13184_v39, 0.0 }
 0x385   : > { %16838 = vst [vmem:[#allocation77_spill] sm:$0xff] %v13188_v57  ;;  %v4274_v1 = vmax.f32 %v13188_v57, 0.0 }
 0x386   : > { %v4306_v56 = vpack.c.bf16 %v4276_v40, %v4275_v61 }
 0x387   : > { %v4305_v49 = vpack.c.bf16 %v4274_v1, %v4273_v44  ;;  %v10541_v27 = vpop.f32.mrb[124].mxu1 }
 0x388   : > { %v4186_v9 = vpop.f32.mrb[125].mxu1  ;;  %v13199_v63 = vadd.f32 %v10541_v27, %v13138_v60 }
 0x389   : > { %v13195_v20 = vadd.f32 %v13138_v60, %v4186_v9  ;;  %v10542_v30 = vpop.f32.mrb[126].mxu1  ;;  %10571 = vmatprep.mubr.msk.bf16.mxu0 %vm2581_vm7, %v4305_v49 }
 0x38a   : > { %16840 = vst [vmem:[#allocation79_spill] sm:$0xff] %v13199_v63  ;;  %v13202_v17 = vadd.f32 %v10542_v30, %v13138_v60  ;;  %v4189_v35 = vpop.f32.mrb[127].mxu1  ;;  %10572 = vmatmul.mubr.msk.bf16.gmra.mrb[156].mxu0 %vm2581_vm7, %v4306_v56  ;;  %v4279_v22 = vmax.f32 %v13199_v63, 0.0 }
 0x38b   : > { %16839 = vst [vmem:[#allocation78_spill] sm:$0xff] %v13195_v20  ;;  %v13206_v28 = vadd.f32 %v13138_v60, %v4189_v35  ;;  %v4277_v24 = vmax.f32 %v13195_v20, 0.0 }
 0x38c   : > { %16841 = vst [vmem:[#allocation80_spill] sm:$0xff] %v13202_v17  ;;  %v4280_v52 = vmax.f32 %v13202_v17, 0.0 }
 0x38d   : > { %16842 = vst [vmem:[#allocation81_spill] sm:$0xff] %v13206_v28  ;;  %v4278_v6 = vmax.f32 %v13206_v28, 0.0 }
 0x38e   : > { %v4308_v44 = vpack.c.bf16 %v4280_v52, %v4279_v22 }
 0x38f   : > { %v4307_v7 = vpack.c.bf16 %v4278_v6, %v4277_v24  ;;  %v10545_v40 = vpop.f32.mrb[128].mxu1 }
 0x390   : > { %v4202_v1 = vpop.f32.mrb[129].mxu1  ;;  %v13217_v27 = vadd.f32 %v10545_v40, %v13138_v60 }
 0x391   : > { %v13213_v61 = vadd.f32 %v13138_v60, %v4202_v1  ;;  %v10546_v49 = vpop.f32.mrb[130].mxu1  ;;  %10575 = vmatprep.mubr.msk.bf16.mxu0 %vm2581_vm7, %v4307_v7 }
 0x392   : > { %16844 = vst [vmem:[#allocation83_spill] sm:$0xff] %v13217_v27  ;;  %v13220_v56 = vadd.f32 %v10546_v49, %v13138_v60  ;;  %v4205_v9 = vpop.f32.mrb[131].mxu1  ;;  %10576 = vmatmul.mubr.msk.bf16.gmra.mrb[160].mxu0 %vm2581_vm7, %v4308_v44  ;;  %v4283_v6 = vmax.f32 %v13217_v27, 0.0 }
 0x393   : > { %16843 = vst [vmem:[#allocation82_spill] sm:$0xff] %v13213_v61  ;;  %v13224_v30 = vadd.f32 %v13138_v60, %v4205_v9  ;;  %v4281_v52 = vmax.f32 %v13213_v61, 0.0 }
 0x394   : > { %16845 = vst [vmem:[#allocation84_spill] sm:$0xff] %v13220_v56  ;;  %v4284_v35 = vmax.f32 %v13220_v56, 0.0 }
 0x395   : > { %16846 = vst [vmem:[#allocation85_spill] sm:$0xff] %v13224_v30  ;;  %v4282_v24 = vmax.f32 %v13224_v30, 0.0 }
 0x396   : > { %v4310_v40 = vpack.c.bf16 %v4284_v35, %v4283_v6 }
 0x397   : > { %v4309_v22 = vpack.c.bf16 %v4282_v24, %v4281_v52  ;;  %v10549_v7 = vpop.f32.mrb[132].mxu1 }
 0x398   : > { %v4218_v1 = vpop.f32.mrb[133].mxu1  ;;  %v13235_v44 = vadd.f32 %v10549_v7, %v13138_v60 }
 0x399   : > { %v13231_v49 = vadd.f32 %v13138_v60, %v4218_v1  ;;  %v10550_v63 = vpop.f32.mrb[134].mxu1  ;;  %10579 = vmatprep.mubr.msk.bf16.mxu0 %vm2581_vm7, %v4309_v22 }
 0x39a   : > { %16848 = vst [vmem:[#allocation87_spill] sm:$0xff] %v13235_v44  ;;  %v13238_v9 = vadd.f32 %v10550_v63, %v13138_v60  ;;  %v4221_v17 = vpop.f32.mrb[135].mxu1  ;;  %10580 = vmatmul.mubr.msk.bf16.gmra.mrb[164].mxu0 %vm2581_vm7, %v4310_v40  ;;  %v4287_v22 = vmax.f32 %v13235_v44, 0.0 }
 0x39b   : > { %16847 = vst [vmem:[#allocation86_spill] sm:$0xff] %v13231_v49  ;;  %v13242_v52 = vadd.f32 %v13138_v60, %v4221_v17  ;;  %v4285_v24 = vmax.f32 %v13231_v49, 0.0 }
 0x39c   : > { %16849 = vst [vmem:[#allocation88_spill] sm:$0xff] %v13238_v9  ;;  %v4288_v35 = vmax.f32 %v13238_v9, 0.0 }
 0x39d   : > { %16850 = vst [vmem:[#allocation89_spill] sm:$0xff] %v13242_v52  ;;  %v4286_v6 = vmax.f32 %v13242_v52, 0.0 }
 0x39e   : > { %v4312_v28 = vpack.c.bf16 %v4288_v35, %v4287_v22 }
 0x39f   : > { %v4311_v1 = vpack.c.bf16 %v4286_v6, %v4285_v24  ;;  %v10553_v7 = vpop.f32.mrb[136].mxu1 }
 0x3a0   : > { %v4234_v20 = vpop.f32.mrb[137].mxu1  ;;  %v13253_v17 = vadd.f32 %v10553_v7, %v13138_v60 }
 0x3a1   : > { %v13249_v63 = vadd.f32 %v13138_v60, %v4234_v20  ;;  %v10554_v39 = vpop.f32.mrb[138].mxu1  ;;  %10583 = vmatprep.mubr.msk.bf16.mxu0 %vm2581_vm7, %v4311_v1 }
 0x3a2   : > { %16852 = vst [vmem:[#allocation91_spill] sm:$0xff] %v13253_v17  ;;  %v13256_v40 = vadd.f32 %v10554_v39, %v13138_v60  ;;  %v4237_v0 = vpop.f32.mrb[139].mxu1  ;;  %10584 = vmatmul.mubr.msk.bf16.gmra.mrb[168].mxu0 %vm2581_vm7, %v4312_v28  ;;  %v4291_v22 = vmax.f32 %v13253_v17, 0.0 }
 0x3a3   : > { %16851 = vst [vmem:[#allocation90_spill] sm:$0xff] %v13249_v63  ;;  %v13260_v24 = vadd.f32 %v13138_v60, %v4237_v0  ;;  %v4289_v20 = vmax.f32 %v13249_v63, 0.0 }
 0x3a4   : > { %16853 = vst [vmem:[#allocation92_spill] sm:$0xff] %v13256_v40  ;;  %v4292_v35 = vmax.f32 %v13256_v40, 0.0 }
 0x3a5   : > { %16854 = vst [vmem:[#allocation93_spill] sm:$0xff] %v13260_v24  ;;  %v4290_v6 = vmax.f32 %v13260_v24, 0.0 }
 0x3a6   : > { %v4314_v57 = vpack.c.bf16 %v4292_v35, %v4291_v22 }
 0x3a7   : > { %v4313_v1 = vpack.c.bf16 %v4290_v6, %v4289_v20  ;;  %v10557_v7 = vpop.f32.mrb[140].mxu1 }
 0x3a8   : > { %v4250_v58 = vpop.f32.mrb[141].mxu1  ;;  %v13271_v0 = vadd.f32 %v10557_v7, %v13138_v60 }
 0x3a9   : > { %v13267_v39 = vadd.f32 %v13138_v60, %v4250_v58  ;;  %v10558_v25 = vpop.f32.mrb[142].mxu1  ;;  %10587 = vmatprep.mubr.msk.bf16.mxu0 %vm2581_vm7, %v4313_v1 }
 0x3aa   : > { %16856 = vst [vmem:[#allocation95_spill] sm:$0xff] %v13271_v0  ;;  %v13274_v28 = vadd.f32 %v10558_v25, %v13138_v60  ;;  %v4253_v40 = vpop.f32.mrb[143].mxu1  ;;  %10588 = vmatmul.mubr.msk.bf16.gmra.mrb[172].mxu0 %vm2581_vm7, %v4314_v57  ;;  %v4295_v22 = vmax.f32 %v13271_v0, 0.0  ;;  %v13289_v25 = vld [vmem:[%s16414_s4 + $0x28] ss:$0 sm:$0xff] }
 0x3ab   : > { %16855 = vst [vmem:[#allocation94_spill] sm:$0xff] %v13267_v39  ;;  %v13278_v20 = vadd.f32 %v13138_v60, %v4253_v40  ;;  %v4293_v58 = vmax.f32 %v13267_v39, 0.0 }
 0x3ac   : > { %16857 = vst [vmem:[#allocation96_spill] sm:$0xff] %v13274_v28  ;;  %v4296_v35 = vmax.f32 %v13274_v28, 0.0 }
 0x3ad   : > { %16858 = vst [vmem:[#allocation97_spill] sm:$0xff] %v13278_v20  ;;  %v4294_v6 = vmax.f32 %v13278_v20, 0.0 }
 0x3ae   : > { %v4316_v7 = vpack.c.bf16 %v4296_v35, %v4295_v22 }
 0x3af   : > { %v4315_v1 = vpack.c.bf16 %v4294_v6, %v4293_v58 }
 0x3b1   : > { %10591 = vmatprep.mubr.msk.bf16.mxu0 %vm2581_vm7, %v4315_v1 }
 0x3b2   : > { %10592 = vmatmul.mubr.msk.bf16.gmra.mrb[176].mxu0 %vm2581_vm7, %v4316_v7 }
 0x3d5   : > { %v10491_v60 = vpop.f32.mrb[116].mxu0 }
 0x3d6   : > { %v13292_v57 = vadd.f32 %v10491_v60, %v13289_v25  ;;  %v2664_v40 = vpop.f32.mrb[117].mxu0 }
 0x3d7   : > { %v10492_v28 = vpop.f32.mrb[118].mxu0  ;;  %v13295_v39 = vadd.f32 %v13289_v25, %v2664_v40 }
 0x3d8   : > { %v13298_v35 = vadd.f32 %v10492_v28, %v13289_v25  ;;  %v2667_v58 = vpop.f32.mrb[119].mxu0  ;;  %v2799_v6 = vsel %vm2581_vm7, %v13292_v57, 0.0 }
 0x3d9   : > { %2800 = vadd.xlane.f32.xlu0 %v2799_v6  ;;  %v13303_v22 = vadd.f32 %v13289_v25, %v2667_v58  ;;  %v2793_v7 = vsel %vm2581_vm7, %v13295_v39, 0.0 }
 0x3da   : > { %v2802_v1 = vsel %vm2581_vm7, %v13298_v35, 0.0 }
 0x3db   : > { %2803 = vadd.xlane.f32.xlu1 %v2802_v1  ;;  %v2796_v28 = vsel %vm2581_vm7, %v13303_v22, 0.0 }
 0x3dd   : > { %2794 = vadd.xlane.f32.xlu0 %v2793_v7 }
 0x3df   : > { %2797 = vadd.xlane.f32.xlu1 %v2796_v28 }
 0x3e5   : > { %v10495_v60 = vpop.f32.mrb[120].mxu0 }
 0x3e6   : > { %v13312_v40 = vadd.f32 %v10495_v60, %v13289_v25  ;;  %v2680_v6 = vpop.f32.mrb[121].mxu0 }
 0x3e7   : > { %v10496_v0 = vpop.f32.mrb[122].mxu0  ;;  %v13315_v58 = vadd.f32 %v13289_v25, %v2680_v6 }
 0x3e8   : > { %v13318_v20 = vadd.f32 %v10496_v0, %v13289_v25  ;;  %v2683_v1 = vpop.f32.mrb[123].mxu0  ;;  %v2811_v7 = vsel %vm2581_vm7, %v13312_v40, 0.0 }
 0x3e9   : > { %2812 = vadd.xlane.f32.xlu0 %v2811_v7  ;;  %v13323_v63 = vadd.f32 %v13289_v25, %v2683_v1  ;;  %v2805_v60 = vsel %vm2581_vm7, %v13315_v58, 0.0 }
 0x3ea   : > { %v2814_v28 = vsel %vm2581_vm7, %v13318_v20, 0.0 }
 0x3eb   : > { %2815 = vadd.xlane.f32.xlu1 %v2814_v28  ;;  %v2808_v0 = vsel %vm2581_vm7, %v13323_v63, 0.0 }
 0x3ed   : > { %2806 = vadd.xlane.f32.xlu0 %v2805_v60 }
 0x3ef   : > { %2809 = vadd.xlane.f32.xlu1 %v2808_v0 }
 0x3f5   : > { %v10499_v6 = vpop.f32.mrb[124].mxu0 }
 0x3f6   : > { %v13332_v17 = vadd.f32 %v10499_v6, %v13289_v25  ;;  %v2696_v7 = vpop.f32.mrb[125].mxu0 }
 0x3f7   : > { %v10500_v24 = vpop.f32.mrb[126].mxu0  ;;  %v13335_v1 = vadd.f32 %v13289_v25, %v2696_v7 }
 0x3f8   : > { %v13338_v38 = vadd.f32 %v10500_v24, %v13289_v25  ;;  %v2699_v28 = vpop.f32.mrb[127].mxu0  ;;  %v2823_v60 = vsel %vm2581_vm7, %v13332_v17, 0.0 }
 0x3f9   : > { %2824 = vadd.xlane.f32.xlu0 %v2823_v60  ;;  %v13343_v9 = vadd.f32 %v13289_v25, %v2699_v28  ;;  %v2817_v6 = vsel %vm2581_vm7, %v13335_v1, 0.0 }
 0x3fa   : > { %v2826_v0 = vsel %vm2581_vm7, %v13338_v38, 0.0 }
 0x3fb   : > { %2827 = vadd.xlane.f32.xlu1 %v2826_v0  ;;  %v2820_v24 = vsel %vm2581_vm7, %v13343_v9, 0.0 }
 0x3fd   : > { %2818 = vadd.xlane.f32.xlu0 %v2817_v6 }
 0x3ff   : > { %2821 = vadd.xlane.f32.xlu1 %v2820_v24 }
 0x405   : > { %v10503_v7 = vpop.f32.mrb[128].mxu0 }
 0x406   : > { %v13352_v48 = vadd.f32 %v10503_v7, %v13289_v25  ;;  %v2712_v60 = vpop.f32.mrb[129].mxu0 }
 0x407   : > { %v10504_v49 = vpop.f32.mrb[130].mxu0  ;;  %v13355_v28 = vadd.f32 %v13289_v25, %v2712_v60 }
 0x408   : > { %v13358_v44 = vadd.f32 %v10504_v49, %v13289_v25  ;;  %v2715_v0 = vpop.f32.mrb[131].mxu0  ;;  %v2835_v6 = vsel %vm2581_vm7, %v13352_v48, 0.0 }
 0x409   : > { %2836 = vadd.xlane.f32.xlu0 %v2835_v6  ;;  %v13363_v52 = vadd.f32 %v13289_v25, %v2715_v0  ;;  %v2829_v7 = vsel %vm2581_vm7, %v13355_v28, 0.0 }
 0x40a   : > { %v2838_v24 = vsel %vm2581_vm7, %v13358_v44, 0.0 }
 0x40b   : > { %2839 = vadd.xlane.f32.xlu1 %v2838_v24  ;;  %v2832_v49 = vsel %vm2581_vm7, %v13363_v52, 0.0 }
 0x40d   : > { %2830 = vadd.xlane.f32.xlu0 %v2829_v7 }
 0x40f   : > { %2833 = vadd.xlane.f32.xlu1 %v2832_v49 }
 0x415   : > { %v10507_v60 = vpop.f32.mrb[132].mxu0 }
 0x416   : > { %v13372_v50 = vadd.f32 %v10507_v60, %v13289_v25  ;;  %v2728_v6 = vpop.f32.mrb[133].mxu0 }
 0x417   : > { %v13375_v0 = vadd.f32 %v13289_v25, %v2728_v6  ;;  %v10508_v18 = vpop.f32.mrb[134].mxu0 }
 0x418   : > { %v2731_v56 = vpop.f32.mrb[135].mxu0  ;;  %v2847_v24 = vsel %vm2581_vm7, %v13372_v50, 0.0  ;;  %v13380_v43 = vadd.f32 %v10508_v18, %v13289_v25 }
 0x419   : > { %v13383_v7 = vadd.f32 %v13289_v25, %v2731_v56  ;;  %2848 = vadd.xlane.f32.xlu0 %v2847_v24  ;;  %v2841_v49 = vsel %vm2581_vm7, %v13375_v0, 0.0 }
 0x41a   : > { %2842 = vadd.xlane.f32.xlu1 %v2841_v49  ;;  %v2850_v6 = vsel %vm2581_vm7, %v13380_v43, 0.0 }
 0x41b   : > { %v2844_v60 = vsel %vm2581_vm7, %v13383_v7, 0.0 }
 0x41d   : > { %2845 = vadd.xlane.f32.xlu0 %v2844_v60 }
 0x41e   : > { %2851 = vadd.xlane.f32.xlu1 %v2850_v6 }
 0x425   : > { %v10511_v61 = vpop.f32.mrb[136].mxu0 }
 0x426   : > { %v13392_v18 = vadd.f32 %v10511_v61, %v13289_v25  ;;  %v2744_v27 = vpop.f32.mrb[137].mxu0 }
 0x427   : > { %v10512_v56 = vpop.f32.mrb[138].mxu0  ;;  %v13395_v24 = vadd.f32 %v13289_v25, %v2744_v27 }
 0x428   : > { %v13398_v30 = vadd.f32 %v10512_v56, %v13289_v25  ;;  %v2747_v49 = vpop.f32.mrb[139].mxu0  ;;  %v2859_v60 = vsel %vm2581_vm7, %v13392_v18, 0.0 }
 0x429   : > { %2860 = vadd.xlane.f32.xlu0 %v2859_v60  ;;  %v13403_v42 = vadd.f32 %v13289_v25, %v2747_v49  ;;  %v2853_v6 = vsel %vm2581_vm7, %v13395_v24, 0.0 }
 0x42a   : > { %v2862_v61 = vsel %vm2581_vm7, %v13398_v30, 0.0 }
 0x42b   : > { %2863 = vadd.xlane.f32.xlu1 %v2862_v61  ;;  %v2856_v27 = vsel %vm2581_vm7, %v13403_v42, 0.0 }
 0x42d   : > { %2854 = vadd.xlane.f32.xlu0 %v2853_v6 }
 0x42f   : > { %2857 = vadd.xlane.f32.xlu1 %v2856_v27 }
 0x435   : > { %v10515_v56 = vpop.f32.mrb[140].mxu0 }
 0x436   : > { %v13412_v33 = vadd.f32 %v10515_v56, %v13289_v25  ;;  %v2760_v60 = vpop.f32.mrb[141].mxu0 }
 0x437   : > { %v10516_v19 = vpop.f32.mrb[142].mxu0  ;;  %v13415_v49 = vadd.f32 %v13289_v25, %v2760_v60 }
 0x438   : > { %v13418_v45 = vadd.f32 %v10516_v19, %v13289_v25  ;;  %v2763_v61 = vpop.f32.mrb[143].mxu0  ;;  %v2871_v6 = vsel %vm2581_vm7, %v13412_v33, 0.0 }
 0x439   : > { %2872 = vadd.xlane.f32.xlu0 %v2871_v6  ;;  %v13423_v32 = vadd.f32 %v13289_v25, %v2763_v61  ;;  %v2865_v56 = vsel %vm2581_vm7, %v13415_v49, 0.0 }
 0x43a   : > { %v2874_v27 = vsel %vm2581_vm7, %v13418_v45, 0.0 }
 0x43b   : > { %2875 = vadd.xlane.f32.xlu1 %v2874_v27  ;;  %v2868_v19 = vsel %vm2581_vm7, %v13423_v32, 0.0 }
 0x43d   : > { %2866 = vadd.xlane.f32.xlu0 %v2865_v56 }
 0x43f   : > { %2869 = vadd.xlane.f32.xlu1 %v2868_v19 }
 0x445   : > { %v10519_v60 = vpop.f32.mrb[144].mxu0 }
 0x446   : > { %v13432_v53 = vadd.f32 %v10519_v60, %v13289_v25  ;;  %v2776_v6 = vpop.f32.mrb[145].mxu0  ;;  %v13450_v60 = vld [vmem:[%s16414_s4 + $0x48] ss:$0 sm:$0xff] }
 0x447   : > { %v10520_v15 = vpop.f32.mrb[146].mxu0  ;;  %v13435_v61 = vadd.f32 %v13289_v25, %v2776_v6 }
 0x448   : > { %v13438_v31 = vadd.f32 %v10520_v15, %v13289_v25  ;;  %v2779_v27 = vpop.f32.mrb[147].mxu0  ;;  %v2883_v56 = vsel %vm2581_vm7, %v13432_v53, 0.0 }
 0x449   : > { %2884 = vadd.xlane.f32.xlu0 %v2883_v56  ;;  %v13443_v51 = vadd.f32 %v13289_v25, %v2779_v27  ;;  %v2877_v15 = vsel %vm2581_vm7, %v13435_v61, 0.0 }
 0x44a   : > { %v2886_v19 = vsel %vm2581_vm7, %v13438_v31, 0.0 }
 0x44b   : > { %2887 = vadd.xlane.f32.xlu1 %v2886_v19  ;;  %v2880_v25 = vsel %vm2581_vm7, %v13443_v51, 0.0 }
 0x44d   : > { %v10565_v6 = vpop.f32.mrb[148].mxu0  ;;  %2878 = vadd.xlane.f32.xlu0 %v2877_v15 }
 0x44e   : > { %v13455_v5 = vadd.f32 %v10565_v6, %v13450_v60  ;;  %v4416_v56 = vpop.f32.mrb[149].mxu0 }
 0x44f   : > { %v10566_v27 = vpop.f32.mrb[150].mxu0  ;;  %2881 = vadd.xlane.f32.xlu1 %v2880_v25  ;;  %v13460_v19 = vadd.f32 %v13450_v60, %v4416_v56 }
 0x450   : > { %v13463_v11 = vadd.f32 %v10566_v27, %v13450_v60  ;;  %v4419_v26 = vpop.f32.mrb[151].mxu0  ;;  %v4551_v14 = vsel %vm2581_vm7, %v13455_v5, 0.0 }
 0x451   : > { %4552 = vadd.xlane.f32.xlu0 %v4551_v14  ;;  %v13468_v15 = vadd.f32 %v13450_v60, %v4419_v26  ;;  %v4545_v25 = vsel %vm2581_vm7, %v13460_v19, 0.0 }
 0x452   : > { %v4554_v6 = vsel %vm2581_vm7, %v13463_v11, 0.0 }
 0x453   : > { %4555 = vadd.xlane.f32.xlu1 %v4554_v6  ;;  %v4548_v62 = vsel %vm2581_vm7, %v13468_v15, 0.0 }
 0x455   : > { %v10569_v56 = vpop.f32.mrb[152].mxu0  ;;  %4546 = vadd.xlane.f32.xlu0 %v4545_v25 }
 0x456   : > { %v13475_v27 = vadd.f32 %v10569_v56, %v13450_v60  ;;  %v4432_v4 = vpop.f32.mrb[153].mxu0 }
 0x457   : > { %v10570_v14 = vpop.f32.mrb[154].mxu0  ;;  %4549 = vadd.xlane.f32.xlu1 %v4548_v62  ;;  %v13480_v26 = vadd.f32 %v13450_v60, %v4432_v4 }
 0x458   : > { %v13483_v37 = vadd.f32 %v10570_v14, %v13450_v60  ;;  %v4435_v6 = vpop.f32.mrb[155].mxu0  ;;  %v4563_v47 = vsel %vm2581_vm7, %v13475_v27, 0.0 }
 0x459   : > { %16859 = vst [vmem:[#allocation98_spill] sm:$0xff] %v13480_v26  ;;  %4564 = vadd.xlane.f32.xlu0 %v4563_v47  ;;  %v13488_v25 = vadd.f32 %v13450_v60, %v4435_v6  ;;  %v4557_v62 = vsel %vm2581_vm7, %v13480_v26, 0.0 }
 0x45a   : > { %16860 = vst [vmem:[#allocation99_spill] sm:$0xff] %v13483_v37  ;;  %v4566_v56 = vsel %vm2581_vm7, %v13483_v37, 0.0 }
 0x45b   : > { %16861 = vst [vmem:[#allocation100_spill] sm:$0xff] %v13488_v25  ;;  %4567 = vadd.xlane.f32.xlu1 %v4566_v56  ;;  %v4560_v10 = vsel %vm2581_vm7, %v13488_v25, 0.0 }
 0x45d   : > { %v10573_v4 = vpop.f32.mrb[156].mxu0  ;;  %4558 = vadd.xlane.f32.xlu0 %v4557_v62 }
 0x45e   : > { %v13495_v14 = vadd.f32 %v10573_v4, %v13450_v60  ;;  %v4448_v29 = vpop.f32.mrb[157].mxu0 }
 0x45f   : > { %v10574_v47 = vpop.f32.mrb[158].mxu0  ;;  %4561 = vadd.xlane.f32.xlu1 %v4560_v10  ;;  %v13500_v6 = vadd.f32 %v13450_v60, %v4448_v29 }
 0x460   : > { %16862 = vst [vmem:[#allocation101_spill] sm:$0xff] %v13495_v14  ;;  %v13503_v13 = vadd.f32 %v10574_v47, %v13450_v60  ;;  %v4451_v56 = vpop.f32.mrb[159].mxu0  ;;  %v4575_v2 = vsel %vm2581_vm7, %v13495_v14, 0.0 }
 0x461   : > { %16863 = vst [vmem:[#allocation102_spill] sm:$0xff] %v13500_v6  ;;  %4576 = vadd.xlane.f32.xlu0 %v4575_v2  ;;  %v13508_v62 = vadd.f32 %v13450_v60, %v4451_v56  ;;  %v4569_v10 = vsel %vm2581_vm7, %v13500_v6, 0.0 }
 0x462   : > { %16864 = vst [vmem:[#allocation103_spill] sm:$0xff] %v13503_v13  ;;  %v4578_v4 = vsel %vm2581_vm7, %v13503_v13, 0.0 }
 0x463   : > { %16865 = vst [vmem:[#allocation104_spill] sm:$0xff] %v13508_v62  ;;  %4579 = vadd.xlane.f32.xlu1 %v4578_v4  ;;  %v4572_v2 = vsel %vm2581_vm7, %v13508_v62, 0.0 }
 0x465   : > { %v10577_v29 = vpop.f32.mrb[160].mxu0  ;;  %4570 = vadd.xlane.f32.xlu0 %v4569_v10 }
 0x466   : > { %v13515_v47 = vadd.f32 %v10577_v29, %v13450_v60  ;;  %v2801_v36 = vpop.xlane.xlu0 %2800  ;;  %v4464_v21 = vpop.f32.mrb[161].mxu0 }
 0x467   : > { %v2892_v16 = vmul.f32 0.03125, %v2801_v36  ;;  %v10578_v56 = vpop.f32.mrb[162].mxu0  ;;  %4573 = vadd.xlane.f32.xlu1 %v4572_v2  ;;  %v13520_v12 = vadd.f32 %v13450_v60, %v4464_v21 }
 0x468   : > { %16866 = vst [vmem:[#allocation105_spill] sm:$0xff] %v13515_v47  ;;  %v13523_v4 = vadd.f32 %v10578_v56, %v13450_v60  ;;  %v2804_v41 = vpop.xlane.xlu1 %2803  ;;  %v4467_v54 = vpop.f32.mrb[163].mxu0  ;;  %v4587_v10 = vsel %vm2581_vm7, %v13515_v47, 0.0 }
 0x469   : > { %16867 = vst [vmem:[#allocation106_spill] sm:$0xff] %v13520_v12  ;;  %v2934_v29 = vrot.slane %v2892_v16, 4  ;;  %v2893_v8 = vmul.f32 0.03125, %v2804_v41  ;;  %4588 = vadd.xlane.f32.xlu0 %v4587_v10  ;;  %v13528_v55 = vadd.f32 %v13450_v60, %v4467_v54  ;;  %v4581_v46 = vsel %vm2581_vm7, %v13520_v12, 0.0 }
 0x46a   : > { %16868 = vst [vmem:[#allocation107_spill] sm:$0xff] %v13523_v4  ;;  %v2795_v36 = vpop.xlane.xlu0 %2794  ;;  %v4590_v2 = vsel %vm2581_vm7, %v13523_v4, 0.0 }
 0x46b   : > { %16869 = vst [vmem:[#allocation108_spill] sm:$0xff] %v13528_v55  ;;  %v2935_v21 = vadd.f32 %v2934_v29, %v2892_v16  ;;  %v2940_v23 = vrot.slane %v2893_v8, 4  ;;  %v2890_v3 = vmul.f32 0.03125, %v2795_v36  ;;  %4591 = vadd.xlane.f32.xlu1 %v4590_v2  ;;  %v4584_v16 = vsel %vm2581_vm7, %v13528_v55, 0.0 }
 0x46c   : > { %v2798_v56 = vpop.xlane.xlu1 %2797 }
 0x46d   : > { %v2936_v59 = vrot.slane %v2935_v21, 2  ;;  %v2941_v34 = vadd.f32 %v2940_v23, %v2893_v8  ;;  %v2922_v47 = vrot.slane %v2890_v3, 4  ;;  %v2891_v41 = vmul.f32 0.03125, %v2798_v56  ;;  %v10581_v10 = vpop.f32.mrb[164].mxu0  ;;  %4582 = vadd.xlane.f32.xlu0 %v4581_v46 }
 0x46e   : > { %v13535_v54 = vadd.f32 %v10581_v10, %v13450_v60  ;;  %v4480_v62 = vpop.f32.mrb[165].mxu0 }
 0x46f   : > { %v2937_v29 = vadd.f32 %v2936_v59, %v2935_v21  ;;  %v2942_v36 = vrot.slane %v2941_v34, 2  ;;  %v2923_v2 = vadd.f32 %v2922_v47, %v2890_v3  ;;  %v2928_v4 = vrot.slane %v2891_v41, 4  ;;  %v10582_v6 = vpop.f32.mrb[166].mxu0  ;;  %4585 = vadd.xlane.f32.xlu1 %v4584_v16 }
 0x470   : > { %16870 = vst [vmem:[#allocation109_spill] sm:$0xff] %v13535_v54  ;;  %v13540_v12 = vadd.f32 %v13450_v60, %v4480_v62  ;;  %v13543_v23 = vadd.f32 %v10582_v6, %v13450_v60  ;;  %v4483_v46 = vpop.f32.mrb[167].mxu0  ;;  %v4599_v8 = vsel %vm2581_vm7, %v13535_v54, 0.0 }
 0x471   : > { %v2938_v56 = vrot.slane %v2937_v29, 1  ;;  %v2943_v10 = vadd.f32 %v2942_v36, %v2941_v34  ;;  %v2924_v13 = vrot.slane %v2923_v2, 2  ;;  %v2929_v55 = vadd.f32 %v2928_v4, %v2891_v41  ;;  %4600 = vadd.xlane.f32.xlu0 %v4599_v8 }
 0x472   : > { %16871 = vst [vmem:[#allocation110_spill] sm:$0xff] %v13540_v12  ;;  %16872 = vst [vmem:[#allocation111_spill] sm:$0xff] %v13543_v23  ;;  %v13548_v3 = vadd.f32 %v13450_v60, %v4483_v46  ;;  %v4602_v59 = vsel %vm2581_vm7, %v13543_v23, 0.0  ;;  %v4593_v16 = vsel %vm2581_vm7, %v13540_v12, 0.0 }
 0x473   : > { %v2944_v62 = vrot.slane %v2943_v10, 1  ;;  %v2925_v47 = vadd.f32 %v2924_v13, %v2923_v2  ;;  %v2930_v21 = vrot.slane %v2929_v55, 2  ;;  %4603 = vadd.xlane.f32.xlu1 %v4602_v59  ;;  %v2939_v6 = vadd.f32 %v2938_v56, %v2937_v29 }
 0x474   : > { %16873 = vst [vmem:[#allocation112_spill] sm:$0xff] %v13548_v3  ;;  %v4596_v13 = vsel %vm2581_vm7, %v13548_v3, 0.0 }
 0x475   : > { %v2926_v54 = vrot.slane %v2925_v47, 1  ;;  %v2931_v14 = vadd.f32 %v2930_v21, %v2929_v55  ;;  %v10585_v34 = vpop.f32.mrb[168].mxu0  ;;  %4594 = vadd.xlane.f32.xlu0 %v4593_v16  ;;  %v3117_v4 = vmul.f32 0.125, %v2939_v6  ;;  %v2945_v41 = vadd.f32 %v2944_v62, %v2943_v10 }
 0x476   : > { %v13555_v36 = vadd.f32 %v10585_v34, %v13450_v60  ;;  %v4496_v46 = vpop.f32.mrb[169].mxu0  ;;  %v2813_v8 = vpop.xlane.xlu0 %2812 }
 0x477   : > { %v2932_v2 = vrot.slane %v2931_v14, 1  ;;  %v13560_v29 = vadd.f32 %v13450_v60, %v4496_v46  ;;  %v2896_v56 = vmul.f32 0.03125, %v2813_v8  ;;  %v10586_v59 = vpop.f32.mrb[170].mxu0  ;;  %4597 = vadd.xlane.f32.xlu1 %v4596_v13  ;;  %v13563_v55 = vsub.f32 %v13292_v57, %v3117_v4 }
 0x478   : > { %16874 = vst [vmem:[#allocation113_spill] sm:$0xff] %v13555_v36  ;;  %v13566_v10 = vadd.f32 %v10586_v59, %v13450_v60  ;;  %v4499_v62 = vpop.f32.mrb[171].mxu0  ;;  %v2816_v21 = vpop.xlane.xlu1 %2815  ;;  %v4611_v6 = vsel %vm2581_vm7, %v13555_v36, 0.0  ;;  %v3118_v16 = vmul.f32 0.125, %v2945_v41  ;;  %v2927_v34 = vadd.f32 %v2926_v54, %v2925_v47 }
 0x479   : > { %16875 = vst [vmem:[#allocation114_spill] sm:$0xff] %v13560_v29  ;;  %16876 = vst [vmem:[#allocation115_spill] sm:$0xff] %v13563_v55  ;;  %v2958_v3 = vrot.slane %v2896_v56, 4  ;;  %v2897_v12 = vmul.f32 0.03125, %v2816_v21  ;;  %4612 = vadd.xlane.f32.xlu0 %v4611_v6  ;;  %v13571_v46 = vadd.f32 %v13450_v60, %v4499_v62  ;;  %v4605_v54 = vsel %vm2581_vm7, %v13560_v29, 0.0 }
 0x47a   : > { %16877 = vst [vmem:[#allocation116_spill] sm:$0xff] %v13566_v10  ;;  %v2807_v8 = vpop.xlane.xlu0 %2806  ;;  %v4614_v57 = vsel %vm2581_vm7, %v13566_v10, 0.0  ;;  %v13576_v4 = vsub.f32 %v13298_v35, %v3118_v16  ;;  %v3115_v13 = vmul.f32 0.125, %v2927_v34  ;;  %v3181_v47 = vmul.f32 %v13563_v55, %v13563_v55 }
 0x47b   : > { %16878 = vst [vmem:[#allocation117_spill] sm:$0xff] %v13571_v46  ;;  %v2959_v59 = vadd.f32 %v2958_v3, %v2896_v56  ;;  %v2964_v23 = vrot.slane %v2897_v12, 4  ;;  %v2894_v25 = vmul.f32 0.03125, %v2807_v8  ;;  %4615 = vadd.xlane.f32.xlu1 %v4614_v57  ;;  %v2933_v21 = vadd.f32 %v2932_v2, %v2931_v14 }
 0x47c   : > { %16879 = vst [vmem:[#allocation118_spill] sm:$0xff] %v13576_v4  ;;  %v2810_v41 = vpop.xlane.xlu1 %2809  ;;  %v13583_v62 = vsub.f32 %v13295_v39, %v3115_v13  ;;  %v4608_v56 = vsel %vm2581_vm7, %v13571_v46, 0.0  ;;  %v3182_v8 = vmul.f32 %v13576_v4, %v13576_v4 }
 0x47d   : > { %v2960_v6 = vrot.slane %v2959_v59, 2  ;;  %v2965_v10 = vadd.f32 %v2964_v23, %v2897_v12  ;;  %v2946_v35 = vrot.slane %v2894_v25, 4  ;;  %v2895_v16 = vmul.f32 0.03125, %v2810_v41  ;;  %v10589_v34 = vpop.f32.mrb[172].mxu0  ;;  %4606 = vadd.xlane.f32.xlu0 %v4605_v54 }
 0x47e   : > { %16880 = vst [vmem:[#allocation119_spill] sm:$0xff] %v13583_v62  ;;  %v4512_v3 = vpop.f32.mrb[173].mxu0  ;;  %v3116_v57 = vmul.f32 0.125, %v2933_v21  ;;  %v3217_v12 = vsel %vm2581_vm7, %v3181_v47, 0.0  ;;  %v3179_v23 = vmul.f32 %v13583_v62, %v13583_v62  ;;  %v3220_v21 = vsel %vm2581_vm7, %v3182_v8, 0.0 }
 0x47f   : > { %v2966_v29 = vrot.slane %v2965_v10, 2  ;;  %v2947_v55 = vadd.f32 %v2946_v35, %v2894_v25  ;;  %v2952_v36 = vrot.slane %v2895_v16, 4  ;;  %v10590_v39 = vpop.f32.mrb[174].mxu0  ;;  %4609 = vadd.xlane.f32.xlu1 %v4608_v56  ;;  %v2961_v14 = vadd.f32 %v2960_v6, %v2959_v59 }
 0x480   : > { %v4515_v2 = vpop.f32.mrb[175].mxu0  ;;  %v13593_v13 = vsub.f32 %v13303_v22, %v3116_v57  ;;  %v13599_v47 = vadd.f32 %v10589_v34, %v13450_v60  ;;  %v3211_v56 = vsel %vm2581_vm7, %v3179_v23, 0.0  ;;  %v13603_v22 = vadd.f32 %v10590_v39, %v13450_v60 }
 0x481   : > { %v2948_v41 = vrot.slane %v2947_v55, 2  ;;  %v2953_v54 = vadd.f32 %v2952_v36, %v2895_v16  ;;  %3218 = vadd.xlane.f32.xlu0 %v3217_v12  ;;  %v2967_v4 = vadd.f32 %v2966_v29, %v2965_v10  ;;  %v2962_v59 = vrot.slane %v2961_v14, 1 }
 0x482   : > { %16881 = vst [vmem:[#allocation120_spill] sm:$0xff] %v13593_v13  ;;  %v3180_v25 = vmul.f32 %v13593_v13, %v13593_v13  ;;  %16882 = vst [vmem:[#allocation121_spill] sm:$0xff] %v13599_v47 }
 0x483   : > { %v2954_v35 = vrot.slane %v2953_v54, 2  ;;  %3221 = vadd.xlane.f32.xlu1 %v3220_v21  ;;  %v2949_v6 = vadd.f32 %v2948_v41, %v2947_v55  ;;  %16883 = vst [vmem:[#allocation122_spill] sm:$0xff] %v13603_v22  ;;  %v2968_v29 = vrot.slane %v2967_v4, 1  ;;  %v13610_v55 = vadd.f32 %v13450_v60, %v4512_v3 }
 0x484   : > { %v3214_v12 = vsel %vm2581_vm7, %v3180_v25, 0.0  ;;  %v2963_v41 = vadd.f32 %v2962_v59, %v2961_v14  ;;  %v4626_v59 = vsel %vm2581_vm7, %v13603_v22, 0.0 }
 0x485   : > { %v10593_v36 = vpop.f32.mrb[176].mxu0  ;;  %3212 = vadd.xlane.f32.xlu0 %v3211_v56  ;;  %v2955_v10 = vadd.f32 %v2954_v35, %v2953_v54  ;;  %v2950_v21 = vrot.slane %v2949_v6, 1 }
 0x486   : > { %v13606_v16 = vadd.f32 %v10593_v36, %v13450_v60  ;;  %v4528_v8 = vpop.f32.mrb[177].mxu0  ;;  %v2825_v57 = vpop.xlane.xlu0 %2824  ;;  %v4623_v36 = vsel %vm2581_vm7, %v13599_v47, 0.0 }
 0x487   : > { %v13613_v34 = vadd.f32 %v13450_v60, %v4528_v8  ;;  %v2900_v23 = vmul.f32 0.03125, %v2825_v57  ;;  %v10594_v39 = vpop.f32.mrb[178].mxu0  ;;  %3215 = vadd.xlane.f32.xlu1 %v3214_v12  ;;  %v2969_v8 = vadd.f32 %v2968_v29, %v2967_v4  ;;  %v2956_v57 = vrot.slane %v2955_v10, 1 }
 0x488   : > { %v13616_v54 = vadd.f32 %v10594_v39, %v13450_v60  ;;  %v4531_v35 = vpop.f32.mrb[179].mxu0  ;;  %v2828_v56 = vpop.xlane.xlu1 %2827  ;;  %v13624_v12 = vadd.f32 %v13450_v60, %v4515_v2  ;;  %v2951_v47 = vadd.f32 %v2950_v21, %v2949_v6  ;;  %v4635_v6 = vsel %vm2581_vm7, %v13606_v16, 0.0 }
 0x489   : > { %v2982_v25 = vrot.slane %v2900_v23, 4  ;;  %v13621_v3 = vadd.f32 %v13450_v60, %v4531_v35  ;;  %v2901_v62 = vmul.f32 0.03125, %v2828_v56  ;;  %4624 = vadd.xlane.f32.xlu0 %v4623_v36  ;;  %v4617_v35 = vsel %vm2581_vm7, %v13610_v55, 0.0 }
 0x48a   : > { %v2819_v14 = vpop.xlane.xlu0 %2818  ;;  %v3121_v56 = vmul.f32 0.125, %v2963_v41  ;;  %v2957_v60 = vadd.f32 %v2956_v57, %v2955_v10  ;;  %v4620_v2 = vsel %vm2581_vm7, %v13624_v12, 0.0  ;;  %v3122_v22 = vmul.f32 0.125, %v2969_v8 }
 0x48b   : > { %v2983_v39 = vadd.f32 %v2982_v25, %v2900_v23  ;;  %v2988_v13 = vrot.slane %v2901_v62, 4  ;;  %v2898_v46 = vmul.f32 0.03125, %v2819_v14  ;;  %4627 = vadd.xlane.f32.xlu1 %v4626_v59  ;;  %v4638_v8 = vsel %vm2581_vm7, %v13616_v54, 0.0 }
 0x48c   : > { %v2822_v26 = vpop.xlane.xlu1 %2821  ;;  %v13635_v41 = vsub.f32 %v13312_v40, %v3121_v56  ;;  %v13640_v57 = vsub.f32 %v13318_v20, %v3122_v22  ;;  %v4629_v40 = vsel %vm2581_vm7, %v13613_v34, 0.0 }
 0x48d   : > { %v2984_v36 = vrot.slane %v2983_v39, 2  ;;  %v2989_v4 = vadd.f32 %v2988_v13, %v2901_v62  ;;  %v2970_v29 = vrot.slane %v2898_v46, 4  ;;  %v2899_v37 = vmul.f32 0.03125, %v2822_v26  ;;  %4618 = vadd.xlane.f32.xlu0 %v4617_v35 }
 0x48e   : > { %v3119_v62 = vmul.f32 0.125, %v2951_v47  ;;  %v3185_v47 = vmul.f32 %v13635_v41, %v13635_v41 }
 0x48f   : > { %v2985_v23 = vadd.f32 %v2984_v36, %v2983_v39  ;;  %v2990_v25 = vrot.slane %v2989_v4, 2  ;;  %v2971_v14 = vadd.f32 %v2970_v29, %v2898_v46  ;;  %v2976_v59 = vrot.slane %v2899_v37, 4  ;;  %4621 = vadd.xlane.f32.xlu1 %v4620_v2 }
 0x490   : > { %v3120_v46 = vmul.f32 0.125, %v2957_v60  ;;  %v4632_v60 = vsel %vm2581_vm7, %v13621_v3, 0.0 }
 0x491   : > { %v2986_v13 = vrot.slane %v2985_v23, 1  ;;  %v2991_v26 = vadd.f32 %v2990_v25, %v2989_v4  ;;  %v2972_v21 = vrot.slane %v2971_v14, 2  ;;  %v2977_v10 = vadd.f32 %v2976_v59, %v2899_v37  ;;  %4636 = vadd.xlane.f32.xlu0 %v4635_v6 }
 0x492   : > { %v13647_v37 = vsub.f32 %v13315_v58, %v3119_v62  ;;  %v13654_v25 = vsub.f32 %v13323_v63, %v3120_v46  ;;  %v3229_v62 = vsel %vm2581_vm7, %v3185_v47, 0.0 }
 0x493   : > { %v2987_v39 = vadd.f32 %v2986_v13, %v2985_v23  ;;  %v2992_v35 = vrot.slane %v2991_v26, 1  ;;  %v2973_v36 = vadd.f32 %v2972_v21, %v2971_v14  ;;  %v2978_v29 = vrot.slane %v2977_v10, 2  ;;  %4639 = vadd.xlane.f32.xlu1 %v4638_v8 }
 0x494   : > { %v3186_v23 = vmul.f32 %v13640_v57, %v13640_v57  ;;  %v3183_v13 = vmul.f32 %v13647_v37, %v13647_v37 }
 0x495   : > { %v2993_v56 = vadd.f32 %v2992_v35, %v2991_v26  ;;  %v2974_v4 = vrot.slane %v2973_v36, 1  ;;  %v2979_v2 = vadd.f32 %v2978_v29, %v2977_v10  ;;  %4630 = vadd.xlane.f32.xlu0 %v4629_v40  ;;  %v3125_v20 = vmul.f32 0.125, %v2987_v39 }
 0x496   : > { %v2837_v22 = vpop.xlane.xlu0 %2836  ;;  %v3232_v46 = vsel %vm2581_vm7, %v3186_v23, 0.0  ;;  %v3184_v35 = vmul.f32 %v13654_v25, %v13654_v25 }
 0x497   : > { %v2975_v14 = vadd.f32 %v2974_v4, %v2973_v36  ;;  %v2980_v59 = vrot.slane %v2979_v2, 1  ;;  %v2904_v6 = vmul.f32 0.03125, %v2837_v22  ;;  %4633 = vadd.xlane.f32.xlu1 %v4632_v60  ;;  %v13660_v26 = vsub.f32 %v13332_v17, %v3125_v20 }
 0x498   : > { %v2840_v58 = vpop.xlane.xlu1 %2839  ;;  %v3126_v21 = vmul.f32 0.125, %v2993_v56  ;;  %v3223_v56 = vsel %vm2581_vm7, %v3183_v13, 0.0 }
 0x499   : > { %v2981_v10 = vadd.f32 %v2980_v59, %v2979_v2  ;;  %v3006_v8 = vrot.slane %v2904_v6, 4  ;;  %v2905_v39 = vmul.f32 0.03125, %v2840_v58  ;;  %3230 = vadd.xlane.f32.xlu0 %v3229_v62  ;;  %v3123_v29 = vmul.f32 0.125, %v2975_v14 }
 0x49a   : > { %v2831_v63 = vpop.xlane.xlu0 %2830  ;;  %v13666_v36 = vsub.f32 %v13338_v38, %v3126_v21  ;;  %v3189_v2 = vmul.f32 %v13660_v26, %v13660_v26  ;;  %v3226_v14 = vsel %vm2581_vm7, %v3184_v35, 0.0 }
 0x49b   : > { %v3007_v40 = vadd.f32 %v3006_v8, %v2904_v6  ;;  %v3012_v47 = vrot.slane %v2905_v39, 4  ;;  %v2902_v4 = vmul.f32 0.03125, %v2831_v63  ;;  %3233 = vadd.xlane.f32.xlu1 %v3232_v46  ;;  %v13672_v20 = vsub.f32 %v13335_v1, %v3123_v29 }
 0x49c   : > { %v2834_v17 = vpop.xlane.xlu1 %2833  ;;  %v3124_v22 = vmul.f32 0.125, %v2981_v10  ;;  %v3190_v6 = vmul.f32 %v13666_v36, %v13666_v36  ;;  %v3241_v1 = vsel %vm2581_vm7, %v3189_v2, 0.0 }
 0x49d   : > { %16884 = vst [vmem:[#allocation123_spill] sm:$0xff] %v13672_v20  ;;  %v3008_v60 = vrot.slane %v3007_v40, 2  ;;  %v3013_v23 = vadd.f32 %v3012_v47, %v2905_v39  ;;  %v2994_v59 = vrot.slane %v2902_v4, 4  ;;  %v2903_v38 = vmul.f32 0.03125, %v2834_v17  ;;  %3224 = vadd.xlane.f32.xlu0 %v3223_v56 }
 0x49e   : > { %v13678_v58 = vsub.f32 %v13343_v9, %v3124_v22  ;;  %v3187_v10 = vmul.f32 %v13672_v20, %v13672_v20  ;;  %v3244_v29 = vsel %vm2581_vm7, %v3190_v6, 0.0 }
 0x49f   : > { %v3009_v62 = vadd.f32 %v3008_v60, %v3007_v40  ;;  %v3014_v13 = vrot.slane %v3013_v23, 2  ;;  %v2995_v21 = vadd.f32 %v2994_v59, %v2902_v4  ;;  %v3000_v8 = vrot.slane %v2903_v38, 4  ;;  %3227 = vadd.xlane.f32.xlu1 %v3226_v14 }
 0x4a0   : > { %v3188_v9 = vmul.f32 %v13678_v58, %v13678_v58  ;;  %v3235_v56 = vsel %vm2581_vm7, %v3187_v10, 0.0 }
 0x4a1   : > { %v3010_v39 = vrot.slane %v3009_v62, 1  ;;  %v3015_v63 = vadd.f32 %v3014_v13, %v3013_v23  ;;  %v2996_v46 = vrot.slane %v2995_v21, 2  ;;  %v3001_v35 = vadd.f32 %v3000_v8, %v2903_v38  ;;  %3242 = vadd.xlane.f32.xlu0 %v3241_v1 }
 0x4a2   : > { %v3238_v38 = vsel %vm2581_vm7, %v3188_v9, 0.0 }
 0x4a3   : > { %v3011_v40 = vadd.f32 %v3010_v39, %v3009_v62  ;;  %v3016_v47 = vrot.slane %v3015_v63, 1  ;;  %v2997_v4 = vadd.f32 %v2996_v46, %v2995_v21  ;;  %v3002_v17 = vrot.slane %v3001_v35, 2  ;;  %3245 = vadd.xlane.f32.xlu1 %v3244_v29 }
 0x4a5   : > { %v3017_v2 = vadd.f32 %v3016_v47, %v3015_v63  ;;  %v2998_v22 = vrot.slane %v2997_v4, 1  ;;  %v3003_v60 = vadd.f32 %v3002_v17, %v3001_v35  ;;  %3236 = vadd.xlane.f32.xlu0 %v3235_v56  ;;  %v3129_v23 = vmul.f32 0.125, %v3011_v40 }
 0x4a6   : > { %v2849_v59 = vpop.xlane.xlu0 %2848 }
 0x4a7   : > { %v2999_v14 = vadd.f32 %v2998_v22, %v2997_v4  ;;  %v3004_v6 = vrot.slane %v3003_v60, 1  ;;  %v2908_v13 = vmul.f32 0.03125, %v2849_v59  ;;  %3239 = vadd.xlane.f32.xlu1 %v3238_v38  ;;  %v2843_v8 = vpop.xlane.xlu1 %2842  ;;  %v13689_v62 = vsub.f32 %v13352_v48, %v3129_v23 }
 0x4a8   : > { %v2906_v21 = vmul.f32 0.03125, %v2843_v8  ;;  %v3130_v1 = vmul.f32 0.125, %v3017_v2 }
 0x4a9   : > { %16885 = vst [vmem:[#allocation124_spill] sm:$0xff] %v13689_v62  ;;  %v3005_v39 = vadd.f32 %v3004_v6, %v3003_v60  ;;  %v3030_v10 = vrot.slane %v2908_v13, 4  ;;  %v3193_v63 = vmul.f32 %v13689_v62, %v13689_v62  ;;  %v3127_v46 = vmul.f32 0.125, %v2999_v14 }
 0x4aa   : > { %v3018_v35 = vrot.slane %v2906_v21, 4  ;;  %v2846_v29 = vpop.xlane.xlu0 %2845  ;;  %v13694_v9 = vsub.f32 %v13358_v44, %v3130_v1 }
 0x4ab   : > { %v3031_v40 = vadd.f32 %v3030_v10, %v2908_v13  ;;  %v2907_v47 = vmul.f32 0.03125, %v2846_v29  ;;  %v2852_v4 = vpop.xlane.xlu1 %2851  ;;  %v3253_v17 = vsel %vm2581_vm7, %v3193_v63, 0.0  ;;  %v13698_v48 = vsub.f32 %v13355_v28, %v3127_v46 }
 0x4ac   : > { %v3019_v56 = vadd.f32 %v3018_v35, %v2906_v21  ;;  %v2909_v2 = vmul.f32 0.03125, %v2852_v4  ;;  %3254 = vadd.xlane.f32.xlu0 %v3253_v17  ;;  %v3194_v22 = vmul.f32 %v13694_v9, %v13694_v9  ;;  %v3128_v60 = vmul.f32 0.125, %v3005_v39 }
 0x4ad   : > { %16886 = vst [vmem:[#allocation125_spill] sm:$0xff] %v13698_v48  ;;  %v3032_v23 = vrot.slane %v3031_v40, 2  ;;  %v3024_v59 = vrot.slane %v2907_v47, 4  ;;  %v3191_v44 = vmul.f32 %v13698_v48, %v13698_v48 }
 0x4ae   : > { %v3020_v38 = vrot.slane %v3019_v56, 2  ;;  %v3036_v14 = vrot.slane %v2909_v2, 4  ;;  %v3256_v6 = vsel %vm2581_vm7, %v3194_v22, 0.0  ;;  %v13706_v13 = vsub.f32 %v13363_v52, %v3128_v60 }
 0x4af   : > { %v3033_v28 = vadd.f32 %v3032_v23, %v3031_v40  ;;  %v3025_v8 = vadd.f32 %v3024_v59, %v2907_v47  ;;  %3257 = vadd.xlane.f32.xlu1 %v3256_v6  ;;  %v3247_v21 = vsel %vm2581_vm7, %v3191_v44, 0.0 }
 0x4b0   : > { %v3021_v1 = vadd.f32 %v3020_v38, %v3019_v56  ;;  %v3037_v10 = vadd.f32 %v3036_v14, %v2909_v2  ;;  %3248 = vadd.xlane.f32.xlu0 %v3247_v21  ;;  %v3192_v39 = vmul.f32 %v13706_v13, %v13706_v13 }
 0x4b1   : > { %v3034_v63 = vrot.slane %v3033_v28, 1  ;;  %v3026_v46 = vrot.slane %v3025_v8, 2 }
 0x4b2   : > { %v3022_v35 = vrot.slane %v3021_v1, 1  ;;  %v3038_v29 = vrot.slane %v3037_v10, 2  ;;  %v3250_v4 = vsel %vm2581_vm7, %v3192_v39, 0.0 }
 0x4b3   : > { %v3035_v17 = vadd.f32 %v3034_v63, %v3033_v28  ;;  %v3027_v52 = vadd.f32 %v3026_v46, %v3025_v8  ;;  %3251 = vadd.xlane.f32.xlu1 %v3250_v4 }
 0x4b4   : > { %v3023_v40 = vadd.f32 %v3022_v35, %v3021_v1  ;;  %v3039_v47 = vadd.f32 %v3038_v29, %v3037_v10 }
 0x4b5   : > { %v3028_v22 = vrot.slane %v3027_v52, 1  ;;  %v3133_v60 = vmul.f32 0.125, %v3035_v17 }
 0x4b6   : > { %v3040_v23 = vrot.slane %v3039_v47, 1  ;;  %v2861_v56 = vpop.xlane.xlu0 %2860  ;;  %v3131_v2 = vmul.f32 0.125, %v3023_v40 }
 0x4b7   : > { %v3029_v59 = vadd.f32 %v3028_v22, %v3027_v52  ;;  %v2912_v44 = vmul.f32 0.03125, %v2861_v56  ;;  %v13713_v38 = vsub.f32 %v13372_v50, %v3133_v60 }
 0x4b8   : > { %v3041_v14 = vadd.f32 %v3040_v23, %v3039_v47  ;;  %v2864_v6 = vpop.xlane.xlu1 %2863  ;;  %v13716_v21 = vsub.f32 %v13375_v0, %v3131_v2 }
 0x4b9   : > { %16887 = vst [vmem:[#allocation126_spill] sm:$0xff] %v13713_v38  ;;  %v3054_v28 = vrot.slane %v2912_v44, 4  ;;  %v2913_v8 = vmul.f32 0.03125, %v2864_v6  ;;  %v3197_v1 = vmul.f32 %v13713_v38, %v13713_v38  ;;  %v3132_v10 = vmul.f32 0.125, %v3029_v59 }
 0x4ba   : > { %v2855_v39 = vpop.xlane.xlu0 %2854  ;;  %v3195_v63 = vmul.f32 %v13716_v21, %v13716_v21  ;;  %v3134_v46 = vmul.f32 0.125, %v3041_v14 }
 0x4bb   : > { %v3055_v35 = vadd.f32 %v3054_v28, %v2912_v44  ;;  %v3060_v29 = vrot.slane %v2913_v8, 4  ;;  %v2910_v50 = vmul.f32 0.03125, %v2855_v39  ;;  %v3265_v4 = vsel %vm2581_vm7, %v3197_v1, 0.0 }
 0x4bc   : > { %v2858_v17 = vpop.xlane.xlu1 %2857  ;;  %3266 = vadd.xlane.f32.xlu0 %v3265_v4  ;;  %v13724_v0 = vsub.f32 %v13380_v43, %v3134_v46  ;;  %v13727_v52 = vsub.f32 %v13383_v7, %v3132_v10  ;;  %v3259_v23 = vsel %vm2581_vm7, %v3195_v63, 0.0 }
 0x4bd   : > { %v3056_v40 = vrot.slane %v3055_v35, 2  ;;  %v3061_v47 = vadd.f32 %v3060_v29, %v2913_v8  ;;  %v3042_v22 = vrot.slane %v2910_v50, 4  ;;  %v2911_v60 = vmul.f32 0.03125, %v2858_v17 }
 0x4be   : > { %16888 = vst [vmem:[#allocation127_spill] sm:$0xff] %v13727_v52  ;;  %v3198_v56 = vmul.f32 %v13724_v0, %v13724_v0  ;;  %v3196_v7 = vmul.f32 %v13727_v52, %v13727_v52 }
 0x4bf   : > { %v3057_v2 = vadd.f32 %v3056_v40, %v3055_v35  ;;  %v3062_v59 = vrot.slane %v3061_v47, 2  ;;  %v3043_v44 = vadd.f32 %v3042_v22, %v2910_v50  ;;  %v3048_v14 = vrot.slane %v2911_v60, 4 }
 0x4c0   : > { %3260 = vadd.xlane.f32.xlu0 %v3259_v23  ;;  %v3268_v43 = vsel %vm2581_vm7, %v3198_v56, 0.0  ;;  %v3262_v35 = vsel %vm2581_vm7, %v3196_v7, 0.0 }
 0x4c1   : > { %v3058_v6 = vrot.slane %v3057_v2, 1  ;;  %v3063_v28 = vadd.f32 %v3062_v59, %v3061_v47  ;;  %v3044_v8 = vrot.slane %v3043_v44, 2  ;;  %v3049_v1 = vadd.f32 %v3048_v14, %v2911_v60  ;;  %3269 = vadd.xlane.f32.xlu1 %v3268_v43 }
 0x4c3   : > { %v3059_v10 = vadd.f32 %v3058_v6, %v3057_v2  ;;  %v3064_v39 = vrot.slane %v3063_v28, 1  ;;  %v3045_v63 = vadd.f32 %v3044_v8, %v3043_v44  ;;  %v3050_v46 = vrot.slane %v3049_v1, 2 }
 0x4c5   : > { %v3065_v29 = vadd.f32 %v3064_v39, %v3063_v28  ;;  %v3046_v50 = vrot.slane %v3045_v63, 1  ;;  %v3051_v4 = vadd.f32 %v3050_v46, %v3049_v1  ;;  %3263 = vadd.xlane.f32.xlu1 %v3262_v35  ;;  %v3137_v17 = vmul.f32 0.125, %v3059_v10 }
 0x4c6   : > { %v2873_v40 = vpop.xlane.xlu0 %2872 }
 0x4c7   : > { %v3047_v22 = vadd.f32 %v3046_v50, %v3045_v63  ;;  %v3052_v23 = vrot.slane %v3051_v4, 1  ;;  %v2916_v56 = vmul.f32 0.03125, %v2873_v40  ;;  %v13737_v47 = vsub.f32 %v13392_v18, %v3137_v17 }
 0x4c8   : > { %v2876_v60 = vpop.xlane.xlu1 %2875  ;;  %v3138_v59 = vmul.f32 0.125, %v3065_v29 }
 0x4c9   : > { %16889 = vst [vmem:[#allocation128_spill] sm:$0xff] %v13737_v47  ;;  %v3053_v2 = vadd.f32 %v3052_v23, %v3051_v4  ;;  %v3078_v14 = vrot.slane %v2916_v56, 4  ;;  %v2917_v44 = vmul.f32 0.03125, %v2876_v60  ;;  %v3201_v43 = vmul.f32 %v13737_v47, %v13737_v47 }
 0x4ca   : > { %v2867_v7 = vpop.xlane.xlu0 %2866  ;;  %v13742_v6 = vsub.f32 %v13398_v30, %v3138_v59  ;;  %v3135_v28 = vmul.f32 0.125, %v3047_v22 }
 0x4cb   : > { %v3079_v8 = vadd.f32 %v3078_v14, %v2916_v56  ;;  %v3084_v1 = vrot.slane %v2917_v44, 4  ;;  %v2914_v10 = vmul.f32 0.03125, %v2867_v7  ;;  %v3277_v39 = vsel %vm2581_vm7, %v3201_v43, 0.0 }
 0x4cc   : > { %v2870_v18 = vpop.xlane.xlu1 %2869  ;;  %3278 = vadd.xlane.f32.xlu0 %v3277_v39  ;;  %v3202_v63 = vmul.f32 %v13742_v6, %v13742_v6  ;;  %v13748_v46 = vsub.f32 %v13395_v24, %v3135_v28  ;;  %v3136_v35 = vmul.f32 0.125, %v3053_v2 }
 0x4cd   : > { %v3080_v29 = vrot.slane %v3079_v8, 2  ;;  %v3085_v50 = vadd.f32 %v3084_v1, %v2917_v44  ;;  %v3066_v4 = vrot.slane %v2914_v10, 4  ;;  %v2915_v30 = vmul.f32 0.03125, %v2870_v18 }
 0x4ce   : > { %16890 = vst [vmem:[#allocation129_spill] sm:$0xff] %v13748_v46  ;;  %v3280_v17 = vsel %vm2581_vm7, %v3202_v63, 0.0  ;;  %v3199_v40 = vmul.f32 %v13748_v46, %v13748_v46  ;;  %v13754_v22 = vsub.f32 %v13403_v42, %v3136_v35 }
 0x4cf   : > { %v3081_v23 = vadd.f32 %v3080_v29, %v3079_v8  ;;  %v3086_v56 = vrot.slane %v3085_v50, 2  ;;  %v3067_v60 = vadd.f32 %v3066_v4, %v2914_v10  ;;  %v3072_v59 = vrot.slane %v2915_v30, 4  ;;  %3281 = vadd.xlane.f32.xlu1 %v3280_v17 }
 0x4d0   : > { %v3271_v24 = vsel %vm2581_vm7, %v3199_v40, 0.0  ;;  %v3200_v2 = vmul.f32 %v13754_v22, %v13754_v22 }
 0x4d1   : > { %v3082_v14 = vrot.slane %v3081_v23, 1  ;;  %v3087_v44 = vadd.f32 %v3086_v56, %v3085_v50  ;;  %v3068_v43 = vrot.slane %v3067_v60, 2  ;;  %v3073_v7 = vadd.f32 %v3072_v59, %v2915_v30  ;;  %3272 = vadd.xlane.f32.xlu0 %v3271_v24 }
 0x4d2   : > { %v3274_v28 = vsel %vm2581_vm7, %v3200_v2, 0.0 }
 0x4d3   : > { %v3083_v1 = vadd.f32 %v3082_v14, %v3081_v23  ;;  %v3088_v42 = vrot.slane %v3087_v44, 1  ;;  %v3069_v39 = vadd.f32 %v3068_v43, %v3067_v60  ;;  %v3074_v8 = vrot.slane %v3073_v7, 2  ;;  %3275 = vadd.xlane.f32.xlu1 %v3274_v28 }
 0x4d5   : > { %v3089_v10 = vadd.f32 %v3088_v42, %v3087_v44  ;;  %v3070_v18 = vrot.slane %v3069_v39, 1  ;;  %v3075_v63 = vadd.f32 %v3074_v8, %v3073_v7  ;;  %v3141_v35 = vmul.f32 0.125, %v3083_v1 }
 0x4d6   : > { %v2885_v29 = vpop.xlane.xlu0 %2884 }
 0x4d7   : > { %v3071_v4 = vadd.f32 %v3070_v18, %v3069_v39  ;;  %v3076_v17 = vrot.slane %v3075_v63, 1  ;;  %v2920_v40 = vmul.f32 0.03125, %v2885_v29  ;;  %v13761_v50 = vsub.f32 %v13412_v33, %v3141_v35 }
 0x4d8   : > { %v2888_v30 = vpop.xlane.xlu1 %2887  ;;  %v3142_v56 = vmul.f32 0.125, %v3089_v10 }
 0x4d9   : > { %16891 = vst [vmem:[#allocation130_spill] sm:$0xff] %v13761_v50  ;;  %v3077_v59 = vadd.f32 %v3076_v17, %v3075_v63  ;;  %v3102_v24 = vrot.slane %v2920_v40, 4  ;;  %v2921_v23 = vmul.f32 0.03125, %v2888_v30  ;;  %v3205_v60 = vmul.f32 %v13761_v50, %v13761_v50 }
 0x4da   : > { %v2879_v2 = vpop.xlane.xlu0 %2878  ;;  %v13766_v14 = vsub.f32 %v13418_v45, %v3142_v56  ;;  %v3139_v44 = vmul.f32 0.125, %v3071_v4 }
 0x4db   : > { %v3103_v43 = vadd.f32 %v3102_v24, %v2920_v40  ;;  %v3108_v7 = vrot.slane %v2921_v23, 4  ;;  %v2918_v28 = vmul.f32 0.03125, %v2879_v2  ;;  %v3289_v1 = vsel %vm2581_vm7, %v3205_v60, 0.0 }
 0x4dc   : > { %v2882_v33 = vpop.xlane.xlu1 %2881  ;;  %3290 = vadd.xlane.f32.xlu0 %v3289_v1  ;;  %v3206_v42 = vmul.f32 %v13766_v14, %v13766_v14  ;;  %v13772_v39 = vsub.f32 %v13415_v49, %v3139_v44  ;;  %v3140_v8 = vmul.f32 0.125, %v3077_v59 }
 0x4dd   : > { %v3104_v10 = vrot.slane %v3103_v43, 2  ;;  %v3109_v18 = vadd.f32 %v3108_v7, %v2921_v23  ;;  %v3090_v63 = vrot.slane %v2918_v28, 4  ;;  %v2919_v45 = vmul.f32 0.03125, %v2882_v33 }
 0x4de   : > { %16892 = vst [vmem:[#allocation131_spill] sm:$0xff] %v13772_v39  ;;  %v3292_v35 = vsel %vm2581_vm7, %v3206_v42, 0.0  ;;  %v4553_v29 = vpop.xlane.xlu0 %4552  ;;  %v3203_v4 = vmul.f32 %v13772_v39, %v13772_v39  ;;  %v13778_v17 = vsub.f32 %v13423_v32, %v3140_v8 }
 0x4df   : > { %v3105_v40 = vadd.f32 %v3104_v10, %v3103_v43  ;;  %v3110_v30 = vrot.slane %v3109_v18, 2  ;;  %v3091_v56 = vadd.f32 %v3090_v63, %v2918_v28  ;;  %v3096_v24 = vrot.slane %v2919_v45, 4  ;;  %3293 = vadd.xlane.f32.xlu1 %v3292_v35 }
 0x4e0   : > { %v4643_v49 = vmul.f32 0.03125, %v4553_v29  ;;  %v4556_v59 = vpop.xlane.xlu1 %4555  ;;  %v3283_v23 = vsel %vm2581_vm7, %v3203_v4, 0.0  ;;  %v3204_v60 = vmul.f32 %v13778_v17, %v13778_v17 }
 0x4e1   : > { %v3106_v2 = vrot.slane %v3105_v40, 1  ;;  %v3097_v44 = vadd.f32 %v3096_v24, %v2919_v45  ;;  %3284 = vadd.xlane.f32.xlu0 %v3283_v23  ;;  %v3111_v7 = vadd.f32 %v3110_v30, %v3109_v18  ;;  %v4644_v33 = vmul.f32 0.03125, %v4556_v59 }
 0x4e2   : > { %v4685_v1 = vrot.slane %v4643_v49, 4  ;;  %v3286_v32 = vsel %vm2581_vm7, %v3204_v60, 0.0  ;;  %v4547_v43 = vpop.xlane.xlu0 %4546  ;;  %v3092_v28 = vrot.slane %v3091_v56, 2 }
 0x4e3   : > { %v3107_v42 = vadd.f32 %v3106_v2, %v3105_v40  ;;  %3287 = vadd.xlane.f32.xlu1 %v3286_v32  ;;  %v4691_v8 = vrot.slane %v4644_v33, 4  ;;  %v4641_v10 = vmul.f32 0.03125, %v4547_v43  ;;  %v3098_v35 = vrot.slane %v3097_v44, 2 }
 0x4e4   : > { %v4550_v63 = vpop.xlane.xlu1 %4549  ;;  %v4686_v29 = vadd.f32 %v4685_v1, %v4643_v49  ;;  %v3112_v39 = vrot.slane %v3111_v7, 1  ;;  %v3093_v18 = vadd.f32 %v3092_v28, %v3091_v56 }
 0x4e5   : > { %v4642_v4 = vmul.f32 0.03125, %v4550_v63  ;;  %v4692_v50 = vadd.f32 %v4691_v8, %v4644_v33  ;;  %v4673_v46 = vrot.slane %v4641_v10, 4  ;;  %v3145_v24 = vmul.f32 0.125, %v3107_v42 }
 0x4e6   : > { %v4565_v45 = vpop.xlane.xlu0 %4564  ;;  %v3099_v40 = vadd.f32 %v3098_v35, %v3097_v44  ;;  %v4687_v2 = vrot.slane %v4686_v29, 2  ;;  %v3113_v47 = vadd.f32 %v3112_v39, %v3111_v7  ;;  %v3094_v33 = vrot.slane %v3093_v18, 1 }
 0x4e7   : > { %v4679_v30 = vrot.slane %v4642_v4, 4  ;;  %v4647_v59 = vmul.f32 0.03125, %v4565_v45  ;;  %v13785_v60 = vsub.f32 %v13432_v53, %v3145_v24  ;;  %v4693_v32 = vrot.slane %v4692_v50, 2 }
 0x4e8   : > { %v4568_v23 = vpop.xlane.xlu1 %4567  ;;  %v4674_v52 = vadd.f32 %v4673_v46, %v4641_v10  ;;  %v3100_v53 = vrot.slane %v3099_v40, 1  ;;  %v4688_v24 = vadd.f32 %v4687_v2, %v4686_v29  ;;  %v3146_v46 = vmul.f32 0.125, %v3113_v47 }
 0x4e9   : > { %16893 = vst [vmem:[#allocation132_spill] sm:$0xff] %v13785_v60  ;;  %v4648_v43 = vmul.f32 0.03125, %v4568_v23  ;;  %v3209_v1 = vmul.f32 %v13785_v60, %v13785_v60  ;;  %v4680_v8 = vadd.f32 %v4679_v30, %v4642_v4  ;;  %v4709_v56 = vrot.slane %v4647_v59, 4 }
 0x4ea   : > { %v4559_v49 = vpop.xlane.xlu0 %4558  ;;  %v4694_v44 = vadd.f32 %v4693_v32, %v4692_v50  ;;  %v4675_v35 = vrot.slane %v4674_v52, 2  ;;  %v3095_v10 = vadd.f32 %v3094_v33, %v3093_v18  ;;  %v13791_v4 = vsub.f32 %v13438_v31, %v3146_v46 }
 0x4eb   : > { %v4645_v42 = vmul.f32 0.03125, %v4559_v49  ;;  %v4715_v28 = vrot.slane %v4648_v43, 4  ;;  %v3301_v45 = vsel %vm2581_vm7, %v3209_v1, 0.0  ;;  %v4681_v38 = vrot.slane %v4680_v8, 2 }
 0x4ec   : > { %v4562_v63 = vpop.xlane.xlu1 %4561  ;;  %3302 = vadd.xlane.f32.xlu0 %v3301_v45  ;;  %v4710_v60 = vadd.f32 %v4709_v56, %v4647_v59  ;;  %v3101_v62 = vadd.f32 %v3100_v53, %v3099_v40  ;;  %v4689_v1 = vrot.slane %v4688_v24, 1  ;;  %v4695_v20 = vrot.slane %v4694_v44, 1 }
 0x4ed   : > { %v4697_v23 = vrot.slane %v4645_v42, 4  ;;  %v4646_v39 = vmul.f32 0.03125, %v4562_v63  ;;  %v4716_v48 = vadd.f32 %v4715_v28, %v4648_v43  ;;  %v4676_v29 = vadd.f32 %v4675_v35, %v4674_v52 }
 0x4ee   : > { %v4577_v7 = vpop.xlane.xlu0 %4576  ;;  %v3210_v32 = vmul.f32 %v13791_v4, %v13791_v4  ;;  %v4682_v63 = vadd.f32 %v4681_v38, %v4680_v8  ;;  %v3143_v33 = vmul.f32 0.125, %v3095_v10  ;;  %v4711_v59 = vrot.slane %v4710_v60, 2 }
 0x4ef   : > { %v4651_v30 = vmul.f32 0.03125, %v4577_v7  ;;  %v4698_v50 = vadd.f32 %v4697_v23, %v4645_v42  ;;  %v4703_v2 = vrot.slane %v4646_v39, 4  ;;  %v4717_v43 = vrot.slane %v4716_v48, 2 }
 0x4f0   : > { %v4580_v49 = vpop.xlane.xlu1 %4579  ;;  %v3304_v31 = vsel %vm2581_vm7, %v3210_v32, 0.0  ;;  %v4690_v45 = vadd.f32 %v4689_v1, %v4688_v24  ;;  %v4696_v40 = vadd.f32 %v4695_v20, %v4694_v44  ;;  %v13797_v52 = vsub.f32 %v13435_v61, %v3143_v33 }
 0x4f1   : > { %v4733_v18 = vrot.slane %v4651_v30, 4  ;;  %v4652_v56 = vmul.f32 0.03125, %v4580_v49  ;;  %3305 = vadd.xlane.f32.xlu1 %v3304_v31  ;;  %v3144_v42 = vmul.f32 0.125, %v3101_v62  ;;  %v4677_v53 = vrot.slane %v4676_v29, 1 }
 0x4f2   : > { %v4571_v47 = vpop.xlane.xlu0 %4570  ;;  %16894 = vst [vmem:[#allocation133_spill] sm:$0xff] %v13797_v52  ;;  %v4699_v35 = vrot.slane %v4698_v50, 2  ;;  %v4704_v23 = vadd.f32 %v4703_v2, %v4646_v39  ;;  %v4683_v8 = vrot.slane %v4682_v63, 1  ;;  %v3207_v10 = vmul.f32 %v13797_v52, %v13797_v52 }
 0x4f3   : > { %v4649_v46 = vmul.f32 0.03125, %v4571_v47  ;;  %v4734_v7 = vadd.f32 %v4733_v18, %v4651_v30  ;;  %v13802_v49 = vsub.f32 %v13443_v51, %v3144_v42  ;;  %v4712_v24 = vadd.f32 %v4711_v59, %v4710_v60 }
 0x4f4   : > { %v4574_v28 = vpop.xlane.xlu1 %4573  ;;  %v4718_v20 = vadd.f32 %v4717_v43, %v4716_v48  ;;  %v4739_v44 = vrot.slane %v4652_v56, 4  ;;  %v3295_v62 = vsel %vm2581_vm7, %v3207_v10, 0.0  ;;  %v4867_v32 = vmul.f32 0.125, %v4690_v45 }
 0x4f5   : > { %v4650_v1 = vmul.f32 0.03125, %v4574_v28  ;;  %v3208_v39 = vmul.f32 %v13802_v49, %v13802_v49  ;;  %v4721_v2 = vrot.slane %v4649_v46, 4  ;;  %v4678_v47 = vadd.f32 %v4677_v53, %v4676_v29  ;;  %3296 = vadd.xlane.f32.xlu0 %v3295_v62 }
 0x4f6   : > { %v4589_v38 = vpop.xlane.xlu0 %4588  ;;  %v4700_v30 = vadd.f32 %v4699_v35, %v4698_v50  ;;  %v4705_v18 = vrot.slane %v4704_v23, 2  ;;  %v4735_v31 = vrot.slane %v4734_v7, 2  ;;  %v13809_v48 = vsub.f32 %v13455_v5, %v4867_v32 }
 0x4f7   : > { %v3298_v51 = vsel %vm2581_vm7, %v3208_v39, 0.0  ;;  %v4868_v60 = vmul.f32 0.125, %v4696_v40  ;;  %v4684_v59 = vadd.f32 %v4683_v8, %v4682_v63  ;;  %v4713_v43 = vrot.slane %v4712_v24, 1 }
 0x4f8   : > { %v4592_v61 = vpop.xlane.xlu1 %4591  ;;  %16895 = vst [vmem:[#allocation134_spill] sm:$0xff] %v13809_v48  ;;  %v4719_v28 = vrot.slane %v4718_v20, 1  ;;  %v4740_v42 = vadd.f32 %v4739_v44, %v4652_v56  ;;  %3299 = vadd.xlane.f32.xlu1 %v3298_v51  ;;  %v4722_v52 = vadd.f32 %v4721_v2, %v4649_v46  ;;  %v4727_v45 = vrot.slane %v4650_v1, 4 }
 0x4f9   : > { %v4931_v29 = vmul.f32 %v13809_v48, %v13809_v48  ;;  %v13814_v50 = vsub.f32 %v13463_v11, %v4868_v60  ;;  %v4701_v53 = vrot.slane %v4700_v30, 1  ;;  %v4655_v35 = vmul.f32 0.03125, %v4589_v38 }
 0x4fa   : > { %v4583_v33 = vpop.xlane.xlu0 %4582  ;;  %v4656_v62 = vmul.f32 0.03125, %v4592_v61  ;;  %v4865_v5 = vmul.f32 0.125, %v4678_v47  ;;  %v4706_v39 = vadd.f32 %v4705_v18, %v4704_v23  ;;  %v4736_v40 = vadd.f32 %v4735_v31, %v4734_v7 }
 0x4fb   : > { %v4967_v63 = vsel %vm2581_vm7, %v4931_v29, 0.0  ;;  %v4932_v56 = vmul.f32 %v13814_v50, %v13814_v50  ;;  %v4714_v8 = vadd.f32 %v4713_v43, %v4712_v24  ;;  %v4720_v46 = vadd.f32 %v4719_v28, %v4718_v20 }
 0x4fc   : > { %v4586_v10 = vpop.xlane.xlu1 %4585  ;;  %4968 = vadd.xlane.f32.xlu0 %v4967_v63  ;;  %v13820_v44 = vsub.f32 %v13460_v19, %v4865_v5  ;;  %v4866_v2 = vmul.f32 0.125, %v4684_v59  ;;  %v4741_v51 = vrot.slane %v4740_v42, 2  ;;  %v4723_v38 = vrot.slane %v4722_v52, 2 }
 0x4fd   : > { %v4728_v61 = vadd.f32 %v4727_v45, %v4650_v1  ;;  %v4970_v23 = vsel %vm2581_vm7, %v4932_v56, 0.0  ;;  %v4757_v7 = vrot.slane %v4655_v35, 4  ;;  %v4763_v47 = vrot.slane %v4656_v62, 4 }
 0x4fe   : > { %16896 = vst [vmem:[#allocation135_spill] sm:$0xff] %v13820_v44  ;;  %v4601_v11 = vpop.xlane.xlu0 %4600  ;;  %4971 = vadd.xlane.f32.xlu1 %v4970_v23  ;;  %v4929_v18 = vmul.f32 %v13820_v44, %v13820_v44  ;;  %v13826_v24 = vsub.f32 %v13468_v15, %v4866_v2  ;;  %v4702_v20 = vadd.f32 %v4701_v53, %v4700_v30  ;;  %v4707_v19 = vrot.slane %v4706_v39, 1  ;;  %v16899_v44 = vld [vmem:[#allocation99_spill] sm:$0xff] }
 0x4ff   : > { %v4737_v31 = vrot.slane %v4736_v40, 1  ;;  %v4653_v60 = vmul.f32 0.03125, %v4583_v33  ;;  %v4654_v43 = vmul.f32 0.03125, %v4586_v10  ;;  %v4871_v28 = vmul.f32 0.125, %v4714_v8 }
 0x500   : > { %v4604_v32 = vpop.xlane.xlu1 %4603  ;;  %16897 = vst [vmem:[#allocation136_spill] sm:$0xff] %v13826_v24  ;;  %v4961_v59 = vsel %vm2581_vm7, %v4929_v18, 0.0  ;;  %v4930_v1 = vmul.f32 %v13826_v24, %v13826_v24  ;;  %v4742_v45 = vadd.f32 %v4741_v51, %v4740_v42  ;;  %v4724_v29 = vadd.f32 %v4723_v38, %v4722_v52 }
 0x501   : > { %v4729_v5 = vrot.slane %v4728_v61, 2  ;;  %4962 = vadd.xlane.f32.xlu0 %v4961_v59  ;;  %v4872_v63 = vmul.f32 0.125, %v4720_v46  ;;  %v4758_v56 = vadd.f32 %v4757_v7, %v4655_v35  ;;  %v4764_v23 = vadd.f32 %v4763_v47, %v4656_v62 }
 0x502   : > { %v4964_v15 = vsel %vm2581_vm7, %v4930_v1, 0.0  ;;  %v13833_v30 = vsub.f32 %v13475_v27, %v4871_v28  ;;  %v4595_v33 = vpop.xlane.xlu0 %4594  ;;  %v4708_v2 = vadd.f32 %v4707_v19, %v4706_v39  ;;  %v4745_v18 = vrot.slane %v4653_v60, 4  ;;  %v16901_v1 = vld [vmem:[#allocation98_spill] sm:$0xff] }
 0x503   : > { %4965 = vadd.xlane.f32.xlu1 %v4964_v15  ;;  %v13836_v10 = vsub.f32 %v16899_v44, %v4872_v63  ;;  %v4738_v42 = vadd.f32 %v4737_v31, %v4736_v40  ;;  %v4751_v52 = vrot.slane %v4654_v43, 4  ;;  %v4659_v35 = vmul.f32 0.03125, %v4601_v11 }
 0x504   : > { %16898 = vst [vmem:[#allocation137_spill] sm:$0xff] %v13833_v30  ;;  %v4598_v53 = vpop.xlane.xlu1 %4597  ;;  %v4935_v8 = vmul.f32 %v13833_v30, %v13833_v30  ;;  %v4743_v62 = vrot.slane %v4742_v45, 1  ;;  %v4725_v46 = vrot.slane %v4724_v29, 1  ;;  %v4730_v51 = vadd.f32 %v4729_v5, %v4728_v61  ;;  %v16903_v30 = vld [vmem:[#allocation100_spill] sm:$0xff] }
 0x505   : > { %16900 = vst [vmem:[#allocation99_spill] sm:$0xff] %v13836_v10  ;;  %v4936_v27 = vmul.f32 %v13836_v10, %v13836_v10  ;;  %v4759_v38 = vrot.slane %v4758_v56, 2  ;;  %v4765_v7 = vrot.slane %v4764_v23, 2  ;;  %v4869_v47 = vmul.f32 0.125, %v4702_v20 }
 0x506   : > { %v4979_v39 = vsel %vm2581_vm7, %v4935_v8, 0.0  ;;  %v4746_v19 = vadd.f32 %v4745_v18, %v4653_v60  ;;  %v4660_v44 = vmul.f32 0.03125, %v4604_v32  ;;  %v4870_v31 = vmul.f32 0.125, %v4708_v2  ;;  %v4613_v61 = vpop.xlane.xlu0 %4612 }
 0x507   : > { %4980 = vadd.xlane.f32.xlu0 %v4979_v39  ;;  %v4982_v40 = vsel %vm2581_vm7, %v4936_v27, 0.0  ;;  %v4752_v59 = vadd.f32 %v4751_v52, %v4654_v43  ;;  %v4781_v11 = vrot.slane %v4659_v35, 4  ;;  %v13845_v28 = vsub.f32 %v16901_v1, %v4869_v47 }
 0x508   : > { %4983 = vadd.xlane.f32.xlu1 %v4982_v40  ;;  %v4616_v5 = vpop.xlane.xlu1 %4615  ;;  %v4744_v63 = vadd.f32 %v4743_v62, %v4742_v45  ;;  %v4731_v15 = vrot.slane %v4730_v51, 1  ;;  %v13848_v48 = vsub.f32 %v16903_v30, %v4870_v31  ;;  %v4726_v20 = vadd.f32 %v4725_v46, %v4724_v29 }
 0x509   : > { %16902 = vst [vmem:[#allocation98_spill] sm:$0xff] %v13845_v28  ;;  %v4760_v60 = vadd.f32 %v4759_v38, %v4758_v56  ;;  %v4766_v18 = vadd.f32 %v4765_v7, %v4764_v23  ;;  %v4933_v32 = vmul.f32 %v13845_v28, %v13845_v28  ;;  %v4747_v2 = vrot.slane %v4746_v19, 2  ;;  %v16905_v56 = vld [vmem:[#allocation101_spill] sm:$0xff] }
 0x50a   : > { %16904 = vst [vmem:[#allocation100_spill] sm:$0xff] %v13848_v48  ;;  %v4787_v43 = vrot.slane %v4660_v44, 4  ;;  %v4934_v52 = vmul.f32 %v13848_v48, %v13848_v48  ;;  %v4875_v8 = vmul.f32 0.125, %v4738_v42  ;;  %v4753_v27 = vrot.slane %v4752_v59, 2  ;;  %v4607_v40 = vpop.xlane.xlu0 %4606  ;;  %v16913_v28 = vld [vmem:[#allocation105_spill] sm:$0xff] }
 0x50b   : > { %v4782_v39 = vadd.f32 %v4781_v11, %v4659_v35  ;;  %v4973_v45 = vsel %vm2581_vm7, %v4933_v32, 0.0  ;;  %v4657_v62 = vmul.f32 0.03125, %v4595_v33  ;;  %v4658_v29 = vmul.f32 0.03125, %v4598_v53  ;;  %v16907_v33 = vld [vmem:[#allocation103_spill] sm:$0xff] }
 0x50c   : > { %4974 = vadd.xlane.f32.xlu0 %v4973_v45  ;;  %v4976_v30 = vsel %vm2581_vm7, %v4934_v52, 0.0  ;;  %v13857_v23 = vsub.f32 %v16905_v56, %v4875_v8  ;;  %v4876_v46 = vmul.f32 0.125, %v4744_v63  ;;  %v4732_v38 = vadd.f32 %v4731_v15, %v4730_v51  ;;  %v4610_v31 = vpop.xlane.xlu1 %4609 }
 0x50d   : > { %v4761_v7 = vrot.slane %v4760_v60, 1  ;;  %v4767_v47 = vrot.slane %v4766_v18, 1  ;;  %4977 = vadd.xlane.f32.xlu1 %v4976_v30  ;;  %v4748_v42 = vadd.f32 %v4747_v2, %v4746_v19  ;;  %v4788_v1 = vadd.f32 %v4787_v43, %v4660_v44  ;;  %v16909_v19 = vld [vmem:[#allocation102_spill] sm:$0xff] }
 0x50e   : > { %16906 = vst [vmem:[#allocation101_spill] sm:$0xff] %v13857_v23  ;;  %v4939_v35 = vmul.f32 %v13857_v23, %v13857_v23  ;;  %v13862_v11 = vsub.f32 %v16907_v33, %v4876_v46  ;;  %v4754_v32 = vadd.f32 %v4753_v27, %v4752_v59  ;;  %v4769_v53 = vrot.slane %v4657_v62, 4 }
 0x50f   : > { %v4873_v52 = vmul.f32 0.125, %v4726_v20  ;;  %v4783_v8 = vrot.slane %v4782_v39, 2  ;;  %v4775_v45 = vrot.slane %v4658_v29, 4  ;;  %v4762_v15 = vadd.f32 %v4761_v7, %v4760_v60  ;;  %v13876_v60 = vpop.xlane.xlu0 %3218 }
 0x510   : > { %16908 = vst [vmem:[#allocation103_spill] sm:$0xff] %v13862_v11  ;;  %v4991_v51 = vsel %vm2581_vm7, %v4939_v35, 0.0  ;;  %v4940_v63 = vmul.f32 %v13862_v11, %v13862_v11  ;;  %v4874_v2 = vmul.f32 0.125, %v4732_v38  ;;  %v4768_v43 = vadd.f32 %v4767_v47, %v4766_v18  ;;  %v16911_v35 = vld [vmem:[#allocation104_spill] sm:$0xff]  ;;  %v13878_v7 = vpop.xlane.xlu1 %3221 }
 0x511   : > { %4992 = vadd.xlane.f32.xlu0 %v4991_v51  ;;  %v13868_v44 = vsub.f32 %v16909_v19, %v4873_v52  ;;  %v4749_v30 = vrot.slane %v4748_v42, 1  ;;  %v4789_v56 = vrot.slane %v4788_v1, 2  ;;  %v4755_v27 = vrot.slane %v4754_v32, 1 }
 0x512   : > { %v4994_v59 = vsel %vm2581_vm7, %v4940_v63, 0.0  ;;  %v4770_v20 = vadd.f32 %v4769_v53, %v4657_v62  ;;  %v13874_v33 = vsub.f32 %v16911_v35, %v4874_v2  ;;  %v4784_v52 = vadd.f32 %v4783_v8, %v4782_v39  ;;  %v16915_v8 = vld [vmem:[#allocation107_spill] sm:$0xff] }
 0x513   : > { %16910 = vst [vmem:[#allocation102_spill] sm:$0xff] %v13868_v44  ;;  %4995 = vadd.xlane.f32.xlu1 %v4994_v59  ;;  %v4937_v46 = vmul.f32 %v13868_v44, %v13868_v44  ;;  %v4776_v38 = vadd.f32 %v4775_v45, %v4658_v29  ;;  %v4663_v18 = vmul.f32 0.03125, %v4613_v61  ;;  %v4664_v47 = vmul.f32 0.03125, %v4616_v5 }
 0x514   : > { %16912 = vst [vmem:[#allocation104_spill] sm:$0xff] %v13874_v33  ;;  %v4938_v62 = vmul.f32 %v13874_v33, %v13874_v33  ;;  %v4661_v53 = vmul.f32 0.03125, %v4607_v40  ;;  %v4879_v63 = vmul.f32 0.125, %v4762_v15  ;;  %v4790_v19 = vadd.f32 %v4789_v56, %v4788_v1  ;;  %v16917_v33 = vld [vmem:[#allocation106_spill] sm:$0xff] }
 0x515   : > { %v4985_v51 = vsel %vm2581_vm7, %v4937_v46, 0.0  ;;  %v4662_v59 = vmul.f32 0.03125, %v4610_v31  ;;  %v4880_v2 = vmul.f32 0.125, %v4768_v43  ;;  %v4750_v35 = vadd.f32 %v4749_v30, %v4748_v42  ;;  %v13892_v42 = vpop.xlane.xlu0 %3212  ;;  %v13894_v43 = vpop.xlane.xlu1 %3215 }
 0x516   : > { %4986 = vadd.xlane.f32.xlu0 %v4985_v51  ;;  %v4771_v44 = vrot.slane %v4770_v20, 2  ;;  %v4988_v23 = vsel %vm2581_vm7, %v4938_v62, 0.0  ;;  %v13885_v39 = vsub.f32 %v16913_v28, %v4879_v63  ;;  %v4756_v61 = vadd.f32 %v4755_v27, %v4754_v32 }
 0x517   : > { %v4785_v5 = vrot.slane %v4784_v52, 1  ;;  %v4805_v29 = vrot.slane %v4663_v18, 4  ;;  %4989 = vadd.xlane.f32.xlu1 %v4988_v23  ;;  %v13888_v45 = vsub.f32 %v16915_v8, %v4880_v2  ;;  %v4777_v40 = vrot.slane %v4776_v38, 2 }
 0x518   : > { %16914 = vst [vmem:[#allocation105_spill] sm:$0xff] %v13885_v39  ;;  %v4811_v15 = vrot.slane %v4664_v47, 4  ;;  %v4793_v1 = vrot.slane %v4661_v53, 4  ;;  %v4943_v31 = vmul.f32 %v13885_v39, %v13885_v39  ;;  %v4791_v30 = vrot.slane %v4790_v19, 1 }
 0x519   : > { %16916 = vst [vmem:[#allocation107_spill] sm:$0xff] %v13888_v45  ;;  %v4799_v28 = vrot.slane %v4662_v59, 4  ;;  %v4944_v32 = vmul.f32 %v13888_v45, %v13888_v45  ;;  %v4772_v56 = vadd.f32 %v4771_v44, %v4770_v20  ;;  %v4877_v27 = vmul.f32 0.125, %v4750_v35  ;;  %v16919_v45 = vld [vmem:[#allocation108_spill] sm:$0xff]  ;;  %v4628_v35 = vpop.xlane.xlu1 %4627 }
 0x51a   : > { %v5003_v23 = vsel %vm2581_vm7, %v4943_v31, 0.0  ;;  %v4786_v46 = vadd.f32 %v4785_v5, %v4784_v52  ;;  %v4806_v51 = vadd.f32 %v4805_v29, %v4663_v18  ;;  %v4878_v63 = vmul.f32 0.125, %v4756_v61  ;;  %v4625_v18 = vpop.xlane.xlu0 %4624 }
 0x51b   : > { %5004 = vadd.xlane.f32.xlu0 %v5003_v23  ;;  %v5006_v62 = vsel %vm2581_vm7, %v4944_v32, 0.0  ;;  %v4778_v2 = vadd.f32 %v4777_v40, %v4776_v38  ;;  %v4812_v8 = vadd.f32 %v4811_v15, %v4664_v47  ;;  %v4794_v39 = vadd.f32 %v4793_v1, %v4661_v53  ;;  %v16923_v32 = vld [vmem:[#allocation111_spill] sm:$0xff] }
 0x51c   : > { %5007 = vadd.xlane.f32.xlu1 %v5006_v62  ;;  %v13901_v11 = vsub.f32 %v16917_v33, %v4877_v27  ;;  %v4792_v48 = vadd.f32 %v4791_v30, %v4790_v19  ;;  %v4800_v10 = vadd.f32 %v4799_v28, %v4662_v59  ;;  %v13904_v44 = vsub.f32 %v16919_v45, %v4878_v63  ;;  %v16921_v45 = vld [vmem:[#allocation109_spill] sm:$0xff] }
 0x51d   : > { %v4773_v20 = vrot.slane %v4772_v56, 1  ;;  %v4807_v5 = vrot.slane %v4806_v51, 2  ;;  %v4883_v47 = vmul.f32 0.125, %v4786_v46  ;;  %v4779_v53 = vrot.slane %v4778_v2, 1 }
 0x51e   : > { %16918 = vst [vmem:[#allocation106_spill] sm:$0xff] %v13901_v11  ;;  %16920 = vst [vmem:[#allocation108_spill] sm:$0xff] %v13904_v44  ;;  %v4941_v52 = vmul.f32 %v13901_v11, %v13901_v11  ;;  %v4942_v38 = vmul.f32 %v13904_v44, %v13904_v44  ;;  %v4813_v61 = vrot.slane %v4812_v8, 2  ;;  %v4795_v33 = vrot.slane %v4794_v39, 2 }
 0x51f   : > { %v4801_v59 = vrot.slane %v4800_v10, 2  ;;  %v13913_v40 = vsub.f32 %v16921_v45, %v4883_v47  ;;  %v4884_v15 = vmul.f32 0.125, %v4792_v48  ;;  %v4774_v1 = vadd.f32 %v4773_v20, %v4772_v56 }
 0x520   : > { %v4997_v19 = vsel %vm2581_vm7, %v4941_v52, 0.0  ;;  %v5000_v29 = vsel %vm2581_vm7, %v4942_v38, 0.0  ;;  %v4667_v31 = vmul.f32 0.03125, %v4625_v18  ;;  %v4808_v30 = vadd.f32 %v4807_v5, %v4806_v51  ;;  %v4619_v52 = vpop.xlane.xlu0 %4618  ;;  %v4622_v38 = vpop.xlane.xlu1 %4621 }
 0x521   : > { %4998 = vadd.xlane.f32.xlu0 %v4997_v19  ;;  %16922 = vst [vmem:[#allocation109_spill] sm:$0xff] %v13913_v40  ;;  %5001 = vadd.xlane.f32.xlu1 %v5000_v29  ;;  %v4947_v28 = vmul.f32 %v13913_v40, %v13913_v40  ;;  %v13918_v23 = vsub.f32 %v16923_v32, %v4884_v15  ;;  %v4668_v27 = vmul.f32 0.03125, %v4628_v35  ;;  %v4881_v5 = vmul.f32 0.125, %v4774_v1  ;;  %v16927_v32 = vld [vmem:[#allocation112_spill] sm:$0xff] }
 0x522   : > { %v4780_v46 = vadd.f32 %v4779_v53, %v4778_v2  ;;  %v4814_v62 = vadd.f32 %v4813_v61, %v4812_v8  ;;  %v4796_v63 = vadd.f32 %v4795_v33, %v4794_v39  ;;  %v4802_v19 = vadd.f32 %v4801_v59, %v4800_v10  ;;  %v16925_v10 = vld [vmem:[#allocation110_spill] sm:$0xff]  ;;  %v16931_v40 = vld [vmem:[#allocation116_spill] sm:$0xff] }
 0x523   : > { %16924 = vst [vmem:[#allocation111_spill] sm:$0xff] %v13918_v23  ;;  %v5015_v47 = vsel %vm2581_vm7, %v4947_v28, 0.0  ;;  %v4948_v48 = vmul.f32 %v13918_v23, %v13918_v23  ;;  %v4829_v56 = vrot.slane %v4667_v31, 4  ;;  %v4835_v51 = vrot.slane %v4668_v27, 4 }
 0x524   : > { %v4809_v20 = vrot.slane %v4808_v30, 1  ;;  %v4815_v29 = vrot.slane %v4814_v62, 1  ;;  %v4797_v35 = vrot.slane %v4796_v63, 1  ;;  %v3309_v2 = vmul.f32 0.03125, %v13876_v60  ;;  %v4637_v45 = vpop.xlane.xlu0 %4636  ;;  %v13928_v15 = vpop.xlane.xlu1 %4639 }
 0x525   : > { %5016 = vadd.xlane.f32.xlu0 %v5015_v47  ;;  %v5018_v18 = vsel %vm2581_vm7, %v4948_v48, 0.0  ;;  %v4803_v39 = vrot.slane %v4802_v19, 1  ;;  %v4830_v8 = vadd.f32 %v4829_v56, %v4667_v31  ;;  %v13926_v53 = vsub.f32 %v16925_v10, %v4881_v5 }
 0x526   : > { %5019 = vadd.xlane.f32.xlu1 %v5018_v18  ;;  %v4882_v61 = vmul.f32 0.125, %v4780_v46  ;;  %v4836_v33 = vadd.f32 %v4835_v51, %v4668_v27  ;;  %v4665_v59 = vmul.f32 0.03125, %v4619_v52  ;;  %v4810_v28 = vadd.f32 %v4809_v20, %v4808_v30 }
 0x527   : > { %16926 = vst [vmem:[#allocation110_spill] sm:$0xff] %v13926_v53  ;;  %v4945_v1 = vmul.f32 %v13926_v53, %v13926_v53  ;;  %v4816_v60 = vadd.f32 %v4815_v29, %v4814_v62  ;;  %v4798_v48 = vadd.f32 %v4797_v35, %v4796_v63  ;;  %v3351_v18 = vrot.slane %v3309_v2, 4  ;;  %v16929_v35 = vld [vmem:[#allocation113_spill] sm:$0xff] }
 0x528   : > { %v13933_v47 = vsub.f32 %v16927_v32, %v4882_v61  ;;  %v4666_v31 = vmul.f32 0.03125, %v4622_v38  ;;  %v4804_v56 = vadd.f32 %v4803_v39, %v4802_v19  ;;  %v4831_v5 = vrot.slane %v4830_v8, 2  ;;  %v4631_v38 = vpop.xlane.xlu0 %4630  ;;  %v13940_v19 = vpop.xlane.xlu1 %4633 }
 0x529   : > { %v5009_v46 = vsel %vm2581_vm7, %v4945_v1, 0.0  ;;  %v4837_v52 = vrot.slane %v4836_v33, 2  ;;  %v4817_v30 = vrot.slane %v4665_v59, 4  ;;  %v4887_v10 = vmul.f32 0.125, %v4810_v28 }
 0x52a   : > { %16928 = vst [vmem:[#allocation112_spill] sm:$0xff] %v13933_v47  ;;  %v4946_v27 = vmul.f32 %v13933_v47, %v13933_v47  ;;  %5010 = vadd.xlane.f32.xlu0 %v5009_v46  ;;  %v4823_v20 = vrot.slane %v4666_v31, 4  ;;  %v3352_v61 = vadd.f32 %v3351_v18, %v3309_v2  ;;  %v3310_v62 = vmul.f32 0.03125, %v13878_v7 }
 0x52b   : > { %v4888_v63 = vmul.f32 0.125, %v4816_v60  ;;  %v4832_v29 = vadd.f32 %v4831_v5, %v4830_v8  ;;  %v13943_v39 = vsub.f32 %v16929_v35, %v4887_v10  ;;  %v4885_v1 = vmul.f32 0.125, %v4798_v48  ;;  %v16933_v60 = vld [vmem:[#allocation114_spill] sm:$0xff] }
 0x52c   : > { %v5012_v51 = vsel %vm2581_vm7, %v4946_v27, 0.0  ;;  %v4886_v32 = vmul.f32 0.125, %v4804_v56  ;;  %v4838_v46 = vadd.f32 %v4837_v52, %v4836_v33  ;;  %v4818_v53 = vadd.f32 %v4817_v30, %v4665_v59 }
 0x52d   : > { %5013 = vadd.xlane.f32.xlu1 %v5012_v51  ;;  %16930 = vst [vmem:[#allocation113_spill] sm:$0xff] %v13943_v39  ;;  %v13946_v27 = vsub.f32 %v16931_v40, %v4888_v63  ;;  %v4671_v28 = vmul.f32 0.03125, %v4637_v45  ;;  %v4824_v2 = vadd.f32 %v4823_v20, %v4666_v31  ;;  %v4951_v7 = vmul.f32 %v13943_v39, %v13943_v39  ;;  %v16935_v51 = vld [vmem:[#allocation117_spill] sm:$0xff]  ;;  %v13965_v20 = vpop.xlane.xlu0 %3230  ;;  %v3234_v63 = vpop.xlane.xlu1 %3233 }
 0x52e   : > { %v13951_v18 = vsub.f32 %v16933_v60, %v4885_v1  ;;  %v13954_v8 = vsub.f32 %v16935_v51, %v4886_v32  ;;  %v3353_v5 = vrot.slane %v3352_v61, 2  ;;  %v3357_v10 = vrot.slane %v3310_v62, 4 }
 0x52f   : > { %16932 = vst [vmem:[#allocation116_spill] sm:$0xff] %v13946_v27  ;;  %v4952_v33 = vmul.f32 %v13946_v27, %v13946_v27  ;;  %v3308_v59 = vmul.f32 0.03125, %v13894_v43  ;;  %v5027_v40 = vsel %vm2581_vm7, %v4951_v7, 0.0  ;;  %v4833_v31 = vrot.slane %v4832_v29, 1 }
 0x530   : > { %16934 = vst [vmem:[#allocation114_spill] sm:$0xff] %v13951_v18  ;;  %16936 = vst [vmem:[#allocation117_spill] sm:$0xff] %v13954_v8  ;;  %v4949_v45 = vmul.f32 %v13951_v18, %v13951_v18  ;;  %v4950_v48 = vmul.f32 %v13954_v8, %v13954_v8  ;;  %v4819_v56 = vrot.slane %v4818_v53, 2  ;;  %5028 = vadd.xlane.f32.xlu0 %v5027_v40  ;;  %v4853_v30 = vrot.slane %v4671_v28, 4 }
 0x531   : > { %v5030_v52 = vsel %vm2581_vm7, %v4952_v33, 0.0  ;;  %v4839_v35 = vrot.slane %v4838_v46, 1  ;;  %v4825_v1 = vrot.slane %v4824_v2, 2  ;;  %v4669_v32 = vmul.f32 0.03125, %v4631_v38 }
 0x532   : > { %5031 = vadd.xlane.f32.xlu1 %v5030_v52  ;;  %v5021_v43 = vsel %vm2581_vm7, %v4949_v45, 0.0  ;;  %v3354_v7 = vadd.f32 %v3353_v5, %v3352_v61  ;;  %v5024_v60 = vsel %vm2581_vm7, %v4950_v48, 0.0  ;;  %v3358_v51 = vadd.f32 %v3357_v10, %v3310_v62  ;;  %v13969_v52 = vpop.xlane.xlu0 %3224  ;;  %v3228_v45 = vpop.xlane.xlu1 %3227 }
 0x533   : > { %v3345_v18 = vrot.slane %v3308_v59, 4  ;;  %v4841_v39 = vrot.slane %v4669_v32, 4  ;;  %v4834_v11 = vadd.f32 %v4833_v31, %v4832_v29  ;;  %v4820_v40 = vadd.f32 %v4819_v56, %v4818_v53 }
 0x534   : > { %v4854_v8 = vadd.f32 %v4853_v30, %v4671_v28  ;;  %5022 = vadd.xlane.f32.xlu0 %v5021_v43  ;;  %v4840_v33 = vadd.f32 %v4839_v35, %v4838_v46  ;;  %v4826_v27 = vadd.f32 %v4825_v1, %v4824_v2  ;;  %v3314_v23 = vmul.f32 0.03125, %v3234_v63  ;;  %v16937_v46 = vld [vmem:[#allocation121_spill] sm:$0xff]  ;;  %v16939_v30 = vld [vmem:[#allocation122_spill] sm:$0xff] }
 0x535   : > { %v4842_v47 = vadd.f32 %v4841_v39, %v4669_v32  ;;  %v3355_v44 = vrot.slane %v3354_v7, 1  ;;  %v3359_v38 = vrot.slane %v3358_v51, 2  ;;  %v3346_v61 = vadd.f32 %v3345_v18, %v3308_v59 }
 0x536   : > { %5025 = vadd.xlane.f32.xlu1 %v5024_v60  ;;  %v4821_v5 = vrot.slane %v4820_v40, 1  ;;  %v4855_v48 = vrot.slane %v4854_v8, 2  ;;  %v4891_v10 = vmul.f32 0.125, %v4834_v11  ;;  %v4827_v24 = vrot.slane %v4826_v27, 1  ;;  %v13979_v11 = vpop.xlane.xlu0 %3242  ;;  %v3246_v43 = vpop.xlane.xlu1 %3245 }
 0x537   : > { %v4843_v62 = vrot.slane %v4842_v47, 2  ;;  %v3381_v29 = vrot.slane %v3314_v23, 4  ;;  %v3312_v53 = vmul.f32 0.03125, %v3228_v45  ;;  %v4892_v28 = vmul.f32 0.125, %v4840_v33 }
 0x538   : > { %v3356_v31 = vadd.f32 %v3355_v44, %v3354_v7  ;;  %v13972_v2 = vsub.f32 %v16937_v46, %v4891_v10  ;;  %v3360_v39 = vadd.f32 %v3359_v38, %v3358_v51  ;;  %v3347_v56 = vrot.slane %v3346_v61, 2 }
 0x539   : > { %v13975_v63 = vsub.f32 %v16939_v30, %v4892_v28  ;;  %v4822_v35 = vadd.f32 %v4821_v5, %v4820_v40  ;;  %v4856_v1 = vadd.f32 %v4855_v48, %v4854_v8  ;;  %v4844_v18 = vadd.f32 %v4843_v62, %v4842_v47 }
 0x53a   : > { %16938 = vst [vmem:[#allocation121_spill] sm:$0xff] %v13972_v2  ;;  %v4955_v59 = vmul.f32 %v13972_v2, %v13972_v2  ;;  %v4828_v32 = vadd.f32 %v4827_v24, %v4826_v27  ;;  %v3382_v60 = vadd.f32 %v3381_v29, %v3314_v23  ;;  %v3369_v44 = vrot.slane %v3312_v53, 4  ;;  %v13988_v28 = vpop.xlane.xlu0 %3236 }
 0x53b   : > { %16940 = vst [vmem:[#allocation122_spill] sm:$0xff] %v13975_v63  ;;  %v4956_v7 = vmul.f32 %v13975_v63, %v13975_v63  ;;  %v3533_v51 = vmul.f32 0.125, %v3356_v31  ;;  %v3361_v45 = vrot.slane %v3360_v39, 1  ;;  %v4857_v47 = vrot.slane %v4856_v1, 1  ;;  %v3240_v31 = vpop.xlane.xlu1 %3239 }
 0x53c   : > { %v5039_v33 = vsel %vm2581_vm7, %v4955_v59, 0.0  ;;  %v4845_v40 = vrot.slane %v4844_v18, 1  ;;  %v3318_v38 = vmul.f32 0.03125, %v3246_v43  ;;  %v4889_v5 = vmul.f32 0.125, %v4822_v35 }
 0x53d   : > { %5040 = vadd.xlane.f32.xlu0 %v5039_v33  ;;  %v5042_v8 = vsel %vm2581_vm7, %v4956_v7, 0.0  ;;  %v3348_v48 = vadd.f32 %v3347_v56, %v3346_v61  ;;  %v3383_v62 = vrot.slane %v3382_v60, 2  ;;  %v3370_v24 = vadd.f32 %v3369_v44, %v3312_v53 }
 0x53e   : > { %5043 = vadd.xlane.f32.xlu1 %v5042_v8  ;;  %v4890_v23 = vmul.f32 0.125, %v4828_v32  ;;  %v3565_v27 = vadd.f32 1e-05, %v3533_v51  ;;  %v3405_v10 = vrot.slane %v3318_v38, 4  ;;  %v13986_v29 = vsub.f32 %v13610_v55, %v4889_v5  ;;  %v13998_v51 = vpop.xlane.xlu0 %3254 }
 0x53f   : > { %v3362_v30 = vadd.f32 %v3361_v45, %v3360_v39  ;;  %v4858_v59 = vadd.f32 %v4857_v47, %v4856_v1  ;;  %v4846_v7 = vadd.f32 %v4845_v40, %v4844_v18  ;;  %v3349_v56 = vrot.slane %v3348_v48, 1 }
 0x540   : > { %16941 = vst [vmem:[#allocation138_spill] sm:$0xff] %v13986_v29  ;;  %v13991_v46 = vsub.f32 %v13624_v12, %v4890_v23  ;;  %v4953_v61 = vmul.f32 %v13986_v29, %v13986_v29  ;;  %v3384_v53 = vadd.f32 %v3383_v62, %v3382_v60  ;;  %v3371_v35 = vrot.slane %v3370_v24, 2  ;;  %v3258_v12 = vpop.xlane.xlu1 %3257 }
 0x541   : > { %11062 = vrsqrt.f32 %v3565_v27  ;;  %v3406_v55 = vadd.f32 %v3405_v10, %v3318_v38  ;;  %v3316_v44 = vmul.f32 0.03125, %v3240_v31  ;;  %v3534_v1 = vmul.f32 0.125, %v3362_v30 }
 0x542   : > { %16942 = vst [vmem:[#allocation139_spill] sm:$0xff] %v13991_v46  ;;  %v4954_v43 = vmul.f32 %v13991_v46, %v13991_v46  ;;  %v5033_v32 = vsel %vm2581_vm7, %v4953_v61, 0.0  ;;  %v4895_v33 = vmul.f32 0.125, %v4858_v59  ;;  %v4893_v60 = vmul.f32 0.125, %v4846_v7  ;;  %v14011_v30 = vpop.xlane.xlu0 %3248 }
 0x543   : > { %5034 = vadd.xlane.f32.xlu0 %v5033_v32  ;;  %v3393_v18 = vrot.slane %v3316_v44, 4  ;;  %v3350_v45 = vadd.f32 %v3349_v56, %v3348_v48  ;;  %v3385_v8 = vrot.slane %v3384_v53, 1  ;;  %v3372_v47 = vadd.f32 %v3371_v35, %v3370_v24 }
 0x544   : > { %v5036_v39 = vsel %vm2581_vm7, %v4954_v43, 0.0  ;;  %v3322_v40 = vmul.f32 0.03125, %v3258_v12  ;;  %v3407_v5 = vrot.slane %v3406_v55, 2  ;;  %v14002_v62 = vsub.f32 %v13606_v16, %v4895_v33  ;;  %v3252_v61 = vpop.xlane.xlu1 %3251 }
 0x545   : > { %5037 = vadd.xlane.f32.xlu1 %v5036_v39  ;;  %v3394_v38 = vadd.f32 %v3393_v18, %v3316_v44  ;;  %v14005_v23 = vsub.f32 %v13613_v34, %v4893_v60  ;;  %v3566_v48 = vadd.f32 1e-05, %v3534_v1  ;;  %v3532_v24 = vmul.f32 0.125, %v3350_v45 }
 0x546   : > { %16943 = vst [vmem:[#allocation140_spill] sm:$0xff] %v14002_v62  ;;  %v3429_v27 = vrot.slane %v3322_v40, 4  ;;  %v4959_v10 = vmul.f32 %v14002_v62, %v14002_v62  ;;  %v3373_v59 = vrot.slane %v3372_v47, 1  ;;  %v3386_v56 = vadd.f32 %v3385_v8, %v3384_v53  ;;  %v14021_v8 = vld [vmem:[%s16414_s4 + $0x30] sm:$0xff] }
 0x547   : > { %16944 = vst [vmem:[#allocation141_spill] sm:$0xff] %v14005_v23  ;;  %v4957_v31 = vmul.f32 %v14005_v23, %v14005_v23  ;;  %v3408_v16 = vadd.f32 %v3407_v5, %v3406_v55  ;;  %v3395_v35 = vrot.slane %v3394_v38, 2  ;;  %v3307_v32 = vmul.f32 0.03125, %v13892_v42  ;;  %v16945_v42 = vld [vmem:[#allocation115_spill] sm:$0xff] }
 0x548   : > { %v3430_v7 = vadd.f32 %v3429_v27, %v3322_v40  ;;  %v5051_v34 = vsel %vm2581_vm7, %v4959_v10, 0.0  ;;  %v3320_v12 = vmul.f32 0.03125, %v3252_v61  ;;  %11064 = vrsqrt.f32 %v3566_v48 }
 0x549   : > { %5052 = vadd.xlane.f32.xlu0 %v5051_v34  ;;  %v5045_v44 = vsel %vm2581_vm7, %v4957_v31, 0.0  ;;  %v14016_v39 = vpop.xlane.xlu0 %3266  ;;  %v3564_v1 = vadd.f32 1e-05, %v3532_v24  ;;  %v3374_v18 = vadd.f32 %v3373_v59, %v3372_v47  ;;  %v3538_v60 = vmul.f32 0.125, %v3386_v56  ;;  %v14028_v47 = vld [vmem:[%s16414_s4 + $0x38] sm:$0xff] }
 0x54a   : > { %v3431_v33 = vrot.slane %v3430_v7, 2  ;;  %v3409_v45 = vrot.slane %v3408_v16, 1  ;;  %v3396_v53 = vadd.f32 %v3395_v35, %v3394_v38  ;;  %v3417_v55 = vrot.slane %v3320_v12, 4 }
 0x54b   : > { %v11063_v43 = vpop.eup %11062  ;;  %v3339_v5 = vrot.slane %v3307_v32, 4  ;;  %v4672_v27 = vmul.f32 0.03125, %v13928_v15  ;;  %11066 = vrsqrt.f32 %v3564_v1  ;;  %v3536_v38 = vmul.f32 0.125, %v3374_v18 }
 0x54c   : > { %v3629_v40 = vmul.f32 %v11063_v43, %v16945_v42  ;;  %v3418_v10 = vadd.f32 %v3417_v55, %v3320_v12  ;;  %v3432_v31 = vadd.f32 %v3431_v33, %v3430_v7  ;;  %v3570_v24 = vadd.f32 1e-05, %v3538_v60 }
 0x54d   : > { %5046 = vadd.xlane.f32.xlu0 %v5045_v44  ;;  %v3410_v59 = vadd.f32 %v3409_v45, %v3408_v16  ;;  %v3397_v61 = vrot.slane %v3396_v53, 1  ;;  %v3261_v35 = vpop.xlane.xlu0 %3260  ;;  %v3340_v15 = vadd.f32 %v3339_v5, %v3307_v32  ;;  %v4859_v44 = vrot.slane %v4672_v27, 4 }
 0x54e   : > { %v3661_v48 = vmul.f32 %v3629_v40, %v14021_v8  ;;  %v3419_v56 = vrot.slane %v3418_v10, 2  ;;  %v3270_v34 = vpop.xlane.xlu1 %3269  ;;  %v3568_v12 = vadd.f32 1e-05, %v3536_v38  ;;  %v3433_v55 = vrot.slane %v3432_v31, 1 }
 0x54f   : > { %v3323_v1 = vmul.f32 0.03125, %v3261_v35  ;;  %v3326_v18 = vmul.f32 0.03125, %v3270_v34  ;;  %11068 = vrsqrt.f32 %v3570_v24  ;;  %v3542_v7 = vmul.f32 0.125, %v3410_v59  ;;  %v16946_v59 = vld [vmem:[#allocation118_spill] sm:$0xff] }
 0x550   : > { %v3693_v43 = vadd.f32 %v3661_v48, %v14028_v47  ;;  %v3398_v33 = vadd.f32 %v3397_v61, %v3396_v53  ;;  %v3420_v60 = vadd.f32 %v3419_v56, %v3418_v10  ;;  %v3341_v40 = vrot.slane %v3340_v15, 2 }
 0x551   : > { %v3435_v45 = vrot.slane %v3323_v1, 4  ;;  %v3453_v42 = vrot.slane %v3326_v18, 4  ;;  %v4860_v23 = vadd.f32 %v4859_v44, %v4672_v27  ;;  %11070 = vrsqrt.f32 %v3568_v12 }
 0x552   : > { %v11065_v16 = vpop.eup %11064  ;;  %v3434_v48 = vadd.f32 %v3433_v55, %v3432_v31  ;;  %v14033_v38 = vpop.xlane.xlu1 %3263  ;;  %v3574_v62 = vadd.f32 1e-05, %v3542_v7  ;;  %v3540_v29 = vmul.f32 0.125, %v3398_v33  ;;  %v3342_v61 = vadd.f32 %v3341_v40, %v3340_v15 }
 0x553   : > { %v3436_v32 = vadd.f32 %v3435_v45, %v3323_v1  ;;  %v3454_v5 = vadd.f32 %v3453_v42, %v3326_v18  ;;  %v3630_v53 = vmul.f32 %v11065_v16, %v16946_v59  ;;  %v4861_v10 = vrot.slane %v4860_v23, 2  ;;  %v16947_v1 = vld [vmem:[#allocation120_spill] sm:$0xff] }
 0x554   : > { %v3546_v56 = vmul.f32 0.125, %v3434_v48  ;;  %11072 = vrsqrt.f32 %v3574_v62  ;;  %v3572_v27 = vadd.f32 1e-05, %v3540_v29  ;;  %v3343_v45 = vrot.slane %v3342_v61, 1 }
 0x555   : > { %v11067_v35 = vpop.eup %11066  ;;  %v3437_v34 = vrot.slane %v3436_v32, 2  ;;  %v3455_v24 = vrot.slane %v3454_v5, 2  ;;  %v3662_v55 = vmul.f32 %v3630_v53, %v14021_v8  ;;  %v4862_v33 = vadd.f32 %v4861_v10, %v4860_v23 }
 0x556   : > { %3759 = vrot.lane.b32.xlu1 %v3693_v43, %s11493_s10  ;;  %v3421_v43 = vrot.slane %v3420_v60, 1  ;;  %v3628_v18 = vmul.f32 %v11067_v35, %v16947_v1  ;;  %v3578_v42 = vadd.f32 1e-05, %v3546_v56  ;;  %11074 = vrsqrt.f32 %v3572_v27 }
 0x557   : > { %v3438_v2 = vadd.f32 %v3437_v34, %v3436_v32  ;;  %v3456_v44 = vadd.f32 %v3455_v24, %v3454_v5  ;;  %v3694_v62 = vadd.f32 %v3662_v55, %v14028_v47  ;;  %v3344_v34 = vadd.f32 %v3343_v45, %v3342_v61 }
 0x558   : > { %v3422_v31 = vadd.f32 %v3421_v43, %v3420_v60  ;;  %v3660_v29 = vmul.f32 %v3628_v18, %v14021_v8  ;;  %v4863_v43 = vrot.slane %v4862_v33, 1  ;;  %11076 = vrsqrt.f32 %v3578_v42 }
 0x559   : > { %v3439_v12 = vrot.slane %v3438_v2, 1  ;;  %v11069_v7 = vpop.eup %11068  ;;  %v3457_v40 = vrot.slane %v3456_v44, 1  ;;  %v14042_v24 = vpop.xlane.xlu0 %3278  ;;  %v3531_v61 = vmul.f32 0.125, %v3344_v34 }
 0x55a   : > { %v3544_v15 = vmul.f32 0.125, %v3422_v31  ;;  %v3634_v60 = vmul.f32 %v11069_v7, %v13640_v57  ;;  %v3692_v10 = vadd.f32 %v3660_v29, %v14028_v47  ;;  %v4864_v31 = vadd.f32 %v4863_v43, %v4862_v33 }
 0x55b   : > { %v3440_v63 = vadd.f32 %v3439_v12, %v3438_v2  ;;  %v11071_v48 = vpop.eup %11070  ;;  %v3458_v23 = vadd.f32 %v3457_v40, %v3456_v44  ;;  %v3563_v40 = vadd.f32 1e-05, %v3531_v61 }
 0x55c   : > { %v3282_v46 = vpop.xlane.xlu1 %3281  ;;  %v3632_v59 = vmul.f32 %v11071_v48, %v13654_v25  ;;  %v3666_v57 = vmul.f32 %v3634_v60, %v14021_v8 }
 0x55d   : > { %v3330_v16 = vmul.f32 0.03125, %v3282_v46  ;;  %v3547_v35 = vmul.f32 0.125, %v3440_v63  ;;  %v3576_v46 = vadd.f32 1e-05, %v3544_v15  ;;  %v3550_v44 = vmul.f32 0.125, %v3458_v23 }
 0x55e   : > { %v11073_v27 = vpop.eup %11072  ;;  %v3664_v18 = vmul.f32 %v3632_v59, %v14021_v8  ;;  %v3698_v25 = vadd.f32 %v3666_v57, %v14028_v47  ;;  %v14051_v33 = vpop.xlane.xlu0 %3272  ;;  %v4896_v15 = vmul.f32 0.125, %v4864_v31 }
 0x55f   : > { %v3477_v32 = vrot.slane %v3330_v16, 4  ;;  %v3579_v63 = vadd.f32 1e-05, %v3547_v35  ;;  %11078 = vrsqrt.f32 %v3576_v46  ;;  %v3638_v45 = vmul.f32 %v11073_v27, %v13666_v36 }
 0x560   : > { %v3276_v5 = vpop.xlane.xlu1 %3275  ;;  %v3582_v29 = vadd.f32 1e-05, %v3550_v44  ;;  %v3696_v60 = vadd.f32 %v3664_v18, %v14028_v47 }
 0x561   : > { %v3478_v2 = vadd.f32 %v3477_v32, %v3330_v16  ;;  %v3328_v53 = vmul.f32 0.03125, %v3276_v5  ;;  %v11075_v16 = vpop.eup %11074  ;;  %11080 = vrsqrt.f32 %v3579_v63  ;;  %v3670_v43 = vmul.f32 %v3638_v45, %v14021_v8 }
 0x562   : > { %v11077_v32 = vpop.eup %11076  ;;  %v3636_v36 = vmul.f32 %v11075_v16, %v13678_v58  ;;  %11082 = vrsqrt.f32 %v3563_v40 }
 0x563   : > { %3761 = vrot.lane.b32.xlu0 %v3694_v62, %s11493_s10  ;;  %v3479_v56 = vrot.slane %v3478_v2, 2  ;;  %v3465_v55 = vrot.slane %v3328_v53, 4  ;;  %11084 = vrsqrt.f32 %v3582_v29  ;;  %v3642_v31 = vmul.f32 %v11077_v32, %v13694_v9 }
 0x564   : > { %v3668_v58 = vmul.f32 %v3636_v36, %v14021_v8 }
 0x565   : > { %v3480_v12 = vadd.f32 %v3479_v56, %v3478_v2  ;;  %v3466_v42 = vadd.f32 %v3465_v55, %v3328_v53  ;;  %v14058_v2 = vsub.f32 %v13616_v54, %v4896_v15  ;;  %v3702_v56 = vadd.f32 %v3670_v43, %v14028_v47 }
 0x566   : > { %v3700_v45 = vadd.f32 %v3668_v58, %v14028_v47  ;;  %v3674_v9 = vmul.f32 %v3642_v31, %v14021_v8 }
 0x567   : > { %3757 = vrot.lane.b32.xlu0 %v3692_v10, %s11493_s10  ;;  %v3481_v7 = vrot.slane %v3480_v12, 1  ;;  %v3467_v62 = vrot.slane %v3466_v42, 2  ;;  %v4960_v63 = vmul.f32 %v14058_v2, %v14058_v2 }
 0x569   : > { %v3482_v48 = vadd.f32 %v3481_v7, %v3480_v12  ;;  %v3468_v35 = vadd.f32 %v3467_v62, %v3466_v42  ;;  %v14060_v46 = vpop.xlane.xlu0 %3290  ;;  %v11079_v54 = vpop.eup %11078  ;;  %v5054_v16 = vsel %vm2581_vm7, %v4960_v63, 0.0 }
 0x56a   : > { %v3640_v42 = vmul.f32 %v11079_v54, %v13706_v13 }
 0x56b   : > { %3769 = vrot.lane.b32.xlu0 %v3698_v25, %s11493_s10  ;;  %v3554_v5 = vmul.f32 0.125, %v3482_v48  ;;  %v3469_v53 = vrot.slane %v3468_v35, 1 }
 0x56c   : > { %v3294_v1 = vpop.xlane.xlu1 %3293  ;;  %v3672_v43 = vmul.f32 %v3640_v42, %v14021_v8 }
 0x56d   : > { %v3334_v23 = vmul.f32 0.03125, %v3294_v1  ;;  %v3586_v59 = vadd.f32 1e-05, %v3554_v5  ;;  %v3470_v27 = vadd.f32 %v3469_v53, %v3468_v35  ;;  %v11081_v1 = vpop.eup %11080  ;;  %v3706_v5 = vadd.f32 %v3674_v9, %v14028_v47 }
 0x56e   : > { %v14069_v18 = vpop.xlane.xlu0 %3284  ;;  %v3643_v48 = vmul.f32 %v11081_v1, %v13716_v21  ;;  %v11083_v32 = vpop.eup %11082  ;;  %v3704_v21 = vadd.f32 %v3672_v43, %v14028_v47 }
 0x56f   : > { %3765 = vrot.lane.b32.xlu0 %v3696_v60, %s11493_s10  ;;  %v3501_v10 = vrot.slane %v3334_v23, 4  ;;  %11086 = vrsqrt.f32 %v3586_v59  ;;  %v3552_v55 = vmul.f32 0.125, %v3470_v27  ;;  %v11085_v35 = vpop.eup %11084 }
 0x570   : > { %v3288_v34 = vpop.xlane.xlu1 %3287 }
 0x571   : > { %v3332_v57 = vmul.f32 0.03125, %v3288_v34  ;;  %v3502_v61 = vadd.f32 %v3501_v10, %v3334_v23  ;;  %v3584_v7 = vadd.f32 1e-05, %v3552_v55  ;;  %v3675_v23 = vmul.f32 %v3643_v48, %v14021_v8 }
 0x572   : > { %v3646_v10 = vmul.f32 %v11085_v35, %v13724_v0 }
 0x573   : > { %v3489_v12 = vrot.slane %v3332_v57, 4  ;;  %3777 = vrot.lane.b32.xlu0 %v3702_v56, %s11493_s10  ;;  %v3503_v44 = vrot.slane %v3502_v61, 2  ;;  %11088 = vrsqrt.f32 %v3584_v7  ;;  %v16948_v56 = vld [vmem:[#allocation119_spill] sm:$0xff]  ;;  %v3707_v63 = vadd.f32 %v3675_v23, %v14028_v47 }
 0x574   : > { %v3627_v27 = vmul.f32 %v11083_v32, %v16948_v56 }
 0x575   : > { %v3490_v25 = vadd.f32 %v3489_v12, %v3332_v57  ;;  %v3504_v15 = vadd.f32 %v3503_v44, %v3502_v61  ;;  %v3678_v44 = vmul.f32 %v3646_v10, %v14021_v8 }
 0x576   : > { %v3659_v0 = vmul.f32 %v3627_v27, %v14021_v8 }
 0x577   : > { %v3491_v40 = vrot.slane %v3490_v25, 2  ;;  %3773 = vrot.lane.b32.xlu0 %v3700_v45, %s11493_s10  ;;  %v3505_v29 = vrot.slane %v3504_v15, 1  ;;  %v3710_v48 = vadd.f32 %v3678_v44, %v14028_v47 }
 0x579   : > { %v14077_v60 = vpop.xlane.xlu0 %3302  ;;  %v3492_v13 = vadd.f32 %v3491_v40, %v3490_v25  ;;  %v3506_v34 = vadd.f32 %v3505_v29, %v3504_v15  ;;  %v11087_v59 = vpop.eup %11086  ;;  %v3313_v15 = vmul.f32 0.03125, %v13965_v20 }
 0x57a   : > { %5055 = vadd.xlane.f32.xlu1 %v5054_v16  ;;  %v3650_v61 = vmul.f32 %v11087_v59, %v13742_v6  ;;  %v4670_v6 = vmul.f32 0.03125, %v13940_v19 }
 0x57b   : > { %3785 = vrot.lane.b32.xlu0 %v3706_v5, %s11493_s10  ;;  %v3493_v53 = vrot.slane %v3492_v13, 1  ;;  %v3558_v54 = vmul.f32 0.125, %v3506_v34  ;;  %v3375_v19 = vrot.slane %v3313_v15, 4 }
 0x57c   : > { %v3682_v45 = vmul.f32 %v3650_v61, %v14021_v8  ;;  %v4847_v43 = vrot.slane %v4670_v6, 4 }
 0x57d   : > { %v11089_v55 = vpop.eup %11088  ;;  %v3494_v1 = vadd.f32 %v3493_v53, %v3492_v13  ;;  %v3590_v7 = vadd.f32 1e-05, %v3558_v54 }
 0x57e   : > { %v3306_v62 = vpop.xlane.xlu1 %3305  ;;  %v3648_v16 = vmul.f32 %v11089_v55, %v13754_v22  ;;  %v3714_v32 = vadd.f32 %v3682_v45, %v14028_v47  ;;  %v4848_v59 = vadd.f32 %v4847_v43, %v4670_v6 }
 0x57f   : > { %v3338_v36 = vmul.f32 0.03125, %v3306_v62  ;;  %3781 = vrot.lane.b32.xlu0 %v3704_v21, %s11493_s10  ;;  %v3556_v40 = vmul.f32 0.125, %v3494_v1  ;;  %v3691_v62 = vadd.f32 %v3659_v0, %v14028_v47  ;;  %11090 = vrsqrt.f32 %v3590_v7 }
 0x580   : > { %v3680_v5 = vmul.f32 %v3648_v16, %v14021_v8  ;;  %v3376_v21 = vadd.f32 %v3375_v19, %v3313_v15  ;;  %v4849_v54 = vrot.slane %v4848_v59, 2  ;;  %v3321_v7 = vmul.f32 0.03125, %v13998_v51 }
 0x581   : > { %v3525_v58 = vrot.slane %v3338_v36, 4  ;;  %v3588_v13 = vadd.f32 1e-05, %v3556_v40 }
 0x582   : > { %v14086_v31 = vpop.xlane.xlu0 %3296  ;;  %v3712_v34 = vadd.f32 %v3680_v5, %v14028_v47  ;;  %v4850_v0 = vadd.f32 %v4849_v54, %v4848_v59  ;;  %v3319_v5 = vmul.f32 0.03125, %v14011_v30 }
 0x583   : > { %v3526_v25 = vadd.f32 %v3525_v58, %v3338_v36  ;;  %3787 = vrot.lane.b32.xlu0 %v3707_v63, %s11493_s10  ;;  %v3311_v36 = vmul.f32 0.03125, %v13969_v52  ;;  %11092 = vrsqrt.f32 %v3588_v13  ;;  %v3377_v52 = vrot.slane %v3376_v21, 2 }
 0x584   : > { %v3315_v63 = vmul.f32 0.03125, %v13988_v28 }
 0x585   : > { %v3300_v57 = vpop.xlane.xlu1 %3299  ;;  %v3527_v29 = vrot.slane %v3526_v25, 2  ;;  %v3363_v10 = vrot.slane %v3311_v36, 4 }
 0x586   : > { %v3336_v12 = vmul.f32 0.03125, %v3300_v57  ;;  %v3317_v57 = vmul.f32 0.03125, %v13979_v11  ;;  %v3387_v45 = vrot.slane %v3315_v63, 4 }
 0x587   : > { %3793 = vrot.lane.b32.xlu0 %v3710_v48, %s11493_s10  ;;  %v3528_v20 = vadd.f32 %v3527_v29, %v3526_v25  ;;  %v3378_v25 = vadd.f32 %v3377_v52, %v3376_v21 }
 0x588   : > { %v3513_v9 = vrot.slane %v3336_v12, 4  ;;  %v3399_v55 = vrot.slane %v3317_v57, 4 }
 0x589   : > { %v14095_v42 = vpop.xlane.xlu0 %4968  ;;  %v3529_v53 = vrot.slane %v3528_v20, 1  ;;  %v11091_v58 = vpop.eup %11090  ;;  %v3379_v29 = vrot.slane %v3378_v25, 1 }
 0x58a   : > { %v3514_v22 = vadd.f32 %v3513_v9, %v3336_v12  ;;  %v3364_v12 = vadd.f32 %v3363_v10, %v3311_v36  ;;  %v3654_v44 = vmul.f32 %v11091_v58, %v13766_v14  ;;  %v3400_v40 = vadd.f32 %v3399_v55, %v3317_v57 }
 0x58b   : > { %3755 = vrot.lane.b32.xlu1 %v3691_v62, %s11493_s10  ;;  %3801 = vrot.lane.b32.xlu0 %v3714_v32, %s11493_s10  ;;  %v3530_v61 = vadd.f32 %v3529_v53, %v3528_v20  ;;  %v4851_v62 = vrot.slane %v4850_v0, 1  ;;  %v3423_v32 = vrot.slane %v3321_v7, 4  ;;  %v3388_v14 = vadd.f32 %v3387_v45, %v3315_v63 }
 0x58c   : > { %v3515_v23 = vrot.slane %v3514_v22, 2  ;;  %v3686_v16 = vmul.f32 %v3654_v44, %v14021_v8  ;;  %v3365_v15 = vrot.slane %v3364_v12, 2  ;;  %v3401_v19 = vrot.slane %v3400_v40, 2 }
 0x58d   : > { %v3562_v11 = vmul.f32 0.125, %v3530_v61  ;;  %v11093_v6 = vpop.eup %11092  ;;  %v3424_v59 = vadd.f32 %v3423_v32, %v3321_v7  ;;  %v3389_v21 = vrot.slane %v3388_v14, 2  ;;  %v3411_v53 = vrot.slane %v3319_v5, 4 }
 0x58e   : > { %v14106_v35 = vpop.xlane.xlu0 %4962  ;;  %v3516_v56 = vadd.f32 %v3515_v23, %v3514_v22  ;;  %v3718_v48 = vadd.f32 %v3686_v16, %v14028_v47  ;;  %v3652_v51 = vmul.f32 %v11093_v6, %v13778_v17  ;;  %v3366_v43 = vadd.f32 %v3365_v15, %v3364_v12 }
 0x58f   : > { %3797 = vrot.lane.b32.xlu0 %v3712_v34, %s11493_s10  ;;  %v3594_v22 = vadd.f32 1e-05, %v3562_v11  ;;  %v4852_v34 = vadd.f32 %v4851_v62, %v4850_v0  ;;  %v3380_v23 = vadd.f32 %v3379_v29, %v3378_v25  ;;  %v3325_v57 = vmul.f32 0.03125, %v14016_v39 }
 0x590   : > { %v3517_v1 = vrot.slane %v3516_v56, 1  ;;  %v3684_v36 = vmul.f32 %v3652_v51, %v14021_v8  ;;  %v3367_v10 = vrot.slane %v3366_v43, 1  ;;  %v3402_v17 = vadd.f32 %v3401_v19, %v3400_v40 }
 0x591   : > { %11094 = vrsqrt.f32 %v3594_v22  ;;  %v3537_v54 = vmul.f32 0.125, %v3380_v23  ;;  %v3425_v52 = vrot.slane %v3424_v59, 2  ;;  %v3324_v63 = vmul.f32 0.03125, %v14033_v38 }
 0x592   : > { %v3518_v28 = vadd.f32 %v3517_v1, %v3516_v56  ;;  %v3716_v30 = vadd.f32 %v3684_v36, %v14028_v47  ;;  %v4972_v56 = vpop.xlane.xlu1 %4971  ;;  %v3390_v61 = vadd.f32 %v3389_v21, %v3388_v14  ;;  %v3412_v12 = vadd.f32 %v3411_v53, %v3319_v5 }
 0x593   : > { %3809 = vrot.lane.b32.xlu0 %v3718_v48, %s11493_s10  ;;  %v4894_v1 = vmul.f32 0.125, %v4852_v34  ;;  %v3368_v44 = vadd.f32 %v3367_v10, %v3366_v43  ;;  %v3447_v0 = vrot.slane %v3325_v57, 4  ;;  %v3403_v25 = vrot.slane %v3402_v17, 1 }
 0x594   : > { %v14113_v27 = vpop.xlane.xlu0 %4980  ;;  %v3560_v13 = vmul.f32 0.125, %v3518_v28  ;;  %v3329_v7 = vmul.f32 0.03125, %v14042_v24  ;;  %v3569_v45 = vadd.f32 1e-05, %v3537_v54  ;;  %v3426_v11 = vadd.f32 %v3425_v52, %v3424_v59 }
 0x595   : > { %v14136_v39 = vsub.f32 %v13621_v3, %v4894_v1  ;;  %v3441_v16 = vrot.slane %v3324_v63, 4  ;;  %v3391_v15 = vrot.slane %v3390_v61, 1  ;;  %v3413_v38 = vrot.slane %v3412_v12, 2 }
 0x596   : > { %v3592_v58 = vadd.f32 1e-05, %v3560_v13  ;;  %v4966_v6 = vpop.xlane.xlu1 %4965  ;;  %v3448_v40 = vadd.f32 %v3447_v0, %v3325_v57  ;;  %v3535_v62 = vmul.f32 0.125, %v3368_v44  ;;  %v3404_v29 = vadd.f32 %v3403_v25, %v3402_v17 }
 0x597   : > { %3805 = vrot.lane.b32.xlu0 %v3716_v30, %s11493_s10  ;;  %v4958_v28 = vmul.f32 %v14136_v39, %v14136_v39  ;;  %v3471_v32 = vrot.slane %v3329_v7, 4  ;;  %v3427_v24 = vrot.slane %v3426_v11, 1  ;;  %v3442_v3 = vadd.f32 %v3441_v16, %v3324_v63 }
 0x598   : > { %11096 = vrsqrt.f32 %v3592_v58  ;;  %v3392_v5 = vadd.f32 %v3391_v15, %v3390_v61  ;;  %v3414_v22 = vadd.f32 %v3413_v38, %v3412_v12  ;;  %v3327_v51 = vmul.f32 0.03125, %v14051_v33 }
 0x599   : > { %v14118_v9 = vpop.xlane.xlu0 %4974  ;;  %11098 = vrsqrt.f32 %v3569_v45  ;;  %v3449_v43 = vrot.slane %v3448_v40, 2  ;;  %v5048_v13 = vsel %vm2581_vm7, %v4958_v28, 0.0  ;;  %v3567_v34 = vadd.f32 1e-05, %v3535_v62 }
 0x59a   : > { %v4984_v19 = vpop.xlane.xlu1 %4983  ;;  %v3541_v23 = vmul.f32 0.125, %v3404_v29  ;;  %v3472_v59 = vadd.f32 %v3471_v32, %v3329_v7  ;;  %v5060_v21 = vmul.f32 0.03125, %v4972_v56  ;;  %v3428_v53 = vadd.f32 %v3427_v24, %v3426_v11 }
 0x59b   : > { %v11095_v48 = vpop.eup %11094  ;;  %v3443_v30 = vrot.slane %v3442_v3, 2  ;;  %v3539_v17 = vmul.f32 0.125, %v3392_v5  ;;  %v3415_v58 = vrot.slane %v3414_v22, 1  ;;  %v3459_v54 = vrot.slane %v3327_v51, 4 }
 0x59c   : > { %v3658_v36 = vmul.f32 %v11095_v48, %v13791_v4  ;;  %v3450_v52 = vadd.f32 %v3449_v43, %v3448_v40  ;;  %v3333_v63 = vmul.f32 0.03125, %v14060_v46  ;;  %11100 = vrsqrt.f32 %v3567_v34 }
 0x59d   : > { %v3573_v61 = vadd.f32 1e-05, %v3541_v23  ;;  %v3473_v12 = vrot.slane %v3472_v59, 2  ;;  %v5107_v56 = vrot.slane %v5060_v21, 4  ;;  %v3545_v1 = vmul.f32 0.125, %v3428_v53 }
 0x59e   : > { %v14125_v20 = vpop.xlane.xlu0 %4992  ;;  %v3690_v10 = vmul.f32 %v3658_v36, %v14021_v8  ;;  %v3444_v44 = vadd.f32 %v3443_v30, %v3442_v3  ;;  %v4978_v0 = vpop.xlane.xlu1 %4977  ;;  %v3571_v7 = vadd.f32 1e-05, %v3539_v17  ;;  %v3416_v45 = vadd.f32 %v3415_v58, %v3414_v22 }
 0x59f   : > { %v3460_v11 = vadd.f32 %v3459_v54, %v3327_v51  ;;  %v5058_v16 = vmul.f32 0.03125, %v4966_v6  ;;  %v3451_v38 = vrot.slane %v3450_v52, 1  ;;  %v3495_v46 = vrot.slane %v3333_v63, 4 }
 0x5a0   : > { %v3722_v4 = vadd.f32 %v3690_v10, %v14028_v47  ;;  %v3331_v40 = vmul.f32 0.03125, %v14069_v18  ;;  %11102 = vrsqrt.f32 %v3573_v61  ;;  %v3474_v48 = vadd.f32 %v3473_v12, %v3472_v59 }
 0x5a1   : > { %v5108_v62 = vadd.f32 %v5107_v56, %v5060_v21  ;;  %v3577_v32 = vadd.f32 1e-05, %v3545_v1  ;;  %v3445_v24 = vrot.slane %v3444_v44, 1  ;;  %v5064_v3 = vmul.f32 0.03125, %v4984_v19 }
 0x5a2   : > { %v11097_v57 = vpop.eup %11096  ;;  %3817 = vrot.lane.b32.xlu0 %v3722_v4, %s11493_s10  ;;  %v3543_v5 = vmul.f32 0.125, %v3416_v45  ;;  %v3461_v22 = vrot.slane %v3460_v11, 2  ;;  %v5095_v6 = vrot.slane %v5058_v16, 4  ;;  %11104 = vrsqrt.f32 %v3571_v7  ;;  %v14158_v36 = vpop.xlane.xlu1 %4995 }
 0x5a3   : > { %v14132_v55 = vpop.xlane.xlu0 %4986  ;;  %v3656_v25 = vmul.f32 %v11097_v57, %v13802_v49  ;;  %v11099_v15 = vpop.eup %11098  ;;  %v3452_v43 = vadd.f32 %v3451_v38, %v3450_v52  ;;  %v3496_v18 = vadd.f32 %v3495_v46, %v3333_v63  ;;  %v3475_v34 = vrot.slane %v3474_v48, 1 }
 0x5a4   : > { %v3633_v51 = vmul.f32 %v11099_v15, %v13635_v41  ;;  %v3337_v23 = vmul.f32 0.03125, %v14077_v60  ;;  %v5109_v59 = vrot.slane %v5108_v62, 2  ;;  %11106 = vrsqrt.f32 %v3577_v32 }
 0x5a5   : > { %v3688_v28 = vmul.f32 %v3656_v25, %v14021_v8  ;;  %v3446_v21 = vadd.f32 %v3445_v24, %v3444_v44  ;;  %v5131_v53 = vrot.slane %v5064_v3, 4  ;;  %v3575_v10 = vadd.f32 1e-05, %v3543_v5 }
 0x5a6   : > { %v3665_v19 = vmul.f32 %v3633_v51, %v14021_v8  ;;  %v11101_v30 = vpop.eup %11100  ;;  %v3462_v41 = vadd.f32 %v3461_v22, %v3460_v11  ;;  %v5096_v57 = vadd.f32 %v5095_v6, %v5058_v16  ;;  %v5062_v17 = vmul.f32 0.03125, %v4978_v0  ;;  %v4990_v25 = vpop.xlane.xlu1 %4989 }
 0x5a7   : > { %v3720_v49 = vadd.f32 %v3688_v28, %v14028_v47  ;;  %v3497_v54 = vrot.slane %v3496_v18, 2  ;;  %v3335_v63 = vmul.f32 0.03125, %v14086_v31  ;;  %v3549_v60 = vmul.f32 0.125, %v3452_v43 }
 0x5a8   : > { %v14140_v14 = vpop.xlane.xlu0 %5004  ;;  %v3697_v4 = vadd.f32 %v3665_v19, %v14028_v47  ;;  %v3476_v61 = vadd.f32 %v3475_v34, %v3474_v48  ;;  %v3519_v12 = vrot.slane %v3337_v23, 4  ;;  %v5110_v56 = vadd.f32 %v5109_v59, %v5108_v62 }
 0x5a9   : > { %3813 = vrot.lane.b32.xlu0 %v3720_v49, %s11493_s10  ;;  %v3548_v1 = vmul.f32 0.125, %v3446_v21  ;;  %v5132_v44 = vadd.f32 %v5131_v53, %v5064_v3  ;;  %v3631_v7 = vmul.f32 %v11101_v30, %v13647_v37  ;;  %v3463_v45 = vrot.slane %v3462_v41, 1  ;;  %v16949_v30 = vld [vmem:[#allocation123_spill] sm:$0xff] }
 0x5aa   : > { %v11103_v0 = vpop.eup %11102  ;;  %v5097_v11 = vrot.slane %v5096_v57, 2  ;;  %v5119_v16 = vrot.slane %v5062_v17, 4  ;;  %11108 = vrsqrt.f32 %v3575_v10  ;;  %v3498_v15 = vadd.f32 %v3497_v54, %v3496_v18 }
 0x5ab   : > { %v3507_v38 = vrot.slane %v3335_v63, 4  ;;  %v3581_v46 = vadd.f32 1e-05, %v3549_v60  ;;  %v3520_v28 = vadd.f32 %v3519_v12, %v3337_v23  ;;  %v5111_v48 = vrot.slane %v5110_v56, 1 }
 0x5ac   : > { %v11105_v32 = vpop.eup %11104  ;;  %v3580_v24 = vadd.f32 1e-05, %v3548_v1  ;;  %v5133_v3 = vrot.slane %v5132_v44, 2  ;;  %v3663_v49 = vmul.f32 %v3631_v7, %v14021_v8  ;;  %v3464_v37 = vadd.f32 %v3463_v45, %v3462_v41  ;;  %v16950_v45 = vld [vmem:[#allocation124_spill] sm:$0xff] }
 0x5ad   : > { %v5098_v5 = vadd.f32 %v5097_v11, %v5096_v57  ;;  %v5120_v22 = vadd.f32 %v5119_v16, %v5062_v17  ;;  %v3499_v51 = vrot.slane %v3498_v15, 1  ;;  %v3508_v18 = vadd.f32 %v3507_v38, %v3335_v63 }
 0x5ae   : > { %v14146_v33 = vpop.xlane.xlu0 %4998  ;;  %v11107_v6 = vpop.eup %11106  ;;  %v3695_v34 = vadd.f32 %v3663_v49, %v14028_v47  ;;  %11110 = vrsqrt.f32 %v3581_v46  ;;  %v3521_v59 = vrot.slane %v3520_v28, 2  ;;  %v5112_v19 = vadd.f32 %v5111_v48, %v5110_v56 }
 0x5af   : > { %5049 = vadd.xlane.f32.xlu1 %v5048_v13  ;;  %v3483_v13 = vrot.slane %v3331_v40, 4  ;;  %11112 = vrsqrt.f32 %v3580_v24  ;;  %v5134_v21 = vadd.f32 %v5133_v3, %v5132_v44  ;;  %v3637_v53 = vmul.f32 %v11103_v0, %v13660_v26 }
 0x5b0   : > { %v3635_v10 = vmul.f32 %v11105_v32, %v16949_v30  ;;  %v3551_v41 = vmul.f32 0.125, %v3464_v37  ;;  %v5099_v57 = vrot.slane %v5098_v5, 1  ;;  %v5121_v17 = vrot.slane %v5120_v22, 2 }
 0x5b1   : > { %v3484_v52 = vadd.f32 %v3483_v13, %v3331_v40  ;;  %v3553_v40 = vmul.f32 0.125, %v3476_v61  ;;  %v14172_v13 = vpop.xlane.xlu1 %5007  ;;  %v5068_v54 = vmul.f32 0.03125, %v14158_v36  ;;  %v3500_v63 = vadd.f32 %v3499_v51, %v3498_v15 }
 0x5b2   : > { %v14154_v29 = vpop.xlane.xlu0 %5016  ;;  %v3509_v60 = vrot.slane %v3508_v18, 2  ;;  %v3669_v61 = vmul.f32 %v3637_v53, %v14021_v8  ;;  %v3522_v12 = vadd.f32 %v3521_v59, %v3520_v28  ;;  %v5284_v56 = vmul.f32 0.125, %v5112_v19 }
 0x5b3   : > { %v3485_v31 = vrot.slane %v3484_v52, 2  ;;  %v3585_v23 = vadd.f32 1e-05, %v3553_v40  ;;  %v5135_v44 = vrot.slane %v5134_v21, 1  ;;  %v3667_v0 = vmul.f32 %v3635_v10, %v14021_v8 }
 0x5b4   : > { %v11109_v1 = vpop.eup %11108  ;;  %v3701_v7 = vadd.f32 %v3669_v61, %v14028_v47  ;;  %v3641_v11 = vmul.f32 %v11107_v6, %v16950_v45  ;;  %v5100_v36 = vadd.f32 %v5099_v57, %v5098_v5  ;;  %v5122_v16 = vadd.f32 %v5121_v17, %v5120_v22  ;;  %v16951_v22 = vld [vmem:[#allocation125_spill] sm:$0xff] }
 0x5b5   : > { %v3486_v43 = vadd.f32 %v3485_v31, %v3484_v52  ;;  %11114 = vrsqrt.f32 %v3585_v23  ;;  %v5002_v26 = vpop.xlane.xlu1 %5001  ;;  %v5155_v31 = vrot.slane %v5068_v54, 4  ;;  %v5066_v15 = vmul.f32 0.03125, %v4990_v25 }
 0x5b6   : > { %v3583_v46 = vadd.f32 1e-05, %v3551_v41  ;;  %v3557_v40 = vmul.f32 0.125, %v3500_v63  ;;  %v3510_v28 = vadd.f32 %v3509_v60, %v3508_v18  ;;  %v3523_v32 = vrot.slane %v3522_v12, 1 }
 0x5b7   : > { %v14163_v58 = vpop.xlane.xlu0 %5010  ;;  %v5059_v24 = vmul.f32 0.03125, %v14095_v42  ;;  %v5316_v3 = vadd.f32 1e-05, %v5284_v56  ;;  %v5070_v49 = vmul.f32 0.03125, %v5002_v26  ;;  %v5136_v37 = vadd.f32 %v5135_v44, %v5134_v21 }
 0x5b8   : > { %v3699_v6 = vadd.f32 %v3667_v0, %v14028_v47  ;;  %v3673_v5 = vmul.f32 %v3641_v11, %v14021_v8  ;;  %v3639_v25 = vmul.f32 %v11109_v1, %v16951_v22  ;;  %v11111_v51 = vpop.eup %11110  ;;  %v5123_v23 = vrot.slane %v5122_v16, 1 }
 0x5b9   : > { %v5156_v59 = vadd.f32 %v5155_v31, %v5068_v54  ;;  %v11113_v18 = vpop.eup %11112  ;;  %11116 = vrsqrt.f32 %v3583_v46  ;;  %v3589_v19 = vadd.f32 1e-05, %v3557_v40  ;;  %v3511_v30 = vrot.slane %v3510_v28, 1  ;;  %v5020_v17 = vpop.xlane.xlu1 %5019 }
 0x5ba   : > { %v3524_v42 = vadd.f32 %v3523_v32, %v3522_v12  ;;  %v5101_v21 = vrot.slane %v5059_v24, 4  ;;  %11118 = vrsqrt.f32 %v5316_v3  ;;  %v5167_v10 = vrot.slane %v5070_v49, 4 }
 0x5bb   : > { %v5288_v57 = vmul.f32 0.125, %v5136_v37  ;;  %v3705_v63 = vadd.f32 %v3673_v5, %v14028_v47  ;;  %v3671_v54 = vmul.f32 %v3639_v25, %v14021_v8  ;;  %v5124_v1 = vadd.f32 %v5123_v23, %v5122_v16  ;;  %v16954_v23 = vld [vmem:[#allocation128_spill] sm:$0xff] }
 0x5bc   : > { %v5157_v44 = vrot.slane %v5156_v59, 2  ;;  %11120 = vrsqrt.f32 %v3589_v19  ;;  %v3512_v12 = vadd.f32 %v3511_v30, %v3510_v28  ;;  %v3561_v45 = vmul.f32 0.125, %v3524_v42 }
 0x5bd   : > { %v14169_v62 = vpop.xlane.xlu0 %5028  ;;  %v5102_v11 = vadd.f32 %v5101_v21, %v5059_v24  ;;  %v5320_v31 = vadd.f32 1e-05, %v5288_v57  ;;  %v3703_v46 = vadd.f32 %v3671_v54, %v14028_v47  ;;  %v5286_v16 = vmul.f32 0.125, %v5124_v1  ;;  %v14216_v54 = vld [vmem:[%s16414_s4 + $0x38] sm:$0xff] }
 0x5be   : > { %v3593_v24 = vadd.f32 1e-05, %v3561_v45  ;;  %v5076_v5 = vmul.f32 0.03125, %v5020_v17 }
 0x5bf   : > { %v11115_v61 = vpop.eup %11114  ;;  %v5103_v25 = vrot.slane %v5102_v11, 2 }
 0x5c0   : > { %3767 = vrot.lane.b32.xlu1 %v3697_v4, %s11493_s10  ;;  %v3487_v4 = vrot.slane %v3486_v43, 1 }
 0x5c1   : > { %v14179_v52 = vpop.xlane.xlu0 %5022  ;;  %v5104_v1 = vadd.f32 %v5103_v25, %v5102_v11 }
 0x5c2   : > { %v3488_v48 = vadd.f32 %v3487_v4, %v3486_v43  ;;  %v5143_v43 = vrot.slane %v5066_v15, 4  ;;  %v16952_v4 = vld [vmem:[#allocation126_spill] sm:$0xff] }
 0x5c3   : > { %v3645_v60 = vmul.f32 %v11111_v51, %v16952_v4  ;;  %v11117_v22 = vpop.eup %11116 }
 0x5c4   : > { %3763 = vrot.lane.b32.xlu1 %v3695_v34, %s11493_s10  ;;  %v5282_v34 = vmul.f32 0.125, %v5100_v36  ;;  %v3555_v53 = vmul.f32 0.125, %v3488_v48  ;;  %v5144_v26 = vadd.f32 %v5143_v43, %v5066_v15  ;;  %v5168_v36 = vadd.f32 %v5167_v10, %v5070_v49  ;;  %v16953_v48 = vld [vmem:[#allocation127_spill] sm:$0xff]  ;;  %v11119_v43 = vpop.eup %11118 }
 0x5c5   : > { %v3677_v40 = vmul.f32 %v3645_v60, %v14021_v8  ;;  %v3644_v32 = vmul.f32 %v11113_v18, %v16953_v48  ;;  %v5158_v15 = vadd.f32 %v5157_v44, %v5156_v59  ;;  %v3649_v59 = vmul.f32 %v11115_v61, %v16954_v23  ;;  %v14222_v60 = vld [vmem:[%s16414_s4 + $0x30] sm:$0xff] }
 0x5c6   : > { %v5314_v56 = vadd.f32 1e-05, %v5282_v34  ;;  %v3587_v0 = vadd.f32 1e-05, %v3555_v53  ;;  %v5145_v3 = vrot.slane %v5144_v26, 2  ;;  %v5169_v49 = vrot.slane %v5168_v36, 2  ;;  %v11121_v17 = vpop.eup %11120 }
 0x5c7   : > { %v3709_v51 = vadd.f32 %v3677_v40, %v14028_v47  ;;  %v3676_v34 = vmul.f32 %v3644_v32, %v14021_v8  ;;  %v5318_v18 = vadd.f32 1e-05, %v5286_v16  ;;  %v5159_v19 = vrot.slane %v5158_v15, 1 }
 0x5c8   : > { %3775 = vrot.lane.b32.xlu1 %v3701_v7, %s11493_s10  ;;  %v5057_v7 = vmul.f32 0.03125, %v14106_v35  ;;  %11122 = vrsqrt.f32 %v5314_v56  ;;  %v3559_v35 = vmul.f32 0.125, %v3512_v12  ;;  %v5146_v53 = vadd.f32 %v5145_v3, %v5144_v26  ;;  %v16957_v3 = vld [vmem:[#allocation130_spill] sm:$0xff] }
 0x5c9   : > { %11124 = vrsqrt.f32 %v3587_v0  ;;  %v5063_v10 = vmul.f32 0.03125, %v14113_v27  ;;  %v5170_v57 = vadd.f32 %v5169_v49, %v5168_v36  ;;  %v5203_v47 = vrot.slane %v5076_v5, 4  ;;  %v16955_v27 = vld [vmem:[#allocation129_spill] sm:$0xff]  ;;  %v16956_v0 = vld [vmem:[#allocation6_spill] sm:$0xff] }
 0x5ca   : > { %v14185_v38 = vpop.xlane.xlu0 %5040  ;;  %v5089_v37 = vrot.slane %v5057_v7, 4  ;;  %11126 = vrsqrt.f32 %v5320_v31  ;;  %v3591_v42 = vadd.f32 1e-05, %v3559_v35  ;;  %v3708_v4 = vadd.f32 %v14216_v54, %v3676_v34 }
 0x5cb   : > { %11128 = vrsqrt.f32 %v3593_v24  ;;  %v3681_v61 = vmul.f32 %v14222_v60, %v3649_v59  ;;  %v3647_v56 = vmul.f32 %v11117_v22, %v16955_v27  ;;  %v5160_v44 = vadd.f32 %v5159_v19, %v5158_v15  ;;  %v16959_v59 = vld [vmem:[#allocation136_spill] sm:$0xff] }
 0x5cc   : > { %3771 = vrot.lane.b32.xlu1 %v3699_v6, %s11493_s10  ;;  %v5014_v6 = vpop.xlane.xlu1 %5013  ;;  %v5090_v21 = vadd.f32 %v5089_v37, %v5057_v7  ;;  %11130 = vrsqrt.f32 %v5318_v18  ;;  %v5147_v26 = vrot.slane %v5146_v53, 1  ;;  %v5380_v36 = vmul.f32 %v11119_v43, %v13814_v50 }
 0x5cd   : > { %v5074_v8 = vmul.f32 0.03125, %v5014_v6  ;;  %11132 = vrsqrt.f32 %v3591_v42  ;;  %v5061_v40 = vmul.f32 0.03125, %v14118_v9  ;;  %v5171_v48 = vrot.slane %v5170_v57, 1  ;;  %v14237_v9 = vld [vmem:[%s16414_s4 + $0x50] sm:$0xff] }
 0x5ce   : > { %v5091_v7 = vrot.slane %v5090_v21, 2  ;;  %v5204_v32 = vadd.f32 %v5203_v47, %v5076_v5  ;;  %v3713_v11 = vadd.f32 %v14216_v54, %v3681_v61  ;;  %v3679_v15 = vmul.f32 %v14222_v60, %v3647_v56 }
 0x5cf   : > { %v5191_v16 = vrot.slane %v5074_v8, 4  ;;  %v3653_v35 = vmul.f32 %v11121_v17, %v16957_v3  ;;  %v5105_v6 = vrot.slane %v5104_v1, 1  ;;  %v5292_v24 = vmul.f32 0.125, %v5160_v44 }
 0x5d0   : > { %v14193_v41 = vpop.xlane.xlu0 %5034  ;;  %3783 = vrot.lane.b32.xlu1 %v3705_v63, %s11493_s10  ;;  %v5032_v63 = vpop.xlane.xlu1 %5031  ;;  %v5148_v50 = vadd.f32 %v5147_v26, %v5146_v53  ;;  %v14239_v5 = vadd.f32 %v5091_v7, %v5090_v21  ;;  %v5412_v23 = vmul.f32 %v5380_v36, %v14237_v9  ;;  %v5113_v53 = vrot.slane %v5061_v40, 4 }
 0x5d1   : > { %v5080_v49 = vmul.f32 0.03125, %v5032_v63  ;;  %v5172_v42 = vadd.f32 %v5171_v48, %v5170_v57  ;;  %v5205_v47 = vrot.slane %v5204_v32, 2  ;;  %v5192_v17 = vadd.f32 %v5191_v16, %v5074_v8 }
 0x5d2   : > { %v11123_v31 = vpop.eup %11122  ;;  %v3711_v21 = vadd.f32 %v14216_v54, %v3679_v15  ;;  %v3685_v63 = vmul.f32 %v14222_v60, %v3653_v35  ;;  %v5324_v56 = vadd.f32 1e-05, %v5292_v24  ;;  %v5290_v44 = vmul.f32 0.125, %v5148_v50 }
 0x5d3   : > { %v11125_v37 = vpop.eup %11124  ;;  %v5378_v43 = vmul.f32 %v11123_v31, %v16959_v59  ;;  %v5227_v26 = vrot.slane %v5080_v49, 4  ;;  %v5106_v57 = vadd.f32 %v5105_v6, %v5104_v1  ;;  %v5294_v48 = vmul.f32 0.125, %v5172_v42 }
 0x5d4   : > { %3779 = vrot.lane.b32.xlu1 %v3703_v46, %s11493_s10  ;;  %v5125_v46 = vrot.slane %v5063_v10, 4  ;;  %v5026_v25 = vpop.xlane.xlu1 %5025  ;;  %v11127_v18 = vpop.eup %11126  ;;  %v5206_v16 = vadd.f32 %v5205_v47, %v5204_v32  ;;  %v5193_v15 = vrot.slane %v5192_v17, 2  ;;  %v3717_v1 = vadd.f32 %v14216_v54, %v3685_v63  ;;  %v16964_v47 = vld [vmem:[#allocation133_spill] sm:$0xff] }
 0x5d5   : > { %v11129_v27 = vpop.eup %11128  ;;  %v5410_v7 = vmul.f32 %v5378_v43, %v14237_v9  ;;  %11134 = vrsqrt.f32 %v5324_v56  ;;  %v5322_v24 = vadd.f32 1e-05, %v5290_v44  ;;  %v5228_v50 = vadd.f32 %v5227_v26, %v5080_v49 }
 0x5d6   : > { %v14203_v28 = vpop.xlane.xlu0 %5052  ;;  %v5126_v19 = vadd.f32 %v5125_v46, %v5063_v10  ;;  %v14252_v10 = vld [vmem:[%s16414_s4 + $0x58] sm:$0xff]  ;;  %v11131_v36 = vpop.eup %11130  ;;  %v5114_v46 = vadd.f32 %v5113_v53, %v5061_v40  ;;  %v5326_v43 = vadd.f32 1e-05, %v5294_v48  ;;  %v5194_v53 = vadd.f32 %v5193_v15, %v5192_v17 }
 0x5d7   : > { %v5444_v8 = vadd.f32 %v5412_v23, %v14252_v10  ;;  %v5442_v40 = vadd.f32 %v5410_v7, %v14252_v10  ;;  %11136 = vrsqrt.f32 %v5322_v24  ;;  %v5229_v63 = vrot.slane %v5228_v50, 2 }
 0x5d8   : > { %3791 = vrot.lane.b32.xlu1 %v3709_v51, %s11493_s10  ;;  %v16958_v51 = vld [vmem:[#allocation9_spill] sm:$0xff]  ;;  %v5127_v31 = vrot.slane %v5126_v19, 2  ;;  %v5044_v3 = vpop.xlane.xlu1 %5043  ;;  %v5115_v59 = vrot.slane %v5114_v46, 2  ;;  %11138 = vrsqrt.f32 %v5326_v43 }
 0x5da   : > { %v14209_v30 = vpop.xlane.xlu0 %5046  ;;  %v5128_v23 = vadd.f32 %v5127_v31, %v5126_v19 }
 0x5dc   : > { %3789 = vrot.lane.b32.xlu1 %v3708_v4, %s11493_s10  ;;  %v16960_v4 = vld [vmem:[#allocation131_spill] sm:$0xff]  ;;  %v5038_v56 = vpop.xlane.xlu1 %5037  ;;  %v5129_v26 = vrot.slane %v5128_v23, 1 }
 0x5dd   : > { %v3651_v61 = vmul.f32 %v11125_v37, %v16960_v4  ;;  %v16962_v37 = vld [vmem:[#allocation132_spill] sm:$0xff]  ;;  %v5082_v48 = vmul.f32 0.03125, %v5038_v56 }
 0x5de   : > { %v3762_v12 = vpop.permute.xlu0 %3761  ;;  %v3657_v6 = vmul.f32 %v11129_v27, %v16962_v37  ;;  %v5283_v27 = vmul.f32 0.125, %v5106_v57  ;;  %v16968_v56 = vld [vmem:[#allocation40_spill] sm:$0xff] }
 0x5df   : > { %v3854_v45 = vadd.f32 %v3762_v12, %v16956_v0  ;;  %v5078_v12 = vmul.f32 0.03125, %v5026_v25  ;;  %v16961_v0 = vld [vmem:[#allocation99_spill] sm:$0xff]  ;;  %v3683_v35 = vmul.f32 %v14222_v60, %v3651_v61  ;;  %v5093_v25 = vrot.slane %v14239_v5, 1 }
 0x5e0   : > { %3799 = vrot.lane.b32.xlu1 %v3713_v11, %s11493_s10  ;;  %v11133_v11 = vpop.eup %11132  ;;  %v3689_v42 = vmul.f32 %v14222_v60, %v3657_v6  ;;  %v5084_v61 = vmul.f32 0.03125, %v5044_v3 }
 0x5e1   : > { %5671 = vrot.lane.b32.xlu0 %v3854_v45, %s11494_s16  ;;  %v5384_v45 = vmul.f32 %v11127_v18, %v16961_v0  ;;  %v5207_v18 = vrot.slane %v5206_v16, 1  ;;  %v3715_v49 = vadd.f32 %v14216_v54, %v3683_v35  ;;  %v5094_v44 = vadd.f32 %v5093_v25, %v14239_v5  ;;  %v11135_v15 = vpop.eup %11134  ;;  %v3760_v25 = vpop.permute.xlu1 %3759 }
 0x5e2   : > { %v3758_v22 = vpop.permute.xlu0 %3757  ;;  %v5195_v0 = vrot.slane %v5194_v53, 1  ;;  %v5251_v31 = vrot.slane %v5084_v61, 4 }
 0x5e3   : > { %v3852_v34 = vadd.f32 %v3758_v22, %v16958_v51  ;;  %v5215_v22 = vrot.slane %v5078_v12, 4  ;;  %v5416_v32 = vmul.f32 %v5384_v45, %v14237_v9  ;;  %v16963_v51 = vld [vmem:[#allocation100_spill] sm:$0xff]  ;;  %v5208_v7 = vadd.f32 %v5207_v18, %v5206_v16 }
 0x5e4   : > { %3795 = vrot.lane.b32.xlu1 %v3711_v21, %s11493_s10  ;;  %v3655_v21 = vmul.f32 %v11133_v11, %v16964_v47  ;;  %v5230_v45 = vadd.f32 %v5229_v63, %v5228_v50  ;;  %v5281_v3 = vmul.f32 0.125, %v5094_v44  ;;  %v5130_v16 = vadd.f32 %v5129_v26, %v5128_v23  ;;  %v16969_v44 = vld [vmem:[#allocation104_spill] sm:$0xff] }
 0x5e5   : > { %5667 = vrot.lane.b32.xlu0 %v3852_v34, %s11494_s16  ;;  %v5382_v34 = vmul.f32 %v11131_v36, %v16963_v51  ;;  %v5216_v4 = vadd.f32 %v5215_v22, %v5078_v12  ;;  %v5448_v19 = vadd.f32 %v5416_v32, %v14252_v10  ;;  %v3721_v12 = vadd.f32 %v14216_v54, %v3689_v42  ;;  %v16966_v51 = vld [vmem:[#allocation103_spill] sm:$0xff] }
 0x5e6   : > { %v3687_v57 = vmul.f32 %v14222_v60, %v3655_v21  ;;  %v3770_v11 = vpop.permute.xlu0 %3769  ;;  %v5300_v35 = vmul.f32 0.125, %v5208_v7  ;;  %v5196_v37 = vadd.f32 %v5195_v0, %v5194_v53  ;;  %v5231_v6 = vrot.slane %v5230_v45, 1 }
 0x5e7   : > { %v5414_v17 = vmul.f32 %v5382_v34, %v14237_v9  ;;  %v5217_v36 = vrot.slane %v5216_v4, 2  ;;  %v5252_v50 = vadd.f32 %v5251_v31, %v5084_v61  ;;  %v5239_v22 = vrot.slane %v5082_v48, 4 }
 0x5e8   : > { %3807 = vrot.lane.b32.xlu1 %v3717_v1, %s11493_s10  ;;  %v3719_v60 = vadd.f32 %v14216_v54, %v3687_v57  ;;  %v5388_v34 = vmul.f32 %v11135_v15, %v16966_v51  ;;  %v5313_v23 = vadd.f32 1e-05, %v5281_v3  ;;  %v5287_v43 = vmul.f32 0.125, %v5130_v16  ;;  %v16967_v54 = vld [vmem:[#allocation39_spill] sm:$0xff] }
 0x5e9   : > { %5511 = vrot.lane.b32.xlu0 %v5444_v8, %s11493_s10  ;;  %v5116_v8 = vadd.f32 %v5115_v59, %v5114_v46  ;;  %v5446_v5 = vadd.f32 %v5414_v17, %v14252_v10  ;;  %v5315_v46 = vadd.f32 1e-05, %v5283_v27  ;;  %v5218_v24 = vadd.f32 %v5217_v36, %v5216_v4  ;;  %v11137_v59 = vpop.eup %11136 }
 0x5ea   : > { %v3766_v53 = vpop.permute.xlu0 %3765  ;;  %v5298_v42 = vmul.f32 0.125, %v5196_v37  ;;  %v3853_v47 = vadd.f32 %v3760_v25, %v16967_v54  ;;  %v11139_v21 = vpop.eup %11138  ;;  %v5232_v63 = vadd.f32 %v5231_v6, %v5230_v45  ;;  %v5253_v61 = vrot.slane %v5252_v50, 2 }
 0x5eb   : > { %v5117_v1 = vrot.slane %v5116_v8, 1  ;;  %11140 = vrsqrt.f32 %v5315_v46  ;;  %v5219_v4 = vrot.slane %v5218_v24, 1  ;;  %v5240_v27 = vadd.f32 %v5239_v22, %v5082_v48 }
 0x5ec   : > { %3803 = vrot.lane.b32.xlu1 %v3715_v49, %s11493_s10  ;;  %v5332_v49 = vadd.f32 1e-05, %v5300_v35  ;;  %v5420_v17 = vmul.f32 %v5388_v34, %v14237_v9  ;;  %v5386_v26 = vmul.f32 %v11137_v59, %v16969_v44  ;;  %11142 = vrsqrt.f32 %v5313_v23  ;;  %v16975_v44 = vld [vmem:[#allocation111_spill] sm:$0xff] }
 0x5ed   : > { %5507 = vrot.lane.b32.xlu0 %v5442_v40, %s11493_s10  ;;  %v16965_v40 = vld [vmem:[#allocation38_spill] sm:$0xff]  ;;  %v5118_v18 = vadd.f32 %v5117_v1, %v5116_v8  ;;  %v5319_v8 = vadd.f32 1e-05, %v5287_v43  ;;  %v5330_v0 = vadd.f32 1e-05, %v5298_v42  ;;  %v5220_v57 = vadd.f32 %v5219_v4, %v5218_v24 }
 0x5ee   : > { %v3858_v32 = vadd.f32 %v3770_v11, %v16965_v40  ;;  %11144 = vrsqrt.f32 %v5332_v49  ;;  %v5254_v45 = vadd.f32 %v5253_v61, %v5252_v50  ;;  %v5241_v36 = vrot.slane %v5240_v27, 2  ;;  %v16970_v11 = vld [vmem:[#allocation108_spill] sm:$0xff]  ;;  %v16971_v50 = vld [vmem:[#allocation134_spill] sm:$0xff]  ;;  %v3778_v34 = vpop.permute.xlu0 %3777  ;;  %v16972_v49 = vld [vmem:[#allocation7_spill] sm:$0xff] }
 0x5ef   : > { %v5285_v7 = vmul.f32 0.125, %v5118_v18  ;;  %v5452_v31 = vadd.f32 %v5420_v17, %v14252_v10  ;;  %v5418_v48 = vmul.f32 %v5386_v26, %v14237_v9  ;;  %11146 = vrsqrt.f32 %v5319_v8 }
 0x5f0   : > { %3815 = vrot.lane.b32.xlu1 %v3721_v12, %s11493_s10  ;;  %v5304_v12 = vmul.f32 0.125, %v5232_v63  ;;  %11148 = vrsqrt.f32 %v5330_v0  ;;  %v5302_v16 = vmul.f32 0.125, %v5220_v57  ;;  %v5255_v1 = vrot.slane %v5254_v45, 1 }
 0x5f1   : > { %5519 = vrot.lane.b32.xlu0 %v5448_v19, %s11493_s10  ;;  %v3856_v19 = vadd.f32 %v3766_v53, %v16968_v56  ;;  %v5317_v15 = vadd.f32 1e-05, %v5285_v7  ;;  %v5242_v35 = vadd.f32 %v5241_v36, %v5240_v27  ;;  %v5450_v37 = vadd.f32 %v5418_v48, %v14252_v10  ;;  %v16974_v56 = vld [vmem:[#allocation43_spill] sm:$0xff] }
 0x5f2   : > { %v5336_v3 = vadd.f32 1e-05, %v5304_v12  ;;  %v5334_v40 = vadd.f32 1e-05, %v5302_v16  ;;  %v5067_v8 = vmul.f32 0.03125, %v14125_v20  ;;  %v3774_v7 = vpop.permute.xlu0 %3773 }
 0x5f3   : > { %11150 = vrsqrt.f32 %v5317_v15  ;;  %v5243_v51 = vrot.slane %v5242_v35, 1 }
 0x5f4   : > { %3811 = vrot.lane.b32.xlu1 %v3719_v60, %s11493_s10  ;;  %11152 = vrsqrt.f32 %v5336_v3  ;;  %v16978_v3 = vld [vmem:[#allocation112_spill] sm:$0xff] }
 0x5f5   : > { %5515 = vrot.lane.b32.xlu0 %v5446_v5, %s11493_s10  ;;  %v5390_v5 = vmul.f32 %v11139_v21, %v16970_v11  ;;  %v11141_v46 = vpop.eup %11140  ;;  %11154 = vrsqrt.f32 %v5334_v40  ;;  %v5244_v61 = vadd.f32 %v5243_v51, %v5242_v35  ;;  %v5149_v35 = vrot.slane %v5067_v8, 4 }
 0x5f6   : > { %v5379_v22 = vmul.f32 %v11141_v46, %v16971_v50  ;;  %v11143_v25 = vpop.eup %11142  ;;  %v16979_v50 = vld [vmem:[#allocation98_spill] sm:$0xff] }
 0x5f7   : > { %v5422_v60 = vmul.f32 %v5390_v5, %v14237_v9  ;;  %v5306_v11 = vmul.f32 0.125, %v5244_v61  ;;  %v16977_v5 = vld [vmem:[#allocation42_spill] sm:$0xff] }
 0x5f8   : > { %5669 = vrot.lane.b32.xlu1 %v3853_v47, %s11494_s16  ;;  %v11145_v59 = vpop.eup %11144  ;;  %v5411_v54 = vmul.f32 %v5379_v22, %v14237_v9  ;;  %v16973_v47 = vld [vmem:[#allocation135_spill] sm:$0xff]  ;;  %v3860_v15 = vadd.f32 %v3774_v7, %v16977_v5 }
 0x5f9   : > { %5679 = vrot.lane.b32.xlu0 %v3858_v32, %s11494_s16  ;;  %v5256_v32 = vadd.f32 %v5255_v1, %v5254_v45  ;;  %v5454_v43 = vadd.f32 %v5422_v60, %v14252_v10  ;;  %v5377_v21 = vmul.f32 %v11143_v25, %v16973_v47  ;;  %v11147_v63 = vpop.eup %11146  ;;  %v5396_v26 = vmul.f32 %v11145_v59, %v16975_v44  ;;  %v16976_v45 = vld [vmem:[#allocation137_spill] sm:$0xff] }
 0x5fa   : > { %v11149_v27 = vpop.eup %11148  ;;  %v5443_v12 = vadd.f32 %v5411_v54, %v14252_v10  ;;  %v5383_v36 = vmul.f32 %v11147_v63, %v16976_v45  ;;  %v5338_v25 = vadd.f32 1e-05, %v5306_v11 }
 0x5fb   : > { %v5308_v4 = vmul.f32 0.125, %v5256_v32  ;;  %v5409_v57 = vmul.f32 %v5377_v21, %v14237_v9  ;;  %v5428_v20 = vmul.f32 %v5396_v26, %v14237_v9  ;;  %v5394_v16 = vmul.f32 %v11149_v27, %v16978_v3  ;;  %v16981_v21 = vld [vmem:[#allocation117_spill] sm:$0xff]  ;;  %v16984_v3 = vld [vmem:[#allocation139_spill] sm:$0xff] }
 0x5fd   : > { %5675 = vrot.lane.b32.xlu0 %v3856_v19, %s11494_s16  ;;  %v3862_v19 = vadd.f32 %v3778_v34, %v16974_v56  ;;  %v5340_v48 = vadd.f32 1e-05, %v5308_v4  ;;  %v5460_v32 = vadd.f32 %v5428_v20, %v14252_v10  ;;  %v5426_v51 = vmul.f32 %v5394_v16, %v14237_v9  ;;  %v16980_v34 = vld [vmem:[#allocation116_spill] sm:$0xff]  ;;  %v14336_v56 = vpop.permute.xlu0 %3785 }
 0x5ff   : > { %11156 = vrsqrt.f32 %v5340_v48  ;;  %v5458_v54 = vadd.f32 %v5426_v51, %v14252_v10 }
 0x600   : > { %11158 = vrsqrt.f32 %v5338_v25 }
 0x601   : > { %5527 = vrot.lane.b32.xlu0 %v5452_v31, %s11493_s10  ;;  %v11151_v31 = vpop.eup %11150 }
 0x602   : > { %v11153_v1 = vpop.eup %11152  ;;  %v5381_v22 = vmul.f32 %v11151_v31, %v16979_v50  ;;  %v3782_v31 = vpop.permute.xlu0 %3781 }
 0x603   : > { %v11155_v59 = vpop.eup %11154 }
 0x604   : > { %v5398_v63 = vmul.f32 %v11155_v59, %v16981_v21 }
 0x605   : > { %5523 = vrot.lane.b32.xlu0 %v5450_v37, %s11493_s10  ;;  %v5065_v37 = vmul.f32 0.03125, %v14132_v55  ;;  %v5400_v55 = vmul.f32 %v11153_v1, %v16980_v34 }
 0x607   : > { %v5056_v6 = vpop.xlane.xlu1 %5055  ;;  %v5432_v47 = vmul.f32 %v5400_v55, %v14237_v9 }
 0x608   : > { %v5088_v24 = vmul.f32 0.03125, %v5056_v6  ;;  %v5441_v6 = vadd.f32 %v5409_v57, %v14252_v10 }
 0x609   : > { %5531 = vrot.lane.b32.xlu0 %v5454_v43, %s11493_s10  ;;  %v5137_v43 = vrot.slane %v5065_v37, 4  ;;  %v11157_v44 = vpop.eup %11156 }
 0x60a   : > { %v5275_v23 = vrot.slane %v5088_v24, 4  ;;  %v11159_v45 = vpop.eup %11158 }
 0x60b   : > { %v3756_v18 = vpop.permute.xlu1 %3755  ;;  %v5138_v61 = vadd.f32 %v5137_v43, %v5065_v37  ;;  %v5402_v16 = vmul.f32 %v11159_v45, %v16984_v3  ;;  %v5073_v37 = vmul.f32 0.03125, %v14163_v58 }
 0x60c   : > { %v5276_v53 = vadd.f32 %v5275_v23, %v5088_v24  ;;  %v3851_v42 = vadd.f32 %v3756_v18, %v16972_v49  ;;  %v5415_v24 = vmul.f32 %v5383_v36, %v14237_v9  ;;  %v5150_v23 = vadd.f32 %v5149_v35, %v5067_v8 }
 0x60d   : > { %5687 = vrot.lane.b32.xlu0 %v3862_v19, %s11494_s16  ;;  %v5069_v18 = vmul.f32 0.03125, %v14146_v33  ;;  %v5413_v49 = vmul.f32 %v5381_v22, %v14237_v9  ;;  %v5464_v19 = vadd.f32 %v5432_v47, %v14252_v10  ;;  %v5139_v8 = vrot.slane %v5138_v61, 2 }
 0x60e   : > { %v5277_v17 = vrot.slane %v5276_v53, 2  ;;  %5665 = vrot.lane.b32.xlu1 %v3851_v42, %s11494_s16  ;;  %v5151_v4 = vrot.slane %v5150_v23, 2  ;;  %v5075_v36 = vmul.f32 0.03125, %v14154_v29  ;;  %v5079_v29 = vmul.f32 0.03125, %v14169_v62 }
 0x60f   : > { %v5161_v27 = vrot.slane %v5069_v18, 4  ;;  %v5445_v33 = vadd.f32 %v5413_v49, %v14252_v10  ;;  %v5140_v11 = vadd.f32 %v5139_v8, %v5138_v61  ;;  %v5434_v22 = vmul.f32 %v5402_v16, %v14237_v9 }
 0x610   : > { %v5278_v0 = vadd.f32 %v5277_v17, %v5276_v53  ;;  %v5447_v53 = vadd.f32 %v5415_v24, %v14252_v10  ;;  %v5430_v17 = vmul.f32 %v5398_v63, %v14237_v9  ;;  %v5152_v26 = vadd.f32 %v5151_v4, %v5150_v23 }
 0x611   : > { %5683 = vrot.lane.b32.xlu0 %v3860_v15, %s11494_s16  ;;  %v5162_v7 = vadd.f32 %v5161_v27, %v5069_v18  ;;  %v16983_v15 = vld [vmem:[#allocation46_spill] sm:$0xff]  ;;  %v5197_v35 = vrot.slane %v5075_v36, 4  ;;  %v5221_v58 = vrot.slane %v5079_v29, 4  ;;  %v5466_v59 = vadd.f32 %v5434_v22, %v14252_v10  ;;  %v14362_v27 = vpop.permute.xlu0 %3787 }
 0x612   : > { %v5279_v46 = vrot.slane %v5278_v0, 1  ;;  %5509 = vrot.lane.b32.xlu1 %v5443_v12, %s11493_s10  ;;  %v16982_v12 = vld [vmem:[#allocation122_spill] sm:$0xff]  ;;  %v5153_v48 = vrot.slane %v5152_v26, 1 }
 0x613   : > { %v5404_v57 = vmul.f32 %v11157_v44, %v16982_v12  ;;  %v5163_v5 = vrot.slane %v5162_v7, 2 }
 0x614   : > { %v5280_v60 = vadd.f32 %v5279_v46, %v5278_v0  ;;  %v5462_v0 = vadd.f32 %v5430_v17, %v14252_v10  ;;  %v3864_v46 = vadd.f32 %v3782_v31, %v16983_v15 }
 0x615   : > { %5543 = vrot.lane.b32.xlu0 %v5460_v32, %s11493_s10  ;;  %v5436_v20 = vmul.f32 %v5404_v57, %v14237_v9  ;;  %v5164_v24 = vadd.f32 %v5163_v5, %v5162_v7  ;;  %v5185_v32 = vrot.slane %v5073_v37, 4  ;;  %v14365_v57 = vpop.permute.xlu0 %3793  ;;  %v5072_v5 = vmul.f32 0.03125, %v14172_v13 }
 0x616   : > { %v5312_v40 = vmul.f32 0.125, %v5280_v60  ;;  %5505 = vrot.lane.b32.xlu1 %v5441_v6, %s11493_s10  ;;  %v5154_v60 = vadd.f32 %v5153_v48, %v5152_v26  ;;  %v5141_v6 = vrot.slane %v5140_v11, 1 }
 0x617   : > { %v5468_v50 = vadd.f32 %v5436_v20, %v14252_v10  ;;  %v5165_v55 = vrot.slane %v5164_v24, 1  ;;  %v5186_v62 = vadd.f32 %v5185_v32, %v5073_v37 }
 0x618   : > { %v5344_v42 = vadd.f32 1e-05, %v5312_v40  ;;  %v5198_v40 = vadd.f32 %v5197_v35, %v5075_v36  ;;  %v5291_v51 = vmul.f32 0.125, %v5154_v60  ;;  %v5142_v34 = vadd.f32 %v5141_v6, %v5140_v11 }
 0x619   : > { %5539 = vrot.lane.b32.xlu0 %v5458_v54, %s11493_s10  ;;  %v5166_v49 = vadd.f32 %v5165_v55, %v5164_v24  ;;  %v5187_v21 = vrot.slane %v5186_v62, 2  ;;  %v5081_v36 = vmul.f32 0.03125, %v14193_v41  ;;  %v5087_v35 = vmul.f32 0.03125, %v14203_v28  ;;  %v14370_v60 = vpop.permute.xlu0 %3801  ;;  %v16985_v24 = vld [vmem:[#allocation8_spill] sm:$0xff] }
 0x61a   : > { %5517 = vrot.lane.b32.xlu1 %v5447_v53, %s11493_s10  ;;  %11160 = vrsqrt.f32 %v5344_v42  ;;  %v5199_v43 = vrot.slane %v5198_v40, 2  ;;  %v5323_v18 = vadd.f32 1e-05, %v5291_v51  ;;  %v5289_v53 = vmul.f32 0.125, %v5142_v34 }
 0x61b   : > { %v5077_v42 = vmul.f32 0.03125, %v14179_v52  ;;  %v5293_v4 = vmul.f32 0.125, %v5166_v49  ;;  %v5188_v17 = vadd.f32 %v5187_v21, %v5186_v62  ;;  %v5083_v52 = vmul.f32 0.03125, %v14185_v38  ;;  %v16987_v62 = vld [vmem:[#allocation41_spill] sm:$0xff]  ;;  %v16988_v49 = vld [vmem:[#allocation102_spill] sm:$0xff] }
 0x61c   : > { %v5200_v47 = vadd.f32 %v5199_v43, %v5198_v40  ;;  %11162 = vrsqrt.f32 %v5323_v18  ;;  %v5321_v63 = vadd.f32 1e-05, %v5289_v53  ;;  %v5269_v28 = vrot.slane %v5087_v35, 4 }
 0x61d   : > { %5551 = vrot.lane.b32.xlu0 %v5464_v19, %s11493_s10  ;;  %v5209_v61 = vrot.slane %v5077_v42, 4  ;;  %v5325_v44 = vadd.f32 1e-05, %v5293_v4  ;;  %v5245_v12 = vrot.slane %v5083_v52, 4  ;;  %v14379_v4 = vpop.permute.xlu0 %3797 }
 0x61e   : > { %5513 = vrot.lane.b32.xlu1 %v5445_v33, %s11493_s10  ;;  %v5201_v19 = vrot.slane %v5200_v47, 1  ;;  %11164 = vrsqrt.f32 %v5321_v63 }
 0x61f   : > { %v5210_v26 = vadd.f32 %v5209_v61, %v5077_v42  ;;  %11166 = vrsqrt.f32 %v5325_v44  ;;  %v5246_v20 = vadd.f32 %v5245_v12, %v5083_v52 }
 0x620   : > { %v5202_v7 = vadd.f32 %v5201_v19, %v5200_v47  ;;  %v5270_v19 = vadd.f32 %v5269_v28, %v5087_v35  ;;  %v16990_v28 = vld [vmem:[#allocation44_spill] sm:$0xff] }
 0x621   : > { %5547 = vrot.lane.b32.xlu0 %v5462_v0, %s11493_s10  ;;  %v5189_v0 = vrot.slane %v5188_v17, 1  ;;  %v5211_v45 = vrot.slane %v5210_v26, 2  ;;  %v5247_v51 = vrot.slane %v5246_v20, 2 }
 0x622   : > { %v5299_v38 = vmul.f32 0.125, %v5202_v7  ;;  %v16989_v7 = vld [vmem:[#allocation106_spill] sm:$0xff] }
 0x623   : > { %v5212_v16 = vadd.f32 %v5211_v45, %v5210_v26  ;;  %v5248_v63 = vadd.f32 %v5247_v51, %v5246_v20 }
 0x624   : > { %v11161_v1 = vpop.eup %11160  ;;  %v5331_v40 = vadd.f32 1e-05, %v5299_v38 }
 0x625   : > { %5691 = vrot.lane.b32.xlu0 %v3864_v46, %s11494_s16  ;;  %v5408_v25 = vmul.f32 %v11161_v1, %v14058_v2  ;;  %v5222_v2 = vadd.f32 %v5221_v58, %v5079_v29  ;;  %v5190_v46 = vadd.f32 %v5189_v0, %v5188_v17  ;;  %v5233_v1 = vrot.slane %v5081_v36, 4  ;;  %v16986_v29 = vld [vmem:[#allocation101_spill] sm:$0xff] }
 0x626   : > { %v11163_v11 = vpop.eup %11162  ;;  %v5213_v55 = vrot.slane %v5212_v16, 1  ;;  %11168 = vrsqrt.f32 %v5331_v40  ;;  %v5249_v45 = vrot.slane %v5248_v63, 1 }
 0x627   : > { %v5440_v23 = vmul.f32 %v5408_v25, %v14237_v9  ;;  %v5223_v33 = vrot.slane %v5222_v2, 2  ;;  %v5179_v25 = vrot.slane %v5072_v5, 4  ;;  %v5297_v32 = vmul.f32 0.125, %v5190_v46 }
 0x628   : > { %v11165_v22 = vpop.eup %11164  ;;  %v5234_v58 = vadd.f32 %v5233_v1, %v5081_v36  ;;  %v14385_v36 = vpop.permute.xlu0 %3809  ;;  %v5250_v1 = vadd.f32 %v5249_v45, %v5248_v63 }
 0x629   : > { %5559 = vrot.lane.b32.xlu0 %v5468_v50, %s11493_s10  ;;  %v5472_v54 = vadd.f32 %v5440_v23, %v14252_v10  ;;  %v5224_v8 = vadd.f32 %v5223_v33, %v5222_v2  ;;  %v5387_v50 = vmul.f32 %v11163_v11, %v16986_v29  ;;  %v5385_v42 = vmul.f32 %v11165_v22, %v16988_v49  ;;  %v11167_v2 = vpop.eup %11166 }
 0x62a   : > { %v5329_v21 = vadd.f32 1e-05, %v5297_v32  ;;  %v5235_v33 = vrot.slane %v5234_v58, 2  ;;  %v5389_v0 = vmul.f32 %v11167_v2, %v16989_v7 }
 0x62b   : > { %v5225_v15 = vrot.slane %v5224_v8, 1  ;;  %v5419_v53 = vmul.f32 %v5387_v50, %v14237_v9 }
 0x62c   : > { %11170 = vrsqrt.f32 %v5329_v21  ;;  %v5236_v11 = vadd.f32 %v5235_v33, %v5234_v58  ;;  %v14391_v50 = vpop.permute.xlu0 %3805  ;;  %v16992_v21 = vld [vmem:[#allocation45_spill] sm:$0xff] }
 0x62d   : > { %5555 = vrot.lane.b32.xlu0 %v5466_v59, %s11493_s10  ;;  %v5226_v13 = vadd.f32 %v5225_v15, %v5224_v8  ;;  %v5085_v59 = vmul.f32 0.03125, %v14209_v30  ;;  %v5214_v30 = vadd.f32 %v5213_v55, %v5212_v16  ;;  %v5451_v26 = vadd.f32 %v5419_v53, %v14252_v10 }
 0x62e   : > { %v5417_v8 = vmul.f32 %v5385_v42, %v14237_v9  ;;  %v5421_v16 = vmul.f32 %v5389_v0, %v14237_v9 }
 0x62f   : > { %v5303_v47 = vmul.f32 0.125, %v5226_v13  ;;  %v5257_v17 = vrot.slane %v5085_v59, 4  ;;  %v5307_v13 = vmul.f32 0.125, %v5250_v1  ;;  %v16995_v1 = vld [vmem:[#allocation114_spill] sm:$0xff] }
 0x630   : > { %v14397_v58 = vpop.permute.xlu0 %3817 }
 0x631   : > { %5567 = vrot.lane.b32.xlu0 %v5472_v54, %s11493_s10  ;;  %v5180_v54 = vadd.f32 %v5179_v25, %v5072_v5  ;;  %v5335_v12 = vadd.f32 1e-05, %v5303_v47  ;;  %v5271_v5 = vrot.slane %v5270_v19, 2  ;;  %v5258_v15 = vadd.f32 %v5257_v17, %v5085_v59 }
 0x632   : > { %v5453_v25 = vadd.f32 %v5421_v16, %v14252_v10 }
 0x633   : > { %v5181_v46 = vrot.slane %v5180_v54, 2  ;;  %11172 = vrsqrt.f32 %v5335_v12 }
 0x634   : > { %v14406_v17 = vpop.permute.xlu0 %3813 }
 0x635   : > { %v5182_v29 = vadd.f32 %v5181_v46, %v5180_v54 }
 0x637   : > { %v5183_v55 = vrot.slane %v5182_v29, 1 }
 0x639   : > { %v5184_v47 = vadd.f32 %v5183_v55, %v5182_v29  ;;  %v16998_v55 = vld [vmem:[#allocation121_spill] sm:$0xff] }
 0x63b   : > { %v5296_v7 = vmul.f32 0.125, %v5184_v47 }
 0x63c   : > { %v5050_v31 = vpop.xlane.xlu1 %5049 }
 0x63d   : > { %v5086_v48 = vmul.f32 0.03125, %v5050_v31 }
 0x63f   : > { %v5263_v3 = vrot.slane %v5086_v48, 4 }
 0x640   : > { %v3768_v37 = vpop.permute.xlu1 %3767 }
 0x641   : > { %v5264_v6 = vadd.f32 %v5263_v3, %v5086_v48  ;;  %v3857_v41 = vadd.f32 %v3768_v37, %v16985_v24  ;;  %v5301_v48 = vmul.f32 0.125, %v5214_v30  ;;  %v5449_v3 = vadd.f32 %v5417_v8, %v14252_v10  ;;  %v16993_v30 = vld [vmem:[#allocation110_spill] sm:$0xff] }
 0x642   : > { %v5237_v37 = vrot.slane %v5236_v11, 1  ;;  %v5259_v24 = vrot.slane %v5258_v15, 2 }
 0x643   : > { %v5265_v34 = vrot.slane %v5264_v6, 2  ;;  %5677 = vrot.lane.b32.xlu1 %v3857_v41, %s11494_s16  ;;  %v5333_v35 = vadd.f32 1e-05, %v5301_v48  ;;  %v11169_v41 = vpop.eup %11168 }
 0x644   : > { %v3764_v23 = vpop.permute.xlu1 %3763  ;;  %v5238_v40 = vadd.f32 %v5237_v37, %v5236_v11  ;;  %v5260_v51 = vadd.f32 %v5259_v24, %v5258_v15  ;;  %v5071_v15 = vmul.f32 0.03125, %v14140_v14  ;;  %v16996_v37 = vld [vmem:[#allocation51_spill] sm:$0xff] }
 0x645   : > { %v5266_v43 = vadd.f32 %v5265_v34, %v5264_v6  ;;  %v3855_v18 = vadd.f32 %v3764_v23, %v16987_v62  ;;  %v5272_v6 = vadd.f32 %v5271_v5, %v5270_v19  ;;  %v11171_v34 = vpop.eup %11170  ;;  %v16991_v23 = vld [vmem:[#allocation109_spill] sm:$0xff]  ;;  %v5339_v62 = vadd.f32 1e-05, %v5307_v13 }
 0x646   : > { %v11173_v53 = vpop.eup %11172  ;;  %v5305_v49 = vmul.f32 0.125, %v5238_v40  ;;  %v5261_v2 = vrot.slane %v5260_v51, 1  ;;  %v5393_v33 = vmul.f32 %v11171_v34, %v16993_v30 }
 0x647   : > { %v5267_v61 = vrot.slane %v5266_v43, 1  ;;  %5673 = vrot.lane.b32.xlu1 %v3855_v18, %s11494_s16  ;;  %v5273_v32 = vrot.slane %v5272_v6, 1 }
 0x648   : > { %v3776_v52 = vpop.permute.xlu1 %3775  ;;  %v5425_v45 = vmul.f32 %v5393_v33, %v14237_v9 }
 0x649   : > { %v5268_v44 = vadd.f32 %v5267_v61, %v5266_v43  ;;  %v3861_v59 = vadd.f32 %v3776_v52, %v16990_v28  ;;  %v5395_v43 = vmul.f32 %v11169_v41, %v16991_v23  ;;  %v5274_v42 = vadd.f32 %v5273_v32, %v5272_v6  ;;  %v16997_v32 = vld [vmem:[#allocation50_spill] sm:$0xff]  ;;  %v16999_v23 = vld [vmem:[#allocation55_spill] sm:$0xff] }
 0x64a   : > { %v5337_v52 = vadd.f32 1e-05, %v5305_v49  ;;  %v3870_v6 = vadd.f32 %v14365_v57, %v16996_v37  ;;  %v5173_v41 = vrot.slane %v5071_v15, 4  ;;  %v17000_v49 = vld [vmem:[#allocation49_spill] sm:$0xff] }
 0x64b   : > { %v5310_v31 = vmul.f32 0.125, %v5268_v44  ;;  %5525 = vrot.lane.b32.xlu1 %v5451_v26, %s11493_s10  ;;  %v5427_v61 = vmul.f32 %v5395_v43, %v14237_v9  ;;  %v5311_v44 = vmul.f32 0.125, %v5274_v42  ;;  %v5262_v26 = vadd.f32 %v5261_v2, %v5260_v51 }
 0x64c   : > { %v3772_v38 = vpop.permute.xlu1 %3771  ;;  %v5174_v57 = vadd.f32 %v5173_v41, %v5071_v15  ;;  %v3874_v43 = vadd.f32 %v14370_v60, %v16999_v23 }
 0x64d   : > { %v5342_v20 = vadd.f32 1e-05, %v5310_v31  ;;  %v3859_v63 = vadd.f32 %v3772_v38, %v16992_v21  ;;  %v5459_v12 = vadd.f32 %v5427_v61, %v14252_v10  ;;  %v16994_v31 = vld [vmem:[#allocation113_spill] sm:$0xff]  ;;  %v5343_v38 = vadd.f32 1e-05, %v5311_v44  ;;  %v17003_v44 = vld [vmem:[#allocation140_spill] sm:$0xff] }
 0x64e   : > { %v5399_v48 = vmul.f32 %v11173_v53, %v16994_v31  ;;  %v5309_v46 = vmul.f32 0.125, %v5262_v26  ;;  %v5175_v53 = vrot.slane %v5174_v57, 2 }
 0x64f   : > { %11174 = vrsqrt.f32 %v5342_v20  ;;  %5521 = vrot.lane.b32.xlu1 %v5449_v3, %s11493_s10  ;;  %v5328_v20 = vadd.f32 1e-05, %v5296_v7  ;;  %v5457_v3 = vadd.f32 %v5425_v45, %v14252_v10  ;;  %v17004_v7 = vld [vmem:[#allocation59_spill] sm:$0xff] }
 0x650   : > { %v14393_v22 = vpop.permute.xlu1 %3783  ;;  %11176 = vrsqrt.f32 %v5333_v35  ;;  %v5431_v16 = vmul.f32 %v5399_v48, %v14237_v9  ;;  %v5341_v14 = vadd.f32 1e-05, %v5309_v46  ;;  %v5176_v60 = vadd.f32 %v5175_v53, %v5174_v57  ;;  %v17014_v53 = vld [vmem:[#allocation57_spill] sm:$0xff] }
 0x651   : > { %11178 = vrsqrt.f32 %v5339_v62 }
 0x652   : > { %11180 = vrsqrt.f32 %v5337_v52  ;;  %v5463_v13 = vadd.f32 %v5431_v16, %v14252_v10  ;;  %v5177_v31 = vrot.slane %v5176_v60, 1 }
 0x653   : > { %5529 = vrot.lane.b32.xlu1 %v5453_v25, %s11493_s10  ;;  %v14416_v5 = vpop.permute.xlu0 %5671  ;;  %11182 = vrsqrt.f32 %v5343_v38  ;;  %v17007_v38 = vld [vmem:[#allocation58_spill] sm:$0xff] }
 0x654   : > { %v3780_v18 = vpop.permute.xlu1 %3779  ;;  %11184 = vrsqrt.f32 %v5328_v20  ;;  %v3876_v46 = vadd.f32 %v14391_v50, %v17007_v38  ;;  %v5178_v16 = vadd.f32 %v5177_v31, %v5176_v60 }
 0x655   : > { %11186 = vrsqrt.f32 %v5341_v14  ;;  %v3863_v42 = vadd.f32 %v3780_v18, %v17000_v49  ;;  %v17008_v14 = vld [vmem:[#allocation62_spill] sm:$0xff] }
 0x657   : > { %5685 = vrot.lane.b32.xlu1 %v3861_v59, %s11494_s16  ;;  %v14428_v25 = vpop.permute.xlu0 %5667 }
 0x658   : > { %v14410_v0 = vpop.permute.xlu1 %3791 }
 0x659   : > { %v11175_v54 = vpop.eup %11174 }
 0x65a   : > { %v5406_v19 = vmul.f32 %v11175_v54, %v14136_v39  ;;  %v11177_v39 = vpop.eup %11176  ;;  %v17001_v54 = vld [vmem:[#allocation138_spill] sm:$0xff] }
 0x65b   : > { %5681 = vrot.lane.b32.xlu1 %v3859_v63, %s11494_s16  ;;  %v5397_v35 = vmul.f32 %v11177_v39, %v16995_v1  ;;  %v11179_v29 = vpop.eup %11178  ;;  %v14439_v62 = vpop.permute.xlu0 %5511  ;;  %v17002_v63 = vld [vmem:[#allocation54_spill] sm:$0xff] }
 0x65c   : > { %v5438_v8 = vmul.f32 %v5406_v19, %v14237_v9  ;;  %v3790_v24 = vpop.permute.xlu1 %3789  ;;  %v5403_v28 = vmul.f32 %v11179_v29, %v16998_v55  ;;  %v11181_v59 = vpop.eup %11180  ;;  %v3872_v61 = vadd.f32 %v14379_v4, %v17002_v63  ;;  %v17005_v4 = vld [vmem:[#allocation107_spill] sm:$0xff]  ;;  %v3880_v29 = vadd.f32 %v14406_v17, %v17008_v14  ;;  %v17011_v17 = vld [vmem:[#allocation53_spill] sm:$0xff] }
 0x65d   : > { %v5429_v40 = vmul.f32 %v5397_v35, %v14237_v9  ;;  %v3868_v51 = vadd.f32 %v3790_v24, %v16997_v32  ;;  %v5401_v47 = vmul.f32 %v11181_v59, %v17001_v54  ;;  %v11183_v21 = vpop.eup %11182  ;;  %v17010_v32 = vld [vmem:[#allocation63_spill] sm:$0xff]  ;;  %v3867_v55 = vadd.f32 %v14362_v27, %v17011_v17  ;;  %v17017_v63 = vld [vmem:[#allocation61_spill] sm:$0xff] }
 0x65e   : > { %v5470_v11 = vadd.f32 %v5438_v8, %v14252_v10  ;;  %v5435_v2 = vmul.f32 %v5403_v28, %v14237_v9  ;;  %v11185_v30 = vpop.eup %11184  ;;  %v5407_v26 = vmul.f32 %v11183_v21, %v17003_v44  ;;  %v17012_v28 = vld [vmem:[#allocation47_spill] sm:$0xff] }
 0x65f   : > { %5541 = vrot.lane.b32.xlu1 %v5459_v12, %s11493_s10  ;;  %v5461_v34 = vadd.f32 %v5429_v40, %v14252_v10  ;;  %v14450_v33 = vpop.permute.xlu0 %5507  ;;  %v5433_v18 = vmul.f32 %v5401_v47, %v14237_v9  ;;  %v11187_v8 = vpop.eup %11186  ;;  %v3878_v12 = vadd.f32 %v14385_v36, %v17004_v7  ;;  %v5392_v45 = vmul.f32 %v11185_v30, %v17005_v4  ;;  %v17016_v47 = vld [vmem:[#allocation105_spill] sm:$0xff] }
 0x660   : > { %5563 = vrot.lane.b32.xlu0 %v5470_v11, %s11493_s10  ;;  %v3800_v19 = vpop.permute.xlu1 %3799  ;;  %v5467_v52 = vadd.f32 %v5435_v2, %v14252_v10  ;;  %v5439_v39 = vmul.f32 %v5407_v26, %v14237_v9  ;;  %v17006_v11 = vld [vmem:[#allocation141_spill] sm:$0xff]  ;;  %v3866_v59 = vadd.f32 %v14336_v56, %v17012_v28  ;;  %v17015_v56 = vld [vmem:[#allocation60_spill] sm:$0xff] }
 0x661   : > { %v5465_v48 = vadd.f32 %v5433_v18, %v14252_v10  ;;  %v5405_v15 = vmul.f32 %v11187_v8, %v17006_v11  ;;  %v5424_v20 = vmul.f32 %v5392_v45, %v14237_v9  ;;  %v17018_v8 = vld [vmem:[#allocation65_spill] sm:$0xff]  ;;  %v17019_v45 = vld [vmem:[#allocation64_spill] sm:$0xff] }
 0x662   : > { %v5471_v1 = vadd.f32 %v5439_v39, %v14252_v10 }
 0x663   : > { %5537 = vrot.lane.b32.xlu1 %v5457_v3, %s11493_s10  ;;  %v14466_v3 = vpop.permute.xlu0 %5519  ;;  %v5437_v35 = vmul.f32 %v5405_v15, %v14237_v9  ;;  %v5456_v37 = vadd.f32 %v5424_v20, %v14252_v10  ;;  %v17009_v9 = vld [vmem:[#allocation52_spill] sm:$0xff] }
 0x664   : > { %5703 = vrot.lane.b32.xlu0 %v3870_v6, %s11494_s16  ;;  %v3796_v36 = vpop.permute.xlu1 %3795  ;;  %v5295_v6 = vmul.f32 0.125, %v5178_v16  ;;  %v3869_v40 = vadd.f32 %v14410_v0, %v17009_v9  ;;  %v17013_v0 = vld [vmem:[#allocation56_spill] sm:$0xff] }
 0x665   : > { %v5469_v41 = vadd.f32 %v5437_v35, %v14252_v10  ;;  %v3871_v49 = vadd.f32 %v3796_v36, %v17014_v53 }
 0x667   : > { %5549 = vrot.lane.b32.xlu1 %v5463_v13, %s11493_s10  ;;  %v14475_v50 = vpop.permute.xlu0 %5515  ;;  %v5327_v13 = vadd.f32 1e-05, %v5295_v6 }
 0x668   : > { %5699 = vrot.lane.b32.xlu0 %v3868_v51, %s11494_s16  ;;  %v3808_v24 = vpop.permute.xlu1 %3807  ;;  %v3882_v51 = vadd.f32 %v14397_v58, %v17010_v32  ;;  %v3873_v58 = vadd.f32 %v3800_v19, %v17013_v0  ;;  %v11480_v19 = vld [vmem:[%s16414_s4 + $0x50] sm:$0xff] }
 0x669   : > { %11188 = vrsqrt.f32 %v5327_v13  ;;  %v3877_v54 = vadd.f32 %v3808_v24, %v17015_v56 }
 0x66b   : > { %5545 = vrot.lane.b32.xlu1 %v5461_v34, %s11493_s10  ;;  %v14486_v57 = vpop.permute.xlu0 %5679 }
 0x66c   : > { %5711 = vrot.lane.b32.xlu0 %v3874_v43, %s11494_s16  ;;  %v3804_v34 = vpop.permute.xlu1 %3803 }
 0x66f   : > { %5689 = vrot.lane.b32.xlu1 %v3863_v42, %s11494_s16  ;;  %v14497_v23 = vpop.permute.xlu0 %5675 }
 0x670   : > { %5707 = vrot.lane.b32.xlu0 %v3872_v61, %s11494_s16  ;;  %v3816_v43 = vpop.permute.xlu1 %3815  ;;  %v3875_v61 = vadd.f32 %v3804_v34, %v17017_v63  ;;  %v17023_v63 = vld [vmem:[#allocation69_spill] sm:$0xff] }
 0x671   : > { %v3881_v31 = vadd.f32 %v3816_v43, %v17019_v45  ;;  %v17027_v45 = vld [vmem:[#allocation67_spill] sm:$0xff] }
 0x673   : > { %5557 = vrot.lane.b32.xlu1 %v5467_v52, %s11493_s10  ;;  %v11189_v42 = vpop.eup %11188  ;;  %v14501_v2 = vpop.permute.xlu0 %5527 }
 0x674   : > { %5719 = vrot.lane.b32.xlu0 %v3878_v12, %s11494_s16  ;;  %v3812_v27 = vpop.permute.xlu1 %3811  ;;  %v5391_v21 = vmul.f32 %v11189_v42, %v17016_v47  ;;  %v11006_v12 = vld [vmem:[%s16416_s6 + $0x4] ss:$8 sps:$4 sm:$0xff]  }
 0x675   : > { %v3879_v7 = vadd.f32 %v3812_v27, %v17018_v8  ;;  %6039 = vmatprep.mubr.bf16.mxu1 %v11006_v12  ;;  %v5841_v42 = vld [vmem:[%s16414_s4 + $0x80] sm:$0xff] }
 0x676   : > { %v5423_v52 = vmul.f32 %v11480_v19, %v5391_v21  ;;  %v17024_v19 = vld [vmem:[#allocation85_spill] sm:$0xff] }
 0x677   : > { %5553 = vrot.lane.b32.xlu1 %v5465_v48, %s11493_s10  ;;  %v14508_v30 = vpop.permute.xlu0 %5523 }
 0x678   : > { %5715 = vrot.lane.b32.xlu0 %v3876_v46, %s11494_s16  ;;  %v14510_v60 = vpop.permute.xlu1 %5669  ;;  %v5455_v44 = vadd.f32 %v5423_v52, %v14252_v10  ;;  %v17020_v10 = vld [vmem:[#allocation48_spill] sm:$0xff] }
 0x679   : > { %v3865_v39 = vadd.f32 %v14393_v22, %v17020_v10 }
 0x67b   : > { %5565 = vrot.lane.b32.xlu1 %v5471_v1, %s11493_s10  ;;  %v14517_v26 = vpop.permute.xlu0 %5531 }
 0x67c   : > { %5535 = vrot.lane.b32.xlu0 %v5456_v37, %s11493_s10 }
 0x67f   : > { %5561 = vrot.lane.b32.xlu1 %v5469_v41, %s11493_s10  ;;  %v14526_v48 = vpop.permute.xlu0 %5687 }
 0x680   : > { %5723 = vrot.lane.b32.xlu0 %v3880_v29, %s11494_s16  ;;  %v5666_v18 = vpop.permute.xlu1 %5665 }
 0x683   : > { %5701 = vrot.lane.b32.xlu1 %v3869_v40, %s11494_s16  ;;  %v14531_v15 = vpop.permute.xlu0 %5683 }
 0x684   : > { %5727 = vrot.lane.b32.xlu0 %v3882_v51, %s11494_s16  ;;  %v5510_v4 = vpop.permute.xlu1 %5509 }
 0x687   : > { %5697 = vrot.lane.b32.xlu1 %v3867_v55, %s11494_s16  ;;  %v5544_v46 = vpop.permute.xlu0 %5543 }
 0x688   : > { %5695 = vrot.lane.b32.xlu0 %v3866_v59, %s11494_s16  ;;  %v5506_v11 = vpop.permute.xlu1 %5505 }
 0x68b   : > { %5709 = vrot.lane.b32.xlu1 %v3873_v58, %s11494_s16  ;;  %v5540_v36 = vpop.permute.xlu0 %5539 }
 0x68c   : > { %v14534_v38 = vpop.permute.xlu1 %5517  ;;  %v5618_v52 = vadd.f32 %v5540_v36, %v17024_v19  ;;  %v17031_v19 = vld [vmem:[#allocation89_spill] sm:$0xff] }
 0x68f   : > { %5705 = vrot.lane.b32.xlu1 %v3871_v49, %s11494_s16  ;;  %v14538_v1 = vpop.permute.xlu0 %5551 }
 0x690   : > { %v5514_v20 = vpop.permute.xlu1 %5513 }
 0x693   : > { %5717 = vrot.lane.b32.xlu1 %v3877_v54, %s11494_s16  ;;  %v5548_v6 = vpop.permute.xlu0 %5547  ;;  %v17022_v54 = vld [vmem:[#allocation68_spill] sm:$0xff] }
 0x694   : > { %v5601_v47 = vadd.f32 %v5506_v11, %v17022_v54 }
 0x696   : > { %v14581_v10 = vsel %vm2581_vm7, %v5666_v18, %v5601_v47 }
 0x697   : > { %5713 = vrot.lane.b32.xlu1 %v3875_v61, %s11494_s16  ;;  %v14544_v22 = vpop.permute.xlu0 %5691  ;;  %v5602_v61 = vadd.f32 %v14450_v33, %v17023_v63 }
 0x699   : > { %v14599_v18 = vsel %vm2581_vm7, %v14428_v25, %v5602_v61 }
 0x69b   : > { %5533 = vrot.lane.b32.xlu1 %v5455_v44, %s11493_s10  ;;  %v14550_v29 = vpop.permute.xlu0 %5559  ;;  %v17025_v44 = vld [vmem:[#allocation83_spill] sm:$0xff] }
 0x69f   : > { %5721 = vrot.lane.b32.xlu1 %v3879_v7, %s11494_s16  ;;  %v14554_v9 = vpop.permute.xlu0 %5555  ;;  %v17026_v7 = vld [vmem:[#allocation82_spill] sm:$0xff] }
 0x6a3   : > { %5725 = vrot.lane.b32.xlu1 %v3881_v31, %s11494_s16  ;;  %v14556_v51 = vpop.permute.xlu0 %5567  ;;  %v5603_v31 = vadd.f32 %v5510_v4, %v17027_v45 }
 0x6a7   : > { %5693 = vrot.lane.b32.xlu1 %v3865_v39, %s11494_s16 }
 0x6ab   : > { %5844 = vperm.xlu1 %10893, %v5841_v42  }
 0x6b5   : > { %v14536_v16 = vpop.permute.xlu1 %5677 }
 0x6b9   : > { %v5674_v35 = vpop.permute.xlu1 %5673 }
 0x6bd   : > { %v14540_v37 = vpop.permute.xlu1 %5525 }
 0x6c1   : > { %v14542_v24 = vpop.permute.xlu1 %5521 }
 0x6c5   : > { %v14546_v41 = vpop.permute.xlu1 %5529 }
 0x6c9   : > { %v14548_v14 = vpop.permute.xlu1 %5685 }
 0x6cd   : > { %v14552_v13 = vpop.permute.xlu1 %5681 }
 0x6d1   : > { %v5542_v40 = vpop.permute.xlu1 %5541 }
 0x6d2   : > { %v14558_v17 = vpop.permute.xlu0 %5563  ;;  %v5619_v8 = vadd.f32 %v5542_v40, %v17025_v44  ;;  %v17029_v40 = vld [vmem:[#allocation66_spill] sm:$0xff] }
 0x6d3   : > { %v5604_v4 = vadd.f32 %v14439_v62, %v17029_v40 }
 0x6d5   : > { %v5538_v32 = vpop.permute.xlu1 %5537  ;;  %v14616_v25 = vsel %vm2581_vm7, %v14416_v5, %v5604_v4  ;;  %v17037_v4 = vld [vmem:[#allocation72_spill] sm:$0xff] }
 0x6d6   : > { %v5704_v28 = vpop.permute.xlu0 %5703  ;;  %v5617_v12 = vadd.f32 %v5538_v32, %v17026_v7 }
 0x6d9   : > { %v5550_v34 = vpop.permute.xlu1 %5549 }
 0x6da   : > { %v5700_v58 = vpop.permute.xlu0 %5699 }
 0x6db   : > { %v14587_v54 = vsel %vm2581_vm7, %v5700_v58, %v5618_v52  ;;  %v17032_v52 = vld [vmem:[#allocation87_spill] sm:$0xff] }
 0x6dc   : > { %v5623_v44 = vadd.f32 %v5550_v34, %v17032_v52 }
 0x6dd   : > { %v5546_v55 = vpop.permute.xlu1 %5545 }
 0x6de   : > { %v5712_v53 = vpop.permute.xlu0 %5711 }
 0x6e1   : > { %v14560_v59 = vpop.permute.xlu1 %5689 }
 0x6e2   : > { %v5708_v56 = vpop.permute.xlu0 %5707 }
 0x6e5   : > { %v14562_v0 = vpop.permute.xlu1 %5557 }
 0x6e6   : > { %v14583_v39 = vpop.permute.xlu0 %5719 }
 0x6e9   : > { %v14564_v43 = vpop.permute.xlu1 %5553 }
 0x6ea   : > { %v5716_v61 = vpop.permute.xlu0 %5715 }
 0x6ed   : > { %v14566_v49 = vpop.permute.xlu1 %5565 }
 0x6ee   : > { %17021 = vst [vmem:[#allocation115_spill] sm:$0xff] %v14566_v49  ;;  %v17028_v49 = vld [vmem:[#allocation84_spill] sm:$0xff] }
 0x6ef   : > { %v5620_v11 = vadd.f32 %v5544_v46, %v17028_v49  ;;  %v5825_v46 = vpack.c.bf16 %v14599_v18, %v14581_v10  ;;  %v14610_v49 = vsel %vm2581_vm7, %v14510_v60, %v5603_v31  ;;  %v5622_v60 = vadd.f32 %v5548_v6, %v17031_v19 }
 0x6f1   : > { %v14571_v27 = vpop.permute.xlu1 %5561  ;;  %v14606_v58 = vsel %vm2581_vm7, %v5704_v28, %v5620_v11  ;;  %v5826_v28 = vpack.c.bf16 %v14616_v25, %v14610_v49  ;;  %v14632_v11 = vsel %vm2581_vm7, %v5708_v56, %v5622_v60  ;;  %v17041_v60 = vld [vmem:[#allocation90_spill] sm:$0xff] }
 0x6f2   : > { %v5625_v52 = vadd.f32 %v14564_v43, %v17041_v60 }
 0x6f5   : > { %v5702_v21 = vpop.permute.xlu1 %5701 }
 0x6f6   : > { %v14590_v33 = vsel %vm2581_vm7, %v5702_v21, %v5619_v8  ;;  %v17030_v21 = vld [vmem:[#allocation70_spill] sm:$0xff] }
 0x6f7   : > { %v5834_v62 = vpack.c.bf16 %v14606_v58, %v14590_v33  ;;  %v5605_v63 = vadd.f32 %v5514_v20, %v17030_v21  ;;  %v17033_v8 = vld [vmem:[#allocation86_spill] sm:$0xff] }
 0x6f8   : > { %v5621_v7 = vadd.f32 %v5546_v55, %v17033_v8 }
 0x6f9   : > { %v5698_v42 = vpop.permute.xlu1 %5697  ;;  %v14627_v31 = vsel %vm2581_vm7, %v5674_v35, %v5605_v63  ;;  %v17036_v35 = vld [vmem:[#allocation71_spill] sm:$0xff] }
 0x6fa   : > { %v14593_v36 = vsel %vm2581_vm7, %v5698_v42, %v5617_v12  ;;  %v17034_v12 = vld [vmem:[#allocation73_spill] sm:$0xff]  ;;  %v17035_v42 = vld [vmem:[#allocation88_spill] sm:$0xff]  ;;  %v5607_v34 = vadd.f32 %v14534_v38, %v17036_v35 }
 0x6fb   : > { %v5833_v32 = vpack.c.bf16 %v14587_v54, %v14593_v36  ;;  %v5606_v45 = vadd.f32 %v14475_v50, %v17034_v12  ;;  %v5624_v20 = vadd.f32 %v14538_v1, %v17035_v42 }
 0x6fd   : > { %v5710_v47 = vpop.permute.xlu1 %5709  ;;  %10197 = vmatprep.subr.bf16.mxu1 %v5833_v32  ;;  %v14642_v50 = vsel %vm2581_vm7, %v14497_v23, %v5606_v45  ;;  %v14651_v56 = vsel %vm2581_vm7, %v5712_v53, %v5624_v20  ;;  %v5608_v32 = vadd.f32 %v14466_v3, %v17037_v4  ;;  %v5536_v23 = vpop.permute.xlu0 %5535  ;;  %v17038_v53 = vld [vmem:[#allocation74_spill] sm:$0xff]  ;;  %v17039_v3 = vld [vmem:[#allocation93_spill] sm:$0xff]  ;;  %v17045_v20 = vld [vmem:[#allocation76_spill] sm:$0xff] }
 0x6fe   : > { %10198 = vmatpush3.bf16.msra.mxu1 %v5825_v46  ;;  %v14635_v40 = vsel %vm2581_vm7, %v5710_v47, %v5623_v44  ;;  %v5827_v55 = vpack.c.bf16 %v14642_v50, %v14627_v31  ;;  %v14657_v46 = vsel %vm2581_vm7, %v14536_v16, %v5607_v34  ;;  %v5609_v21 = vadd.f32 %v14542_v24, %v17038_v53  ;;  %v17042_v44 = vld [vmem:[#allocation77_spill] sm:$0xff] }
 0x6ff   : > { %10199 = vmatprep.subr.bf16.mxu1 %v5834_v62  ;;  %v5836_v38 = vpack.c.bf16 %v14651_v56, %v14635_v40  ;;  %v14663_v47 = vsel %vm2581_vm7, %v14486_v57, %v5608_v32  ;;  %v5626_v63 = vadd.f32 %v14554_v9, %v17039_v3  ;;  %v5610_v57 = vadd.f32 %v14508_v30, %v17042_v44  ;;  %v17047_v4 = vld [vmem:[#allocation97_spill] sm:$0xff]  ;;  %v17048_v32 = vld [vmem:[#allocation94_spill] sm:$0xff] }
 0x700   : > { %v5828_v16 = vpack.c.bf16 %v14663_v47, %v14657_v46  ;;  %v14679_v8 = vsel %vm2581_vm7, %v14552_v13, %v5609_v21  ;;  %v17044_v13 = vld [vmem:[#allocation75_spill] sm:$0xff]  ;;  %v5612_v35 = vadd.f32 %v14501_v2, %v17045_v20 }
 0x701   : > { %v5706_v5 = vpop.permute.xlu1 %5705  ;;  %v14684_v12 = vsel %vm2581_vm7, %v5716_v61, %v5626_v63  ;;  %v14694_v30 = vsel %vm2581_vm7, %v14531_v15, %v5610_v57  ;;  %v5611_v43 = vadd.f32 %v14540_v37, %v17044_v13  ;;  %v11004_v20 = vld [vmem:[%s16416_s6] ss:$8 sps:$4 sm:$0xff]  }
 0x702   : > { %v14638_v6 = vsel %vm2581_vm7, %v5706_v5, %v5621_v7  ;;  %10200 = vmatpush3.bf16.msra.mxu1 %v5826_v28  ;;  %v17040_v28 = vld [vmem:[#allocation91_spill] sm:$0xff]  ;;  %v17043_v7 = vld [vmem:[#allocation92_spill] sm:$0xff]  ;;  %v5724_v5 = vpop.permute.xlu0 %5723  ;;  %v5829_v61 = vpack.c.bf16 %v14694_v30, %v14679_v8 }
 0x703   : > { %v5835_v1 = vpack.c.bf16 %v14632_v11, %v14638_v6  ;;  %v5627_v19 = vadd.f32 %v14562_v0, %v17040_v28  ;;  %v5628_v9 = vadd.f32 %v14550_v29, %v17043_v7  ;;  %v14710_v15 = vsel %vm2581_vm7, %v14548_v14, %v5611_v43  ;;  %v17051_v28 = vld [vmem:[#allocation95_spill] sm:$0xff] }
 0x704   : > { %v5630_v14 = vadd.f32 %v14558_v17, %v17047_v4  ;;  %v11018_v4 = vld [vmem:[%s16416_s6 + $0x40] ss:$8 sps:$4 sm:$0xff]  }
 0x705   : > { %v5718_v62 = vpop.permute.xlu1 %5717  ;;  %10201 = vmatprep.subr.bf16.mxu1 %v5835_v1  ;;  %v14704_v42 = vsel %vm2581_vm7, %v14583_v39, %v5628_v9  ;;  %v14716_v1 = vsel %vm2581_vm7, %v14526_v48, %v5612_v35  ;;  %v17054_v9 = vld [vmem:[#allocation79_spill] sm:$0xff]  ;;  %v11009_v35 = vld [vmem:[%s16416_s6 + $0x10] ss:$8 sps:$4 sm:$0xff]  }
 0x706   : > { %10202 = vmatpush3.bf16.msra.mxu1 %v5827_v55  ;;  %v14687_v45 = vsel %vm2581_vm7, %v5718_v62, %v5627_v19  ;;  %v17046_v55 = vld [vmem:[#allocation78_spill] sm:$0xff]  ;;  %v5830_v2 = vpack.c.bf16 %v14716_v1, %v14710_v15  ;;  %v17049_v62 = vld [vmem:[#allocation81_spill] sm:$0xff]  ;;  %v5728_v21 = vpop.permute.xlu0 %5727  ;;  %v17052_v19 = vld [vmem:[#allocation115_spill] sm:$0xff] }
 0x707   : > { %10203 = vmatprep.subr.bf16.mxu1 %v5836_v38  ;;  %v5838_v37 = vpack.c.bf16 %v14704_v42, %v14687_v45  ;;  %v5613_v39 = vadd.f32 %v14546_v41, %v17046_v55  ;;  %v5629_v38 = vadd.f32 %v14571_v27, %v17048_v32  ;;  %v5614_v53 = vadd.f32 %v14517_v26, %v17049_v62  ;;  %v17050_v27 = vld [vmem:[#allocation96_spill] sm:$0xff]  ;;  %v11024_v62 = vld [vmem:[%s16416_s6 + $0x60] ss:$8 sps:$4 sm:$0xff]  }
 0x708   : > { %v14733_v41 = vsel %vm2581_vm7, %v5724_v5, %v5630_v14  ;;  %v5631_v60 = vadd.f32 %v17052_v19, %v17051_v28  ;;  %v11013_v55 = vld [vmem:[%s16416_s6 + $0x34] ss:$8 sps:$4 sm:$0xff]   ;;  %v11021_v32 = vld [vmem:[%s16416_s6 + $0x50] ss:$8 sps:$4 sm:$0xff]   ;;  %v11036_v28 = vld [vmem:[%s16416_s6 + $0xa0] ss:$8 sps:$4 sm:$0xff]  }
 0x709   : > { %v5714_v24 = vpop.permute.xlu1 %5713  ;;  %v14730_v48 = vsel %vm2581_vm7, %v14560_v59, %v5613_v39  ;;  %v14740_v17 = vsel %vm2581_vm7, %v14544_v22, %v5614_v53  ;;  %v5632_v59 = vadd.f32 %v14556_v51, %v17050_v27  ;;  %v17053_v51 = vld [vmem:[#allocation80_spill] sm:$0xff] }
 0x70a   : > { %v14690_v0 = vsel %vm2581_vm7, %v5714_v24, %v5625_v52  ;;  %10204 = vmatpush3.bf16.msra.mxu1 %v5828_v16  ;;  %v5831_v16 = vpack.c.bf16 %v14740_v17, %v14730_v48  ;;  %v5696_v57 = vpop.permute.xlu0 %5695  ;;  %v5616_v7 = vadd.f32 %v5536_v23, %v17053_v51  ;;  %v11007_v23 = vld [vmem:[%s16416_s6 + $0x14] ss:$8 sps:$4 sm:$0xff]   ;;  %v11015_v39 = vld [vmem:[%s16416_s6 + $0x30] ss:$8 sps:$4 sm:$0xff]  }
 0x70b   : > { %v5837_v29 = vpack.c.bf16 %v14684_v12, %v14690_v0  ;;  %v14751_v44 = vsel %vm2581_vm7, %v5728_v21, %v5632_v59  ;;  %v11019_v14 = vld [vmem:[%s16416_s6 + $0x54] ss:$8 sps:$4 sm:$0xff]   ;;  %v11027_v21 = vld [vmem:[%s16416_s6 + $0x70] ss:$8 sps:$4 sm:$0xff]  }
 0x70c   : > { %v14761_v5 = vsel %vm2581_vm7, %v5696_v57, %v5616_v7  ;;  %v11025_v53 = vld [vmem:[%s16416_s6 + $0x74] ss:$8 sps:$4 sm:$0xff]   ;;  %v11033_v59 = vld [vmem:[%s16416_s6 + $0x90] ss:$8 sps:$4 sm:$0xff]   ;;  %v11042_v57 = vld [vmem:[%s16416_s6 + $0xc0] ss:$8 sps:$4 sm:$0xff]  }
 0x70d   : > { %v5534_v34 = vpop.permute.xlu1 %5533  ;;  %10205 = vmatprep.subr.bf16.mxu1 %v5837_v29  ;;  %v11031_v27 = vld [vmem:[%s16416_s6 + $0x94] ss:$8 sps:$4 sm:$0xff]   ;;  %v11045_v51 = vld [vmem:[%s16416_s6 + $0xd0] ss:$8 sps:$4 sm:$0xff]   ;;  %v11046_v7 = vld [vmem:[%s16416_s6 + $0xe4] ss:$8 sps:$4 sm:$0xff]  }
 0x70e   : > { %10206 = vmatpush3.bf16.msra.mxu1 %v5829_v61  ;;  %v5615_v13 = vadd.f32 %v5534_v34, %v17054_v9  ;;  %v11012_v34 = vld [vmem:[%s16416_s6 + $0x20] ss:$8 sps:$4 sm:$0xff]   ;;  %v11037_v19 = vld [vmem:[%s16416_s6 + $0xb4] ss:$8 sps:$4 sm:$0xff]  }
 0x70f   : > { %10207 = vmatprep.subr.bf16.mxu1 %v5838_v37  ;;  %v11010_v37 = vld [vmem:[%s16416_s6 + $0x24] ss:$8 sps:$4 sm:$0xff]   ;;  %v11048_v9 = vld [vmem:[%s16416_s6 + $0xe0] ss:$8 sps:$4 sm:$0xff]  }
 0x711   : > { %v5722_v3 = vpop.permute.xlu1 %5721 }
 0x712   : > { %v14736_v63 = vsel %vm2581_vm7, %v5722_v3, %v5629_v38  ;;  %10208 = vmatpush3.bf16.msra.mxu1 %v5830_v2  ;;  %v11016_v2 = vld [vmem:[%s16416_s6 + $0x44] ss:$8 sps:$4 sm:$0xff]  }
 0x713   : > { %v5839_v26 = vpack.c.bf16 %v14733_v41, %v14736_v63  ;;  %v11022_v38 = vld [vmem:[%s16416_s6 + $0x64] ss:$8 sps:$4 sm:$0xff]  }
 0x714   : > { %v11028_v3 = vld [vmem:[%s16416_s6 + $0x84] ss:$8 sps:$4 sm:$0xff]  }
 0x715   : > { %v5726_v52 = vpop.permute.xlu1 %5725  ;;  %10209 = vmatprep.subr.bf16.mxu1 %v5839_v26  ;;  %v11030_v26 = vld [vmem:[%s16416_s6 + $0x80] ss:$8 sps:$4 sm:$0xff]  }
 0x716   : > { %v14754_v22 = vsel %vm2581_vm7, %v5726_v52, %v5631_v60  ;;  %10210 = vmatpush3.bf16.msra.mxu1 %v5831_v16  ;;  %v11034_v16 = vld [vmem:[%s16416_s6 + $0xa4] ss:$8 sps:$4 sm:$0xff]   ;;  %v11039_v60 = vld [vmem:[%s16416_s6 + $0xb0] ss:$8 sps:$4 sm:$0xff]  }
 0x717   : > { %v5840_v24 = vpack.c.bf16 %v14751_v44, %v14754_v22  ;;  %v11040_v52 = vld [vmem:[%s16416_s6 + $0xc4] ss:$8 sps:$4 sm:$0xff]  }
 0x719   : > { %v5694_v43 = vpop.permute.xlu1 %5693  ;;  %10211 = vmatprep.subr.bf16.mxu1 %v5840_v24  ;;  %v11043_v24 = vld [vmem:[%s16416_s6 + $0xd4] ss:$8 sps:$4 sm:$0xff]  }
 0x71a   : > { %v14764_v29 = vsel %vm2581_vm7, %v5694_v43, %v5615_v13  ;;  %v11049_v13 = vld [vmem:[%s16416_s6 + $0xf4] ss:$8 sps:$4 sm:$0xff]   ;;  %v11051_v43 = vld [vmem:[%s16416_s6 + $0xf0] ss:$8 sps:$4 sm:$0xff]  }
 0x71b   : > { %v5832_v61 = vpack.c.bf16 %v14761_v5, %v14764_v29 }
 0x71d   : > { %10212 = vmatpush3.bf16.msra.mxu1 %v5832_v61 }
 0x720   : > { %6040 = vmatmul.mubr.bf16.vlgmr.msra.gmra.mrb[144].mxu1 %v11004_v20 }
 0x721   : > { %6047 = vmatprep.mubr.bf16.mxu1 %v11007_v23 }
 0x728   : > { %6048 = vmatmul.mubr.bf16.gmra.mrb[148].mxu1 %v11009_v35 }
 0x729   : > { %6055 = vmatprep.mubr.bf16.mxu1 %v11010_v37 }
 0x72a   : > { %v14861_v23 = vpop.permute.xlu1 %5844 }
 0x730   : > { %6056 = vmatmul.mubr.bf16.gmra.mrb[152].mxu1 %v11012_v34 }
 0x731   : > { %6063 = vmatprep.mubr.bf16.mxu1 %v11013_v55 }
 0x738   : > { %6064 = vmatmul.mubr.bf16.gmra.mrb[156].mxu1 %v11015_v39 }
 0x739   : > { %6071 = vmatprep.mubr.bf16.mxu1 %v11016_v2 }
 0x740   : > { %6072 = vmatmul.mubr.bf16.gmra.mrb[160].mxu1 %v11018_v4 }
 0x741   : > { %6079 = vmatprep.mubr.bf16.mxu1 %v11019_v14 }
 0x748   : > { %6080 = vmatmul.mubr.bf16.gmra.mrb[164].mxu1 %v11021_v32 }
 0x749   : > { %6087 = vmatprep.mubr.bf16.mxu1 %v11022_v38 }
 0x750   : > { %6088 = vmatmul.mubr.bf16.gmra.mrb[168].mxu1 %v11024_v62 }
 0x751   : > { %6095 = vmatprep.mubr.bf16.mxu1 %v11025_v53 }
 0x758   : > { %6096 = vmatmul.mubr.bf16.gmra.mrb[172].mxu1 %v11027_v21 }
 0x759   : > { %6103 = vmatprep.mubr.bf16.mxu1 %v11028_v3 }
 0x760   : > { %6104 = vmatmul.mubr.bf16.gmra.mrb[176].mxu1 %v11030_v26 }
 0x761   : > { %6111 = vmatprep.mubr.bf16.mxu1 %v11031_v27 }
 0x768   : > { %6112 = vmatmul.mubr.bf16.gmra.mrb[180].mxu1 %v11033_v59 }
 0x769   : > { %6119 = vmatprep.mubr.bf16.mxu1 %v11034_v16 }
 0x770   : > { %6120 = vmatmul.mubr.bf16.gmra.mrb[184].mxu1 %v11036_v28 }
 0x771   : > { %6127 = vmatprep.mubr.bf16.mxu1 %v11037_v19 }
 0x778   : > { %6128 = vmatmul.mubr.bf16.gmra.mrb[188].mxu1 %v11039_v60 }
 0x779   : > { %6135 = vmatprep.mubr.bf16.mxu1 %v11040_v52 }
 0x780   : > { %6136 = vmatmul.mubr.bf16.gmra.mrb[192].mxu1 %v11042_v57 }
 0x781   : > { %6143 = vmatprep.mubr.bf16.mxu1 %v11043_v24 }
 0x788   : > { %6144 = vmatmul.mubr.bf16.gmra.mrb[196].mxu1 %v11045_v51 }
 0x789   : > { %6151 = vmatprep.mubr.bf16.mxu1 %v11046_v7 }
 0x790   : > { %6152 = vmatmul.mubr.bf16.gmra.mrb[200].mxu1 %v11048_v9 }
 0x791   : > { %6159 = vmatprep.mubr.bf16.mxu1 %v11049_v13 }
 0x798   : > { %6160 = vmatmul.mubr.bf16.gmra.mrb[204].mxu1 %v11051_v43 }
 0x7f3   : > { %v10213_v61 = vpop.f32.mrb[144].mxu1 }
 0x7f4   : > { %v10214_v20 = vpop.f32.mrb[145].mxu1 }
 0x7f5   : > { %v10215_v35 = vadd.f32 %v10214_v20, %v10213_v61  ;;  %v10216_v37 = vpop.f32.mrb[146].mxu1 }
 0x7f6   : > { %v10217_v34 = vpop.f32.mrb[147].mxu1 }
 0x7f7   : > { %v10218_v55 = vadd.f32 %v10217_v34, %v10216_v37  ;;  %v6042_v39 = vadd.f32 %v10215_v35, %v14861_v23 }
 0x7f9   : > { %v6045_v2 = vadd.f32 %v10218_v55, %v14861_v23  ;;  %v6168_v4 = vmax.f32 %v6042_v39, 0.0 }
 0x7fb   : > { %v6169_v14 = vmax.f32 %v6045_v2, 0.0  ;;  %v10219_v32 = vpop.f32.mrb[148].mxu1  ;;  %v14866_v38 = vadd.f32 %v6168_v4, %v14581_v10 }
 0x7fc   : > { %v10220_v62 = vpop.f32.mrb[149].mxu1 }
 0x7fd   : > { %v10221_v53 = vadd.f32 %v10220_v62, %v10219_v32  ;;  %v10222_v21 = vpop.f32.mrb[150].mxu1  ;;  %v6234_v3 = vsel %vm713_vm2, %v14866_v38, 0.0  ;;  %v14871_v26 = vadd.f32 %v6169_v14, %v14599_v18 }
 0x7fe   : > { %v10223_v27 = vpop.f32.mrb[151].mxu1  ;;  %6235 = vadd.xlane.f32.xlu0 %v6234_v3 }
 0x7ff   : > { %v6050_v59 = vadd.f32 %v10221_v53, %v14861_v23  ;;  %v10224_v16 = vadd.f32 %v10223_v27, %v10222_v21  ;;  %v6237_v28 = vsel %vm713_vm2, %v14871_v26, 0.0 }
 0x800   : > { %6238 = vadd.xlane.f32.xlu1 %v6237_v28 }
 0x801   : > { %v6170_v10 = vmax.f32 %v6050_v59, 0.0  ;;  %v6053_v19 = vadd.f32 %v10224_v16, %v14861_v23 }
 0x803   : > { %v6171_v60 = vmax.f32 %v6053_v19, 0.0  ;;  %v10225_v52 = vpop.f32.mrb[152].mxu1  ;;  %v14878_v57 = vadd.f32 %v6170_v10, %v14610_v49 }
 0x804   : > { %v10226_v24 = vpop.f32.mrb[153].mxu1 }
 0x805   : > { %v10227_v18 = vadd.f32 %v10226_v24, %v10225_v52  ;;  %v10228_v51 = vpop.f32.mrb[154].mxu1  ;;  %v6240_v7 = vsel %vm713_vm2, %v14878_v57, 0.0  ;;  %v14883_v9 = vadd.f32 %v6171_v60, %v14616_v25 }
 0x806   : > { %v10229_v13 = vpop.f32.mrb[155].mxu1  ;;  %6241 = vadd.xlane.f32.xlu0 %v6240_v7 }
 0x807   : > { %v6058_v43 = vadd.f32 %v10227_v18, %v14861_v23  ;;  %v10230_v61 = vadd.f32 %v10229_v13, %v10228_v51  ;;  %v6243_v49 = vsel %vm713_vm2, %v14883_v9, 0.0 }
 0x809   : > { %v6172_v20 = vmax.f32 %v6058_v43, 0.0  ;;  %v6061_v35 = vadd.f32 %v10230_v61, %v14861_v23 }
 0x80a   : > { %6244 = vadd.xlane.f32.xlu0 %v6243_v49 }
 0x80b   : > { %v6173_v37 = vmax.f32 %v6061_v35, 0.0  ;;  %v10231_v34 = vpop.f32.mrb[156].mxu1  ;;  %v14890_v55 = vadd.f32 %v6172_v20, %v14627_v31 }
 0x80c   : > { %v10232_v39 = vpop.f32.mrb[157].mxu1 }
 0x80d   : > { %v10233_v25 = vadd.f32 %v10232_v39, %v10231_v34  ;;  %v10234_v2 = vpop.f32.mrb[158].mxu1  ;;  %v6246_v4 = vsel %vm713_vm2, %v14890_v55, 0.0  ;;  %v14895_v14 = vadd.f32 %v6173_v37, %v14642_v50 }
 0x80e   : > { %v10235_v32 = vpop.f32.mrb[159].mxu1  ;;  %6247 = vadd.xlane.f32.xlu1 %v6246_v4 }
 0x80f   : > { %v6066_v62 = vadd.f32 %v10233_v25, %v14861_v23  ;;  %v10236_v53 = vadd.f32 %v10235_v32, %v10234_v2  ;;  %v6249_v21 = vsel %vm713_vm2, %v14895_v14, 0.0 }
 0x810   : > { %6250 = vadd.xlane.f32.xlu0 %v6249_v21 }
 0x811   : > { %v6174_v31 = vmax.f32 %v6066_v62, 0.0  ;;  %v6069_v3 = vadd.f32 %v10236_v53, %v14861_v23 }
 0x813   : > { %v6175_v27 = vmax.f32 %v6069_v3, 0.0  ;;  %v10237_v59 = vpop.f32.mrb[160].mxu1  ;;  %v14902_v16 = vadd.f32 %v6174_v31, %v14657_v46 }
 0x814   : > { %v10238_v28 = vpop.f32.mrb[161].mxu1 }
 0x815   : > { %v10239_v50 = vadd.f32 %v10238_v28, %v10237_v59  ;;  %v10240_v10 = vpop.f32.mrb[162].mxu1  ;;  %v6252_v19 = vsel %vm713_vm2, %v14902_v16, 0.0  ;;  %v14907_v60 = vadd.f32 %v6175_v27, %v14663_v47 }
 0x816   : > { %v10241_v52 = vpop.f32.mrb[163].mxu1  ;;  %6253 = vadd.xlane.f32.xlu1 %v6252_v19 }
 0x817   : > { %v6074_v24 = vadd.f32 %v10239_v50, %v14861_v23  ;;  %v10242_v18 = vadd.f32 %v10241_v52, %v10240_v10  ;;  %v6255_v51 = vsel %vm713_vm2, %v14907_v60, 0.0 }
 0x818   : > { %6256 = vadd.xlane.f32.xlu0 %v6255_v51 }
 0x819   : > { %v6176_v46 = vmax.f32 %v6074_v24, 0.0  ;;  %v6077_v7 = vadd.f32 %v10242_v18, %v14861_v23 }
 0x81b   : > { %v6177_v13 = vmax.f32 %v6077_v7, 0.0  ;;  %v10243_v43 = vpop.f32.mrb[164].mxu1  ;;  %v14914_v61 = vadd.f32 %v6176_v46, %v14679_v8 }
 0x81c   : > { %v10244_v20 = vpop.f32.mrb[165].mxu1 }
 0x81d   : > { %v10245_v47 = vadd.f32 %v10244_v20, %v10243_v43  ;;  %v10246_v35 = vpop.f32.mrb[166].mxu1  ;;  %v6258_v49 = vsel %vm713_vm2, %v14914_v61, 0.0  ;;  %v14919_v37 = vadd.f32 %v6177_v13, %v14694_v30 }
 0x81e   : > { %v10247_v34 = vpop.f32.mrb[167].mxu1  ;;  %6259 = vadd.xlane.f32.xlu1 %v6258_v49 }
 0x81f   : > { %v6082_v39 = vadd.f32 %v10245_v47, %v14861_v23  ;;  %v10248_v25 = vadd.f32 %v10247_v34, %v10246_v35  ;;  %v6261_v2 = vsel %vm713_vm2, %v14919_v37, 0.0 }
 0x820   : > { %6262 = vadd.xlane.f32.xlu0 %v6261_v2 }
 0x821   : > { %v6178_v8 = vmax.f32 %v6082_v39, 0.0  ;;  %v6085_v4 = vadd.f32 %v10248_v25, %v14861_v23 }
 0x823   : > { %v6179_v32 = vmax.f32 %v6085_v4, 0.0  ;;  %v10249_v62 = vpop.f32.mrb[168].mxu1  ;;  %v14926_v53 = vadd.f32 %v6178_v8, %v14710_v15 }
 0x824   : > { %v10250_v21 = vpop.f32.mrb[169].mxu1 }
 0x825   : > { %v10251_v30 = vadd.f32 %v10250_v21, %v10249_v62  ;;  %v10252_v31 = vpop.f32.mrb[170].mxu1  ;;  %v6264_v3 = vsel %vm713_vm2, %v14926_v53, 0.0  ;;  %v14931_v27 = vadd.f32 %v6179_v32, %v14716_v1 }
 0x826   : > { %v10253_v59 = vpop.f32.mrb[171].mxu1  ;;  %6265 = vadd.xlane.f32.xlu1 %v6264_v3 }
 0x827   : > { %v6090_v28 = vadd.f32 %v10251_v30, %v14861_v23  ;;  %v10254_v50 = vadd.f32 %v10253_v59, %v10252_v31  ;;  %v6267_v10 = vsel %vm713_vm2, %v14931_v27, 0.0 }
 0x828   : > { %6268 = vadd.xlane.f32.xlu0 %v6267_v10 }
 0x829   : > { %v6180_v15 = vmax.f32 %v6090_v28, 0.0  ;;  %v6093_v19 = vadd.f32 %v10254_v50, %v14861_v23 }
 0x82b   : > { %v6181_v52 = vmax.f32 %v6093_v19, 0.0  ;;  %v10255_v24 = vpop.f32.mrb[172].mxu1  ;;  %v14938_v18 = vadd.f32 %v6180_v15, %v14730_v48 }
 0x82c   : > { %v10256_v51 = vpop.f32.mrb[173].mxu1 }
 0x82d   : > { %v10257_v1 = vadd.f32 %v10256_v51, %v10255_v24  ;;  %v10258_v46 = vpop.f32.mrb[174].mxu1  ;;  %v6270_v7 = vsel %vm713_vm2, %v14938_v18, 0.0  ;;  %v14943_v13 = vadd.f32 %v6181_v52, %v14740_v17 }
 0x82e   : > { %v10259_v43 = vpop.f32.mrb[175].mxu1  ;;  %6271 = vadd.xlane.f32.xlu1 %v6270_v7 }
 0x82f   : > { %v6098_v20 = vadd.f32 %v10257_v1, %v14861_v23  ;;  %v10260_v47 = vadd.f32 %v10259_v43, %v10258_v46  ;;  %v6273_v35 = vsel %vm713_vm2, %v14943_v13, 0.0 }
 0x830   : > { %6274 = vadd.xlane.f32.xlu0 %v6273_v35 }
 0x831   : > { %v6182_v48 = vmax.f32 %v6098_v20, 0.0  ;;  %v6101_v49 = vadd.f32 %v10260_v47, %v14861_v23 }
 0x833   : > { %v6183_v34 = vmax.f32 %v6101_v49, 0.0  ;;  %v10261_v39 = vpop.f32.mrb[176].mxu1  ;;  %v14950_v25 = vadd.f32 %v6182_v48, %v14764_v29 }
 0x834   : > { %v10262_v2 = vpop.f32.mrb[177].mxu1 }
 0x835   : > { %v10263_v17 = vadd.f32 %v10262_v2, %v10261_v39  ;;  %v10264_v8 = vpop.f32.mrb[178].mxu1  ;;  %v6276_v4 = vsel %vm713_vm2, %v14950_v25, 0.0  ;;  %v14955_v32 = vadd.f32 %v6183_v34, %v14761_v5 }
 0x836   : > { %v10265_v62 = vpop.f32.mrb[179].mxu1  ;;  %6277 = vadd.xlane.f32.xlu1 %v6276_v4 }
 0x837   : > { %v6106_v21 = vadd.f32 %v10263_v17, %v14861_v23  ;;  %v10266_v30 = vadd.f32 %v10265_v62, %v10264_v8  ;;  %v6279_v31 = vsel %vm713_vm2, %v14955_v32, 0.0 }
 0x838   : > { %6280 = vadd.xlane.f32.xlu0 %v6279_v31 }
 0x839   : > { %v6184_v29 = vmax.f32 %v6106_v21, 0.0  ;;  %v6109_v3 = vadd.f32 %v10266_v30, %v14861_v23 }
 0x83b   : > { %v6185_v59 = vmax.f32 %v6109_v3, 0.0  ;;  %v10267_v28 = vpop.f32.mrb[180].mxu1  ;;  %v14962_v50 = vadd.f32 %v6184_v29, %v14593_v36 }
 0x83c   : > { %v10268_v10 = vpop.f32.mrb[181].mxu1 }
 0x83d   : > { %v10269_v5 = vadd.f32 %v10268_v10, %v10267_v28  ;;  %v10270_v15 = vpop.f32.mrb[182].mxu1  ;;  %v6282_v19 = vsel %vm713_vm2, %v14962_v50, 0.0  ;;  %v14967_v52 = vadd.f32 %v6185_v59, %v14587_v54 }
 0x83e   : > { %v10271_v24 = vpop.f32.mrb[183].mxu1  ;;  %6283 = vadd.xlane.f32.xlu1 %v6282_v19 }
 0x83f   : > { %v6114_v51 = vadd.f32 %v10269_v5, %v14861_v23  ;;  %v10272_v1 = vadd.f32 %v10271_v24, %v10270_v15  ;;  %v6285_v46 = vsel %vm713_vm2, %v14967_v52, 0.0 }
 0x840   : > { %6286 = vadd.xlane.f32.xlu0 %v6285_v46 }
 0x841   : > { %v6186_v36 = vmax.f32 %v6114_v51, 0.0  ;;  %v6117_v7 = vadd.f32 %v10272_v1, %v14861_v23 }
 0x843   : > { %v6187_v43 = vmax.f32 %v6117_v7, 0.0  ;;  %v10273_v20 = vpop.f32.mrb[184].mxu1  ;;  %v14974_v47 = vadd.f32 %v6186_v36, %v14590_v33 }
 0x844   : > { %v10274_v35 = vpop.f32.mrb[185].mxu1 }
 0x845   : > { %v10275_v54 = vadd.f32 %v10274_v35, %v10273_v20  ;;  %v10276_v48 = vpop.f32.mrb[186].mxu1  ;;  %v6288_v49 = vsel %vm713_vm2, %v14974_v47, 0.0  ;;  %v14979_v34 = vadd.f32 %v6187_v43, %v14606_v58 }
 0x846   : > { %v10277_v39 = vpop.f32.mrb[187].mxu1  ;;  %6289 = vadd.xlane.f32.xlu1 %v6288_v49 }
 0x847   : > { %v6122_v2 = vadd.f32 %v10275_v54, %v14861_v23  ;;  %v10278_v17 = vadd.f32 %v10277_v39, %v10276_v48  ;;  %v6291_v8 = vsel %vm713_vm2, %v14979_v34, 0.0 }
 0x848   : > { %6292 = vadd.xlane.f32.xlu0 %v6291_v8 }
 0x849   : > { %v6188_v33 = vmax.f32 %v6122_v2, 0.0  ;;  %v6125_v4 = vadd.f32 %v10278_v17, %v14861_v23 }
 0x84b   : > { %v6189_v62 = vmax.f32 %v6125_v4, 0.0  ;;  %v10279_v21 = vpop.f32.mrb[188].mxu1  ;;  %v14986_v30 = vadd.f32 %v6188_v33, %v14638_v6 }
 0x84c   : > { %v10280_v31 = vpop.f32.mrb[189].mxu1 }
 0x84d   : > { %v10281_v58 = vadd.f32 %v10280_v31, %v10279_v21  ;;  %v10282_v29 = vpop.f32.mrb[190].mxu1  ;;  %v6294_v3 = vsel %vm713_vm2, %v14986_v30, 0.0  ;;  %v14991_v59 = vadd.f32 %v6189_v62, %v14632_v11 }
 0x84e   : > { %v10283_v28 = vpop.f32.mrb[191].mxu1  ;;  %6295 = vadd.xlane.f32.xlu1 %v6294_v3 }
 0x84f   : > { %v6130_v10 = vadd.f32 %v10281_v58, %v14861_v23  ;;  %v10284_v5 = vadd.f32 %v10283_v28, %v10282_v29  ;;  %v6297_v15 = vsel %vm713_vm2, %v14991_v59, 0.0 }
 0x850   : > { %6298 = vadd.xlane.f32.xlu0 %v6297_v15 }
 0x851   : > { %v6190_v6 = vmax.f32 %v6130_v10, 0.0  ;;  %v6133_v19 = vadd.f32 %v10284_v5, %v14861_v23 }
 0x853   : > { %v6191_v24 = vmax.f32 %v6133_v19, 0.0  ;;  %v10285_v51 = vpop.f32.mrb[192].mxu1  ;;  %v14998_v1 = vadd.f32 %v6190_v6, %v14635_v40 }
 0x854   : > { %v10286_v46 = vpop.f32.mrb[193].mxu1 }
 0x855   : > { %v10287_v11 = vadd.f32 %v10286_v46, %v10285_v51  ;;  %v10288_v36 = vpop.f32.mrb[194].mxu1  ;;  %v6300_v7 = vsel %vm713_vm2, %v14998_v1, 0.0  ;;  %v15003_v43 = vadd.f32 %v6191_v24, %v14651_v56 }
 0x856   : > { %v10289_v20 = vpop.f32.mrb[195].mxu1  ;;  %6301 = vadd.xlane.f32.xlu1 %v6300_v7 }
 0x857   : > { %v6138_v35 = vadd.f32 %v10287_v11, %v14861_v23  ;;  %v10290_v54 = vadd.f32 %v10289_v20, %v10288_v36  ;;  %v6303_v48 = vsel %vm713_vm2, %v15003_v43, 0.0 }
 0x858   : > { %6304 = vadd.xlane.f32.xlu0 %v6303_v48 }
 0x859   : > { %v6192_v40 = vmax.f32 %v6138_v35, 0.0  ;;  %v6141_v49 = vadd.f32 %v10290_v54, %v14861_v23 }
 0x85b   : > { %v6193_v39 = vmax.f32 %v6141_v49, 0.0  ;;  %v10291_v2 = vpop.f32.mrb[196].mxu1  ;;  %v15010_v17 = vadd.f32 %v6192_v40, %v14690_v0 }
 0x85c   : > { %v10292_v8 = vpop.f32.mrb[197].mxu1 }
 0x85d   : > { %v10293_v56 = vadd.f32 %v10292_v8, %v10291_v2  ;;  %v10294_v33 = vpop.f32.mrb[198].mxu1  ;;  %v6306_v4 = vsel %vm713_vm2, %v15010_v17, 0.0  ;;  %v15015_v62 = vadd.f32 %v6193_v39, %v14684_v12 }
 0x85e   : > { %v10295_v21 = vpop.f32.mrb[199].mxu1  ;;  %6307 = vadd.xlane.f32.xlu1 %v6306_v4 }
 0x85f   : > { %v6146_v31 = vadd.f32 %v10293_v56, %v14861_v23  ;;  %v10296_v58 = vadd.f32 %v10295_v21, %v10294_v33  ;;  %v6309_v29 = vsel %vm713_vm2, %v15015_v62, 0.0 }
 0x860   : > { %6310 = vadd.xlane.f32.xlu0 %v6309_v29 }
 0x861   : > { %v6194_v0 = vmax.f32 %v6146_v31, 0.0  ;;  %v6149_v3 = vadd.f32 %v10296_v58, %v14861_v23 }
 0x863   : > { %v6195_v28 = vmax.f32 %v6149_v3, 0.0  ;;  %v10297_v10 = vpop.f32.mrb[200].mxu1  ;;  %v15022_v5 = vadd.f32 %v6194_v0, %v14687_v45 }
 0x864   : > { %v10298_v15 = vpop.f32.mrb[201].mxu1 }
 0x865   : > { %v10299_v12 = vadd.f32 %v10298_v15, %v10297_v10  ;;  %v10300_v6 = vpop.f32.mrb[202].mxu1  ;;  %v6312_v19 = vsel %vm713_vm2, %v15022_v5, 0.0  ;;  %v15027_v24 = vadd.f32 %v6195_v28, %v14704_v42 }
 0x866   : > { %v10301_v51 = vpop.f32.mrb[203].mxu1  ;;  %6313 = vadd.xlane.f32.xlu1 %v6312_v19 }
 0x867   : > { %v6154_v46 = vadd.f32 %v10299_v12, %v14861_v23  ;;  %v10302_v11 = vadd.f32 %v10301_v51, %v10300_v6  ;;  %v6315_v36 = vsel %vm713_vm2, %v15027_v24, 0.0 }
 0x868   : > { %6316 = vadd.xlane.f32.xlu0 %v6315_v36 }
 0x869   : > { %v6196_v45 = vmax.f32 %v6154_v46, 0.0  ;;  %v6157_v7 = vadd.f32 %v10302_v11, %v14861_v23 }
 0x86b   : > { %v6197_v20 = vmax.f32 %v6157_v7, 0.0  ;;  %v10303_v35 = vpop.f32.mrb[204].mxu1  ;;  %v15034_v54 = vadd.f32 %v6196_v45, %v14736_v63 }
 0x86c   : > { %v10304_v48 = vpop.f32.mrb[205].mxu1 }
 0x86d   : > { %v10305_v42 = vadd.f32 %v10304_v48, %v10303_v35  ;;  %v10306_v40 = vpop.f32.mrb[206].mxu1  ;;  %v6318_v49 = vsel %vm713_vm2, %v15034_v54, 0.0  ;;  %v15039_v39 = vadd.f32 %v6197_v20, %v14733_v41 }
 0x86e   : > { %v10307_v2 = vpop.f32.mrb[207].mxu1  ;;  %6319 = vadd.xlane.f32.xlu1 %v6318_v49 }
 0x86f   : > { %v6162_v8 = vadd.f32 %v10305_v42, %v14861_v23  ;;  %v10308_v56 = vadd.f32 %v10307_v2, %v10306_v40  ;;  %v6321_v33 = vsel %vm713_vm2, %v15039_v39, 0.0 }
 0x870   : > { %6322 = vadd.xlane.f32.xlu0 %v6321_v33 }
 0x871   : > { %v6198_v63 = vmax.f32 %v6162_v8, 0.0  ;;  %v6165_v4 = vadd.f32 %v10308_v56, %v14861_v23 }
 0x873   : > { %v6199_v21 = vmax.f32 %v6165_v4, 0.0  ;;  %v15046_v31 = vadd.f32 %v6198_v63, %v14754_v22 }
 0x875   : > { %v6324_v41 = vsel %vm713_vm2, %v15046_v31, 0.0  ;;  %v15051_v58 = vadd.f32 %v6199_v21, %v14751_v44 }
 0x876   : > { %6325 = vadd.xlane.f32.xlu1 %v6324_v41 }
 0x877   : > { %v6327_v29 = vsel %vm713_vm2, %v15051_v58, 0.0 }
 0x878   : > { %6328 = vadd.xlane.f32.xlu0 %v6327_v29 }
 0x88b   : > { %v6236_v0 = vpop.xlane.xlu0 %6235 }
 0x88c   : > { %v6331_v3 = vmul.f32 0.015625, %v6236_v0 }
 0x88d   : > { %v6239_v28 = vpop.xlane.xlu1 %6238 }
 0x88e   : > { %v6363_v10 = vrot.slane %v6331_v3, 4  ;;  %v6332_v23 = vmul.f32 0.015625, %v6239_v28 }
 0x890   : > { %v6364_v15 = vadd.f32 %v6363_v10, %v6331_v3  ;;  %v6369_v12 = vrot.slane %v6332_v23, 4 }
 0x892   : > { %v6365_v22 = vrot.slane %v6364_v15, 2  ;;  %v6370_v6 = vadd.f32 %v6369_v12, %v6332_v23 }
 0x893   : > { %v6242_v19 = vpop.xlane.xlu0 %6241 }
 0x894   : > { %v6366_v51 = vadd.f32 %v6365_v22, %v6364_v15  ;;  %v6371_v46 = vrot.slane %v6370_v6, 2  ;;  %v6333_v11 = vmul.f32 0.015625, %v6242_v19 }
 0x896   : > { %v6367_v44 = vrot.slane %v6366_v51, 1  ;;  %v6372_v36 = vadd.f32 %v6371_v46, %v6370_v6  ;;  %v6375_v45 = vrot.slane %v6333_v11, 4 }
 0x897   : > { %v6245_v7 = vpop.xlane.xlu0 %6244 }
 0x898   : > { %v6368_v20 = vadd.f32 %v6367_v44, %v6366_v51  ;;  %v6373_v35 = vrot.slane %v6372_v36, 1  ;;  %v6376_v48 = vadd.f32 %v6375_v45, %v6333_v11  ;;  %v6334_v42 = vmul.f32 0.015625, %v6245_v7 }
 0x89a   : > { %v6374_v40 = vadd.f32 %v6373_v35, %v6372_v36  ;;  %v6377_v49 = vrot.slane %v6376_v48, 2  ;;  %v6381_v2 = vrot.slane %v6334_v42, 4  ;;  %v6555_v8 = vmul.f32 0.125, %v6368_v20 }
 0x89b   : > { %v6248_v56 = vpop.xlane.xlu1 %6247 }
 0x89c   : > { %v6378_v33 = vadd.f32 %v6377_v49, %v6376_v48  ;;  %v6382_v63 = vadd.f32 %v6381_v2, %v6334_v42  ;;  %v6335_v4 = vmul.f32 0.015625, %v6248_v56  ;;  %v15056_v21 = vsub.f32 %v14866_v38, %v6555_v8 }
 0x89d   : > { %v6251_v41 = vpop.xlane.xlu0 %6250  ;;  %v6556_v29 = vmul.f32 0.125, %v6374_v40 }
 0x89e   : > { %v6379_v0 = vrot.slane %v6378_v33, 1  ;;  %v6383_v3 = vrot.slane %v6382_v63, 2  ;;  %v6387_v28 = vrot.slane %v6335_v4, 4  ;;  %v6336_v10 = vmul.f32 0.015625, %v6251_v41 }
 0x89f   : > { %v6619_v23 = vmul.f32 %v15056_v21, %v15056_v21  ;;  %v15061_v15 = vsub.f32 %v14871_v26, %v6556_v29 }
 0x8a0   : > { %v6380_v12 = vadd.f32 %v6379_v0, %v6378_v33  ;;  %v6384_v22 = vadd.f32 %v6383_v3, %v6382_v63  ;;  %v6388_v6 = vadd.f32 %v6387_v28, %v6335_v4  ;;  %v6393_v19 = vrot.slane %v6336_v10, 4 }
 0x8a1   : > { %v6651_v51 = vsel %vm713_vm2, %v6619_v23, 0.0  ;;  %v6620_v38 = vmul.f32 %v15061_v15, %v15061_v15 }
 0x8a2   : > { %v6385_v46 = vrot.slane %v6384_v22, 1  ;;  %v6389_v11 = vrot.slane %v6388_v6, 2  ;;  %v6394_v44 = vadd.f32 %v6393_v19, %v6336_v10  ;;  %6652 = vadd.xlane.f32.xlu1 %v6651_v51  ;;  %v6557_v36 = vmul.f32 0.125, %v6380_v12 }
 0x8a3   : > { %v6254_v45 = vpop.xlane.xlu1 %6253  ;;  %v6654_v7 = vsel %vm713_vm2, %v6620_v38, 0.0 }
 0x8a4   : > { %v6386_v20 = vadd.f32 %v6385_v46, %v6384_v22  ;;  %v6390_v26 = vadd.f32 %v6389_v11, %v6388_v6  ;;  %v6395_v35 = vrot.slane %v6394_v44, 2  ;;  %v6337_v48 = vmul.f32 0.015625, %v6254_v45  ;;  %6655 = vadd.xlane.f32.xlu0 %v6654_v7 }
 0x8a5   : > { %v6257_v42 = vpop.xlane.xlu0 %6256  ;;  %v15068_v40 = vsub.f32 %v14878_v57, %v6557_v36 }
 0x8a6   : > { %v6391_v49 = vrot.slane %v6390_v26, 1  ;;  %v6396_v2 = vadd.f32 %v6395_v35, %v6394_v44  ;;  %v6399_v8 = vrot.slane %v6337_v48, 4  ;;  %v6338_v56 = vmul.f32 0.015625, %v6257_v42 }
 0x8a7   : > { %v6621_v33 = vmul.f32 %v15068_v40, %v15068_v40  ;;  %v6558_v63 = vmul.f32 0.125, %v6386_v20 }
 0x8a8   : > { %v6392_v4 = vadd.f32 %v6391_v49, %v6390_v26  ;;  %v6397_v41 = vrot.slane %v6396_v2, 1  ;;  %v6400_v29 = vadd.f32 %v6399_v8, %v6337_v48  ;;  %v6405_v0 = vrot.slane %v6338_v56, 4 }
 0x8a9   : > { %v6657_v3 = vsel %vm713_vm2, %v6621_v33, 0.0  ;;  %v15074_v28 = vsub.f32 %v14883_v9, %v6558_v63 }
 0x8aa   : > { %v6398_v10 = vadd.f32 %v6397_v41, %v6396_v2  ;;  %v6401_v57 = vrot.slane %v6400_v29, 2  ;;  %v6406_v23 = vadd.f32 %v6405_v0, %v6338_v56  ;;  %6658 = vadd.xlane.f32.xlu1 %v6657_v3  ;;  %v6559_v12 = vmul.f32 0.125, %v6392_v4 }
 0x8ab   : > { %v6260_v22 = vpop.xlane.xlu1 %6259  ;;  %v6622_v6 = vmul.f32 %v15074_v28, %v15074_v28 }
 0x8ac   : > { %v6402_v19 = vadd.f32 %v6401_v57, %v6400_v29  ;;  %v6407_v51 = vrot.slane %v6406_v23, 2  ;;  %v6339_v38 = vmul.f32 0.015625, %v6260_v22  ;;  %v15079_v46 = vsub.f32 %v14890_v55, %v6559_v12 }
 0x8ad   : > { %v6660_v11 = vsel %vm713_vm2, %v6622_v6, 0.0  ;;  %v6263_v44 = vpop.xlane.xlu0 %6262  ;;  %v6560_v9 = vmul.f32 0.125, %v6398_v10 }
 0x8ae   : > { %v6403_v36 = vrot.slane %v6402_v19, 1  ;;  %v6408_v45 = vadd.f32 %v6407_v51, %v6406_v23  ;;  %v6411_v7 = vrot.slane %v6339_v38, 4  ;;  %6661 = vadd.xlane.f32.xlu0 %v6660_v11  ;;  %v6340_v20 = vmul.f32 0.015625, %v6263_v44 }
 0x8af   : > { %v6623_v26 = vmul.f32 %v15079_v46, %v15079_v46  ;;  %v15085_v35 = vsub.f32 %v14895_v14, %v6560_v9 }
 0x8b0   : > { %v6404_v48 = vadd.f32 %v6403_v36, %v6402_v19  ;;  %v6409_v42 = vrot.slane %v6408_v45, 1  ;;  %v6412_v49 = vadd.f32 %v6411_v7, %v6339_v38  ;;  %v6417_v55 = vrot.slane %v6340_v20, 4 }
 0x8b1   : > { %v6663_v2 = vsel %vm713_vm2, %v6623_v26, 0.0  ;;  %v6624_v8 = vmul.f32 %v15085_v35, %v15085_v35 }
 0x8b2   : > { %v6410_v56 = vadd.f32 %v6409_v42, %v6408_v45  ;;  %v6413_v33 = vrot.slane %v6412_v49, 2  ;;  %v6418_v63 = vadd.f32 %v6417_v55, %v6340_v20  ;;  %6664 = vadd.xlane.f32.xlu1 %v6663_v2  ;;  %v6561_v4 = vmul.f32 0.125, %v6404_v48 }
 0x8b3   : > { %v6266_v41 = vpop.xlane.xlu1 %6265  ;;  %v6666_v29 = vsel %vm713_vm2, %v6624_v8, 0.0 }
 0x8b4   : > { %v6414_v0 = vadd.f32 %v6413_v33, %v6412_v49  ;;  %v6419_v14 = vrot.slane %v6418_v63, 2  ;;  %v6341_v3 = vmul.f32 0.015625, %v6266_v41  ;;  %6667 = vadd.xlane.f32.xlu0 %v6666_v29  ;;  %v15092_v10 = vsub.f32 %v14902_v16, %v6561_v4 }
 0x8b5   : > { %v6269_v57 = vpop.xlane.xlu0 %6268  ;;  %v6562_v23 = vmul.f32 0.125, %v6410_v56 }
 0x8b6   : > { %v6415_v12 = vrot.slane %v6414_v0, 1  ;;  %v6420_v22 = vadd.f32 %v6419_v14, %v6418_v63  ;;  %v6423_v6 = vrot.slane %v6341_v3, 4  ;;  %v6342_v19 = vmul.f32 0.015625, %v6269_v57 }
 0x8b7   : > { %v6625_v51 = vmul.f32 %v15092_v10, %v15092_v10  ;;  %v15097_v38 = vsub.f32 %v14907_v60, %v6562_v23 }
 0x8b8   : > { %v6416_v11 = vadd.f32 %v6415_v12, %v6414_v0  ;;  %v6421_v44 = vrot.slane %v6420_v22, 1  ;;  %v6424_v9 = vadd.f32 %v6423_v6, %v6341_v3  ;;  %v6429_v36 = vrot.slane %v6342_v19, 4 }
 0x8b9   : > { %v6669_v45 = vsel %vm713_vm2, %v6625_v51, 0.0  ;;  %v6626_v16 = vmul.f32 %v15097_v38, %v15097_v38 }
 0x8ba   : > { %v6422_v7 = vadd.f32 %v6421_v44, %v6420_v22  ;;  %v6425_v20 = vrot.slane %v6424_v9, 2  ;;  %v6430_v26 = vadd.f32 %v6429_v36, %v6342_v19  ;;  %6670 = vadd.xlane.f32.xlu1 %v6669_v45  ;;  %v6563_v48 = vmul.f32 0.125, %v6416_v11 }
 0x8bb   : > { %v6272_v42 = vpop.xlane.xlu1 %6271  ;;  %v6672_v49 = vsel %vm713_vm2, %v6626_v16, 0.0 }
 0x8bc   : > { %v6426_v55 = vadd.f32 %v6425_v20, %v6424_v9  ;;  %v6431_v60 = vrot.slane %v6430_v26, 2  ;;  %v6343_v2 = vmul.f32 0.015625, %v6272_v42  ;;  %6673 = vadd.xlane.f32.xlu0 %v6672_v49  ;;  %v15104_v8 = vsub.f32 %v14914_v61, %v6563_v48 }
 0x8bd   : > { %v6275_v56 = vpop.xlane.xlu0 %6274  ;;  %v6564_v33 = vmul.f32 0.125, %v6422_v7 }
 0x8be   : > { %v6427_v63 = vrot.slane %v6426_v55, 1  ;;  %v6432_v4 = vadd.f32 %v6431_v60, %v6430_v26  ;;  %v6435_v41 = vrot.slane %v6343_v2, 4  ;;  %v6344_v29 = vmul.f32 0.015625, %v6275_v56 }
 0x8bf   : > { %v6627_v0 = vmul.f32 %v15104_v8, %v15104_v8  ;;  %v15109_v14 = vsub.f32 %v14919_v37, %v6564_v33 }
 0x8c0   : > { %v6428_v3 = vadd.f32 %v6427_v63, %v6426_v55  ;;  %v6433_v57 = vrot.slane %v6432_v4, 1  ;;  %v6436_v23 = vadd.f32 %v6435_v41, %v6343_v2  ;;  %v6441_v12 = vrot.slane %v6344_v29, 4 }
 0x8c1   : > { %v6675_v22 = vsel %vm713_vm2, %v6627_v0, 0.0  ;;  %v6628_v61 = vmul.f32 %v15109_v14, %v15109_v14 }
 0x8c2   : > { %v6434_v6 = vadd.f32 %v6433_v57, %v6432_v4  ;;  %v6437_v19 = vrot.slane %v6436_v23, 2  ;;  %v6442_v51 = vadd.f32 %v6441_v12, %v6344_v29  ;;  %6676 = vadd.xlane.f32.xlu1 %v6675_v22  ;;  %v6565_v11 = vmul.f32 0.125, %v6428_v3 }
 0x8c3   : > { %v6278_v44 = vpop.xlane.xlu1 %6277  ;;  %v6678_v9 = vsel %vm713_vm2, %v6628_v61, 0.0 }
 0x8c4   : > { %v6438_v36 = vadd.f32 %v6437_v19, %v6436_v23  ;;  %v6443_v37 = vrot.slane %v6442_v51, 2  ;;  %v6345_v45 = vmul.f32 0.015625, %v6278_v44  ;;  %6679 = vadd.xlane.f32.xlu0 %v6678_v9  ;;  %v15116_v16 = vsub.f32 %v14926_v53, %v6565_v11 }
 0x8c5   : > { %v6281_v7 = vpop.xlane.xlu0 %6280  ;;  %v6566_v20 = vmul.f32 0.125, %v6434_v6 }
 0x8c6   : > { %v6439_v26 = vrot.slane %v6438_v36, 1  ;;  %v6444_v48 = vadd.f32 %v6443_v37, %v6442_v51  ;;  %v6447_v42 = vrot.slane %v6345_v45, 4  ;;  %v6346_v49 = vmul.f32 0.015625, %v6281_v7 }
 0x8c7   : > { %v6629_v55 = vmul.f32 %v15116_v16, %v15116_v16  ;;  %v15121_v60 = vsub.f32 %v14931_v27, %v6566_v20 }
 0x8c8   : > { %v6440_v2 = vadd.f32 %v6439_v26, %v6438_v36  ;;  %v6445_v56 = vrot.slane %v6444_v48, 1  ;;  %v6448_v33 = vadd.f32 %v6447_v42, %v6345_v45  ;;  %v6453_v63 = vrot.slane %v6346_v49, 4 }
 0x8c9   : > { %v6681_v4 = vsel %vm713_vm2, %v6629_v55, 0.0  ;;  %v6630_v53 = vmul.f32 %v15121_v60, %v15121_v60 }
 0x8ca   : > { %v6446_v41 = vadd.f32 %v6445_v56, %v6444_v48  ;;  %v6449_v29 = vrot.slane %v6448_v33, 2  ;;  %v6454_v0 = vadd.f32 %v6453_v63, %v6346_v49  ;;  %6682 = vadd.xlane.f32.xlu1 %v6681_v4  ;;  %v6567_v3 = vmul.f32 0.125, %v6440_v2 }
 0x8cb   : > { %v6284_v57 = vpop.xlane.xlu1 %6283  ;;  %v6684_v23 = vsel %vm713_vm2, %v6630_v53, 0.0 }
 0x8cc   : > { %v6450_v12 = vadd.f32 %v6449_v29, %v6448_v33  ;;  %v6455_v27 = vrot.slane %v6454_v0, 2  ;;  %v6347_v22 = vmul.f32 0.015625, %v6284_v57  ;;  %6685 = vadd.xlane.f32.xlu0 %v6684_v23  ;;  %v15128_v61 = vsub.f32 %v14938_v18, %v6567_v3 }
 0x8cd   : > { %v6287_v6 = vpop.xlane.xlu0 %6286  ;;  %v6568_v19 = vmul.f32 0.125, %v6446_v41 }
 0x8ce   : > { %v6451_v51 = vrot.slane %v6450_v12, 1  ;;  %v6456_v11 = vadd.f32 %v6455_v27, %v6454_v0  ;;  %v6459_v44 = vrot.slane %v6347_v22, 4  ;;  %v6348_v9 = vmul.f32 0.015625, %v6287_v6 }
 0x8cf   : > { %v6631_v36 = vmul.f32 %v15128_v61, %v15128_v61  ;;  %v15133_v37 = vsub.f32 %v14943_v13, %v6568_v19 }
 0x8d0   : > { %v6452_v45 = vadd.f32 %v6451_v51, %v6450_v12  ;;  %v6457_v7 = vrot.slane %v6456_v11, 1  ;;  %v6460_v20 = vadd.f32 %v6459_v44, %v6347_v22  ;;  %v6465_v26 = vrot.slane %v6348_v9, 4 }
 0x8d1   : > { %v6687_v48 = vsel %vm713_vm2, %v6631_v36, 0.0  ;;  %v6632_v18 = vmul.f32 %v15133_v37, %v15133_v37 }
 0x8d2   : > { %v6458_v42 = vadd.f32 %v6457_v7, %v6456_v11  ;;  %v6461_v49 = vrot.slane %v6460_v20, 2  ;;  %v6466_v55 = vadd.f32 %v6465_v26, %v6348_v9  ;;  %6688 = vadd.xlane.f32.xlu1 %v6687_v48  ;;  %v6569_v2 = vmul.f32 0.125, %v6452_v45 }
 0x8d3   : > { %v6290_v56 = vpop.xlane.xlu1 %6289  ;;  %v6690_v33 = vsel %vm713_vm2, %v6632_v18, 0.0 }
 0x8d4   : > { %v6462_v63 = vadd.f32 %v6461_v49, %v6460_v20  ;;  %v6467_v13 = vrot.slane %v6466_v55, 2  ;;  %v6349_v4 = vmul.f32 0.015625, %v6290_v56  ;;  %6691 = vadd.xlane.f32.xlu0 %v6690_v33  ;;  %v15140_v53 = vsub.f32 %v14950_v25, %v6569_v2  ;;  %v11053_v49 = vld [vmem:[%s16413_s3 + $0x88] sm:$0xff]  }
 0x8d5   : > { %v6293_v41 = vpop.xlane.xlu0 %6292  ;;  %v6570_v29 = vmul.f32 0.125, %v6458_v42  ;;  %v11052_v42 = vld [vmem:[%s16413_s3 + $0x80] sm:$0xff]  }
 0x8d6   : > { %v6463_v0 = vrot.slane %v6462_v63, 1  ;;  %v6468_v3 = vadd.f32 %v6467_v13, %v6466_v55  ;;  %v6471_v57 = vrot.slane %v6349_v4, 4  ;;  %v6350_v23 = vmul.f32 0.015625, %v6293_v41  ;;  %10595 = vmatprep.subr.bf16.mxu0 %v11052_v42 }
 0x8d7   : > { %v6633_v12 = vmul.f32 %v15140_v53, %v15140_v53  ;;  %v15145_v27 = vsub.f32 %v14955_v32, %v6570_v29  ;;  %10596 = vmatpush3.bf16.msra.mxu0 %v11052_v42 }
 0x8d8   : > { %v6464_v22 = vadd.f32 %v6463_v0, %v6462_v63  ;;  %v6469_v6 = vrot.slane %v6468_v3, 1  ;;  %v6472_v19 = vadd.f32 %v6471_v57, %v6349_v4  ;;  %v6477_v51 = vrot.slane %v6350_v23, 4  ;;  %10597 = vmatprep.subr.bf16.mxu0 %v11053_v49 }
 0x8d9   : > { %v6693_v11 = vsel %vm713_vm2, %v6633_v12, 0.0  ;;  %v6634_v25 = vmul.f32 %v15145_v27, %v15145_v27 }
 0x8da   : > { %v6470_v44 = vadd.f32 %v6469_v6, %v6468_v3  ;;  %v6473_v9 = vrot.slane %v6472_v19, 2  ;;  %v6478_v36 = vadd.f32 %v6477_v51, %v6350_v23  ;;  %6694 = vadd.xlane.f32.xlu1 %v6693_v11  ;;  %v6571_v45 = vmul.f32 0.125, %v6464_v22 }
 0x8db   : > { %v6296_v7 = vpop.xlane.xlu1 %6295  ;;  %v6696_v20 = vsel %vm713_vm2, %v6634_v25, 0.0  ;;  %10598 = vmatpush3.bf16.msra.mxu0 %v11053_v49 }
 0x8dc   : > { %v6474_v26 = vadd.f32 %v6473_v9, %v6472_v19  ;;  %v6479_v32 = vrot.slane %v6478_v36, 2  ;;  %v6351_v48 = vmul.f32 0.015625, %v6296_v7  ;;  %6697 = vadd.xlane.f32.xlu0 %v6696_v20  ;;  %v15152_v18 = vsub.f32 %v14962_v50, %v6571_v45  ;;  %v11055_v45 = vld [vmem:[%s16413_s3 + $0x98] sm:$0xff]  }
 0x8dd   : > { %v6299_v55 = vpop.xlane.xlu0 %6298  ;;  %v6572_v2 = vmul.f32 0.125, %v6470_v44 }
 0x8de   : > { %v6475_v56 = vrot.slane %v6474_v26, 1  ;;  %v6480_v33 = vadd.f32 %v6479_v32, %v6478_v36  ;;  %v6483_v63 = vrot.slane %v6351_v48, 4  ;;  %v6352_v13 = vmul.f32 0.015625, %v6299_v55  ;;  %v11054_v36 = vld [vmem:[%s16413_s3 + $0x90] sm:$0xff]  }
 0x8df   : > { %v6635_v4 = vmul.f32 %v15152_v18, %v15152_v18  ;;  %v15163_v50 = vsub.f32 %v14967_v52, %v6572_v2  ;;  %10599 = vmatprep.subr.bf16.mxu0 %v11054_v36 }
 0x8e0   : > { %v6476_v41 = vadd.f32 %v6475_v56, %v6474_v26  ;;  %v6481_v29 = vrot.slane %v6480_v33, 1  ;;  %v6484_v0 = vadd.f32 %v6483_v63, %v6351_v48  ;;  %v6489_v3 = vrot.slane %v6352_v13, 4  ;;  %10600 = vmatpush3.bf16.msra.mxu0 %v11054_v36 }
 0x8e1   : > { %v6699_v57 = vsel %vm713_vm2, %v6635_v4, 0.0  ;;  %v6636_v23 = vmul.f32 %v15163_v50, %v15163_v50  ;;  %10601 = vmatprep.subr.bf16.mxu0 %v11055_v45 }
 0x8e2   : > { %v6482_v12 = vadd.f32 %v6481_v29, %v6480_v33  ;;  %v6485_v22 = vrot.slane %v6484_v0, 2  ;;  %v6490_v6 = vadd.f32 %v6489_v3, %v6352_v13  ;;  %6700 = vadd.xlane.f32.xlu1 %v6699_v57  ;;  %v6573_v19 = vmul.f32 0.125, %v6476_v41 }
 0x8e3   : > { %v6302_v51 = vpop.xlane.xlu1 %6301  ;;  %v6702_v52 = vsel %vm713_vm2, %v6636_v23, 0.0 }
 0x8e4   : > { %v6486_v11 = vadd.f32 %v6485_v22, %v6484_v0  ;;  %v6491_v25 = vrot.slane %v6490_v6, 2  ;;  %v6353_v44 = vmul.f32 0.015625, %v6302_v51  ;;  %6703 = vadd.xlane.f32.xlu0 %v6702_v52  ;;  %v15170_v9 = vsub.f32 %v14974_v47, %v6573_v19  ;;  %10602 = vmatpush3.bf16.msra.mxu0 %v11055_v45  ;;  %v11056_v51 = vld [vmem:[%s16413_s3 + $0xa0] sm:$0xff]   ;;  %v11057_v52 = vld [vmem:[%s16413_s3 + $0xa8] sm:$0xff]  }
 0x8e5   : > { %v6305_v7 = vpop.xlane.xlu0 %6304  ;;  %v6574_v20 = vmul.f32 0.125, %v6482_v12  ;;  %10603 = vmatprep.subr.bf16.mxu0 %v11056_v51 }
 0x8e6   : > { %v6487_v26 = vrot.slane %v6486_v11, 1  ;;  %v6492_v32 = vadd.f32 %v6491_v25, %v6490_v6  ;;  %v6495_v48 = vrot.slane %v6353_v44, 4  ;;  %v6354_v42 = vmul.f32 0.015625, %v6305_v7 }
 0x8e7   : > { %v6637_v49 = vmul.f32 %v15170_v9, %v15170_v9  ;;  %v15181_v47 = vsub.f32 %v14979_v34, %v6574_v20 }
 0x8e8   : > { %v6488_v55 = vadd.f32 %v6487_v26, %v6486_v11  ;;  %v6493_v2 = vrot.slane %v6492_v32, 1  ;;  %v6496_v56 = vadd.f32 %v6495_v48, %v6353_v44  ;;  %v6501_v33 = vrot.slane %v6354_v42, 4  ;;  %10604 = vmatpush3.bf16.msra.mxu0 %v11056_v51 }
 0x8e9   : > { %v6705_v63 = vsel %vm713_vm2, %v6637_v49, 0.0  ;;  %v6638_v13 = vmul.f32 %v15181_v47, %v15181_v47  ;;  %10605 = vmatprep.subr.bf16.mxu0 %v11057_v52 }
 0x8ea   : > { %v6494_v4 = vadd.f32 %v6493_v2, %v6492_v32  ;;  %v6497_v41 = vrot.slane %v6496_v56, 2  ;;  %v6502_v29 = vadd.f32 %v6501_v33, %v6354_v42  ;;  %6706 = vadd.xlane.f32.xlu1 %v6705_v63  ;;  %v6575_v0 = vmul.f32 0.125, %v6488_v55 }
 0x8eb   : > { %v6308_v3 = vpop.xlane.xlu1 %6307  ;;  %v6708_v34 = vsel %vm713_vm2, %v6638_v13, 0.0 }
 0x8ec   : > { %v6498_v57 = vadd.f32 %v6497_v41, %v6496_v56  ;;  %v6503_v23 = vrot.slane %v6502_v29, 2  ;;  %v6355_v12 = vmul.f32 0.015625, %v6308_v3  ;;  %6709 = vadd.xlane.f32.xlu0 %v6708_v34  ;;  %v15188_v22 = vsub.f32 %v14986_v30, %v6575_v0  ;;  %10606 = vmatpush3.bf16.msra.mxu0 %v11057_v52 }
 0x8ed   : > { %v6311_v6 = vpop.xlane.xlu0 %6310  ;;  %v6576_v19 = vmul.f32 0.125, %v6494_v4 }
 0x8ee   : > { %v6499_v11 = vrot.slane %v6498_v57, 1  ;;  %v6504_v25 = vadd.f32 %v6503_v23, %v6502_v29  ;;  %v6507_v44 = vrot.slane %v6355_v12, 4  ;;  %v6356_v36 = vmul.f32 0.015625, %v6311_v6 }
 0x8ef   : > { %v6639_v45 = vmul.f32 %v15188_v22, %v15188_v22  ;;  %v15199_v30 = vsub.f32 %v14991_v59, %v6576_v19 }
 0x8f0   : > { %v6500_v7 = vadd.f32 %v6499_v11, %v6498_v57  ;;  %v6505_v20 = vrot.slane %v6504_v25, 1  ;;  %v6508_v26 = vadd.f32 %v6507_v44, %v6355_v12  ;;  %v6513_v32 = vrot.slane %v6356_v36, 4 }
 0x8f1   : > { %v6711_v48 = vsel %vm713_vm2, %v6639_v45, 0.0  ;;  %v6640_v42 = vmul.f32 %v15199_v30, %v15199_v30 }
 0x8f2   : > { %v6506_v49 = vadd.f32 %v6505_v20, %v6504_v25  ;;  %v6509_v55 = vrot.slane %v6508_v26, 2  ;;  %v6514_v2 = vadd.f32 %v6513_v32, %v6356_v36  ;;  %6712 = vadd.xlane.f32.xlu1 %v6711_v48  ;;  %v6577_v56 = vmul.f32 0.125, %v6500_v7 }
 0x8f3   : > { %v6314_v33 = vpop.xlane.xlu1 %6313  ;;  %v6714_v59 = vsel %vm713_vm2, %v6640_v42, 0.0 }
 0x8f4   : > { %v6510_v63 = vadd.f32 %v6509_v55, %v6508_v26  ;;  %v6515_v13 = vrot.slane %v6514_v2, 2  ;;  %v6357_v4 = vmul.f32 0.015625, %v6314_v33  ;;  %6715 = vadd.xlane.f32.xlu0 %v6714_v59  ;;  %v15206_v41 = vsub.f32 %v14998_v1, %v6577_v56 }
 0x8f5   : > { %v6317_v29 = vpop.xlane.xlu0 %6316  ;;  %v6578_v0 = vmul.f32 0.125, %v6506_v49 }
 0x8f6   : > { %v6511_v3 = vrot.slane %v6510_v63, 1  ;;  %v6516_v34 = vadd.f32 %v6515_v13, %v6514_v2  ;;  %v6519_v57 = vrot.slane %v6357_v4, 4  ;;  %v6358_v23 = vmul.f32 0.015625, %v6317_v29 }
 0x8f7   : > { %v6641_v12 = vmul.f32 %v15206_v41, %v15206_v41  ;;  %v15211_v6 = vsub.f32 %v15003_v43, %v6578_v0 }
 0x8f8   : > { %v6512_v19 = vadd.f32 %v6511_v3, %v6510_v63  ;;  %v6517_v51 = vrot.slane %v6516_v34, 1  ;;  %v6520_v11 = vadd.f32 %v6519_v57, %v6357_v4  ;;  %v6525_v25 = vrot.slane %v6358_v23, 4 }
 0x8f9   : > { %v6717_v1 = vsel %vm713_vm2, %v6641_v12, 0.0  ;;  %v6642_v52 = vmul.f32 %v15211_v6, %v15211_v6 }
 0x8fa   : > { %v6518_v44 = vadd.f32 %v6517_v51, %v6516_v34  ;;  %v6521_v36 = vrot.slane %v6520_v11, 2  ;;  %v6526_v45 = vadd.f32 %v6525_v25, %v6358_v23  ;;  %6718 = vadd.xlane.f32.xlu1 %v6717_v1  ;;  %v6579_v7 = vmul.f32 0.125, %v6512_v19 }
 0x8fb   : > { %v6320_v20 = vpop.xlane.xlu1 %6319  ;;  %v6720_v26 = vsel %vm713_vm2, %v6642_v52, 0.0 }
 0x8fc   : > { %v6522_v32 = vadd.f32 %v6521_v36, %v6520_v11  ;;  %v6527_v43 = vrot.slane %v6526_v45, 2  ;;  %v6359_v48 = vmul.f32 0.015625, %v6320_v20  ;;  %6721 = vadd.xlane.f32.xlu0 %v6720_v26  ;;  %v15218_v42 = vsub.f32 %v15010_v17, %v6579_v7 }
 0x8fd   : > { %v6323_v49 = vpop.xlane.xlu0 %6322  ;;  %v6580_v55 = vmul.f32 0.125, %v6518_v44 }
 0x8fe   : > { %v6523_v2 = vrot.slane %v6522_v32, 1  ;;  %v6528_v56 = vadd.f32 %v6527_v43, %v6526_v45  ;;  %v6531_v33 = vrot.slane %v6359_v48, 4  ;;  %v6360_v59 = vmul.f32 0.015625, %v6323_v49 }
 0x8ff   : > { %v6643_v63 = vmul.f32 %v15218_v42, %v15218_v42  ;;  %v15223_v13 = vsub.f32 %v15015_v62, %v6580_v55 }
 0x900   : > { %v6524_v4 = vadd.f32 %v6523_v2, %v6522_v32  ;;  %v6529_v29 = vrot.slane %v6528_v56, 1  ;;  %v6532_v0 = vadd.f32 %v6531_v33, %v6359_v48  ;;  %v6537_v3 = vrot.slane %v6360_v59, 4 }
 0x901   : > { %v6723_v34 = vsel %vm713_vm2, %v6643_v63, 0.0  ;;  %v6644_v17 = vmul.f32 %v15223_v13, %v15223_v13 }
 0x902   : > { %v6530_v57 = vadd.f32 %v6529_v29, %v6528_v56  ;;  %v6533_v23 = vrot.slane %v6532_v0, 2  ;;  %v6538_v12 = vadd.f32 %v6537_v3, %v6360_v59  ;;  %6724 = vadd.xlane.f32.xlu1 %v6723_v34  ;;  %v6581_v19 = vmul.f32 0.125, %v6524_v4 }
 0x903   : > { %v6326_v51 = vpop.xlane.xlu1 %6325  ;;  %v6726_v11 = vsel %vm713_vm2, %v6644_v17, 0.0 }
 0x904   : > { %v6534_v25 = vadd.f32 %v6533_v23, %v6532_v0  ;;  %v6539_v62 = vrot.slane %v6538_v12, 2  ;;  %v6361_v1 = vmul.f32 0.015625, %v6326_v51  ;;  %6727 = vadd.xlane.f32.xlu0 %v6726_v11  ;;  %v15230_v52 = vsub.f32 %v15022_v5, %v6581_v19 }
 0x905   : > { %v6329_v44 = vpop.xlane.xlu0 %6328  ;;  %v6582_v36 = vmul.f32 0.125, %v6530_v57 }
 0x906   : > { %v6535_v45 = vrot.slane %v6534_v25, 1  ;;  %v6540_v7 = vadd.f32 %v6539_v62, %v6538_v12  ;;  %v6543_v20 = vrot.slane %v6361_v1, 4  ;;  %v6362_v26 = vmul.f32 0.015625, %v6329_v44 }
 0x907   : > { %v6645_v32 = vmul.f32 %v15230_v52, %v15230_v52  ;;  %v15235_v43 = vsub.f32 %v15027_v24, %v6582_v36 }
 0x908   : > { %v6536_v48 = vadd.f32 %v6535_v45, %v6534_v25  ;;  %v6541_v49 = vrot.slane %v6540_v7, 1  ;;  %v6544_v55 = vadd.f32 %v6543_v20, %v6361_v1  ;;  %v6549_v2 = vrot.slane %v6362_v26, 4 }
 0x909   : > { %v6729_v56 = vsel %vm713_vm2, %v6645_v32, 0.0  ;;  %v6646_v5 = vmul.f32 %v15235_v43, %v15235_v43 }
 0x90a   : > { %v6542_v33 = vadd.f32 %v6541_v49, %v6540_v7  ;;  %v6545_v59 = vrot.slane %v6544_v55, 2  ;;  %v6550_v63 = vadd.f32 %v6549_v2, %v6362_v26  ;;  %6730 = vadd.xlane.f32.xlu1 %v6729_v56  ;;  %v6583_v4 = vmul.f32 0.125, %v6536_v48 }
 0x90b   : > { %v6732_v29 = vsel %vm713_vm2, %v6646_v5, 0.0 }
 0x90c   : > { %v6546_v0 = vadd.f32 %v6545_v59, %v6544_v55  ;;  %v6551_v3 = vrot.slane %v6550_v63, 2  ;;  %6733 = vadd.xlane.f32.xlu0 %v6732_v29  ;;  %v15242_v24 = vsub.f32 %v15034_v54, %v6583_v4  ;;  %v6584_v34 = vmul.f32 0.125, %v6542_v33 }
 0x90e   : > { %v6547_v17 = vrot.slane %v6546_v0, 1  ;;  %v6552_v57 = vadd.f32 %v6551_v3, %v6550_v63  ;;  %v6647_v23 = vmul.f32 %v15242_v24, %v15242_v24  ;;  %v15247_v12 = vsub.f32 %v15039_v39, %v6584_v34 }
 0x910   : > { %v6548_v19 = vadd.f32 %v6547_v17, %v6546_v0  ;;  %v6553_v51 = vrot.slane %v6552_v57, 1  ;;  %v6735_v11 = vsel %vm713_vm2, %v6647_v23, 0.0  ;;  %v6648_v25 = vmul.f32 %v15247_v12, %v15247_v12 }
 0x911   : > { %6736 = vadd.xlane.f32.xlu1 %v6735_v11 }
 0x912   : > { %v6554_v62 = vadd.f32 %v6553_v51, %v6552_v57  ;;  %v6738_v54 = vsel %vm713_vm2, %v6648_v25, 0.0  ;;  %v6585_v1 = vmul.f32 0.125, %v6548_v19 }
 0x913   : > { %6739 = vadd.xlane.f32.xlu0 %v6738_v54 }
 0x914   : > { %v15254_v44 = vsub.f32 %v15046_v31, %v6585_v1  ;;  %v6586_v36 = vmul.f32 0.125, %v6554_v62 }
 0x916   : > { %v6649_v39 = vmul.f32 %v15254_v44, %v15254_v44  ;;  %v15259_v45 = vsub.f32 %v15051_v58, %v6586_v36 }
 0x918   : > { %v6741_v7 = vsel %vm713_vm2, %v6649_v39, 0.0  ;;  %v6650_v20 = vmul.f32 %v15259_v45, %v15259_v45 }
 0x919   : > { %6742 = vadd.xlane.f32.xlu1 %v6741_v7 }
 0x91a   : > { %v6744_v26 = vsel %vm713_vm2, %v6650_v20, 0.0 }
 0x91b   : > { %6745 = vadd.xlane.f32.xlu0 %v6744_v26 }
 0x92f   : > { %v6653_v32 = vpop.xlane.xlu1 %6652 }
 0x930   : > { %v6747_v48 = vmul.f32 0.015625, %v6653_v32 }
 0x931   : > { %v6656_v31 = vpop.xlane.xlu0 %6655 }
 0x932   : > { %v6779_v49 = vrot.slane %v6747_v48, 4  ;;  %v6748_v55 = vmul.f32 0.015625, %v6656_v31 }
 0x934   : > { %v6780_v2 = vadd.f32 %v6779_v49, %v6747_v48  ;;  %v6785_v56 = vrot.slane %v6748_v55, 4 }
 0x936   : > { %v6781_v5 = vrot.slane %v6780_v2, 2  ;;  %v6786_v33 = vadd.f32 %v6785_v56, %v6748_v55 }
 0x937   : > { %v6659_v58 = vpop.xlane.xlu1 %6658 }
 0x938   : > { %v6782_v59 = vadd.f32 %v6781_v5, %v6780_v2  ;;  %v6787_v63 = vrot.slane %v6786_v33, 2  ;;  %v6749_v4 = vmul.f32 0.015625, %v6659_v58 }
 0x93a   : > { %v6783_v29 = vrot.slane %v6782_v59, 1  ;;  %v6788_v0 = vadd.f32 %v6787_v63, %v6786_v33  ;;  %v6791_v3 = vrot.slane %v6749_v4, 4 }
 0x93b   : > { %v6662_v34 = vpop.xlane.xlu0 %6661 }
 0x93c   : > { %v6784_v17 = vadd.f32 %v6783_v29, %v6782_v59  ;;  %v6789_v57 = vrot.slane %v6788_v0, 1  ;;  %v6792_v23 = vadd.f32 %v6791_v3, %v6749_v4  ;;  %v6750_v19 = vmul.f32 0.015625, %v6662_v34 }
 0x93e   : > { %v6971_v51 = vmul.f32 0.125, %v6784_v17  ;;  %v6790_v11 = vadd.f32 %v6789_v57, %v6788_v0  ;;  %v6793_v25 = vrot.slane %v6792_v23, 2  ;;  %v6797_v62 = vrot.slane %v6750_v19, 4 }
 0x93f   : > { %v6665_v54 = vpop.xlane.xlu1 %6664 }
 0x940   : > { %v7003_v1 = vadd.f32 1e-05, %v6971_v51  ;;  %v6972_v36 = vmul.f32 0.125, %v6790_v11  ;;  %v6794_v39 = vadd.f32 %v6793_v25, %v6792_v23  ;;  %v6798_v7 = vadd.f32 %v6797_v62, %v6750_v19 }
 0x941   : > { %v6751_v20 = vmul.f32 0.015625, %v6665_v54  ;;  %v6668_v26 = vpop.xlane.xlu0 %6667 }
 0x942   : > { %11190 = vrsqrt.f32 %v7003_v1  ;;  %v7004_v32 = vadd.f32 1e-05, %v6972_v36  ;;  %v6795_v48 = vrot.slane %v6794_v39, 1  ;;  %v6799_v31 = vrot.slane %v6798_v7, 2  ;;  %v15268_v1 = vld [vmem:[%s16414_s4 + $0x88] sm:$0xff] }
 0x943   : > { %v6803_v49 = vrot.slane %v6751_v20, 4  ;;  %v6752_v55 = vmul.f32 0.015625, %v6668_v26 }
 0x944   : > { %11192 = vrsqrt.f32 %v7004_v32  ;;  %v6796_v2 = vadd.f32 %v6795_v48, %v6794_v39  ;;  %v6800_v56 = vadd.f32 %v6799_v31, %v6798_v7 }
 0x945   : > { %v6804_v5 = vadd.f32 %v6803_v49, %v6751_v20  ;;  %v6809_v33 = vrot.slane %v6752_v55, 4 }
 0x946   : > { %v6973_v58 = vmul.f32 0.125, %v6796_v2  ;;  %v6801_v59 = vrot.slane %v6800_v56, 1 }
 0x947   : > { %v6805_v63 = vrot.slane %v6804_v5, 2  ;;  %v6810_v4 = vadd.f32 %v6809_v33, %v6752_v55  ;;  %v6671_v29 = vpop.xlane.xlu1 %6670  ;;  %v15274_v55 = vld [vmem:[%s16414_s4 + $0x90] sm:$0xff] }
 0x948   : > { %v7005_v0 = vadd.f32 1e-05, %v6973_v58  ;;  %v6802_v3 = vadd.f32 %v6801_v59, %v6800_v56  ;;  %v6753_v34 = vmul.f32 0.015625, %v6671_v29 }
 0x949   : > { %v6806_v17 = vadd.f32 %v6805_v63, %v6804_v5  ;;  %v6811_v57 = vrot.slane %v6810_v4, 2  ;;  %v6674_v23 = vpop.xlane.xlu0 %6673 }
 0x94a   : > { %11194 = vrsqrt.f32 %v7005_v0  ;;  %v6974_v19 = vmul.f32 0.125, %v6802_v3  ;;  %v6815_v51 = vrot.slane %v6753_v34, 4  ;;  %v6754_v11 = vmul.f32 0.015625, %v6674_v23 }
 0x94b   : > { %v6807_v25 = vrot.slane %v6806_v17, 1  ;;  %v6812_v62 = vadd.f32 %v6811_v57, %v6810_v4 }
 0x94c   : > { %v11191_v54 = vpop.eup %11190  ;;  %v7006_v36 = vadd.f32 1e-05, %v6974_v19  ;;  %v6816_v39 = vadd.f32 %v6815_v51, %v6753_v34  ;;  %v6821_v7 = vrot.slane %v6754_v11, 4 }
 0x94d   : > { %v6808_v20 = vadd.f32 %v6807_v25, %v6806_v17  ;;  %v6813_v26 = vrot.slane %v6812_v62, 1  ;;  %v7067_v32 = vmul.f32 %v11191_v54, %v15056_v21 }
 0x94e   : > { %v11193_v48 = vpop.eup %11192  ;;  %11196 = vrsqrt.f32 %v7006_v36  ;;  %v6817_v31 = vrot.slane %v6816_v39, 2  ;;  %v6822_v49 = vadd.f32 %v6821_v7, %v6754_v11  ;;  %v17055_v7 = vld [vmem:[#allocation11_spill] sm:$0xff] }
 0x94f   : > { %v6975_v2 = vmul.f32 0.125, %v6808_v20  ;;  %v6814_v56 = vadd.f32 %v6813_v26, %v6812_v62  ;;  %v6677_v5 = vpop.xlane.xlu1 %6676  ;;  %v7068_v33 = vmul.f32 %v11193_v48, %v15061_v15  ;;  %v7099_v58 = vmul.f32 %v7067_v32, %v15268_v1  ;;  %v17056_v26 = vld [vmem:[#allocation12_spill] sm:$0xff] }
 0x950   : > { %v6818_v59 = vadd.f32 %v6817_v31, %v6816_v39  ;;  %v6823_v63 = vrot.slane %v6822_v49, 2  ;;  %v6755_v4 = vmul.f32 0.015625, %v6677_v5 }
 0x951   : > { %v7007_v21 = vadd.f32 1e-05, %v6975_v2  ;;  %v6976_v29 = vmul.f32 0.125, %v6814_v56  ;;  %v6680_v0 = vpop.xlane.xlu0 %6679  ;;  %v7100_v3 = vmul.f32 %v7068_v33, %v15268_v1  ;;  %v7131_v34 = vadd.f32 %v7099_v58, %v15274_v55 }
 0x952   : > { %v6819_v17 = vrot.slane %v6818_v59, 1  ;;  %v6824_v57 = vadd.f32 %v6823_v63, %v6822_v49  ;;  %v6827_v23 = vrot.slane %v6755_v4, 4  ;;  %v6756_v19 = vmul.f32 0.015625, %v6680_v0 }
 0x953   : > { %11198 = vrsqrt.f32 %v7007_v21  ;;  %v7008_v51 = vadd.f32 1e-05, %v6976_v29  ;;  %v7132_v15 = vadd.f32 %v7100_v3, %v15274_v55  ;;  %v7195_v20 = vsel %vm713_vm2, %v7131_v34, %v17055_v7 }
 0x954   : > { %v11195_v11 = vpop.eup %11194  ;;  %v6820_v25 = vadd.f32 %v6819_v17, %v6818_v59  ;;  %v6825_v62 = vrot.slane %v6824_v57, 1  ;;  %v6828_v54 = vadd.f32 %v6827_v23, %v6755_v4  ;;  %v6833_v36 = vrot.slane %v6756_v19, 4 }
 0x955   : > { %v7069_v39 = vmul.f32 %v11195_v11, %v15068_v40  ;;  %11200 = vrsqrt.f32 %v7008_v51  ;;  %v7196_v32 = vsel %vm713_vm2, %v7132_v15, %v17056_v26 }
 0x956   : > { %v6977_v48 = vmul.f32 0.125, %v6820_v25  ;;  %v6826_v31 = vadd.f32 %v6825_v62, %v6824_v57  ;;  %v6829_v49 = vrot.slane %v6828_v54, 2  ;;  %v6834_v2 = vadd.f32 %v6833_v36, %v6756_v19 }
 0x957   : > { %v7101_v56 = vmul.f32 %v7069_v39, %v15268_v1  ;;  %v6683_v5 = vpop.xlane.xlu1 %6682  ;;  %v7239_v33 = vpack.c.bf16 %v7196_v32, %v7195_v20 }
 0x958   : > { %v11197_v58 = vpop.eup %11196  ;;  %v7009_v59 = vadd.f32 1e-05, %v6977_v48  ;;  %v6978_v63 = vmul.f32 0.125, %v6826_v31  ;;  %v6830_v4 = vadd.f32 %v6829_v49, %v6828_v54  ;;  %v6835_v40 = vrot.slane %v6834_v2, 2  ;;  %v17057_v31 = vld [vmem:[#allocation13_spill] sm:$0xff] }
 0x959   : > { %v7070_v21 = vmul.f32 %v11197_v58, %v15074_v28  ;;  %v6757_v29 = vmul.f32 0.015625, %v6683_v5  ;;  %10607 = vmatprep.mubr.msk.bf16.mxu0 %vm7296_vm8, %v7239_v33  ;;  %v6686_v0 = vpop.xlane.xlu0 %6685  ;;  %v7133_v51 = vadd.f32 %v7101_v56, %v15274_v55 }
 0x95a   : > { %11202 = vrsqrt.f32 %v7009_v59  ;;  %v7010_v3 = vadd.f32 1e-05, %v6978_v63  ;;  %v6831_v34 = vrot.slane %v6830_v4, 1  ;;  %v6836_v17 = vadd.f32 %v6835_v40, %v6834_v2  ;;  %v17058_v2 = vld [vmem:[#allocation14_spill] sm:$0xff] }
 0x95b   : > { %v7102_v57 = vmul.f32 %v7070_v21, %v15268_v1  ;;  %v6839_v23 = vrot.slane %v6757_v29, 4  ;;  %v6758_v19 = vmul.f32 0.015625, %v6686_v0  ;;  %v7197_v49 = vsel %vm713_vm2, %v7133_v51, %v17057_v31 }
 0x95c   : > { %11204 = vrsqrt.f32 %v7010_v3  ;;  %v6832_v15 = vadd.f32 %v6831_v34, %v6830_v4  ;;  %v6837_v11 = vrot.slane %v6836_v17, 1 }
 0x95d   : > { %v11199_v25 = vpop.eup %11198  ;;  %v6840_v62 = vadd.f32 %v6839_v23, %v6757_v29  ;;  %v6845_v28 = vrot.slane %v6758_v19, 4  ;;  %v7134_v54 = vadd.f32 %v7102_v57, %v15274_v55 }
 0x95e   : > { %v6979_v36 = vmul.f32 0.125, %v6832_v15  ;;  %v6838_v39 = vadd.f32 %v6837_v11, %v6836_v17  ;;  %v7071_v7 = vmul.f32 %v11199_v25, %v15079_v46 }
 0x95f   : > { %v11201_v20 = vpop.eup %11200  ;;  %v6841_v26 = vrot.slane %v6840_v62, 2  ;;  %v6846_v32 = vadd.f32 %v6845_v28, %v6758_v19  ;;  %v6689_v48 = vpop.xlane.xlu1 %6688  ;;  %v7198_v56 = vsel %vm713_vm2, %v7134_v54, %v17058_v2 }
 0x960   : > { %v7011_v5 = vadd.f32 1e-05, %v6979_v36  ;;  %v6980_v33 = vmul.f32 0.125, %v6838_v39  ;;  %v6759_v58 = vmul.f32 0.015625, %v6689_v48  ;;  %v7240_v59 = vpack.c.bf16 %v7198_v56, %v7197_v49  ;;  %v17059_v36 = vld [vmem:[#allocation19_spill] sm:$0xff]  ;;  %v17060_v48 = vld [vmem:[#allocation17_spill] sm:$0xff] }
 0x961   : > { %v6842_v63 = vadd.f32 %v6841_v26, %v6840_v62  ;;  %v6847_v4 = vrot.slane %v6846_v32, 2  ;;  %v6692_v40 = vpop.xlane.xlu0 %6691  ;;  %v7072_v21 = vmul.f32 %v11201_v20, %v15085_v35  ;;  %v7103_v46 = vmul.f32 %v7071_v7, %v15268_v1 }
 0x962   : > { %11206 = vrsqrt.f32 %v7011_v5  ;;  %v7012_v29 = vadd.f32 1e-05, %v6980_v33  ;;  %v6851_v0 = vrot.slane %v6759_v58, 4  ;;  %v6760_v3 = vmul.f32 0.015625, %v6692_v40  ;;  %10608 = vmatmul.mubr.msk.bf16.vlgmr.msra.gmra.mrb[180].mxu0 %vm7296_vm8, %v7240_v59 }
 0x963   : > { %v6843_v34 = vrot.slane %v6842_v63, 1  ;;  %v6848_v17 = vadd.f32 %v6847_v4, %v6846_v32  ;;  %v7104_v57 = vmul.f32 %v7072_v21, %v15268_v1  ;;  %v7135_v23 = vadd.f32 %v7103_v46, %v15274_v55 }
 0x964   : > { %v11203_v19 = vpop.eup %11202  ;;  %11208 = vrsqrt.f32 %v7012_v29  ;;  %v6852_v51 = vadd.f32 %v6851_v0, %v6759_v58  ;;  %v6857_v15 = vrot.slane %v6760_v3, 4 }
 0x965   : > { %v6844_v11 = vadd.f32 %v6843_v34, %v6842_v63  ;;  %v6849_v35 = vrot.slane %v6848_v17, 1  ;;  %v7136_v25 = vadd.f32 %v7104_v57, %v15274_v55  ;;  %v7199_v39 = vsel %vm713_vm2, %v7135_v23, %v17059_v36 }
 0x966   : > { %v11205_v62 = vpop.eup %11204  ;;  %v6853_v28 = vrot.slane %v6852_v51, 2  ;;  %v6858_v54 = vadd.f32 %v6857_v15, %v6760_v3  ;;  %v7073_v7 = vmul.f32 %v11203_v19, %v15092_v10 }
 0x967   : > { %v6981_v20 = vmul.f32 0.125, %v6844_v11  ;;  %v6850_v26 = vadd.f32 %v6849_v35, %v6848_v17  ;;  %v6695_v32 = vpop.xlane.xlu1 %6694  ;;  %v7200_v31 = vsel %vm713_vm2, %v7136_v25, %v17060_v48  ;;  %v7074_v49 = vmul.f32 %v11205_v62, %v15097_v38  ;;  %v17062_v11 = vld [vmem:[#allocation16_spill] sm:$0xff] }
 0x968   : > { %v6854_v2 = vadd.f32 %v6853_v28, %v6852_v51  ;;  %v6859_v56 = vrot.slane %v6858_v54, 2  ;;  %v6761_v5 = vmul.f32 0.015625, %v6695_v32  ;;  %v7241_v33 = vpack.c.bf16 %v7200_v31, %v7199_v39  ;;  %v17061_v51 = vld [vmem:[#allocation15_spill] sm:$0xff] }
 0x969   : > { %v7013_v58 = vadd.f32 1e-05, %v6981_v20  ;;  %v6982_v59 = vmul.f32 0.125, %v6850_v26  ;;  %v6698_v63 = vpop.xlane.xlu0 %6697  ;;  %v7105_v4 = vmul.f32 %v7073_v7, %v15268_v1  ;;  %v7106_v40 = vmul.f32 %v7074_v49, %v15268_v1 }
 0x96a   : > { %v6855_v10 = vrot.slane %v6854_v2, 1  ;;  %v6860_v21 = vadd.f32 %v6859_v56, %v6858_v54  ;;  %v6863_v46 = vrot.slane %v6761_v5, 4  ;;  %10611 = vmatprep.mubr.msk.bf16.mxu0 %vm7296_vm8, %v7241_v33  ;;  %v6762_v29 = vmul.f32 0.015625, %v6698_v63 }
 0x96b   : > { %11210 = vrsqrt.f32 %v7013_v58  ;;  %v7014_v0 = vadd.f32 1e-05, %v6982_v59  ;;  %v7137_v38 = vadd.f32 %v7105_v4, %v15274_v55  ;;  %v7138_v3 = vadd.f32 %v7106_v40, %v15274_v55 }
 0x96c   : > { %v11207_v34 = vpop.eup %11206  ;;  %v6856_v17 = vadd.f32 %v6855_v10, %v6854_v2  ;;  %v6861_v57 = vrot.slane %v6860_v21, 1  ;;  %v6864_v23 = vadd.f32 %v6863_v46, %v6761_v5  ;;  %v6869_v19 = vrot.slane %v6762_v29, 4 }
 0x96d   : > { %11212 = vrsqrt.f32 %v7014_v0  ;;  %v7201_v15 = vsel %vm713_vm2, %v7137_v38, %v17061_v51  ;;  %v7202_v35 = vsel %vm713_vm2, %v7138_v3, %v17062_v11  ;;  %v7075_v25 = vmul.f32 %v11207_v34, %v15104_v8  ;;  %v17063_v38 = vld [vmem:[#allocation22_spill] sm:$0xff]  ;;  %v17064_v34 = vld [vmem:[#allocation21_spill] sm:$0xff] }
 0x96e   : > { %v11209_v62 = vpop.eup %11208  ;;  %v6983_v28 = vmul.f32 0.125, %v6856_v17  ;;  %v6862_v54 = vadd.f32 %v6861_v57, %v6860_v21  ;;  %v6865_v36 = vrot.slane %v6864_v23, 2  ;;  %v6870_v39 = vadd.f32 %v6869_v19, %v6762_v29 }
 0x96f   : > { %v6701_v7 = vpop.xlane.xlu1 %6700  ;;  %v7242_v20 = vpack.c.bf16 %v7202_v35, %v7201_v15  ;;  %v7076_v26 = vmul.f32 %v11209_v62, %v15109_v14  ;;  %v7107_v32 = vmul.f32 %v7075_v25, %v15268_v1 }
 0x970   : > { %v7015_v48 = vadd.f32 1e-05, %v6983_v28  ;;  %v6984_v31 = vmul.f32 0.125, %v6862_v54  ;;  %v6866_v49 = vadd.f32 %v6865_v36, %v6864_v23  ;;  %v6871_v2 = vrot.slane %v6870_v39, 2 }
 0x971   : > { %v6763_v56 = vmul.f32 0.015625, %v6701_v7  ;;  %10612 = vmatmul.mubr.msk.bf16.gmra.mrb[184].mxu0 %vm7296_vm8, %v7242_v20  ;;  %v6704_v5 = vpop.xlane.xlu0 %6703  ;;  %v7108_v8 = vmul.f32 %v7076_v26, %v15268_v1  ;;  %v7139_v33 = vadd.f32 %v7107_v32, %v15274_v55 }
 0x972   : > { %11214 = vrsqrt.f32 %v7015_v48  ;;  %v7016_v58 = vadd.f32 1e-05, %v6984_v31  ;;  %v6867_v59 = vrot.slane %v6866_v49, 1  ;;  %v6872_v63 = vadd.f32 %v6871_v2, %v6870_v39 }
 0x973   : > { %v6875_v4 = vrot.slane %v6763_v56, 4  ;;  %v6764_v14 = vmul.f32 0.015625, %v6704_v5  ;;  %v7140_v40 = vadd.f32 %v7108_v8, %v15274_v55  ;;  %v7203_v3 = vsel %vm713_vm2, %v7139_v33, %v17063_v38  ;;  %v17066_v38 = vld [vmem:[#allocation18_spill] sm:$0xff] }
 0x974   : > { %11216 = vrsqrt.f32 %v7016_v58  ;;  %v6868_v10 = vadd.f32 %v6867_v59, %v6866_v49  ;;  %v6873_v21 = vrot.slane %v6872_v63, 1 }
 0x975   : > { %v11211_v46 = vpop.eup %11210  ;;  %v6876_v29 = vadd.f32 %v6875_v4, %v6763_v56  ;;  %v6881_v0 = vrot.slane %v6764_v14, 4  ;;  %v7204_v17 = vsel %vm713_vm2, %v7140_v40, %v17064_v34  ;;  %v17065_v40 = vld [vmem:[#allocation20_spill] sm:$0xff] }
 0x976   : > { %v6985_v57 = vmul.f32 0.125, %v6868_v10  ;;  %v6874_v23 = vadd.f32 %v6873_v21, %v6872_v63  ;;  %v7243_v19 = vpack.c.bf16 %v7204_v17, %v7203_v3  ;;  %v7077_v51 = vmul.f32 %v11211_v46, %v15116_v16 }
 0x977   : > { %v11213_v15 = vpop.eup %11212  ;;  %v6877_v11 = vrot.slane %v6876_v29, 2  ;;  %v6882_v35 = vadd.f32 %v6881_v0, %v6764_v14  ;;  %v6707_v25 = vpop.xlane.xlu1 %6706 }
 0x978   : > { %v7017_v62 = vadd.f32 1e-05, %v6985_v57  ;;  %v6986_v28 = vmul.f32 0.125, %v6874_v23  ;;  %v6765_v54 = vmul.f32 0.015625, %v6707_v25  ;;  %10615 = vmatprep.mubr.msk.bf16.mxu0 %vm7296_vm8, %v7243_v19  ;;  %v7078_v36 = vmul.f32 %v11213_v15, %v15121_v60 }
 0x979   : > { %v6878_v39 = vadd.f32 %v6877_v11, %v6876_v29  ;;  %v6883_v7 = vrot.slane %v6882_v35, 2  ;;  %v6710_v20 = vpop.xlane.xlu0 %6709  ;;  %v7109_v26 = vmul.f32 %v7077_v51, %v15268_v1 }
 0x97a   : > { %11218 = vrsqrt.f32 %v7017_v62  ;;  %v7018_v32 = vadd.f32 1e-05, %v6986_v28  ;;  %v6887_v48 = vrot.slane %v6765_v54, 4  ;;  %v6766_v16 = vmul.f32 0.015625, %v6710_v20 }
 0x97b   : > { %v6879_v31 = vrot.slane %v6878_v39, 1  ;;  %v6884_v49 = vadd.f32 %v6883_v7, %v6882_v35  ;;  %v7110_v2 = vmul.f32 %v7078_v36, %v15268_v1  ;;  %v7141_v56 = vadd.f32 %v7109_v26, %v15274_v55 }
 0x97c   : > { %v11215_v5 = vpop.eup %11214  ;;  %11220 = vrsqrt.f32 %v7018_v32  ;;  %v6888_v8 = vadd.f32 %v6887_v48, %v6765_v54  ;;  %v6893_v33 = vrot.slane %v6766_v16, 4 }
 0x97d   : > { %v6880_v60 = vadd.f32 %v6879_v31, %v6878_v39  ;;  %v6885_v58 = vrot.slane %v6884_v49, 1  ;;  %v7142_v59 = vadd.f32 %v7110_v2, %v15274_v55  ;;  %v7205_v10 = vsel %vm713_vm2, %v7141_v56, %v17065_v40 }
 0x97e   : > { %v11217_v63 = vpop.eup %11216  ;;  %v6889_v4 = vrot.slane %v6888_v8, 2  ;;  %v6894_v14 = vadd.f32 %v6893_v33, %v6766_v16  ;;  %v7079_v21 = vmul.f32 %v11215_v5, %v15128_v61  ;;  %v17067_v16 = vld [vmem:[#allocation27_spill] sm:$0xff] }
 0x97f   : > { %v6987_v46 = vmul.f32 0.125, %v6880_v60  ;;  %v6886_v29 = vadd.f32 %v6885_v58, %v6884_v49  ;;  %v6713_v0 = vpop.xlane.xlu1 %6712  ;;  %v7206_v3 = vsel %vm713_vm2, %v7142_v59, %v17066_v38  ;;  %v7080_v34 = vmul.f32 %v11217_v63, %v15133_v37  ;;  %v17068_v49 = vld [vmem:[#allocation25_spill] sm:$0xff] }
 0x980   : > { %v6890_v17 = vadd.f32 %v6889_v4, %v6888_v8  ;;  %v6895_v57 = vrot.slane %v6894_v14, 2  ;;  %v6767_v23 = vmul.f32 0.015625, %v6713_v0  ;;  %v7244_v19 = vpack.c.bf16 %v7206_v3, %v7205_v10 }
 0x981   : > { %v7019_v51 = vadd.f32 1e-05, %v6987_v46  ;;  %v6988_v15 = vmul.f32 0.125, %v6886_v29  ;;  %v6716_v11 = vpop.xlane.xlu0 %6715  ;;  %v7111_v35 = vmul.f32 %v7079_v21, %v15268_v1  ;;  %v7112_v25 = vmul.f32 %v7080_v34, %v15268_v1 }
 0x982   : > { %v6891_v61 = vrot.slane %v6890_v17, 1  ;;  %v6896_v62 = vadd.f32 %v6895_v57, %v6894_v14  ;;  %v6899_v28 = vrot.slane %v6767_v23, 4  ;;  %10616 = vmatmul.mubr.msk.bf16.gmra.mrb[188].mxu0 %vm7296_vm8, %v7244_v19  ;;  %v6768_v54 = vmul.f32 0.015625, %v6716_v11 }
 0x983   : > { %11222 = vrsqrt.f32 %v7019_v51  ;;  %v7020_v36 = vadd.f32 1e-05, %v6988_v15  ;;  %v7143_v37 = vadd.f32 %v7111_v35, %v15274_v55  ;;  %v7144_v39 = vadd.f32 %v7112_v25, %v15274_v55  ;;  %v17069_v25 = vld [vmem:[#allocation24_spill] sm:$0xff] }
 0x984   : > { %v11219_v7 = vpop.eup %11218  ;;  %v6892_v20 = vadd.f32 %v6891_v61, %v6890_v17  ;;  %v6897_v26 = vrot.slane %v6896_v62, 1  ;;  %v6900_v32 = vadd.f32 %v6899_v28, %v6767_v23  ;;  %v6905_v48 = vrot.slane %v6768_v54, 4 }
 0x985   : > { %11224 = vrsqrt.f32 %v7020_v36  ;;  %v7207_v31 = vsel %vm713_vm2, %v7143_v37, %v17067_v16  ;;  %v7208_v2 = vsel %vm713_vm2, %v7144_v39, %v17068_v49  ;;  %v7081_v56 = vmul.f32 %v11219_v7, %v15140_v53 }
 0x986   : > { %v11221_v5 = vpop.eup %11220  ;;  %v6989_v8 = vmul.f32 0.125, %v6892_v20  ;;  %v6898_v33 = vadd.f32 %v6897_v26, %v6896_v62  ;;  %v6901_v60 = vrot.slane %v6900_v32, 2  ;;  %v6906_v58 = vadd.f32 %v6905_v48, %v6768_v54  ;;  %v17070_v62 = vld [vmem:[#allocation23_spill] sm:$0xff] }
 0x987   : > { %v6719_v59 = vpop.xlane.xlu1 %6718  ;;  %v7245_v63 = vpack.c.bf16 %v7208_v2, %v7207_v31  ;;  %v7082_v4 = vmul.f32 %v11221_v5, %v15145_v27  ;;  %v7113_v14 = vmul.f32 %v7081_v56, %v15268_v1 }
 0x988   : > { %v7021_v40 = vadd.f32 1e-05, %v6989_v8  ;;  %v6990_v10 = vmul.f32 0.125, %v6898_v33  ;;  %v6902_v21 = vadd.f32 %v6901_v60, %v6900_v32  ;;  %v6907_v46 = vrot.slane %v6906_v58, 2 }
 0x989   : > { %v6769_v29 = vmul.f32 0.015625, %v6719_v59  ;;  %10619 = vmatprep.mubr.msk.bf16.mxu0 %vm7296_vm8, %v7245_v63  ;;  %v6722_v0 = vpop.xlane.xlu0 %6721  ;;  %v7114_v53 = vmul.f32 %v7082_v4, %v15268_v1  ;;  %v7145_v38 = vadd.f32 %v7113_v14, %v15274_v55 }
 0x98a   : > { %11226 = vrsqrt.f32 %v7021_v40  ;;  %v7022_v3 = vadd.f32 1e-05, %v6990_v10  ;;  %v6903_v34 = vrot.slane %v6902_v21, 1  ;;  %v6908_v17 = vadd.f32 %v6907_v46, %v6906_v58 }
 0x98b   : > { %v6911_v57 = vrot.slane %v6769_v29, 4  ;;  %v6770_v27 = vmul.f32 0.015625, %v6722_v0  ;;  %v7146_v23 = vadd.f32 %v7114_v53, %v15274_v55  ;;  %v7209_v61 = vsel %vm713_vm2, %v7145_v38, %v17069_v25  ;;  %v17071_v38 = vld [vmem:[#allocation10_spill] sm:$0xff] }
 0x98c   : > { %11228 = vrsqrt.f32 %v7022_v3  ;;  %v6904_v19 = vadd.f32 %v6903_v34, %v6902_v21  ;;  %v6909_v51 = vrot.slane %v6908_v17, 1 }
 0x98d   : > { %v11223_v15 = vpop.eup %11222  ;;  %v6912_v11 = vadd.f32 %v6911_v57, %v6769_v29  ;;  %v6917_v35 = vrot.slane %v6770_v27, 4  ;;  %v7210_v28 = vsel %vm713_vm2, %v7146_v23, %v17070_v62  ;;  %v17072_v23 = vld [vmem:[#allocation29_spill] sm:$0xff] }
 0x98e   : > { %v6991_v54 = vmul.f32 0.125, %v6904_v19  ;;  %v6910_v36 = vadd.f32 %v6909_v51, %v6908_v17  ;;  %v7246_v37 = vpack.c.bf16 %v7210_v28, %v7209_v61  ;;  %v7083_v39 = vmul.f32 %v11223_v15, %v15152_v18 }
 0x98f   : > { %v11225_v7 = vpop.eup %11224  ;;  %v6913_v20 = vrot.slane %v6912_v11, 2  ;;  %v6918_v26 = vadd.f32 %v6917_v35, %v6770_v27  ;;  %v6725_v32 = vpop.xlane.xlu1 %6724 }
 0x990   : > { %v7023_v48 = vadd.f32 1e-05, %v6991_v54  ;;  %v6992_v16 = vmul.f32 0.125, %v6910_v36  ;;  %v6771_v31 = vmul.f32 0.015625, %v6725_v32  ;;  %10620 = vmatmul.mubr.msk.bf16.gmra.mrb[192].mxu0 %vm7296_vm8, %v7246_v37  ;;  %v7084_v49 = vmul.f32 %v11225_v7, %v15163_v50 }
 0x991   : > { %v6914_v2 = vadd.f32 %v6913_v20, %v6912_v11  ;;  %v6919_v56 = vrot.slane %v6918_v26, 2  ;;  %v6728_v5 = vpop.xlane.xlu0 %6727  ;;  %v7115_v8 = vmul.f32 %v7083_v39, %v15268_v1 }
 0x992   : > { %11230 = vrsqrt.f32 %v7023_v48  ;;  %v7024_v33 = vadd.f32 1e-05, %v6992_v16  ;;  %v6923_v60 = vrot.slane %v6771_v31, 4  ;;  %v6772_v18 = vmul.f32 0.015625, %v6728_v5  ;;  %v17074_v5 = vld [vmem:[#allocation26_spill] sm:$0xff] }
 0x993   : > { %v6915_v58 = vrot.slane %v6914_v2, 1  ;;  %v6920_v59 = vadd.f32 %v6919_v56, %v6918_v26  ;;  %v7116_v63 = vmul.f32 %v7084_v49, %v15268_v1  ;;  %v7147_v4 = vadd.f32 %v7115_v8, %v15274_v55 }
 0x994   : > { %v11227_v14 = vpop.eup %11226  ;;  %11232 = vrsqrt.f32 %v7024_v33  ;;  %v6924_v40 = vadd.f32 %v6923_v60, %v6771_v31  ;;  %v6929_v10 = vrot.slane %v6772_v18, 4 }
 0x995   : > { %v6916_v50 = vadd.f32 %v6915_v58, %v6914_v2  ;;  %v6921_v21 = vrot.slane %v6920_v59, 1  ;;  %v7148_v46 = vadd.f32 %v7116_v63, %v15274_v55  ;;  %v7211_v3 = vsel %vm713_vm2, %v7147_v4, %v17071_v38  ;;  %v17073_v2 = vld [vmem:[#allocation28_spill] sm:$0xff] }
 0x996   : > { %v11229_v29 = vpop.eup %11228  ;;  %v6925_v0 = vrot.slane %v6924_v40, 2  ;;  %v6930_v53 = vadd.f32 %v6929_v10, %v6772_v18  ;;  %v7085_v34 = vmul.f32 %v11227_v14, %v15170_v9 }
 0x997   : > { %v6993_v17 = vmul.f32 0.125, %v6916_v50  ;;  %v6922_v57 = vadd.f32 %v6921_v21, %v6920_v59  ;;  %v6731_v27 = vpop.xlane.xlu1 %6730  ;;  %v7212_v19 = vsel %vm713_vm2, %v7148_v46, %v17072_v23  ;;  %v7086_v51 = vmul.f32 %v11229_v29, %v15181_v47 }
 0x998   : > { %v6926_v15 = vadd.f32 %v6925_v0, %v6924_v40  ;;  %v6931_v11 = vrot.slane %v6930_v53, 2  ;;  %v6773_v35 = vmul.f32 0.015625, %v6731_v27  ;;  %v7247_v25 = vpack.c.bf16 %v7212_v19, %v7211_v3 }
 0x999   : > { %v7025_v61 = vadd.f32 1e-05, %v6993_v17  ;;  %v6994_v62 = vmul.f32 0.125, %v6922_v57  ;;  %v6734_v28 = vpop.xlane.xlu0 %6733  ;;  %v7117_v54 = vmul.f32 %v7085_v34, %v15268_v1  ;;  %v7118_v36 = vmul.f32 %v7086_v51, %v15268_v1 }
 0x99a   : > { %v6927_v9 = vrot.slane %v6926_v15, 1  ;;  %v6932_v37 = vadd.f32 %v6931_v11, %v6930_v53  ;;  %v6935_v39 = vrot.slane %v6773_v35, 4  ;;  %10623 = vmatprep.mubr.msk.bf16.mxu0 %vm7296_vm8, %v7247_v25  ;;  %v6774_v7 = vmul.f32 0.015625, %v6734_v28  ;;  %v17076_v28 = vld [vmem:[#allocation32_spill] sm:$0xff] }
 0x99b   : > { %11234 = vrsqrt.f32 %v7025_v61  ;;  %v7026_v20 = vadd.f32 1e-05, %v6994_v62  ;;  %v7149_v47 = vadd.f32 %v7117_v54, %v15274_v55  ;;  %v7150_v26 = vadd.f32 %v7118_v36, %v15274_v55  ;;  %v17075_v61 = vld [vmem:[#allocation34_spill] sm:$0xff] }
 0x99c   : > { %v11231_v32 = vpop.eup %11230  ;;  %v6928_v48 = vadd.f32 %v6927_v9, %v6926_v15  ;;  %v6933_v16 = vrot.slane %v6932_v37, 1  ;;  %v6936_v31 = vadd.f32 %v6935_v39, %v6773_v35  ;;  %v6941_v49 = vrot.slane %v6774_v7, 4 }
 0x99d   : > { %11236 = vrsqrt.f32 %v7026_v20  ;;  %v7213_v56 = vsel %vm713_vm2, %v7149_v47, %v17073_v2  ;;  %v7214_v8 = vsel %vm713_vm2, %v7150_v26, %v17074_v5  ;;  %v7087_v33 = vmul.f32 %v11231_v32, %v15188_v22 }
 0x99e   : > { %v11233_v60 = vpop.eup %11232  ;;  %v6995_v18 = vmul.f32 0.125, %v6928_v48  ;;  %v6934_v58 = vadd.f32 %v6933_v16, %v6932_v37  ;;  %v6937_v59 = vrot.slane %v6936_v31, 2  ;;  %v6942_v63 = vadd.f32 %v6941_v49, %v6774_v7  ;;  %v6737_v4 = vpop.xlane.xlu1 %6736 }
 0x99f   : > { %v6775_v14 = vmul.f32 0.015625, %v6737_v4  ;;  %v7248_v40 = vpack.c.bf16 %v7214_v8, %v7213_v56  ;;  %v7088_v10 = vmul.f32 %v11233_v60, %v15199_v30  ;;  %v7119_v50 = vmul.f32 %v7087_v33, %v15268_v1 }
 0x9a0   : > { %v7027_v21 = vadd.f32 1e-05, %v6995_v18  ;;  %v6996_v46 = vmul.f32 0.125, %v6934_v58  ;;  %v6938_v29 = vadd.f32 %v6937_v59, %v6936_v31  ;;  %v6943_v0 = vrot.slane %v6942_v63, 2  ;;  %v6740_v53 = vpop.xlane.xlu0 %6739 }
 0x9a1   : > { %v6947_v38 = vrot.slane %v6775_v14, 4  ;;  %10624 = vmatmul.mubr.msk.bf16.gmra.mrb[196].mxu0 %vm7296_vm8, %v7248_v40  ;;  %v6776_v22 = vmul.f32 0.015625, %v6740_v53  ;;  %v7120_v3 = vmul.f32 %v7088_v10, %v15268_v1  ;;  %v7151_v34 = vadd.f32 %v7119_v50, %v15274_v55  ;;  %v17078_v53 = vld [vmem:[#allocation31_spill] sm:$0xff] }
 0x9a2   : > { %11238 = vrsqrt.f32 %v7027_v21  ;;  %v7028_v17 = vadd.f32 1e-05, %v6996_v46  ;;  %v6939_v57 = vrot.slane %v6938_v29, 1  ;;  %v6944_v27 = vadd.f32 %v6943_v0, %v6942_v63 }
 0x9a3   : > { %v6948_v30 = vadd.f32 %v6947_v38, %v6775_v14  ;;  %v6953_v23 = vrot.slane %v6776_v22, 4  ;;  %v7152_v19 = vadd.f32 %v7120_v3, %v15274_v55  ;;  %v7215_v62 = vsel %vm713_vm2, %v7151_v34, %v17075_v61 }
 0x9a4   : > { %11240 = vrsqrt.f32 %v7028_v17  ;;  %v6940_v51 = vadd.f32 %v6939_v57, %v6938_v29  ;;  %v6945_v15 = vrot.slane %v6944_v27, 1  ;;  %v17077_v29 = vld [vmem:[#allocation30_spill] sm:$0xff] }
 0x9a5   : > { %v11235_v11 = vpop.eup %11234  ;;  %v6949_v35 = vrot.slane %v6948_v30, 2  ;;  %v6954_v25 = vadd.f32 %v6953_v23, %v6776_v22  ;;  %v7216_v54 = vsel %vm713_vm2, %v7152_v19, %v17076_v28 }
 0x9a6   : > { %v6997_v36 = vmul.f32 0.125, %v6940_v51  ;;  %v6946_v9 = vadd.f32 %v6945_v15, %v6944_v27  ;;  %v6743_v37 = vpop.xlane.xlu1 %6742  ;;  %v7249_v39 = vpack.c.bf16 %v7216_v54, %v7215_v62  ;;  %v7089_v7 = vmul.f32 %v11235_v11, %v15206_v41 }
 0x9a7   : > { %v11237_v20 = vpop.eup %11236  ;;  %v6950_v47 = vadd.f32 %v6949_v35, %v6948_v30  ;;  %v6955_v26 = vrot.slane %v6954_v25, 2  ;;  %v6777_v32 = vmul.f32 0.015625, %v6743_v37 }
 0x9a8   : > { %v7029_v48 = vadd.f32 1e-05, %v6997_v36  ;;  %v6998_v16 = vmul.f32 0.125, %v6946_v9  ;;  %10627 = vmatprep.mubr.msk.bf16.mxu0 %vm7296_vm8, %v7249_v39  ;;  %v6746_v31 = vpop.xlane.xlu0 %6745  ;;  %v7090_v49 = vmul.f32 %v11237_v20, %v15211_v6  ;;  %v7121_v2 = vmul.f32 %v7089_v7, %v15268_v1  ;;  %v17079_v9 = vld [vmem:[#allocation3_spill] sm:$0xff]  ;;  %v17080_v39 = vld [vmem:[#allocation36_spill] sm:$0xff] }
 0x9a9   : > { %v6951_v56 = vrot.slane %v6950_v47, 1  ;;  %v6956_v5 = vadd.f32 %v6955_v26, %v6954_v25  ;;  %v6959_v8 = vrot.slane %v6777_v32, 4  ;;  %v6778_v33 = vmul.f32 0.015625, %v6746_v31 }
 0x9aa   : > { %11242 = vrsqrt.f32 %v7029_v48  ;;  %v7030_v60 = vadd.f32 1e-05, %v6998_v16  ;;  %v7122_v41 = vmul.f32 %v7090_v49, %v15268_v1  ;;  %v7153_v18 = vadd.f32 %v7121_v2, %v15274_v55 }
 0x9ab   : > { %v6952_v58 = vadd.f32 %v6951_v56, %v6950_v47  ;;  %v6957_v59 = vrot.slane %v6956_v5, 1  ;;  %v6960_v63 = vadd.f32 %v6959_v8, %v6777_v32  ;;  %v6965_v4 = vrot.slane %v6778_v33, 4  ;;  %v17081_v8 = vld [vmem:[#allocation35_spill] sm:$0xff] }
 0x9ac   : > { %v11239_v14 = vpop.eup %11238  ;;  %11244 = vrsqrt.f32 %v7030_v60  ;;  %v7154_v6 = vadd.f32 %v7122_v41, %v15274_v55  ;;  %v7217_v0 = vsel %vm713_vm2, %v7153_v18, %v17077_v29  ;;  %v11058_v41 = vld [vmem:[%s16413_s3 + $0xb0] sm:$0xff]  }
 0x9ad   : > { %v6999_v40 = vmul.f32 0.125, %v6952_v58  ;;  %v6958_v10 = vadd.f32 %v6957_v59, %v6956_v5  ;;  %v6961_v50 = vrot.slane %v6960_v63, 2  ;;  %v6966_v21 = vadd.f32 %v6965_v4, %v6778_v33  ;;  %v17082_v33 = vld [vmem:[#allocation33_spill] sm:$0xff]  ;;  %10639 = vmatprep.subr.bf16.mxu0 %v11058_v41 }
 0x9ae   : > { %v11241_v46 = vpop.eup %11240  ;;  %v7218_v38 = vsel %vm713_vm2, %v7154_v6, %v17078_v53  ;;  %v7091_v22 = vmul.f32 %v11239_v14, %v15218_v42  ;;  %10640 = vmatpush3.bf16.msra.mxu0 %v11058_v41 }
 0x9af   : > { %v7031_v3 = vadd.f32 1e-05, %v6999_v40  ;;  %v7000_v34 = vmul.f32 0.125, %v6958_v10  ;;  %v6962_v17 = vadd.f32 %v6961_v50, %v6960_v63  ;;  %v6967_v57 = vrot.slane %v6966_v21, 2  ;;  %v17083_v40 = vld [vmem:[#allocation4_spill] sm:$0xff]  ;;  %v17084_v10 = vld [vmem:[#allocation5_spill] sm:$0xff] }
 0x9b0   : > { %v7250_v27 = vpack.c.bf16 %v7218_v38, %v7217_v0  ;;  %v7092_v30 = vmul.f32 %v11241_v46, %v15223_v13  ;;  %v7123_v23 = vmul.f32 %v7091_v22, %v15268_v1 }
 0x9b1   : > { %11246 = vrsqrt.f32 %v7031_v3  ;;  %v7032_v19 = vadd.f32 1e-05, %v7000_v34  ;;  %v6963_v51 = vrot.slane %v6962_v17, 1  ;;  %v6968_v15 = vadd.f32 %v6967_v57, %v6966_v21  ;;  %v17085_v34 = vld [vmem:[#allocation2_spill] sm:$0xff]  ;;  %v17086_v57 = vld [vmem:[#allocation37_spill] sm:$0xff] }
 0x9b2   : > { %10628 = vmatmul.mubr.msk.bf16.gmra.mrb[200].mxu0 %vm7296_vm8, %v7250_v27  ;;  %v7124_v11 = vmul.f32 %v7092_v30, %v15268_v1  ;;  %v7155_v35 = vadd.f32 %v7123_v23, %v15274_v55 }
 0x9b3   : > { %11248 = vrsqrt.f32 %v7032_v19  ;;  %v6964_v42 = vadd.f32 %v6963_v51, %v6962_v17  ;;  %v6969_v25 = vrot.slane %v6968_v15, 1 }
 0x9b4   : > { %v11243_v61 = vpop.eup %11242  ;;  %v7156_v62 = vadd.f32 %v7124_v11, %v15274_v55  ;;  %v7219_v37 = vsel %vm713_vm2, %v7155_v35, %v17079_v9 }
 0x9b5   : > { %v7001_v28 = vmul.f32 0.125, %v6964_v42  ;;  %v6970_v13 = vadd.f32 %v6969_v25, %v6968_v15  ;;  %v7093_v54 = vmul.f32 %v11243_v61, %v15230_v52 }
 0x9b6   : > { %v11245_v36 = vpop.eup %11244  ;;  %v7220_v7 = vsel %vm713_vm2, %v7156_v62, %v17080_v39 }
 0x9b7   : > { %v7033_v20 = vadd.f32 1e-05, %v7001_v28  ;;  %v7002_v47 = vmul.f32 0.125, %v6970_v13  ;;  %v7251_v26 = vpack.c.bf16 %v7220_v7, %v7219_v37  ;;  %v7094_v32 = vmul.f32 %v11245_v36, %v15235_v43 }
 0x9b8   : > { %v7125_v48 = vmul.f32 %v7093_v54, %v15268_v1 }
 0x9b9   : > { %11250 = vrsqrt.f32 %v7033_v20  ;;  %v7034_v16 = vadd.f32 1e-05, %v7002_v47  ;;  %10631 = vmatprep.mubr.msk.bf16.mxu0 %vm7296_vm8, %v7251_v26  ;;  %v7126_v52 = vmul.f32 %v7094_v32, %v15268_v1 }
 0x9ba   : > { %v7157_v31 = vadd.f32 %v7125_v48, %v15274_v55 }
 0x9bb   : > { %v11247_v49 = vpop.eup %11246  ;;  %11252 = vrsqrt.f32 %v7034_v16  ;;  %v7158_v2 = vadd.f32 %v7126_v52, %v15274_v55 }
 0x9bc   : > { %v7095_v56 = vmul.f32 %v11247_v49, %v15242_v24  ;;  %v7221_v43 = vsel %vm713_vm2, %v7157_v31, %v17081_v8  ;;  %v11059_v24 = vld [vmem:[%s16413_s3 + $0xb8] sm:$0xff]  }
 0x9bd   : > { %v11249_v5 = vpop.eup %11248  ;;  %v7222_v60 = vsel %vm713_vm2, %v7158_v2, %v17082_v33  ;;  %10641 = vmatprep.subr.bf16.mxu0 %v11059_v24 }
 0x9be   : > { %v7252_v18 = vpack.c.bf16 %v7222_v60, %v7221_v43  ;;  %v7096_v58 = vmul.f32 %v11249_v5, %v15247_v12  ;;  %v7127_v59 = vmul.f32 %v7095_v56, %v15268_v1  ;;  %10642 = vmatpush3.bf16.msra.mxu0 %v11059_v24 }
 0x9c0   : > { %10632 = vmatmul.mubr.msk.bf16.gmra.mrb[204].mxu0 %vm7296_vm8, %v7252_v18  ;;  %v7128_v63 = vmul.f32 %v7096_v58, %v15268_v1  ;;  %v7159_v4 = vadd.f32 %v7127_v59, %v15274_v55 }
 0x9c2   : > { %v7160_v14 = vadd.f32 %v7128_v63, %v15274_v55  ;;  %v7223_v12 = vsel %vm713_vm2, %v7159_v4, %v17083_v40 }
 0x9c3   : > { %v11251_v6 = vpop.eup %11250 }
 0x9c4   : > { %v7224_v50 = vsel %vm713_vm2, %v7160_v14, %v17084_v10  ;;  %v7097_v21 = vmul.f32 %v11251_v6, %v15254_v44 }
 0x9c5   : > { %v11253_v46 = vpop.eup %11252  ;;  %v7253_v29 = vpack.c.bf16 %v7224_v50, %v7223_v12 }
 0x9c6   : > { %v7098_v0 = vmul.f32 %v11253_v46, %v15259_v45  ;;  %v7129_v53 = vmul.f32 %v7097_v21, %v15268_v1  ;;  %v15460_v45 = vld [vmem:[%s16414_s4 + $0x60] ss:$0 sm:$0xff] }
 0x9c7   : > { %10635 = vmatprep.mubr.msk.bf16.mxu0 %vm7296_vm8, %v7253_v29 }
 0x9c8   : > { %v7130_v38 = vmul.f32 %v7098_v0, %v15268_v1  ;;  %v7161_v22 = vadd.f32 %v7129_v53, %v15274_v55 }
 0x9ca   : > { %v7162_v3 = vadd.f32 %v7130_v38, %v15274_v55  ;;  %v7225_v17 = vsel %vm713_vm2, %v7161_v22, %v17085_v34 }
 0x9cc   : > { %v7226_v44 = vsel %vm713_vm2, %v7162_v3, %v17086_v57 }
 0x9cd   : > { %v7254_v27 = vpack.c.bf16 %v7226_v44, %v7225_v17 }
 0x9cf   : > { %10636 = vmatmul.mubr.msk.bf16.gmra.mrb[208].mxu0 %vm7296_vm8, %v7254_v27 }
 0xa35   : > { %v10609_v30 = vpop.f32.mrb[180].mxu0 }
 0xa36   : > { %v7379_v1 = vpop.f32.mrb[181].mxu0  ;;  %v15466_v19 = vadd.f32 %v10609_v30, %v15460_v45 }
 0xa37   : > { %v15463_v23 = vadd.f32 %v15460_v45, %v7379_v1  ;;  %v10610_v55 = vpop.f32.mrb[182].mxu0 }
 0xa38   : > { %v15469_v51 = vadd.f32 %v10610_v55, %v15460_v45  ;;  %v7382_v15 = vpop.f32.mrb[183].mxu0  ;;  %v7508_v61 = vmax.f32 %v15466_v19, 0.0 }
 0xa39   : > { %v15472_v11 = vadd.f32 %v15460_v45, %v7382_v15  ;;  %v7506_v42 = vmax.f32 %v15463_v23, 0.0 }
 0xa3a   : > { %v7509_v35 = vmax.f32 %v15469_v51, 0.0 }
 0xa3b   : > { %v7507_v25 = vmax.f32 %v15472_v11, 0.0 }
 0xa3c   : > { %v7543_v28 = vpack.c.bf16 %v7509_v35, %v7508_v61 }
 0xa3d   : > { %v7542_v62 = vpack.c.bf16 %v7507_v25, %v7506_v42 }
 0xa3f   : > { %10643 = vmatprep.mubr.msk.bf16.mxu0 %vm2581_vm7, %v7542_v62 }
 0xa40   : > { %10644 = vmatmul.mubr.msk.bf16.vlgmr.msra.gmra.mrb[212].mxu0 %vm2581_vm7, %v7543_v28 }
 0xa44   : > { %v10613_v13 = vpop.f32.mrb[184].mxu0 }
 0xa45   : > { %v7395_v54 = vpop.f32.mrb[185].mxu0  ;;  %v15484_v37 = vadd.f32 %v10613_v13, %v15460_v45 }
 0xa46   : > { %v15481_v36 = vadd.f32 %v15460_v45, %v7395_v54  ;;  %v10614_v9 = vpop.f32.mrb[186].mxu0 }
 0xa47   : > { %17087 = vst [vmem:[#allocation118_spill] sm:$0xff] %v15484_v37  ;;  %v15487_v39 = vadd.f32 %v10614_v9, %v15460_v45  ;;  %v7398_v7 = vpop.f32.mrb[187].mxu0  ;;  %v7512_v48 = vmax.f32 %v15484_v37, 0.0 }
 0xa48   : > { %v15490_v20 = vadd.f32 %v15460_v45, %v7398_v7  ;;  %v7510_v26 = vmax.f32 %v15481_v36, 0.0 }
 0xa49   : > { %17088 = vst [vmem:[#allocation120_spill] sm:$0xff] %v15487_v39  ;;  %v7513_v47 = vmax.f32 %v15487_v39, 0.0 }
 0xa4a   : > { %17089 = vst [vmem:[#allocation119_spill] sm:$0xff] %v15490_v20  ;;  %v7511_v32 = vmax.f32 %v15490_v20, 0.0 }
 0xa4b   : > { %v7545_v52 = vpack.c.bf16 %v7513_v47, %v7512_v48 }
 0xa4c   : > { %v7544_v16 = vpack.c.bf16 %v7511_v32, %v7510_v26 }
 0xa4e   : > { %10647 = vmatprep.mubr.msk.bf16.mxu0 %vm2581_vm7, %v7544_v16 }
 0xa4f   : > { %10648 = vmatmul.mubr.msk.bf16.gmra.mrb[216].mxu0 %vm2581_vm7, %v7545_v52 }
 0xa55   : > { %v10617_v31 = vpop.f32.mrb[188].mxu0 }
 0xa56   : > { %v7411_v49 = vpop.f32.mrb[189].mxu0  ;;  %v15502_v5 = vadd.f32 %v10617_v31, %v15460_v45 }
 0xa57   : > { %v15499_v2 = vadd.f32 %v15460_v45, %v7411_v49  ;;  %v10618_v56 = vpop.f32.mrb[190].mxu0 }
 0xa58   : > { %17091 = vst [vmem:[#allocation124_spill] sm:$0xff] %v15502_v5  ;;  %v15505_v8 = vadd.f32 %v10618_v56, %v15460_v45  ;;  %v7414_v43 = vpop.f32.mrb[191].mxu0  ;;  %v7516_v58 = vmax.f32 %v15502_v5, 0.0 }
 0xa59   : > { %17090 = vst [vmem:[#allocation123_spill] sm:$0xff] %v15499_v2  ;;  %v15508_v33 = vadd.f32 %v15460_v45, %v7414_v43  ;;  %v7514_v41 = vmax.f32 %v15499_v2, 0.0 }
 0xa5a   : > { %17092 = vst [vmem:[#allocation125_spill] sm:$0xff] %v15505_v8  ;;  %v7517_v60 = vmax.f32 %v15505_v8, 0.0 }
 0xa5b   : > { %17093 = vst [vmem:[#allocation126_spill] sm:$0xff] %v15508_v33  ;;  %v7515_v18 = vmax.f32 %v15508_v33, 0.0 }
 0xa5c   : > { %v7547_v24 = vpack.c.bf16 %v7517_v60, %v7516_v58 }
 0xa5d   : > { %v7546_v59 = vpack.c.bf16 %v7515_v18, %v7514_v41 }
 0xa5f   : > { %10651 = vmatprep.mubr.msk.bf16.mxu0 %vm2581_vm7, %v7546_v59 }
 0xa60   : > { %10652 = vmatmul.mubr.msk.bf16.gmra.mrb[220].mxu0 %vm2581_vm7, %v7547_v24 }
 0xa63   : > { %v10621_v63 = vpop.f32.mrb[192].mxu0 }
 0xa64   : > { %v7427_v4 = vpop.f32.mrb[193].mxu0  ;;  %v15520_v40 = vadd.f32 %v10621_v63, %v15460_v45 }
 0xa65   : > { %v15517_v14 = vadd.f32 %v15460_v45, %v7427_v4  ;;  %v10622_v6 = vpop.f32.mrb[194].mxu0 }
 0xa66   : > { %17095 = vst [vmem:[#allocation128_spill] sm:$0xff] %v15520_v40  ;;  %v15523_v12 = vadd.f32 %v10622_v6, %v15460_v45  ;;  %v7430_v10 = vpop.f32.mrb[195].mxu0  ;;  %v7520_v0 = vmax.f32 %v15520_v40, 0.0 }
 0xa67   : > { %17094 = vst [vmem:[#allocation127_spill] sm:$0xff] %v15517_v14  ;;  %v15526_v50 = vadd.f32 %v15460_v45, %v7430_v10  ;;  %v7518_v46 = vmax.f32 %v15517_v14, 0.0 }
 0xa68   : > { %17096 = vst [vmem:[#allocation129_spill] sm:$0xff] %v15523_v12  ;;  %v7521_v21 = vmax.f32 %v15523_v12, 0.0 }
 0xa69   : > { %17097 = vst [vmem:[#allocation6_spill] sm:$0xff] %v15526_v50  ;;  %v7519_v29 = vmax.f32 %v15526_v50, 0.0 }
 0xa6a   : > { %v7549_v38 = vpack.c.bf16 %v7521_v21, %v7520_v0 }
 0xa6b   : > { %v7548_v53 = vpack.c.bf16 %v7519_v29, %v7518_v46 }
 0xa6d   : > { %10655 = vmatprep.mubr.msk.bf16.mxu0 %vm2581_vm7, %v7548_v53 }
 0xa6e   : > { %10656 = vmatmul.mubr.msk.bf16.gmra.mrb[224].mxu0 %vm2581_vm7, %v7549_v38 }
 0xa74   : > { %v10625_v22 = vpop.f32.mrb[196].mxu0 }
 0xa75   : > { %v7443_v3 = vpop.f32.mrb[197].mxu0  ;;  %v15538_v57 = vadd.f32 %v10625_v22, %v15460_v45 }
 0xa76   : > { %v15535_v34 = vadd.f32 %v15460_v45, %v7443_v3  ;;  %v10626_v17 = vpop.f32.mrb[198].mxu0 }
 0xa77   : > { %17099 = vst [vmem:[#allocation9_spill] sm:$0xff] %v15538_v57  ;;  %v15541_v44 = vadd.f32 %v10626_v17, %v15460_v45  ;;  %v7446_v27 = vpop.f32.mrb[199].mxu0  ;;  %v7524_v35 = vmax.f32 %v15538_v57, 0.0 }
 0xa78   : > { %17098 = vst [vmem:[#allocation130_spill] sm:$0xff] %v15535_v34  ;;  %v15544_v30 = vadd.f32 %v15460_v45, %v7446_v27  ;;  %v7522_v55 = vmax.f32 %v15535_v34, 0.0 }
 0xa79   : > { %17100 = vst [vmem:[#allocation136_spill] sm:$0xff] %v15541_v44  ;;  %v7525_v1 = vmax.f32 %v15541_v44, 0.0 }
 0xa7a   : > { %17101 = vst [vmem:[#allocation131_spill] sm:$0xff] %v15544_v30  ;;  %v7523_v15 = vmax.f32 %v15544_v30, 0.0 }
 0xa7b   : > { %v7551_v25 = vpack.c.bf16 %v7525_v1, %v7524_v35 }
 0xa7c   : > { %v7550_v42 = vpack.c.bf16 %v7523_v15, %v7522_v55 }
 0xa7e   : > { %10659 = vmatprep.mubr.msk.bf16.mxu0 %vm2581_vm7, %v7550_v42 }
 0xa7f   : > { %10660 = vmatmul.mubr.msk.bf16.gmra.mrb[228].mxu0 %vm2581_vm7, %v7551_v25  ;;  %v15609_v25 = vld [vmem:[%s16414_s4 + $0x68] ss:$0 sm:$0xff] }
 0xa85   : > { %v10629_v61 = vpop.f32.mrb[200].mxu0 }
 0xa86   : > { %v7459_v62 = vpop.f32.mrb[201].mxu0  ;;  %v15556_v54 = vadd.f32 %v10629_v61, %v15460_v45 }
 0xa87   : > { %v15553_v28 = vadd.f32 %v15460_v45, %v7459_v62  ;;  %v10630_v13 = vpop.f32.mrb[202].mxu0 }
 0xa88   : > { %17103 = vst [vmem:[#allocation132_spill] sm:$0xff] %v15556_v54  ;;  %v15559_v9 = vadd.f32 %v10630_v13, %v15460_v45  ;;  %v7462_v7 = vpop.f32.mrb[203].mxu0  ;;  %v7528_v16 = vmax.f32 %v15556_v54, 0.0 }
 0xa89   : > { %17102 = vst [vmem:[#allocation99_spill] sm:$0xff] %v15553_v28  ;;  %v15562_v47 = vadd.f32 %v15460_v45, %v7462_v7  ;;  %v7526_v32 = vmax.f32 %v15553_v28, 0.0 }
 0xa8a   : > { %17104 = vst [vmem:[#allocation100_spill] sm:$0xff] %v15559_v9  ;;  %v7529_v26 = vmax.f32 %v15559_v9, 0.0 }
 0xa8b   : > { %17105 = vst [vmem:[#allocation133_spill] sm:$0xff] %v15562_v47  ;;  %v7527_v48 = vmax.f32 %v15562_v47, 0.0 }
 0xa8c   : > { %v7553_v31 = vpack.c.bf16 %v7529_v26, %v7528_v16 }
 0xa8d   : > { %v7552_v52 = vpack.c.bf16 %v7527_v48, %v7526_v32 }
 0xa8f   : > { %10663 = vmatprep.mubr.msk.bf16.mxu0 %vm2581_vm7, %v7552_v52 }
 0xa90   : > { %10664 = vmatmul.mubr.msk.bf16.gmra.mrb[232].mxu0 %vm2581_vm7, %v7553_v31 }
 0xa93   : > { %v10633_v49 = vpop.f32.mrb[204].mxu0 }
 0xa94   : > { %v7475_v56 = vpop.f32.mrb[205].mxu0  ;;  %v15574_v41 = vadd.f32 %v10633_v49, %v15460_v45 }
 0xa95   : > { %v15571_v43 = vadd.f32 %v15460_v45, %v7475_v56  ;;  %v10634_v60 = vpop.f32.mrb[206].mxu0 }
 0xa96   : > { %17107 = vst [vmem:[#allocation103_spill] sm:$0xff] %v15574_v41  ;;  %v15577_v18 = vadd.f32 %v10634_v60, %v15460_v45  ;;  %v7478_v58 = vpop.f32.mrb[207].mxu0  ;;  %v7532_v6 = vmax.f32 %v15574_v41, 0.0 }
 0xa97   : > { %17106 = vst [vmem:[#allocation38_spill] sm:$0xff] %v15571_v43  ;;  %v15580_v59 = vadd.f32 %v15460_v45, %v7478_v58  ;;  %v7530_v63 = vmax.f32 %v15571_v43, 0.0 }
 0xa98   : > { %17108 = vst [vmem:[#allocation39_spill] sm:$0xff] %v15577_v18  ;;  %v7533_v24 = vmax.f32 %v15577_v18, 0.0 }
 0xa99   : > { %17109 = vst [vmem:[#allocation40_spill] sm:$0xff] %v15580_v59  ;;  %v7531_v4 = vmax.f32 %v15580_v59, 0.0 }
 0xa9a   : > { %v7555_v21 = vpack.c.bf16 %v7533_v24, %v7532_v6 }
 0xa9b   : > { %v7554_v10 = vpack.c.bf16 %v7531_v4, %v7530_v63 }
 0xa9d   : > { %10667 = vmatprep.mubr.msk.bf16.mxu0 %vm2581_vm7, %v7554_v10 }
 0xa9e   : > { %10668 = vmatmul.mubr.msk.bf16.gmra.mrb[236].mxu0 %vm2581_vm7, %v7555_v21 }
 0xaa2   : > { %v10637_v46 = vpop.f32.mrb[208].mxu0 }
 0xaa3   : > { %v7491_v29 = vpop.f32.mrb[209].mxu0  ;;  %v15592_v38 = vadd.f32 %v10637_v46, %v15460_v45 }
 0xaa4   : > { %v15589_v0 = vadd.f32 %v15460_v45, %v7491_v29  ;;  %v10638_v53 = vpop.f32.mrb[210].mxu0 }
 0xaa5   : > { %17111 = vst [vmem:[#allocation108_spill] sm:$0xff] %v15592_v38  ;;  %v15595_v22 = vadd.f32 %v10638_v53, %v15460_v45  ;;  %v7494_v3 = vpop.f32.mrb[211].mxu0  ;;  %v7536_v15 = vmax.f32 %v15592_v38, 0.0 }
 0xaa6   : > { %17110 = vst [vmem:[#allocation104_spill] sm:$0xff] %v15589_v0  ;;  %v15598_v17 = vadd.f32 %v15460_v45, %v7494_v3  ;;  %v7534_v1 = vmax.f32 %v15589_v0, 0.0 }
 0xaa7   : > { %17112 = vst [vmem:[#allocation134_spill] sm:$0xff] %v15595_v22  ;;  %v7537_v27 = vmax.f32 %v15595_v22, 0.0 }
 0xaa8   : > { %17113 = vst [vmem:[#allocation7_spill] sm:$0xff] %v15598_v17  ;;  %v7535_v55 = vmax.f32 %v15598_v17, 0.0 }
 0xaa9   : > { %v7557_v42 = vpack.c.bf16 %v7537_v27, %v7536_v15 }
 0xaaa   : > { %v7556_v35 = vpack.c.bf16 %v7535_v55, %v7534_v1 }
 0xaac   : > { %10671 = vmatprep.mubr.msk.bf16.mxu0 %vm2581_vm7, %v7556_v35 }
 0xaad   : > { %10672 = vmatmul.mubr.msk.bf16.gmra.mrb[240].mxu0 %vm2581_vm7, %v7557_v42 }
 0xb13   : > { %v10645_v45 = vpop.f32.mrb[212].mxu0 }
 0xb14   : > { %v7657_v61 = vpop.f32.mrb[213].mxu0  ;;  %v15615_v26 = vadd.f32 %v10645_v45, %v15609_v25 }
 0xb15   : > { %v15612_v62 = vadd.f32 %v15609_v25, %v7657_v61  ;;  %v10646_v13 = vpop.f32.mrb[214].mxu0 }
 0xb16   : > { %v7660_v7 = vpop.f32.mrb[215].mxu0  ;;  %v15623_v16 = vadd.f32 %v10646_v13, %v15609_v25  ;;  %v7792_v31 = vsel %vm2581_vm7, %v15615_v26, 0.0 }
 0xb17   : > { %v15618_v32 = vadd.f32 %v15609_v25, %v7660_v7  ;;  %v7786_v48 = vsel %vm2581_vm7, %v15612_v62, 0.0 }
 0xb18   : > { %7787 = vadd.xlane.f32.xlu1 %v7786_v48  ;;  %v7795_v49 = vsel %vm2581_vm7, %v15623_v16, 0.0 }
 0xb19   : > { %v7789_v52 = vsel %vm2581_vm7, %v15618_v32, 0.0 }
 0xb1a   : > { %7790 = vadd.xlane.f32.xlu0 %v7789_v52 }
 0xb1c   : > { %7793 = vadd.xlane.f32.xlu1 %v7792_v31 }
 0xb1e   : > { %7796 = vadd.xlane.f32.xlu0 %v7795_v49 }
 0xb22   : > { %v10649_v56 = vpop.f32.mrb[216].mxu0 }
 0xb23   : > { %v7673_v60 = vpop.f32.mrb[217].mxu0  ;;  %v15635_v4 = vadd.f32 %v10649_v56, %v15609_v25 }
 0xb24   : > { %v15632_v58 = vadd.f32 %v15609_v25, %v7673_v60  ;;  %v10650_v24 = vpop.f32.mrb[218].mxu0 }
 0xb25   : > { %v7676_v63 = vpop.f32.mrb[219].mxu0  ;;  %v15643_v21 = vadd.f32 %v10650_v24, %v15609_v25  ;;  %v7804_v29 = vsel %vm2581_vm7, %v15635_v4, 0.0 }
 0xb26   : > { %v15638_v6 = vadd.f32 %v15609_v25, %v7676_v63  ;;  %v7798_v10 = vsel %vm2581_vm7, %v15632_v58, 0.0 }
 0xb27   : > { %7799 = vadd.xlane.f32.xlu1 %v7798_v10  ;;  %v7807_v53 = vsel %vm2581_vm7, %v15643_v21, 0.0 }
 0xb28   : > { %v7801_v46 = vsel %vm2581_vm7, %v15638_v6, 0.0 }
 0xb29   : > { %7802 = vadd.xlane.f32.xlu0 %v7801_v46 }
 0xb2b   : > { %7805 = vadd.xlane.f32.xlu1 %v7804_v29 }
 0xb2d   : > { %7808 = vadd.xlane.f32.xlu0 %v7807_v53 }
 0xb33   : > { %v10653_v3 = vpop.f32.mrb[220].mxu0 }
 0xb34   : > { %v7689_v27 = vpop.f32.mrb[221].mxu0  ;;  %v15655_v35 = vadd.f32 %v10653_v3, %v15609_v25 }
 0xb35   : > { %v15652_v1 = vadd.f32 %v15609_v25, %v7689_v27  ;;  %v10654_v55 = vpop.f32.mrb[222].mxu0 }
 0xb36   : > { %v7692_v15 = vpop.f32.mrb[223].mxu0  ;;  %v15663_v61 = vadd.f32 %v10654_v55, %v15609_v25  ;;  %v7816_v7 = vsel %vm2581_vm7, %v15655_v35, 0.0 }
 0xb37   : > { %v15658_v42 = vadd.f32 %v15609_v25, %v7692_v15  ;;  %v7810_v45 = vsel %vm2581_vm7, %v15652_v1, 0.0 }
 0xb38   : > { %7811 = vadd.xlane.f32.xlu1 %v7810_v45  ;;  %v7819_v48 = vsel %vm2581_vm7, %v15663_v61, 0.0 }
 0xb39   : > { %v7813_v13 = vsel %vm2581_vm7, %v15658_v42, 0.0 }
 0xb3a   : > { %7814 = vadd.xlane.f32.xlu0 %v7813_v13 }
 0xb3c   : > { %7817 = vadd.xlane.f32.xlu1 %v7816_v7 }
 0xb3e   : > { %7820 = vadd.xlane.f32.xlu0 %v7819_v48 }
 0xb41   : > { %v10657_v52 = vpop.f32.mrb[224].mxu0 }
 0xb42   : > { %v7705_v31 = vpop.f32.mrb[225].mxu0  ;;  %v15675_v24 = vadd.f32 %v10657_v52, %v15609_v25 }
 0xb43   : > { %v15672_v49 = vadd.f32 %v15609_v25, %v7705_v31  ;;  %v10658_v56 = vpop.f32.mrb[226].mxu0 }
 0xb44   : > { %v7708_v60 = vpop.f32.mrb[227].mxu0  ;;  %v15683_v46 = vadd.f32 %v10658_v56, %v15609_v25  ;;  %v7828_v53 = vsel %vm2581_vm7, %v15675_v24, 0.0 }
 0xb45   : > { %v15678_v63 = vadd.f32 %v15609_v25, %v7708_v60  ;;  %v7822_v10 = vsel %vm2581_vm7, %v15672_v49, 0.0 }
 0xb46   : > { %7823 = vadd.xlane.f32.xlu1 %v7822_v10  ;;  %v7831_v3 = vsel %vm2581_vm7, %v15683_v46, 0.0 }
 0xb47   : > { %v7825_v29 = vsel %vm2581_vm7, %v15678_v63, 0.0 }
 0xb48   : > { %7826 = vadd.xlane.f32.xlu0 %v7825_v29 }
 0xb4a   : > { %7829 = vadd.xlane.f32.xlu1 %v7828_v53 }
 0xb4c   : > { %7832 = vadd.xlane.f32.xlu0 %v7831_v3 }
 0xb52   : > { %v10661_v27 = vpop.f32.mrb[228].mxu0 }
 0xb53   : > { %v7721_v55 = vpop.f32.mrb[229].mxu0  ;;  %v15695_v7 = vadd.f32 %v10661_v27, %v15609_v25 }
 0xb54   : > { %v15692_v15 = vadd.f32 %v15609_v25, %v7721_v55  ;;  %v10662_v45 = vpop.f32.mrb[230].mxu0 }
 0xb55   : > { %v7724_v13 = vpop.f32.mrb[231].mxu0  ;;  %v15703_v31 = vadd.f32 %v10662_v45, %v15609_v25  ;;  %v7840_v60 = vsel %vm2581_vm7, %v15695_v7, 0.0 }
 0xb56   : > { %v15698_v48 = vadd.f32 %v15609_v25, %v7724_v13  ;;  %v7834_v52 = vsel %vm2581_vm7, %v15692_v15, 0.0 }
 0xb57   : > { %7835 = vadd.xlane.f32.xlu1 %v7834_v52  ;;  %v7843_v10 = vsel %vm2581_vm7, %v15703_v31, 0.0 }
 0xb58   : > { %v7837_v56 = vsel %vm2581_vm7, %v15698_v48, 0.0 }
 0xb59   : > { %7838 = vadd.xlane.f32.xlu0 %v7837_v56 }
 0xb5b   : > { %7841 = vadd.xlane.f32.xlu1 %v7840_v60 }
 0xb5d   : > { %7844 = vadd.xlane.f32.xlu0 %v7843_v10 }
 0xb63   : > { %v10665_v29 = vpop.f32.mrb[232].mxu0 }
 0xb64   : > { %v7737_v53 = vpop.f32.mrb[233].mxu0  ;;  %v15715_v45 = vadd.f32 %v10665_v29, %v15609_v25 }
 0xb65   : > { %v15712_v3 = vadd.f32 %v15609_v25, %v7737_v53  ;;  %v10666_v27 = vpop.f32.mrb[234].mxu0 }
 0xb66   : > { %v7740_v55 = vpop.f32.mrb[235].mxu0  ;;  %v15723_v56 = vadd.f32 %v10666_v27, %v15609_v25  ;;  %v7852_v10 = vsel %vm2581_vm7, %v15715_v45, 0.0 }
 0xb67   : > { %v15718_v13 = vadd.f32 %v15609_v25, %v7740_v55  ;;  %v7846_v52 = vsel %vm2581_vm7, %v15712_v3, 0.0 }
 0xb68   : > { %7847 = vadd.xlane.f32.xlu1 %v7846_v52  ;;  %v7855_v29 = vsel %vm2581_vm7, %v15723_v56, 0.0 }
 0xb69   : > { %v7849_v60 = vsel %vm2581_vm7, %v15718_v13, 0.0 }
 0xb6a   : > { %7850 = vadd.xlane.f32.xlu0 %v7849_v60 }
 0xb6c   : > { %7853 = vadd.xlane.f32.xlu1 %v7852_v10 }
 0xb6e   : > { %7856 = vadd.xlane.f32.xlu0 %v7855_v29 }
 0xb71   : > { %v10669_v53 = vpop.f32.mrb[236].mxu0 }
 0xb72   : > { %v7753_v55 = vpop.f32.mrb[237].mxu0  ;;  %v15735_v38 = vadd.f32 %v10669_v53, %v15609_v25 }
 0xb73   : > { %v15732_v22 = vadd.f32 %v15609_v25, %v7753_v55  ;;  %v10670_v52 = vpop.f32.mrb[238].mxu0 }
 0xb74   : > { %v7756_v27 = vpop.f32.mrb[239].mxu0  ;;  %v15743_v17 = vadd.f32 %v10670_v52, %v15609_v25  ;;  %v7864_v55 = vsel %vm2581_vm7, %v15735_v38, 0.0 }
 0xb75   : > { %v15738_v60 = vadd.f32 %v15609_v25, %v7756_v27  ;;  %v7858_v10 = vsel %vm2581_vm7, %v15732_v22, 0.0 }
 0xb76   : > { %7859 = vadd.xlane.f32.xlu1 %v7858_v10  ;;  %v7867_v53 = vsel %vm2581_vm7, %v15743_v17, 0.0 }
 0xb77   : > { %v7861_v29 = vsel %vm2581_vm7, %v15738_v60, 0.0 }
 0xb78   : > { %7862 = vadd.xlane.f32.xlu0 %v7861_v29 }
 0xb7a   : > { %7865 = vadd.xlane.f32.xlu1 %v7864_v55 }
 0xb7c   : > { %7868 = vadd.xlane.f32.xlu0 %v7867_v53 }
 0xb80   : > { %v10673_v27 = vpop.f32.mrb[240].mxu0 }
 0xb81   : > { %v7769_v0 = vpop.f32.mrb[241].mxu0  ;;  %v15755_v41 = vadd.f32 %v10673_v27, %v15609_v25 }
 0xb82   : > { %v15752_v18 = vadd.f32 %v15609_v25, %v7769_v0  ;;  %v10674_v10 = vpop.f32.mrb[242].mxu0 }
 0xb83   : > { %v7772_v52 = vpop.f32.mrb[243].mxu0  ;;  %v15763_v59 = vadd.f32 %v10674_v10, %v15609_v25  ;;  %v7876_v0 = vsel %vm2581_vm7, %v15755_v41, 0.0 }
 0xb84   : > { %v15758_v29 = vadd.f32 %v15609_v25, %v7772_v52  ;;  %v7870_v55 = vsel %vm2581_vm7, %v15752_v18, 0.0 }
 0xb85   : > { %7871 = vadd.xlane.f32.xlu1 %v7870_v55  ;;  %v7879_v27 = vsel %vm2581_vm7, %v15763_v59, 0.0 }
 0xb86   : > { %v7873_v53 = vsel %vm2581_vm7, %v15758_v29, 0.0 }
 0xb87   : > { %7874 = vadd.xlane.f32.xlu0 %v7873_v53 }
 0xb89   : > { %7877 = vadd.xlane.f32.xlu1 %v7876_v0 }
 0xb8b   : > { %7880 = vadd.xlane.f32.xlu0 %v7879_v27 }
 0xba5   : > { %v7788_v52 = vpop.xlane.xlu1 %7787 }
 0xba6   : > { %v7882_v43 = vmul.f32 0.03125, %v7788_v52 }
 0xba7   : > { %v7791_v9 = vpop.xlane.xlu0 %7790 }
 0xba8   : > { %v7914_v54 = vrot.slane %v7882_v43, 4  ;;  %v7883_v55 = vmul.f32 0.03125, %v7791_v9 }
 0xba9   : > { %v7794_v47 = vpop.xlane.xlu1 %7793 }
 0xbaa   : > { %v7915_v25 = vadd.f32 %v7914_v54, %v7882_v43  ;;  %v7920_v10 = vrot.slane %v7883_v55, 4  ;;  %v7884_v28 = vmul.f32 0.03125, %v7794_v47 }
 0xbab   : > { %v7797_v44 = vpop.xlane.xlu0 %7796 }
 0xbac   : > { %v7916_v57 = vrot.slane %v7915_v25, 2  ;;  %v7921_v53 = vadd.f32 %v7920_v10, %v7883_v55  ;;  %v7926_v30 = vrot.slane %v7884_v28, 4  ;;  %v7885_v34 = vmul.f32 0.03125, %v7797_v44 }
 0xbae   : > { %v7917_v12 = vadd.f32 %v7916_v57, %v7915_v25  ;;  %v7922_v0 = vrot.slane %v7921_v53, 2  ;;  %v7927_v40 = vadd.f32 %v7926_v30, %v7884_v28  ;;  %v7932_v50 = vrot.slane %v7885_v34, 4 }
 0xbb0   : > { %v7918_v14 = vrot.slane %v7917_v12, 1  ;;  %v7923_v27 = vadd.f32 %v7922_v0, %v7921_v53  ;;  %v7928_v8 = vrot.slane %v7927_v40, 2  ;;  %v7933_v52 = vadd.f32 %v7932_v50, %v7885_v34 }
 0xbb2   : > { %v7919_v5 = vadd.f32 %v7918_v14, %v7917_v12  ;;  %v7924_v33 = vrot.slane %v7923_v27, 1  ;;  %v7929_v9 = vadd.f32 %v7928_v8, %v7927_v40  ;;  %v7934_v2 = vrot.slane %v7933_v52, 2 }
 0xbb4   : > { %v7925_v54 = vadd.f32 %v7924_v33, %v7923_v27  ;;  %v7930_v43 = vrot.slane %v7929_v9, 1  ;;  %v7935_v47 = vadd.f32 %v7934_v2, %v7933_v52  ;;  %v7800_v39 = vpop.xlane.xlu1 %7799  ;;  %v8106_v37 = vmul.f32 0.125, %v7919_v5 }
 0xbb5   : > { %v7886_v55 = vmul.f32 0.03125, %v7800_v39 }
 0xbb6   : > { %v7931_v10 = vadd.f32 %v7930_v43, %v7929_v9  ;;  %v7936_v44 = vrot.slane %v7935_v47, 1  ;;  %v7803_v57 = vpop.xlane.xlu0 %7802  ;;  %v15772_v30 = vsub.f32 %v15612_v62, %v8106_v37  ;;  %v8107_v28 = vmul.f32 0.125, %v7925_v54 }
 0xbb7   : > { %v7938_v25 = vrot.slane %v7886_v55, 4  ;;  %v7887_v53 = vmul.f32 0.03125, %v7803_v57 }
 0xbb8   : > { %v7937_v50 = vadd.f32 %v7936_v44, %v7935_v47  ;;  %v7806_v14 = vpop.xlane.xlu1 %7805  ;;  %v8170_v8 = vmul.f32 %v15772_v30, %v15772_v30  ;;  %v15777_v33 = vsub.f32 %v15618_v32, %v8107_v28  ;;  %v8108_v2 = vmul.f32 0.125, %v7931_v10 }
 0xbb9   : > { %v7939_v5 = vadd.f32 %v7938_v25, %v7886_v55  ;;  %v7944_v39 = vrot.slane %v7887_v53, 4  ;;  %v7888_v40 = vmul.f32 0.03125, %v7806_v14 }
 0xbba   : > { %v7809_v12 = vpop.xlane.xlu0 %7808  ;;  %v8202_v34 = vsel %vm2581_vm7, %v8170_v8, 0.0  ;;  %v8171_v37 = vmul.f32 %v15777_v33, %v15777_v33  ;;  %v15783_v62 = vsub.f32 %v15615_v26, %v8108_v2  ;;  %v8109_v0 = vmul.f32 0.125, %v7937_v50 }
 0xbbb   : > { %v7940_v27 = vrot.slane %v7939_v5, 2  ;;  %v7945_v52 = vadd.f32 %v7944_v39, %v7887_v53  ;;  %v7950_v9 = vrot.slane %v7888_v40, 4  ;;  %v7889_v54 = vmul.f32 0.03125, %v7809_v12  ;;  %8203 = vadd.xlane.f32.xlu1 %v8202_v34 }
 0xbbc   : > { %v8205_v32 = vsel %vm2581_vm7, %v8171_v37, 0.0  ;;  %v8172_v43 = vmul.f32 %v15783_v62, %v15783_v62  ;;  %v15789_v47 = vsub.f32 %v15623_v16, %v8109_v0 }
 0xbbd   : > { %v7941_v55 = vadd.f32 %v7940_v27, %v7939_v5  ;;  %v7946_v10 = vrot.slane %v7945_v52, 2  ;;  %v7951_v44 = vadd.f32 %v7950_v9, %v7888_v40  ;;  %v7956_v57 = vrot.slane %v7889_v54, 4  ;;  %8206 = vadd.xlane.f32.xlu0 %v8205_v32 }
 0xbbe   : > { %v8208_v26 = vsel %vm2581_vm7, %v8172_v43, 0.0  ;;  %v8173_v28 = vmul.f32 %v15789_v47, %v15789_v47 }
 0xbbf   : > { %v7942_v25 = vrot.slane %v7941_v55, 1  ;;  %v7947_v53 = vadd.f32 %v7946_v10, %v7945_v52  ;;  %v7952_v50 = vrot.slane %v7951_v44, 2  ;;  %v7957_v14 = vadd.f32 %v7956_v57, %v7889_v54  ;;  %8209 = vadd.xlane.f32.xlu1 %v8208_v26 }
 0xbc0   : > { %v8211_v8 = vsel %vm2581_vm7, %v8173_v28, 0.0 }
 0xbc1   : > { %v7943_v2 = vadd.f32 %v7942_v25, %v7941_v55  ;;  %v7948_v16 = vrot.slane %v7947_v53, 1  ;;  %v7953_v39 = vadd.f32 %v7952_v50, %v7951_v44  ;;  %v7958_v5 = vrot.slane %v7957_v14, 2  ;;  %8212 = vadd.xlane.f32.xlu0 %v8211_v8 }
 0xbc3   : > { %v7949_v40 = vadd.f32 %v7948_v16, %v7947_v53  ;;  %v7954_v12 = vrot.slane %v7953_v39, 1  ;;  %v7959_v34 = vadd.f32 %v7958_v5, %v7957_v14  ;;  %v8110_v37 = vmul.f32 0.125, %v7943_v2 }
 0xbc5   : > { %v7955_v0 = vadd.f32 %v7954_v12, %v7953_v39  ;;  %v7960_v27 = vrot.slane %v7959_v34, 1  ;;  %v7812_v9 = vpop.xlane.xlu1 %7811  ;;  %v15796_v32 = vsub.f32 %v15632_v58, %v8110_v37  ;;  %v8111_v52 = vmul.f32 0.125, %v7949_v40 }
 0xbc6   : > { %v7890_v54 = vmul.f32 0.03125, %v7812_v9 }
 0xbc7   : > { %v7961_v43 = vadd.f32 %v7960_v27, %v7959_v34  ;;  %v7815_v10 = vpop.xlane.xlu0 %7814  ;;  %v8174_v55 = vmul.f32 %v15796_v32, %v15796_v32  ;;  %v15801_v44 = vsub.f32 %v15638_v6, %v8111_v52  ;;  %v8112_v57 = vmul.f32 0.125, %v7955_v0 }
 0xbc8   : > { %v7962_v26 = vrot.slane %v7890_v54, 4  ;;  %v7891_v28 = vmul.f32 0.03125, %v7815_v10 }
 0xbc9   : > { %v7818_v25 = vpop.xlane.xlu1 %7817  ;;  %v8214_v53 = vsel %vm2581_vm7, %v8174_v55, 0.0  ;;  %v8175_v58 = vmul.f32 %v15801_v44, %v15801_v44  ;;  %v15807_v50 = vsub.f32 %v15635_v4, %v8112_v57  ;;  %v8113_v14 = vmul.f32 0.125, %v7961_v43 }
 0xbca   : > { %v7963_v8 = vadd.f32 %v7962_v26, %v7890_v54  ;;  %v7968_v2 = vrot.slane %v7891_v28, 4  ;;  %v7892_v16 = vmul.f32 0.03125, %v7818_v25  ;;  %8215 = vadd.xlane.f32.xlu1 %v8214_v53 }
 0xbcb   : > { %v7821_v39 = vpop.xlane.xlu0 %7820  ;;  %v8217_v6 = vsel %vm2581_vm7, %v8175_v58, 0.0  ;;  %v8176_v5 = vmul.f32 %v15807_v50, %v15807_v50  ;;  %v15813_v40 = vsub.f32 %v15643_v21, %v8113_v14 }
 0xbcc   : > { %v7964_v12 = vrot.slane %v7963_v8, 2  ;;  %v7969_v34 = vadd.f32 %v7968_v2, %v7891_v28  ;;  %v7974_v37 = vrot.slane %v7892_v16, 4  ;;  %v7893_v0 = vmul.f32 0.03125, %v7821_v39  ;;  %8218 = vadd.xlane.f32.xlu0 %v8217_v6 }
 0xbcd   : > { %v8220_v4 = vsel %vm2581_vm7, %v8176_v5, 0.0  ;;  %v8177_v27 = vmul.f32 %v15813_v40, %v15813_v40 }
 0xbce   : > { %v7965_v9 = vadd.f32 %v7964_v12, %v7963_v8  ;;  %v7970_v52 = vrot.slane %v7969_v34, 2  ;;  %v7975_v54 = vadd.f32 %v7974_v37, %v7892_v16  ;;  %v7980_v43 = vrot.slane %v7893_v0, 4  ;;  %8221 = vadd.xlane.f32.xlu1 %v8220_v4 }
 0xbcf   : > { %v8223_v10 = vsel %vm2581_vm7, %v8177_v27, 0.0 }
 0xbd0   : > { %v7966_v55 = vrot.slane %v7965_v9, 1  ;;  %v7971_v21 = vadd.f32 %v7970_v52, %v7969_v34  ;;  %v7976_v57 = vrot.slane %v7975_v54, 2  ;;  %v7981_v26 = vadd.f32 %v7980_v43, %v7893_v0  ;;  %8224 = vadd.xlane.f32.xlu0 %v8223_v10 }
 0xbd2   : > { %v7967_v28 = vadd.f32 %v7966_v55, %v7965_v9  ;;  %v7972_v25 = vrot.slane %v7971_v21, 1  ;;  %v7977_v53 = vadd.f32 %v7976_v57, %v7975_v54  ;;  %v7982_v58 = vrot.slane %v7981_v26, 2 }
 0xbd3   : > { %v7824_v14 = vpop.xlane.xlu1 %7823 }
 0xbd4   : > { %v7973_v2 = vadd.f32 %v7972_v25, %v7971_v21  ;;  %v7978_v39 = vrot.slane %v7977_v53, 1  ;;  %v7983_v6 = vadd.f32 %v7982_v58, %v7981_v26  ;;  %v7894_v8 = vmul.f32 0.03125, %v7824_v14 }
 0xbd5   : > { %v7827_v5 = vpop.xlane.xlu0 %7826  ;;  %v8114_v16 = vmul.f32 0.125, %v7967_v28 }
 0xbd6   : > { %v7979_v12 = vadd.f32 %v7978_v39, %v7977_v53  ;;  %v7984_v37 = vrot.slane %v7983_v6, 1  ;;  %v7986_v4 = vrot.slane %v7894_v8, 4  ;;  %v7895_v27 = vmul.f32 0.03125, %v7827_v5 }
 0xbd7   : > { %v7830_v20 = vpop.xlane.xlu1 %7829  ;;  %v15820_v34 = vsub.f32 %v15652_v1, %v8114_v16  ;;  %v8115_v0 = vmul.f32 0.125, %v7973_v2 }
 0xbd8   : > { %v7985_v9 = vadd.f32 %v7984_v37, %v7983_v6  ;;  %v7987_v52 = vadd.f32 %v7986_v4, %v7894_v8  ;;  %v7992_v54 = vrot.slane %v7895_v27, 4  ;;  %v7896_v43 = vmul.f32 0.03125, %v7830_v20 }
 0xbd9   : > { %v7833_v10 = vpop.xlane.xlu0 %7832  ;;  %v8178_v55 = vmul.f32 %v15820_v34, %v15820_v34  ;;  %v15825_v21 = vsub.f32 %v15658_v42, %v8115_v0  ;;  %v8116_v57 = vmul.f32 0.125, %v7979_v12 }
 0xbda   : > { %v7988_v26 = vrot.slane %v7987_v52, 2  ;;  %v7993_v28 = vadd.f32 %v7992_v54, %v7895_v27  ;;  %v7998_v25 = vrot.slane %v7896_v43, 4  ;;  %v7897_v53 = vmul.f32 0.03125, %v7833_v10 }
 0xbdb   : > { %v8226_v1 = vsel %vm2581_vm7, %v8178_v55, 0.0  ;;  %v8179_v58 = vmul.f32 %v15825_v21, %v15825_v21  ;;  %v15831_v14 = vsub.f32 %v15655_v35, %v8116_v57  ;;  %v8117_v20 = vmul.f32 0.125, %v7985_v9 }
 0xbdc   : > { %v7989_v2 = vadd.f32 %v7988_v26, %v7987_v52  ;;  %v7994_v39 = vrot.slane %v7993_v28, 2  ;;  %v7999_v6 = vadd.f32 %v7998_v25, %v7896_v43  ;;  %v8004_v8 = vrot.slane %v7897_v53, 4  ;;  %8227 = vadd.xlane.f32.xlu1 %v8226_v1 }
 0xbdd   : > { %v8229_v42 = vsel %vm2581_vm7, %v8179_v58, 0.0  ;;  %v8180_v5 = vmul.f32 %v15831_v14, %v15831_v14  ;;  %v15837_v16 = vsub.f32 %v15663_v61, %v8117_v20 }
 0xbde   : > { %v7990_v12 = vrot.slane %v7989_v2, 1  ;;  %v7995_v37 = vadd.f32 %v7994_v39, %v7993_v28  ;;  %v8000_v4 = vrot.slane %v7999_v6, 2  ;;  %v8005_v27 = vadd.f32 %v8004_v8, %v7897_v53  ;;  %8230 = vadd.xlane.f32.xlu0 %v8229_v42 }
 0xbdf   : > { %v8232_v35 = vsel %vm2581_vm7, %v8180_v5, 0.0  ;;  %v8181_v0 = vmul.f32 %v15837_v16, %v15837_v16 }
 0xbe0   : > { %v7991_v9 = vadd.f32 %v7990_v12, %v7989_v2  ;;  %v7996_v52 = vrot.slane %v7995_v37, 1  ;;  %v8001_v54 = vadd.f32 %v8000_v4, %v7999_v6  ;;  %v8006_v43 = vrot.slane %v8005_v27, 2  ;;  %8233 = vadd.xlane.f32.xlu1 %v8232_v35 }
 0xbe1   : > { %v8235_v10 = vsel %vm2581_vm7, %v8181_v0, 0.0 }
 0xbe2   : > { %v7997_v55 = vadd.f32 %v7996_v52, %v7995_v37  ;;  %v8002_v61 = vrot.slane %v8001_v54, 1  ;;  %v8007_v57 = vadd.f32 %v8006_v43, %v8005_v27  ;;  %8236 = vadd.xlane.f32.xlu0 %v8235_v10  ;;  %v8118_v26 = vmul.f32 0.125, %v7991_v9 }
 0xbe4   : > { %v8119_v28 = vmul.f32 0.125, %v7997_v55  ;;  %v8003_v25 = vadd.f32 %v8002_v61, %v8001_v54  ;;  %v8008_v53 = vrot.slane %v8007_v57, 1  ;;  %v7836_v1 = vpop.xlane.xlu1 %7835  ;;  %v15844_v58 = vsub.f32 %v15672_v49, %v8118_v26 }
 0xbe5   : > { %v7898_v20 = vmul.f32 0.03125, %v7836_v1 }
 0xbe6   : > { %v8009_v2 = vadd.f32 %v8008_v53, %v8007_v57  ;;  %v7839_v39 = vpop.xlane.xlu0 %7838  ;;  %v8182_v6 = vmul.f32 %v15844_v58, %v15844_v58  ;;  %v15849_v8 = vsub.f32 %v15678_v63, %v8119_v28  ;;  %v8120_v42 = vmul.f32 0.125, %v8003_v25 }
 0xbe7   : > { %v8010_v5 = vrot.slane %v7898_v20, 4  ;;  %v7899_v12 = vmul.f32 0.03125, %v7839_v39 }
 0xbe8   : > { %v8121_v37 = vmul.f32 0.125, %v8009_v2  ;;  %v7842_v4 = vpop.xlane.xlu1 %7841  ;;  %v8238_v27 = vsel %vm2581_vm7, %v8182_v6, 0.0  ;;  %v8183_v49 = vmul.f32 %v15849_v8, %v15849_v8  ;;  %v15855_v35 = vsub.f32 %v15675_v24, %v8120_v42 }
 0xbe9   : > { %v8011_v0 = vadd.f32 %v8010_v5, %v7898_v20  ;;  %v8016_v9 = vrot.slane %v7899_v12, 4  ;;  %v7900_v52 = vmul.f32 0.03125, %v7842_v4  ;;  %8239 = vadd.xlane.f32.xlu1 %v8238_v27 }
 0xbea   : > { %v7845_v54 = vpop.xlane.xlu0 %7844  ;;  %v8241_v63 = vsel %vm2581_vm7, %v8183_v49, 0.0  ;;  %v8184_v43 = vmul.f32 %v15855_v35, %v15855_v35  ;;  %v15861_v10 = vsub.f32 %v15683_v46, %v8121_v37 }
 0xbeb   : > { %v8012_v55 = vrot.slane %v8011_v0, 2  ;;  %v8017_v61 = vadd.f32 %v8016_v9, %v7899_v12  ;;  %v8022_v57 = vrot.slane %v7900_v52, 4  ;;  %v7901_v26 = vmul.f32 0.03125, %v7845_v54  ;;  %8242 = vadd.xlane.f32.xlu0 %v8241_v63 }
 0xbec   : > { %v8244_v24 = vsel %vm2581_vm7, %v8184_v43, 0.0  ;;  %v8185_v28 = vmul.f32 %v15861_v10, %v15861_v10 }
 0xbed   : > { %v8013_v25 = vadd.f32 %v8012_v55, %v8011_v0  ;;  %v8018_v53 = vrot.slane %v8017_v61, 2  ;;  %v8023_v1 = vadd.f32 %v8022_v57, %v7900_v52  ;;  %v8028_v20 = vrot.slane %v7901_v26, 4  ;;  %8245 = vadd.xlane.f32.xlu1 %v8244_v24 }
 0xbee   : > { %v8247_v2 = vsel %vm2581_vm7, %v8185_v28, 0.0 }
 0xbef   : > { %v8014_v39 = vrot.slane %v8013_v25, 1  ;;  %v8019_v46 = vadd.f32 %v8018_v53, %v8017_v61  ;;  %v8024_v6 = vrot.slane %v8023_v1, 2  ;;  %v8029_v42 = vadd.f32 %v8028_v20, %v7901_v26  ;;  %8248 = vadd.xlane.f32.xlu0 %v8247_v2 }
 0xbf1   : > { %v8015_v5 = vadd.f32 %v8014_v39, %v8013_v25  ;;  %v8020_v12 = vrot.slane %v8019_v46, 1  ;;  %v8025_v37 = vadd.f32 %v8024_v6, %v8023_v1  ;;  %v8030_v4 = vrot.slane %v8029_v42, 2 }
 0xbf3   : > { %v8122_v27 = vmul.f32 0.125, %v8015_v5  ;;  %v8021_v49 = vadd.f32 %v8020_v12, %v8019_v46  ;;  %v8026_v9 = vrot.slane %v8025_v37, 1  ;;  %v8031_v54 = vadd.f32 %v8030_v4, %v8029_v42 }
 0xbf5   : > { %v8123_v0 = vmul.f32 0.125, %v8021_v49  ;;  %v8027_v63 = vadd.f32 %v8026_v9, %v8025_v37  ;;  %v8032_v52 = vrot.slane %v8031_v54, 1  ;;  %v7848_v43 = vpop.xlane.xlu1 %7847  ;;  %v15868_v55 = vsub.f32 %v15692_v15, %v8122_v27 }
 0xbf6   : > { %v7902_v57 = vmul.f32 0.03125, %v7848_v43 }
 0xbf7   : > { %v8124_v61 = vmul.f32 0.125, %v8027_v63  ;;  %v8033_v24 = vadd.f32 %v8032_v52, %v8031_v54  ;;  %v7851_v26 = vpop.xlane.xlu0 %7850  ;;  %v8186_v28 = vmul.f32 %v15868_v55, %v15868_v55  ;;  %v15873_v25 = vsub.f32 %v15698_v48, %v8123_v0 }
 0xbf8   : > { %v8034_v53 = vrot.slane %v7902_v57, 4  ;;  %v7903_v1 = vmul.f32 0.03125, %v7851_v26 }
 0xbf9   : > { %v8125_v20 = vmul.f32 0.125, %v8033_v24  ;;  %v7854_v2 = vpop.xlane.xlu1 %7853  ;;  %v8250_v39 = vsel %vm2581_vm7, %v8186_v28, 0.0  ;;  %v8187_v15 = vmul.f32 %v15873_v25, %v15873_v25  ;;  %v15879_v46 = vsub.f32 %v15695_v7, %v8124_v61 }
 0xbfa   : > { %v8035_v6 = vadd.f32 %v8034_v53, %v7902_v57  ;;  %v8040_v42 = vrot.slane %v7903_v1, 4  ;;  %v7904_v5 = vmul.f32 0.03125, %v7854_v2  ;;  %8251 = vadd.xlane.f32.xlu1 %v8250_v39 }
 0xbfb   : > { %v7857_v12 = vpop.xlane.xlu0 %7856  ;;  %v8253_v48 = vsel %vm2581_vm7, %v8187_v15, 0.0  ;;  %v8188_v37 = vmul.f32 %v15879_v46, %v15879_v46  ;;  %v15885_v4 = vsub.f32 %v15703_v31, %v8125_v20 }
 0xbfc   : > { %v8036_v27 = vrot.slane %v8035_v6, 2  ;;  %v8041_v49 = vadd.f32 %v8040_v42, %v7903_v1  ;;  %v8046_v9 = vrot.slane %v7904_v5, 4  ;;  %v7905_v54 = vmul.f32 0.03125, %v7857_v12  ;;  %8254 = vadd.xlane.f32.xlu0 %v8253_v48 }
 0xbfd   : > { %v8256_v7 = vsel %vm2581_vm7, %v8188_v37, 0.0  ;;  %v8189_v0 = vmul.f32 %v15885_v4, %v15885_v4 }
 0xbfe   : > { %v8037_v63 = vadd.f32 %v8036_v27, %v8035_v6  ;;  %v8042_v52 = vrot.slane %v8041_v49, 2  ;;  %v8047_v43 = vadd.f32 %v8046_v9, %v7904_v5  ;;  %v8052_v57 = vrot.slane %v7905_v54, 4  ;;  %8257 = vadd.xlane.f32.xlu1 %v8256_v7 }
 0xbff   : > { %v8259_v61 = vsel %vm2581_vm7, %v8189_v0, 0.0 }
 0xc00   : > { %v8038_v24 = vrot.slane %v8037_v63, 1  ;;  %v8043_v31 = vadd.f32 %v8042_v52, %v8041_v49  ;;  %v8048_v26 = vrot.slane %v8047_v43, 2  ;;  %v8053_v28 = vadd.f32 %v8052_v57, %v7905_v54  ;;  %8260 = vadd.xlane.f32.xlu0 %v8259_v61 }
 0xc02   : > { %v8039_v53 = vadd.f32 %v8038_v24, %v8037_v63  ;;  %v8044_v1 = vrot.slane %v8043_v31, 1  ;;  %v8049_v20 = vadd.f32 %v8048_v26, %v8047_v43  ;;  %v8054_v2 = vrot.slane %v8053_v28, 2 }
 0xc03   : > { %v7860_v39 = vpop.xlane.xlu1 %7859 }
 0xc04   : > { %v8126_v15 = vmul.f32 0.125, %v8039_v53  ;;  %v8045_v42 = vadd.f32 %v8044_v1, %v8043_v31  ;;  %v8050_v12 = vrot.slane %v8049_v20, 1  ;;  %v8055_v6 = vadd.f32 %v8054_v2, %v8053_v28 }
 0xc05   : > { %v7906_v48 = vmul.f32 0.03125, %v7860_v39  ;;  %v7863_v5 = vpop.xlane.xlu0 %7862 }
 0xc06   : > { %v8127_v37 = vmul.f32 0.125, %v8045_v42  ;;  %v8051_v27 = vadd.f32 %v8050_v12, %v8049_v20  ;;  %v8056_v9 = vrot.slane %v8055_v6, 1  ;;  %v7907_v7 = vmul.f32 0.03125, %v7863_v5 }
 0xc07   : > { %v8058_v0 = vrot.slane %v7906_v48, 4  ;;  %v7866_v49 = vpop.xlane.xlu1 %7865  ;;  %v15892_v54 = vsub.f32 %v15712_v3, %v8126_v15 }
 0xc08   : > { %v8128_v63 = vmul.f32 0.125, %v8051_v27  ;;  %v8057_v52 = vadd.f32 %v8056_v9, %v8055_v6  ;;  %v8064_v43 = vrot.slane %v7907_v7, 4  ;;  %v7908_v57 = vmul.f32 0.03125, %v7866_v49 }
 0xc09   : > { %v8059_v61 = vadd.f32 %v8058_v0, %v7906_v48  ;;  %v7869_v24 = vpop.xlane.xlu0 %7868  ;;  %v8190_v31 = vmul.f32 %v15892_v54, %v15892_v54  ;;  %v15897_v26 = vsub.f32 %v15718_v13, %v8127_v37 }
 0xc0a   : > { %v8129_v28 = vmul.f32 0.125, %v8057_v52  ;;  %v8065_v53 = vadd.f32 %v8064_v43, %v7907_v7  ;;  %v8070_v1 = vrot.slane %v7908_v57, 4  ;;  %v7909_v20 = vmul.f32 0.03125, %v7869_v24 }
 0xc0b   : > { %v8060_v2 = vrot.slane %v8059_v61, 2  ;;  %v8262_v3 = vsel %vm2581_vm7, %v8190_v31, 0.0  ;;  %v8191_v39 = vmul.f32 %v15897_v26, %v15897_v26  ;;  %v15903_v15 = vsub.f32 %v15715_v45, %v8128_v63 }
 0xc0c   : > { %v8066_v42 = vrot.slane %v8065_v53, 2  ;;  %v8071_v12 = vadd.f32 %v8070_v1, %v7908_v57  ;;  %v8076_v6 = vrot.slane %v7909_v20, 4  ;;  %8263 = vadd.xlane.f32.xlu1 %v8262_v3  ;;  %v15906_v13 = vsub.f32 %v15723_v56, %v8129_v28 }
 0xc0d   : > { %v8061_v48 = vadd.f32 %v8060_v2, %v8059_v61  ;;  %v8265_v5 = vsel %vm2581_vm7, %v8191_v39, 0.0  ;;  %v8192_v37 = vmul.f32 %v15903_v15, %v15903_v15 }
 0xc0e   : > { %v8067_v27 = vadd.f32 %v8066_v42, %v8065_v53  ;;  %v8072_v9 = vrot.slane %v8071_v12, 2  ;;  %v8077_v7 = vadd.f32 %v8076_v6, %v7909_v20  ;;  %8266 = vadd.xlane.f32.xlu0 %v8265_v5  ;;  %v8193_v45 = vmul.f32 %v15906_v13, %v15906_v13 }
 0xc0f   : > { %v8062_v0 = vrot.slane %v8061_v48, 1  ;;  %v8268_v49 = vsel %vm2581_vm7, %v8192_v37, 0.0 }
 0xc10   : > { %v8068_v63 = vrot.slane %v8067_v27, 1  ;;  %v8073_v52 = vadd.f32 %v8072_v9, %v8071_v12  ;;  %v8078_v56 = vrot.slane %v8077_v7, 2  ;;  %8269 = vadd.xlane.f32.xlu1 %v8268_v49  ;;  %v8271_v43 = vsel %vm2581_vm7, %v8193_v45, 0.0 }
 0xc11   : > { %v8063_v57 = vadd.f32 %v8062_v0, %v8061_v48 }
 0xc12   : > { %v8069_v61 = vadd.f32 %v8068_v63, %v8067_v27  ;;  %v8074_v24 = vrot.slane %v8073_v52, 1  ;;  %v8079_v31 = vadd.f32 %v8078_v56, %v8077_v7  ;;  %8272 = vadd.xlane.f32.xlu0 %v8271_v43  ;;  %v7872_v28 = vpop.xlane.xlu1 %7871 }
 0xc13   : > { %v8130_v53 = vmul.f32 0.125, %v8063_v57  ;;  %v7910_v1 = vmul.f32 0.03125, %v7872_v28 }
 0xc14   : > { %v8131_v20 = vmul.f32 0.125, %v8069_v61  ;;  %v8075_v2 = vadd.f32 %v8074_v24, %v8073_v52  ;;  %v8080_v3 = vrot.slane %v8079_v31, 1  ;;  %v7875_v39 = vpop.xlane.xlu0 %7874 }
 0xc15   : > { %v8082_v42 = vrot.slane %v7910_v1, 4  ;;  %v7911_v6 = vmul.f32 0.03125, %v7875_v39  ;;  %v15916_v12 = vsub.f32 %v15732_v22, %v8130_v53 }
 0xc16   : > { %v8132_v5 = vmul.f32 0.125, %v8075_v2  ;;  %v8081_v37 = vadd.f32 %v8080_v3, %v8079_v31  ;;  %v7878_v9 = vpop.xlane.xlu1 %7877  ;;  %v15919_v48 = vsub.f32 %v15738_v60, %v8131_v20 }
 0xc17   : > { %v8083_v27 = vadd.f32 %v8082_v42, %v7910_v1  ;;  %v8088_v7 = vrot.slane %v7911_v6, 4  ;;  %v7912_v45 = vmul.f32 0.03125, %v7878_v9  ;;  %v8194_v0 = vmul.f32 %v15916_v12, %v15916_v12 }
 0xc18   : > { %v8133_v49 = vmul.f32 0.125, %v8081_v37  ;;  %v7881_v63 = vpop.xlane.xlu0 %7880  ;;  %v8195_v52 = vmul.f32 %v15919_v48, %v15919_v48  ;;  %v15926_v22 = vsub.f32 %v15735_v38, %v8132_v5 }
 0xc19   : > { %v8084_v56 = vrot.slane %v8083_v27, 2  ;;  %v8089_v43 = vadd.f32 %v8088_v7, %v7911_v6  ;;  %v8094_v57 = vrot.slane %v7912_v45, 4  ;;  %v7913_v61 = vmul.f32 0.03125, %v7881_v63 }
 0xc1a   : > { %v8274_v60 = vsel %vm2581_vm7, %v8194_v0, 0.0  ;;  %v8277_v24 = vsel %vm2581_vm7, %v8195_v52, 0.0  ;;  %v8196_v31 = vmul.f32 %v15926_v22, %v15926_v22  ;;  %v15933_v28 = vsub.f32 %v15743_v17, %v8133_v49 }
 0xc1b   : > { %v8085_v53 = vadd.f32 %v8084_v56, %v8083_v27  ;;  %v8090_v1 = vrot.slane %v8089_v43, 2  ;;  %v8095_v20 = vadd.f32 %v8094_v57, %v7912_v45  ;;  %v8100_v2 = vrot.slane %v7913_v61, 4  ;;  %8275 = vadd.xlane.f32.xlu1 %v8274_v60  ;;  %8278 = vadd.xlane.f32.xlu0 %v8277_v24 }
 0xc1c   : > { %v8280_v38 = vsel %vm2581_vm7, %v8196_v31, 0.0  ;;  %v8197_v3 = vmul.f32 %v15933_v28, %v15933_v28 }
 0xc1d   : > { %v8086_v39 = vrot.slane %v8085_v53, 1  ;;  %v8091_v42 = vadd.f32 %v8090_v1, %v8089_v43  ;;  %v8096_v6 = vrot.slane %v8095_v20, 2  ;;  %v8101_v5 = vadd.f32 %v8100_v2, %v7913_v61 }
 0xc1e   : > { %v8283_v37 = vsel %vm2581_vm7, %v8197_v3, 0.0 }
 0xc1f   : > { %v8087_v9 = vadd.f32 %v8086_v39, %v8085_v53  ;;  %v8092_v17 = vrot.slane %v8091_v42, 1  ;;  %v8097_v7 = vadd.f32 %v8096_v6, %v8095_v20  ;;  %v8102_v27 = vrot.slane %v8101_v5, 2  ;;  %8281 = vadd.xlane.f32.xlu1 %v8280_v38  ;;  %8284 = vadd.xlane.f32.xlu0 %v8283_v37 }
 0xc21   : > { %v8134_v45 = vmul.f32 0.125, %v8087_v9  ;;  %v8093_v0 = vadd.f32 %v8092_v17, %v8091_v42  ;;  %v8098_v49 = vrot.slane %v8097_v7, 1  ;;  %v8103_v63 = vadd.f32 %v8102_v27, %v8101_v5 }
 0xc23   : > { %v8135_v52 = vmul.f32 0.125, %v8093_v0  ;;  %v8099_v56 = vadd.f32 %v8098_v49, %v8097_v7  ;;  %v8104_v57 = vrot.slane %v8103_v63, 1  ;;  %v15940_v60 = vsub.f32 %v15752_v18, %v8134_v45 }
 0xc25   : > { %v8136_v43 = vmul.f32 0.125, %v8099_v56  ;;  %v8105_v61 = vadd.f32 %v8104_v57, %v8103_v63  ;;  %v8198_v24 = vmul.f32 %v15940_v60, %v15940_v60  ;;  %v15945_v31 = vsub.f32 %v15758_v29, %v8135_v52 }
 0xc27   : > { %v8137_v53 = vmul.f32 0.125, %v8105_v61  ;;  %v8286_v1 = vsel %vm2581_vm7, %v8198_v24, 0.0  ;;  %v8199_v20 = vmul.f32 %v15945_v31, %v15945_v31  ;;  %v15951_v2 = vsub.f32 %v15755_v41, %v8136_v43 }
 0xc28   : > { %8287 = vadd.xlane.f32.xlu1 %v8286_v1 }
 0xc29   : > { %v8289_v18 = vsel %vm2581_vm7, %v8199_v20, 0.0  ;;  %v8200_v38 = vmul.f32 %v15951_v2, %v15951_v2  ;;  %v15957_v3 = vsub.f32 %v15763_v59, %v8137_v53 }
 0xc2a   : > { %8290 = vadd.xlane.f32.xlu0 %v8289_v18 }
 0xc2b   : > { %v8292_v29 = vsel %vm2581_vm7, %v8200_v38, 0.0  ;;  %v8201_v39 = vmul.f32 %v15957_v3, %v15957_v3 }
 0xc2c   : > { %8293 = vadd.xlane.f32.xlu1 %v8292_v29 }
 0xc2d   : > { %v8295_v42 = vsel %vm2581_vm7, %v8201_v39, 0.0 }
 0xc2e   : > { %8296 = vadd.xlane.f32.xlu0 %v8295_v42 }
 0xc48   : > { %v8204_v41 = vpop.xlane.xlu1 %8203 }
 0xc49   : > { %v8298_v6 = vmul.f32 0.03125, %v8204_v41 }
 0xc4a   : > { %v8207_v5 = vpop.xlane.xlu0 %8206 }
 0xc4b   : > { %v8330_v37 = vrot.slane %v8298_v6, 4  ;;  %v8299_v9 = vmul.f32 0.03125, %v8207_v5 }
 0xc4c   : > { %v8210_v17 = vpop.xlane.xlu1 %8209 }
 0xc4d   : > { %v8331_v7 = vadd.f32 %v8330_v37, %v8298_v6  ;;  %v8336_v27 = vrot.slane %v8299_v9, 4  ;;  %v8300_v59 = vmul.f32 0.03125, %v8210_v17 }
 0xc4e   : > { %v8213_v45 = vpop.xlane.xlu0 %8212 }
 0xc4f   : > { %v8332_v0 = vrot.slane %v8331_v7, 2  ;;  %v8337_v49 = vadd.f32 %v8336_v27, %v8299_v9  ;;  %v8342_v63 = vrot.slane %v8300_v59, 4  ;;  %v8301_v52 = vmul.f32 0.03125, %v8213_v45 }
 0xc51   : > { %v8333_v56 = vadd.f32 %v8332_v0, %v8331_v7  ;;  %v8338_v57 = vrot.slane %v8337_v49, 2  ;;  %v8343_v43 = vadd.f32 %v8342_v63, %v8300_v59  ;;  %v8348_v61 = vrot.slane %v8301_v52, 4 }
 0xc53   : > { %v8334_v24 = vrot.slane %v8333_v56, 1  ;;  %v8339_v53 = vadd.f32 %v8338_v57, %v8337_v49  ;;  %v8344_v1 = vrot.slane %v8343_v43, 2  ;;  %v8349_v20 = vadd.f32 %v8348_v61, %v8301_v52 }
 0xc55   : > { %v8335_v18 = vadd.f32 %v8334_v24, %v8333_v56  ;;  %v8340_v38 = vrot.slane %v8339_v53, 1  ;;  %v8345_v29 = vadd.f32 %v8344_v1, %v8343_v43  ;;  %v8350_v39 = vrot.slane %v8349_v20, 2 }
 0xc57   : > { %v8522_v42 = vmul.f32 0.125, %v8335_v18  ;;  %v8341_v41 = vadd.f32 %v8340_v38, %v8339_v53  ;;  %v8346_v6 = vrot.slane %v8345_v29, 1  ;;  %v8351_v5 = vadd.f32 %v8350_v39, %v8349_v20  ;;  %v8216_v37 = vpop.xlane.xlu1 %8215 }
 0xc58   : > { %v8302_v9 = vmul.f32 0.03125, %v8216_v37 }
 0xc59   : > { %v8554_v17 = vadd.f32 1e-05, %v8522_v42  ;;  %v8523_v27 = vmul.f32 0.125, %v8341_v41  ;;  %v8347_v7 = vadd.f32 %v8346_v6, %v8345_v29  ;;  %v8352_v45 = vrot.slane %v8351_v5, 1  ;;  %v8219_v59 = vpop.xlane.xlu0 %8218 }
 0xc5a   : > { %v8354_v0 = vrot.slane %v8302_v9, 4  ;;  %v8303_v63 = vmul.f32 0.03125, %v8219_v59 }
 0xc5b   : > { %11254 = vrsqrt.f32 %v8554_v17  ;;  %v8555_v49 = vadd.f32 1e-05, %v8523_v27  ;;  %v8524_v52 = vmul.f32 0.125, %v8347_v7  ;;  %v8353_v56 = vadd.f32 %v8352_v45, %v8351_v5  ;;  %v8222_v57 = vpop.xlane.xlu1 %8221 }
 0xc5c   : > { %v8355_v43 = vadd.f32 %v8354_v0, %v8302_v9  ;;  %v8360_v61 = vrot.slane %v8303_v63, 4  ;;  %v8304_v24 = vmul.f32 0.03125, %v8222_v57 }
 0xc5d   : > { %11256 = vrsqrt.f32 %v8555_v49  ;;  %v8556_v53 = vadd.f32 1e-05, %v8524_v52  ;;  %v8525_v1 = vmul.f32 0.125, %v8353_v56  ;;  %v8225_v20 = vpop.xlane.xlu0 %8224 }
 0xc5e   : > { %v8356_v18 = vrot.slane %v8355_v43, 2  ;;  %v8361_v38 = vadd.f32 %v8360_v61, %v8303_v63  ;;  %v8366_v39 = vrot.slane %v8304_v24, 4  ;;  %v8305_v29 = vmul.f32 0.03125, %v8225_v20 }
 0xc5f   : > { %11258 = vrsqrt.f32 %v8556_v53  ;;  %v8557_v42 = vadd.f32 1e-05, %v8525_v1 }
 0xc60   : > { %v8357_v41 = vadd.f32 %v8356_v18, %v8355_v43  ;;  %v8362_v6 = vrot.slane %v8361_v38, 2  ;;  %v8367_v37 = vadd.f32 %v8366_v39, %v8304_v24  ;;  %v8372_v17 = vrot.slane %v8305_v29, 4  ;;  %v15966_v43 = vld [vmem:[%s16414_s4 + $0x70] sm:$0xff]  ;;  %v15972_v39 = vld [vmem:[%s16414_s4 + $0x78] sm:$0xff] }
 0xc61   : > { %11260 = vrsqrt.f32 %v8557_v42 }
 0xc62   : > { %v8358_v5 = vrot.slane %v8357_v41, 1  ;;  %v8363_v27 = vadd.f32 %v8362_v6, %v8361_v38  ;;  %v8368_v9 = vrot.slane %v8367_v37, 2  ;;  %v8373_v7 = vadd.f32 %v8372_v17, %v8305_v29 }
 0xc64   : > { %v8359_v45 = vadd.f32 %v8358_v5, %v8357_v41  ;;  %v8364_v59 = vrot.slane %v8363_v27, 1  ;;  %v8369_v0 = vadd.f32 %v8368_v9, %v8367_v37  ;;  %v8374_v49 = vrot.slane %v8373_v7, 2 }
 0xc65   : > { %v11255_v52 = vpop.eup %11254 }
 0xc66   : > { %v8526_v56 = vmul.f32 0.125, %v8359_v45  ;;  %v8365_v63 = vadd.f32 %v8364_v59, %v8363_v27  ;;  %v8370_v57 = vrot.slane %v8369_v0, 1  ;;  %v8375_v61 = vadd.f32 %v8374_v49, %v8373_v7 }
 0xc67   : > { %v11257_v24 = vpop.eup %11256  ;;  %v8618_v53 = vmul.f32 %v11255_v52, %v15772_v30 }
 0xc68   : > { %v8558_v1 = vadd.f32 1e-05, %v8526_v56  ;;  %v8527_v20 = vmul.f32 0.125, %v8365_v63  ;;  %v8371_v18 = vadd.f32 %v8370_v57, %v8369_v0  ;;  %v8376_v38 = vrot.slane %v8375_v61, 1 }
 0xc69   : > { %v11259_v29 = vpop.eup %11258  ;;  %v8228_v42 = vpop.xlane.xlu1 %8227  ;;  %v8650_v41 = vmul.f32 %v8618_v53, %v15966_v43  ;;  %v8619_v6 = vmul.f32 %v11257_v24, %v15777_v33 }
 0xc6a   : > { %11262 = vrsqrt.f32 %v8558_v1  ;;  %v8559_v37 = vadd.f32 1e-05, %v8527_v20  ;;  %v8528_v17 = vmul.f32 0.125, %v8371_v18  ;;  %v8377_v5 = vadd.f32 %v8376_v38, %v8375_v61 }
 0xc6b   : > { %v11261_v30 = vpop.eup %11260  ;;  %v8306_v27 = vmul.f32 0.03125, %v8228_v42  ;;  %v8231_v9 = vpop.xlane.xlu0 %8230  ;;  %v8682_v7 = vadd.f32 %v8650_v41, %v15972_v39  ;;  %v8651_v45 = vmul.f32 %v8619_v6, %v15966_v43  ;;  %v8620_v59 = vmul.f32 %v11259_v29, %v15783_v62 }
 0xc6c   : > { %11264 = vrsqrt.f32 %v8559_v37  ;;  %v8529_v0 = vmul.f32 0.125, %v8377_v5  ;;  %v8307_v49 = vmul.f32 0.03125, %v8231_v9  ;;  %v8621_v57 = vmul.f32 %v11261_v30, %v15789_v47 }
 0xc6d   : > { %v8378_v52 = vrot.slane %v8306_v27, 4  ;;  %v8234_v56 = vpop.xlane.xlu1 %8233  ;;  %8746 = vrot.lane.b32.xlu1 %v8682_v7, %s11493_s10  ;;  %v8683_v33 = vadd.f32 %v8651_v45, %v15972_v39  ;;  %v8652_v63 = vmul.f32 %v8620_v59, %v15966_v43  ;;  %v8560_v61 = vadd.f32 1e-05, %v8528_v17 }
 0xc6e   : > { %v8384_v24 = vrot.slane %v8307_v49, 4  ;;  %v8308_v53 = vmul.f32 0.03125, %v8234_v56  ;;  %v8561_v1 = vadd.f32 1e-05, %v8529_v0  ;;  %v8653_v38 = vmul.f32 %v8621_v57, %v15966_v43 }
 0xc6f   : > { %v8379_v20 = vadd.f32 %v8378_v52, %v8306_v27  ;;  %v8237_v18 = vpop.xlane.xlu0 %8236  ;;  %8748 = vrot.lane.b32.xlu0 %v8683_v33, %s11493_s10  ;;  %v8684_v62 = vadd.f32 %v8652_v63, %v15972_v39  ;;  %11266 = vrsqrt.f32 %v8560_v61 }
 0xc70   : > { %v8385_v29 = vadd.f32 %v8384_v24, %v8307_v49  ;;  %v8390_v42 = vrot.slane %v8308_v53, 4  ;;  %v8309_v41 = vmul.f32 0.03125, %v8237_v18  ;;  %11268 = vrsqrt.f32 %v8561_v1 }
 0xc71   : > { %v8380_v6 = vrot.slane %v8379_v20, 2  ;;  %8750 = vrot.lane.b32.xlu1 %v8684_v62, %s11493_s10  ;;  %v8685_v30 = vadd.f32 %v8653_v38, %v15972_v39 }
 0xc72   : > { %v8386_v47 = vrot.slane %v8385_v29, 2  ;;  %v8391_v37 = vadd.f32 %v8390_v42, %v8308_v53  ;;  %v8396_v17 = vrot.slane %v8309_v41, 4 }
 0xc73   : > { %v8381_v5 = vadd.f32 %v8380_v6, %v8379_v20 }
 0xc74   : > { %v11263_v27 = vpop.eup %11262  ;;  %v8387_v9 = vadd.f32 %v8386_v47, %v8385_v29  ;;  %v8392_v7 = vrot.slane %v8391_v37, 2  ;;  %v8397_v45 = vadd.f32 %v8396_v17, %v8309_v41 }
 0xc75   : > { %v8382_v59 = vrot.slane %v8381_v5, 1  ;;  %8752 = vrot.lane.b32.xlu1 %v8685_v30, %s11493_s10  ;;  %v8622_v0 = vmul.f32 %v11263_v27, %v15796_v32 }
 0xc76   : > { %v11265_v49 = vpop.eup %11264  ;;  %v8388_v52 = vrot.slane %v8387_v9, 1  ;;  %v8393_v56 = vadd.f32 %v8392_v7, %v8391_v37  ;;  %v8398_v33 = vrot.slane %v8397_v45, 2  ;;  %v8240_v63 = vpop.xlane.xlu1 %8239 }
 0xc77   : > { %v8383_v57 = vadd.f32 %v8382_v59, %v8381_v5  ;;  %v8310_v61 = vmul.f32 0.03125, %v8240_v63  ;;  %v8654_v24 = vmul.f32 %v8622_v0, %v15966_v43  ;;  %v8623_v53 = vmul.f32 %v11265_v49, %v15801_v44 }
 0xc78   : > { %v8389_v1 = vadd.f32 %v8388_v52, %v8387_v9  ;;  %v8394_v20 = vrot.slane %v8393_v56, 1  ;;  %v8399_v18 = vadd.f32 %v8398_v33, %v8397_v45  ;;  %v8243_v62 = vpop.xlane.xlu0 %8242 }
 0xc79   : > { %v8530_v38 = vmul.f32 0.125, %v8383_v57  ;;  %v8402_v29 = vrot.slane %v8310_v61, 4  ;;  %v8311_v42 = vmul.f32 0.03125, %v8243_v62  ;;  %v8686_v32 = vadd.f32 %v8654_v24, %v15972_v39  ;;  %v11267_v9 = vpop.eup %11266 }
 0xc7a   : > { %v8531_v41 = vmul.f32 0.125, %v8389_v1  ;;  %v8395_v6 = vadd.f32 %v8394_v20, %v8393_v56  ;;  %v8400_v47 = vrot.slane %v8399_v18, 1  ;;  %v8246_v37 = vpop.xlane.xlu1 %8245  ;;  %v8655_v17 = vmul.f32 %v8623_v53, %v15966_v43  ;;  %v11269_v52 = vpop.eup %11268 }
 0xc7b   : > { %v8562_v5 = vadd.f32 1e-05, %v8530_v38  ;;  %v8403_v30 = vadd.f32 %v8402_v29, %v8310_v61  ;;  %v8408_v27 = vrot.slane %v8311_v42, 4  ;;  %8754 = vrot.lane.b32.xlu0 %v8686_v32, %s11493_s10  ;;  %v8312_v44 = vmul.f32 0.03125, %v8246_v37 }
 0xc7c   : > { %v8563_v7 = vadd.f32 1e-05, %v8531_v41  ;;  %v8532_v45 = vmul.f32 0.125, %v8395_v6  ;;  %v8401_v59 = vadd.f32 %v8400_v47, %v8399_v18  ;;  %v8249_v0 = vpop.xlane.xlu0 %8248  ;;  %v8687_v49 = vadd.f32 %v8655_v17, %v15972_v39 }
 0xc7d   : > { %11270 = vrsqrt.f32 %v8562_v5  ;;  %v8404_v56 = vrot.slane %v8403_v30, 2  ;;  %v8409_v33 = vadd.f32 %v8408_v27, %v8311_v42  ;;  %v8414_v63 = vrot.slane %v8312_v44, 4 }
 0xc7e   : > { %11272 = vrsqrt.f32 %v8563_v7  ;;  %v8564_v57 = vadd.f32 1e-05, %v8532_v45  ;;  %v8533_v24 = vmul.f32 0.125, %v8401_v59  ;;  %v8313_v61 = vmul.f32 0.03125, %v8249_v0  ;;  %8756 = vrot.lane.b32.xlu1 %v8687_v49, %s11493_s10 }
 0xc7f   : > { %v8405_v53 = vadd.f32 %v8404_v56, %v8403_v30  ;;  %v8410_v1 = vrot.slane %v8409_v33, 2  ;;  %v8415_v20 = vadd.f32 %v8414_v63, %v8312_v44  ;;  %v8624_v62 = vmul.f32 %v11267_v9, %v15807_v50 }
 0xc80   : > { %11274 = vrsqrt.f32 %v8564_v57  ;;  %v8565_v18 = vadd.f32 1e-05, %v8533_v24  ;;  %v8420_v38 = vrot.slane %v8313_v61, 4  ;;  %v8625_v29 = vmul.f32 %v11269_v52, %v15813_v40 }
 0xc81   : > { %v8406_v32 = vrot.slane %v8405_v53, 1  ;;  %v8411_v41 = vadd.f32 %v8410_v1, %v8409_v33  ;;  %v8416_v42 = vrot.slane %v8415_v20, 2  ;;  %v8656_v6 = vmul.f32 %v8624_v62, %v15966_v43 }
 0xc82   : > { %11276 = vrsqrt.f32 %v8565_v18  ;;  %v8421_v47 = vadd.f32 %v8420_v38, %v8313_v61  ;;  %v8657_v37 = vmul.f32 %v8625_v29, %v15966_v43 }
 0xc83   : > { %v8407_v17 = vadd.f32 %v8406_v32, %v8405_v53  ;;  %v8412_v5 = vrot.slane %v8411_v41, 1  ;;  %v8417_v30 = vadd.f32 %v8416_v42, %v8415_v20  ;;  %v8688_v27 = vadd.f32 %v8656_v6, %v15972_v39 }
 0xc84   : > { %v8422_v50 = vrot.slane %v8421_v47, 2  ;;  %v8689_v44 = vadd.f32 %v8657_v37, %v15972_v39 }
 0xc85   : > { %v8534_v9 = vmul.f32 0.125, %v8407_v17  ;;  %v8413_v7 = vadd.f32 %v8412_v5, %v8411_v41  ;;  %v8418_v40 = vrot.slane %v8417_v30, 1  ;;  %8758 = vrot.lane.b32.xlu0 %v8688_v27, %s11493_s10 }
 0xc86   : > { %v8423_v45 = vadd.f32 %v8422_v50, %v8421_v47  ;;  %8760 = vrot.lane.b32.xlu1 %v8689_v44, %s11493_s10 }
 0xc87   : > { %v11271_v59 = vpop.eup %11270  ;;  %v8566_v0 = vadd.f32 1e-05, %v8534_v9  ;;  %v8535_v49 = vmul.f32 0.125, %v8413_v7  ;;  %v8419_v52 = vadd.f32 %v8418_v40, %v8417_v30  ;;  %v8252_v56 = vpop.xlane.xlu1 %8251 }
 0xc88   : > { %v11273_v33 = vpop.eup %11272  ;;  %v8424_v63 = vrot.slane %v8423_v45, 1  ;;  %v8314_v57 = vmul.f32 0.03125, %v8252_v56  ;;  %v8626_v24 = vmul.f32 %v11271_v59, %v15820_v34 }
 0xc89   : > { %11278 = vrsqrt.f32 %v8566_v0  ;;  %v8567_v61 = vadd.f32 1e-05, %v8535_v49  ;;  %v8536_v53 = vmul.f32 0.125, %v8419_v52  ;;  %v8255_v1 = vpop.xlane.xlu0 %8254  ;;  %v8627_v20 = vmul.f32 %v11273_v33, %v15825_v21 }
 0xc8a   : > { %v11275_v62 = vpop.eup %11274  ;;  %v8425_v18 = vadd.f32 %v8424_v63, %v8423_v45  ;;  %v8426_v38 = vrot.slane %v8314_v57, 4  ;;  %v8315_v29 = vmul.f32 0.03125, %v8255_v1  ;;  %v8658_v32 = vmul.f32 %v8626_v24, %v15966_v43 }
 0xc8b   : > { %11280 = vrsqrt.f32 %v8567_v61  ;;  %v8568_v41 = vadd.f32 1e-05, %v8536_v53  ;;  %v8258_v42 = vpop.xlane.xlu1 %8257  ;;  %v8659_v6 = vmul.f32 %v8627_v20, %v15966_v43  ;;  %v8628_v47 = vmul.f32 %v11275_v62, %v15831_v14 }
 0xc8c   : > { %v11277_v34 = vpop.eup %11276  ;;  %v8537_v37 = vmul.f32 0.125, %v8425_v18  ;;  %v8427_v17 = vadd.f32 %v8426_v38, %v8314_v57  ;;  %v8432_v5 = vrot.slane %v8315_v29, 4  ;;  %v8690_v30 = vadd.f32 %v8658_v32, %v15972_v39 }
 0xc8d   : > { %11282 = vrsqrt.f32 %v8568_v41  ;;  %v8316_v21 = vmul.f32 0.03125, %v8258_v42  ;;  %v8261_v27 = vpop.xlane.xlu0 %8260  ;;  %v8691_v50 = vadd.f32 %v8659_v6, %v15972_v39  ;;  %v8660_v44 = vmul.f32 %v8628_v47, %v15966_v43 }
 0xc8e   : > { %v8569_v9 = vadd.f32 1e-05, %v8537_v37  ;;  %v8428_v7 = vrot.slane %v8427_v17, 2  ;;  %v8433_v40 = vadd.f32 %v8432_v5, %v8315_v29  ;;  %8762 = vrot.lane.b32.xlu0 %v8690_v30, %s11493_s10  ;;  %v8317_v45 = vmul.f32 0.03125, %v8261_v27 }
 0xc8f   : > { %v8438_v14 = vrot.slane %v8316_v21, 4  ;;  %8764 = vrot.lane.b32.xlu1 %v8691_v50, %s11493_s10  ;;  %v8692_v59 = vadd.f32 %v8660_v44, %v15972_v39  ;;  %v8629_v0 = vmul.f32 %v11277_v34, %v15837_v16 }
 0xc90   : > { %11284 = vrsqrt.f32 %v8569_v9  ;;  %v8429_v49 = vadd.f32 %v8428_v7, %v8427_v17  ;;  %v8434_v52 = vrot.slane %v8433_v40, 2  ;;  %v8444_v56 = vrot.slane %v8317_v45, 4 }
 0xc91   : > { %v8439_v33 = vadd.f32 %v8438_v14, %v8316_v21  ;;  %v8661_v63 = vmul.f32 %v8629_v0, %v15966_v43 }
 0xc92   : > { %v8430_v57 = vrot.slane %v8429_v49, 1  ;;  %v8435_v24 = vadd.f32 %v8434_v52, %v8433_v40  ;;  %v8445_v61 = vadd.f32 %v8444_v56, %v8317_v45  ;;  %8766 = vrot.lane.b32.xlu0 %v8692_v59, %s11493_s10 }
 0xc93   : > { %v11279_v53 = vpop.eup %11278  ;;  %v8440_v1 = vrot.slane %v8439_v33, 2  ;;  %v8693_v20 = vadd.f32 %v8661_v63, %v15972_v39 }
 0xc94   : > { %v8431_v62 = vadd.f32 %v8430_v57, %v8429_v49  ;;  %v8436_v18 = vrot.slane %v8435_v24, 1  ;;  %v8446_v38 = vrot.slane %v8445_v61, 2  ;;  %v8630_v16 = vmul.f32 %v11279_v53, %v15844_v58 }
 0xc95   : > { %v11281_v29 = vpop.eup %11280  ;;  %v8441_v32 = vadd.f32 %v8440_v1, %v8439_v33  ;;  %8768 = vrot.lane.b32.xlu1 %v8693_v20, %s11493_s10 }
 0xc96   : > { %v8538_v41 = vmul.f32 0.125, %v8431_v62  ;;  %v8437_v42 = vadd.f32 %v8436_v18, %v8435_v24  ;;  %v8447_v6 = vadd.f32 %v8446_v38, %v8445_v61  ;;  %v8662_v47 = vmul.f32 %v8630_v16, %v15966_v43 }
 0xc97   : > { %v11283_v34 = vpop.eup %11282  ;;  %v8442_v37 = vrot.slane %v8441_v32, 1  ;;  %v8631_v17 = vmul.f32 %v11281_v29, %v15849_v8 }
 0xc98   : > { %v8570_v5 = vadd.f32 1e-05, %v8538_v41  ;;  %v8539_v30 = vmul.f32 0.125, %v8437_v42  ;;  %v8448_v21 = vrot.slane %v8447_v6, 1  ;;  %v8694_v27 = vadd.f32 %v8662_v47, %v15972_v39 }
 0xc99   : > { %v8443_v50 = vadd.f32 %v8442_v37, %v8441_v32  ;;  %v8264_v58 = vpop.xlane.xlu1 %8263  ;;  %v8663_v44 = vmul.f32 %v8631_v17, %v15966_v43  ;;  %v8632_v9 = vmul.f32 %v11283_v34, %v15855_v35 }
 0xc9a   : > { %v11285_v7 = vpop.eup %11284  ;;  %11286 = vrsqrt.f32 %v8570_v5  ;;  %v8571_v40 = vadd.f32 1e-05, %v8539_v30  ;;  %v8449_v45 = vadd.f32 %v8448_v21, %v8447_v6  ;;  %v8318_v14 = vmul.f32 0.03125, %v8264_v58  ;;  %8770 = vrot.lane.b32.xlu0 %v8694_v27, %s11493_s10 }
 0xc9b   : > { %v8540_v59 = vmul.f32 0.125, %v8443_v50  ;;  %v8267_v8 = vpop.xlane.xlu0 %8266  ;;  %v8695_v0 = vadd.f32 %v8663_v44, %v15972_v39  ;;  %v8664_v49 = vmul.f32 %v8632_v9, %v15966_v43  ;;  %v8633_v52 = vmul.f32 %v11285_v7, %v15861_v10 }
 0xc9c   : > { %11288 = vrsqrt.f32 %v8571_v40  ;;  %v8541_v56 = vmul.f32 0.125, %v8449_v45  ;;  %v8450_v33 = vrot.slane %v8318_v14, 4  ;;  %v8319_v63 = vmul.f32 0.03125, %v8267_v8 }
 0xc9d   : > { %v8572_v35 = vadd.f32 1e-05, %v8540_v59  ;;  %v8270_v57 = vpop.xlane.xlu1 %8269  ;;  %8772 = vrot.lane.b32.xlu1 %v8695_v0, %s11493_s10  ;;  %v8696_v24 = vadd.f32 %v8664_v49, %v15972_v39  ;;  %v8665_v61 = vmul.f32 %v8633_v52, %v15966_v43 }
 0xc9e   : > { %v8451_v53 = vadd.f32 %v8450_v33, %v8318_v14  ;;  %v8456_v1 = vrot.slane %v8319_v63, 4  ;;  %v8320_v20 = vmul.f32 0.03125, %v8270_v57  ;;  %v8573_v62 = vadd.f32 1e-05, %v8541_v56 }
 0xc9f   : > { %11290 = vrsqrt.f32 %v8572_v35  ;;  %v8273_v18 = vpop.xlane.xlu0 %8272  ;;  %8774 = vrot.lane.b32.xlu0 %v8696_v24, %s11493_s10  ;;  %v8697_v10 = vadd.f32 %v8665_v61, %v15972_v39 }
 0xca0   : > { %v8452_v38 = vrot.slane %v8451_v53, 2  ;;  %v8457_v16 = vadd.f32 %v8456_v1, %v8319_v63  ;;  %v8462_v29 = vrot.slane %v8320_v20, 4  ;;  %v8321_v32 = vmul.f32 0.03125, %v8273_v18 }
 0xca1   : > { %8776 = vrot.lane.b32.xlu1 %v8697_v10, %s11493_s10  ;;  %11292 = vrsqrt.f32 %v8573_v62 }
 0xca2   : > { %v8453_v41 = vadd.f32 %v8452_v38, %v8451_v53  ;;  %v8458_v42 = vrot.slane %v8457_v16, 2  ;;  %v8463_v6 = vadd.f32 %v8462_v29, %v8320_v20  ;;  %v8468_v47 = vrot.slane %v8321_v32, 4 }
 0xca4   : > { %v11287_v34 = vpop.eup %11286  ;;  %v8454_v37 = vrot.slane %v8453_v41, 1  ;;  %v8459_v17 = vadd.f32 %v8458_v42, %v8457_v16  ;;  %v8464_v5 = vrot.slane %v8463_v6, 2  ;;  %v8469_v30 = vadd.f32 %v8468_v47, %v8321_v32 }
 0xca5   : > { %v8634_v21 = vmul.f32 %v11287_v34, %v15868_v55 }
 0xca6   : > { %v11289_v27 = vpop.eup %11288  ;;  %v8455_v50 = vadd.f32 %v8454_v37, %v8453_v41  ;;  %v8460_v58 = vrot.slane %v8459_v17, 1  ;;  %v8465_v44 = vadd.f32 %v8464_v5, %v8463_v6  ;;  %v8470_v9 = vrot.slane %v8469_v30, 2 }
 0xca7   : > { %v8666_v7 = vmul.f32 %v8634_v21, %v15966_v43  ;;  %v8635_v40 = vmul.f32 %v11289_v27, %v15873_v25 }
 0xca8   : > { %v8542_v45 = vmul.f32 0.125, %v8455_v50  ;;  %v8461_v14 = vadd.f32 %v8460_v58, %v8459_v17  ;;  %v8466_v59 = vrot.slane %v8465_v44, 1  ;;  %v8276_v8 = vpop.xlane.xlu1 %8275  ;;  %v8279_v0 = vpop.xlane.xlu0 %8278  ;;  %v8471_v52 = vadd.f32 %v8470_v9, %v8469_v30 }
 0xca9   : > { %v11291_v49 = vpop.eup %11290  ;;  %v8322_v56 = vmul.f32 0.03125, %v8276_v8  ;;  %v8323_v33 = vmul.f32 0.03125, %v8279_v0  ;;  %v8698_v55 = vadd.f32 %v8666_v7, %v15972_v39  ;;  %v8667_v24 = vmul.f32 %v8635_v40, %v15966_v43 }
 0xcaa   : > { %v8574_v63 = vadd.f32 1e-05, %v8542_v45  ;;  %v8543_v35 = vmul.f32 0.125, %v8461_v14  ;;  %v8467_v57 = vadd.f32 %v8466_v59, %v8465_v44  ;;  %v8472_v61 = vrot.slane %v8471_v52, 1 }
 0xcab   : > { %v8474_v53 = vrot.slane %v8322_v56, 4  ;;  %v8480_v1 = vrot.slane %v8323_v33, 4  ;;  %8778 = vrot.lane.b32.xlu0 %v8698_v55, %s11493_s10  ;;  %v8636_v25 = vmul.f32 %v11291_v49, %v15879_v46  ;;  %v8699_v38 = vadd.f32 %v8667_v24, %v15972_v39  ;;  %v11293_v16 = vpop.eup %11292 }
 0xcac   : > { %11294 = vrsqrt.f32 %v8574_v63  ;;  %v8575_v20 = vadd.f32 1e-05, %v8543_v35  ;;  %v8544_v62 = vmul.f32 0.125, %v8467_v57  ;;  %v8282_v18 = vpop.xlane.xlu1 %8281  ;;  %v8285_v10 = vpop.xlane.xlu0 %8284  ;;  %v8473_v29 = vadd.f32 %v8472_v61, %v8471_v52  ;;  %v11060_v35 = vld [vmem:[%s16413_s3 + $0xc0] sm:$0xff]  }
 0xcad   : > { %v8475_v32 = vadd.f32 %v8474_v53, %v8322_v56  ;;  %v8481_v41 = vadd.f32 %v8480_v1, %v8323_v33  ;;  %v8324_v42 = vmul.f32 0.03125, %v8282_v18  ;;  %v8325_v47 = vmul.f32 0.03125, %v8285_v10  ;;  %8780 = vrot.lane.b32.xlu1 %v8699_v38, %s11493_s10  ;;  %10675 = vmatprep.subr.bf16.mxu1 %v11060_v35 }
 0xcae   : > { %11296 = vrsqrt.f32 %v8575_v20  ;;  %v8576_v6 = vadd.f32 1e-05, %v8544_v62  ;;  %v8668_v34 = vmul.f32 %v8636_v25, %v15966_v43  ;;  %v8545_v46 = vmul.f32 0.125, %v8473_v29  ;;  %10676 = vmatpush3.bf16.msra.mxu1 %v11060_v35 }
 0xcaf   : > { %v8476_v37 = vrot.slane %v8475_v32, 2  ;;  %v8482_v17 = vrot.slane %v8481_v41, 2  ;;  %v8486_v5 = vrot.slane %v8324_v42, 4  ;;  %v8492_v30 = vrot.slane %v8325_v47, 4 }
 0xcb0   : > { %11298 = vrsqrt.f32 %v8576_v6  ;;  %v8700_v21 = vadd.f32 %v8668_v34, %v15972_v39  ;;  %v8637_v27 = vmul.f32 %v11293_v16, %v15885_v4  ;;  %v8577_v50 = vadd.f32 1e-05, %v8545_v46 }
 0xcb1   : > { %v8477_v58 = vadd.f32 %v8476_v37, %v8475_v32  ;;  %v8483_v44 = vadd.f32 %v8482_v17, %v8481_v41  ;;  %v8487_v9 = vadd.f32 %v8486_v5, %v8324_v42  ;;  %v8493_v7 = vadd.f32 %v8492_v30, %v8325_v47 }
 0xcb2   : > { %8782 = vrot.lane.b32.xlu0 %v8700_v21, %s11493_s10  ;;  %v8669_v40 = vmul.f32 %v8637_v27, %v15966_v43  ;;  %11300 = vrsqrt.f32 %v8577_v50 }
 0xcb3   : > { %v8478_v45 = vrot.slane %v8477_v58, 1  ;;  %v8484_v14 = vrot.slane %v8483_v44, 1  ;;  %v8488_v59 = vrot.slane %v8487_v9, 2  ;;  %v8494_v8 = vrot.slane %v8493_v7, 2 }
 0xcb4   : > { %v8701_v0 = vadd.f32 %v8669_v40, %v15972_v39 }
 0xcb5   : > { %v8479_v49 = vadd.f32 %v8478_v45, %v8477_v58  ;;  %v8485_v52 = vadd.f32 %v8484_v14, %v8483_v44  ;;  %v8489_v56 = vadd.f32 %v8488_v59, %v8487_v9  ;;  %v8288_v4 = vpop.xlane.xlu1 %8287  ;;  %v8495_v55 = vadd.f32 %v8494_v8, %v8493_v7 }
 0xcb6   : > { %v11295_v33 = vpop.eup %11294  ;;  %8784 = vrot.lane.b32.xlu1 %v8701_v0, %s11493_s10  ;;  %v8326_v63 = vmul.f32 0.03125, %v8288_v4 }
 0xcb7   : > { %v8546_v57 = vmul.f32 0.125, %v8479_v49  ;;  %v8547_v24 = vmul.f32 0.125, %v8485_v52  ;;  %v8490_v61 = vrot.slane %v8489_v56, 1  ;;  %v8291_v53 = vpop.xlane.xlu0 %8290  ;;  %v8638_v1 = vmul.f32 %v11295_v33, %v15892_v54 }
 0xcb8   : > { %v11297_v25 = vpop.eup %11296  ;;  %v8496_v20 = vrot.slane %v8495_v55, 1  ;;  %v8498_v62 = vrot.slane %v8326_v63, 4  ;;  %v8327_v18 = vmul.f32 0.03125, %v8291_v53 }
 0xcb9   : > { %v8578_v10 = vadd.f32 1e-05, %v8546_v57  ;;  %v8579_v38 = vadd.f32 1e-05, %v8547_v24  ;;  %v8491_v16 = vadd.f32 %v8490_v61, %v8489_v56  ;;  %v8670_v29 = vmul.f32 %v8638_v1, %v15966_v43  ;;  %v8294_v32 = vpop.xlane.xlu1 %8293 }
 0xcba   : > { %v11299_v41 = vpop.eup %11298  ;;  %v8497_v42 = vadd.f32 %v8496_v20, %v8495_v55  ;;  %v8499_v6 = vadd.f32 %v8498_v62, %v8326_v63  ;;  %v8504_v47 = vrot.slane %v8327_v18, 4  ;;  %v8328_v34 = vmul.f32 0.03125, %v8294_v32 }
 0xcbb   : > { %11302 = vrsqrt.f32 %v8578_v10  ;;  %v8548_v46 = vmul.f32 0.125, %v8491_v16  ;;  %v8702_v54 = vadd.f32 %v8670_v29, %v15972_v39  ;;  %v8297_v37 = vpop.xlane.xlu0 %8296  ;;  %v8639_v17 = vmul.f32 %v11297_v25, %v15897_v26 }
 0xcbc   : > { %11304 = vrsqrt.f32 %v8579_v38  ;;  %v8549_v5 = vmul.f32 0.125, %v8497_v42  ;;  %v8500_v30 = vrot.slane %v8499_v6, 2  ;;  %v8505_v21 = vadd.f32 %v8504_v47, %v8327_v18  ;;  %v11301_v9 = vpop.eup %11300 }
 0xcbd   : > { %v8580_v27 = vadd.f32 1e-05, %v8548_v46  ;;  %8786 = vrot.lane.b32.xlu0 %v8702_v54, %s11493_s10  ;;  %v8510_v50 = vrot.slane %v8328_v34, 4  ;;  %v8329_v58 = vmul.f32 0.03125, %v8297_v37  ;;  %v8671_v44 = vmul.f32 %v8639_v17, %v15966_v43 }
 0xcbe   : > { %v8581_v7 = vadd.f32 1e-05, %v8549_v5  ;;  %v8501_v40 = vadd.f32 %v8500_v30, %v8499_v6  ;;  %v8506_v45 = vrot.slane %v8505_v21, 2  ;;  %v8640_v14 = vmul.f32 %v11299_v41, %v15903_v15 }
 0xcbf   : > { %11306 = vrsqrt.f32 %v8580_v27  ;;  %v8511_v59 = vadd.f32 %v8510_v50, %v8328_v34  ;;  %v8516_v26 = vrot.slane %v8329_v58, 4  ;;  %v8703_v8 = vadd.f32 %v8671_v44, %v15972_v39 }
 0xcc0   : > { %11308 = vrsqrt.f32 %v8581_v7  ;;  %v8502_v0 = vrot.slane %v8501_v40, 1  ;;  %v8507_v49 = vadd.f32 %v8506_v45, %v8505_v21  ;;  %v8672_v52 = vmul.f32 %v8640_v14, %v15966_v43 }
 0xcc1   : > { %v8512_v56 = vrot.slane %v8511_v59, 2  ;;  %v8517_v4 = vadd.f32 %v8516_v26, %v8329_v58  ;;  %8788 = vrot.lane.b32.xlu1 %v8703_v8, %s11493_s10  ;;  %v8641_v33 = vmul.f32 %v11301_v9, %v15906_v13 }
 0xcc2   : > { %v8503_v55 = vadd.f32 %v8502_v0, %v8501_v40  ;;  %v8508_v63 = vrot.slane %v8507_v49, 1  ;;  %v8704_v15 = vadd.f32 %v8672_v52, %v15972_v39 }
 0xcc3   : > { %v8513_v35 = vadd.f32 %v8512_v56, %v8511_v59  ;;  %v8518_v57 = vrot.slane %v8517_v4, 2  ;;  %v8673_v24 = vmul.f32 %v8641_v33, %v15966_v43 }
 0xcc4   : > { %v8550_v61 = vmul.f32 0.125, %v8503_v55  ;;  %v8509_v53 = vadd.f32 %v8508_v63, %v8507_v49  ;;  %8790 = vrot.lane.b32.xlu0 %v8704_v15, %s11493_s10 }
 0xcc5   : > { %v11303_v1 = vpop.eup %11302  ;;  %v8514_v25 = vrot.slane %v8513_v35, 1  ;;  %v8519_v20 = vadd.f32 %v8518_v57, %v8517_v4  ;;  %v8705_v62 = vadd.f32 %v8673_v24, %v15972_v39 }
 0xcc6   : > { %v11305_v18 = vpop.eup %11304  ;;  %v8582_v10 = vadd.f32 1e-05, %v8550_v61  ;;  %v8551_v13 = vmul.f32 0.125, %v8509_v53  ;;  %v8642_v38 = vmul.f32 %v11303_v1, %v15916_v12  ;;  %v17114_v1 = vld [vmem:[#allocation119_spill] sm:$0xff] }
 0xcc7   : > { %v8515_v16 = vadd.f32 %v8514_v25, %v8513_v35  ;;  %v8520_v29 = vrot.slane %v8519_v20, 1  ;;  %8792 = vrot.lane.b32.xlu1 %v8705_v62, %s11493_s10  ;;  %v8643_v32 = vmul.f32 %v11305_v18, %v15919_v48  ;;  %v17115_v62 = vld [vmem:[#allocation118_spill] sm:$0xff] }
 0xcc8   : > { %11310 = vrsqrt.f32 %v8582_v10  ;;  %v8583_v41 = vadd.f32 1e-05, %v8551_v13  ;;  %v8674_v42 = vmul.f32 %v8642_v38, %v15966_v43  ;;  %v17116_v10 = vld [vmem:[#allocation120_spill] sm:$0xff] }
 0xcc9   : > { %v11307_v6 = vpop.eup %11306  ;;  %v8552_v47 = vmul.f32 0.125, %v8515_v16  ;;  %v8521_v34 = vadd.f32 %v8520_v29, %v8519_v20  ;;  %v8675_v46 = vmul.f32 %v8643_v32, %v15966_v43  ;;  %v17117_v16 = vld [vmem:[#allocation123_spill] sm:$0xff]  ;;  %v17118_v32 = vld [vmem:[#allocation126_spill] sm:$0xff] }
 0xcca   : > { %v11309_v54 = vpop.eup %11308  ;;  %11312 = vrsqrt.f32 %v8583_v41  ;;  %v8706_v37 = vadd.f32 %v8674_v42, %v15972_v39  ;;  %v8644_v12 = vmul.f32 %v11307_v6, %v15926_v22 }
 0xccb   : > { %v8584_v17 = vadd.f32 1e-05, %v8552_v47  ;;  %v8553_v5 = vmul.f32 0.125, %v8521_v34  ;;  %v8707_v30 = vadd.f32 %v8675_v46, %v15972_v39  ;;  %v8645_v48 = vmul.f32 %v11309_v54, %v15933_v28  ;;  %v17119_v47 = vld [vmem:[#allocation124_spill] sm:$0xff]  ;;  %v17120_v46 = vld [vmem:[#allocation125_spill] sm:$0xff] }
 0xccc   : > { %8794 = vrot.lane.b32.xlu0 %v8706_v37, %s11493_s10  ;;  %v8676_v21 = vmul.f32 %v8644_v12, %v15966_v43 }
 0xccd   : > { %11314 = vrsqrt.f32 %v8584_v17  ;;  %v8585_v27 = vadd.f32 1e-05, %v8553_v5  ;;  %8796 = vrot.lane.b32.xlu1 %v8707_v30, %s11493_s10  ;;  %v8677_v50 = vmul.f32 %v8645_v48, %v15966_v43  ;;  %v17121_v5 = vld [vmem:[#allocation127_spill] sm:$0xff]  ;;  %v17122_v48 = vld [vmem:[#allocation6_spill] sm:$0xff] }
 0xcce   : > { %v8708_v58 = vadd.f32 %v8676_v21, %v15972_v39 }
 0xccf   : > { %11316 = vrsqrt.f32 %v8585_v27  ;;  %v8709_v22 = vadd.f32 %v8677_v50, %v15972_v39 }
 0xcd0   : > { %8798 = vrot.lane.b32.xlu0 %v8708_v58, %s11493_s10 }
 0xcd1   : > { %8800 = vrot.lane.b32.xlu1 %v8709_v22, %s11493_s10  ;;  %v17123_v22 = vld [vmem:[#allocation128_spill] sm:$0xff] }
 0xcd2   : > { %v11311_v28 = vpop.eup %11310 }
 0xcd3   : > { %v8646_v44 = vmul.f32 %v11311_v28, %v15940_v60  ;;  %v11061_v60 = vld [vmem:[%s16413_s3 + $0xc8] sm:$0xff]  }
 0xcd4   : > { %v11313_v9 = vpop.eup %11312  ;;  %10677 = vmatprep.subr.bf16.mxu1 %v11061_v60 }
 0xcd5   : > { %v8678_v7 = vmul.f32 %v8646_v44, %v15966_v43  ;;  %v8647_v40 = vmul.f32 %v11313_v9, %v15945_v31  ;;  %10678 = vmatpush3.bf16.msra.mxu1 %v11061_v60  ;;  %v17124_v44 = vld [vmem:[#allocation129_spill] sm:$0xff] }
 0xcd7   : > { %v11315_v45 = vpop.eup %11314  ;;  %v8710_v14 = vadd.f32 %v8678_v7, %v15972_v39  ;;  %v8679_v59 = vmul.f32 %v8647_v40, %v15966_v43 }
 0xcd8   : > { %v8648_v26 = vmul.f32 %v11315_v45, %v15951_v2 }
 0xcd9   : > { %v11317_v8 = vpop.eup %11316  ;;  %8802 = vrot.lane.b32.xlu0 %v8710_v14, %s11493_s10  ;;  %v8711_v0 = vadd.f32 %v8679_v59, %v15972_v39  ;;  %v17125_v14 = vld [vmem:[#allocation130_spill] sm:$0xff] }
 0xcda   : > { %v8680_v49 = vmul.f32 %v8648_v26, %v15966_v43  ;;  %v8649_v31 = vmul.f32 %v11317_v8, %v15957_v3  ;;  %v17126_v26 = vld [vmem:[#allocation131_spill] sm:$0xff] }
 0xcdb   : > { %8804 = vrot.lane.b32.xlu1 %v8711_v0, %s11493_s10 }
 0xcdc   : > { %v8712_v52 = vadd.f32 %v8680_v49, %v15972_v39  ;;  %v8681_v2 = vmul.f32 %v8649_v31, %v15966_v43  ;;  %v17127_v31 = vld [vmem:[#allocation9_spill] sm:$0xff] }
 0xcde   : > { %8806 = vrot.lane.b32.xlu0 %v8712_v52, %s11493_s10  ;;  %v8713_v56 = vadd.f32 %v8681_v2, %v15972_v39  ;;  %v17128_v2 = vld [vmem:[#allocation136_spill] sm:$0xff] }
 0xcdf   : > { %v8747_v4 = vpop.permute.xlu1 %8746 }
 0xce0   : > { %8808 = vrot.lane.b32.xlu1 %v8713_v56, %s11493_s10  ;;  %v8842_v55 = vadd.f32 %v8747_v4, %v15463_v23 }
 0xce1   : > { %v8749_v33 = vpop.permute.xlu0 %8748 }
 0xce2   : > { %v8843_v3 = vadd.f32 %v8749_v33, %v15472_v11 }
 0xce3   : > { %v8751_v63 = vpop.permute.xlu1 %8750 }
 0xce4   : > { %v8878_v15 = vpack.c.bf16 %v8843_v3, %v8842_v55  ;;  %v8844_v43 = vadd.f32 %v8751_v63, %v15466_v19  ;;  %v17129_v3 = vld [vmem:[#allocation99_spill] sm:$0xff] }
 0xce6   : > { %8915 = vrot.lane.b32.xlu0 %v8878_v15, %s11494_s16  ;;  %v17130_v15 = vld [vmem:[#allocation133_spill] sm:$0xff] }
 0xce7   : > { %v8753_v35 = vpop.permute.xlu1 %8752 }
 0xce8   : > { %v8845_v57 = vadd.f32 %v8753_v35, %v15469_v51 }
 0xcea   : > { %v8879_v24 = vpack.c.bf16 %v8845_v57, %v8844_v43 }
 0xcec   : > { %8917 = vrot.lane.b32.xlu1 %v8879_v24, %s11494_s16 }
 0xced   : > { %v8755_v39 = vpop.permute.xlu0 %8754 }
 0xcee   : > { %v8846_v53 = vadd.f32 %v8755_v39, %v15481_v36  ;;  %v17131_v39 = vld [vmem:[#allocation132_spill] sm:$0xff] }
 0xcf0   : > { %v8757_v61 = vpop.permute.xlu1 %8756 }
 0xcf1   : > { %v8847_v23 = vadd.f32 %v8757_v61, %v17114_v1 }
 0xcf3   : > { %v8880_v25 = vpack.c.bf16 %v8847_v23, %v8846_v53  ;;  %v17132_v53 = vld [vmem:[#allocation100_spill] sm:$0xff] }
 0xcf5   : > { %8919 = vrot.lane.b32.xlu0 %v8880_v25, %s11494_s16 }
 0xcf7   : > { %v8759_v11 = vpop.permute.xlu0 %8758 }
 0xcf8   : > { %v8761_v20 = vpop.permute.xlu1 %8760  ;;  %v8848_v18 = vadd.f32 %v8759_v11, %v17115_v62 }
 0xcf9   : > { %v8849_v19 = vadd.f32 %v8761_v20, %v17116_v10  ;;  %v17133_v20 = vld [vmem:[#allocation38_spill] sm:$0xff] }
 0xcfb   : > { %v8881_v13 = vpack.c.bf16 %v8849_v19, %v8848_v18  ;;  %v17134_v18 = vld [vmem:[#allocation40_spill] sm:$0xff] }
 0xcfd   : > { %8921 = vrot.lane.b32.xlu1 %v8881_v13, %s11494_s16 }
 0xd00   : > { %v8763_v51 = vpop.permute.xlu0 %8762 }
 0xd01   : > { %v8765_v38 = vpop.permute.xlu1 %8764  ;;  %v8850_v29 = vadd.f32 %v8763_v51, %v17117_v16 }
 0xd02   : > { %v8851_v36 = vadd.f32 %v8765_v38, %v17118_v32  ;;  %v17135_v38 = vld [vmem:[#allocation103_spill] sm:$0xff] }
 0xd04   : > { %v8882_v41 = vpack.c.bf16 %v8851_v36, %v8850_v29  ;;  %v8767_v42 = vpop.permute.xlu0 %8766  ;;  %v17136_v29 = vld [vmem:[#allocation39_spill] sm:$0xff] }
 0xd05   : > { %v8852_v34 = vadd.f32 %v8767_v42, %v17119_v47 }
 0xd06   : > { %8923 = vrot.lane.b32.xlu0 %v8882_v41, %s11494_s16 }
 0xd07   : > { %v8769_v6 = vpop.permute.xlu1 %8768 }
 0xd08   : > { %v8853_v54 = vadd.f32 %v8769_v6, %v17120_v46  ;;  %v17137_v6 = vld [vmem:[#allocation104_spill] sm:$0xff] }
 0xd0a   : > { %v8883_v37 = vpack.c.bf16 %v8853_v54, %v8852_v34  ;;  %v17138_v34 = vld [vmem:[#allocation7_spill] sm:$0xff] }
 0xd0c   : > { %8925 = vrot.lane.b32.xlu1 %v8883_v37, %s11494_s16  ;;  %v8771_v12 = vpop.permute.xlu0 %8770 }
 0xd0d   : > { %v8854_v30 = vadd.f32 %v8771_v12, %v17121_v5 }
 0xd0f   : > { %v8773_v17 = vpop.permute.xlu1 %8772 }
 0xd10   : > { %v8855_v21 = vadd.f32 %v8773_v17, %v17122_v48  ;;  %v17139_v17 = vld [vmem:[#allocation108_spill] sm:$0xff] }
 0xd11   : > { %v8775_v27 = vpop.permute.xlu0 %8774 }
 0xd12   : > { %v8884_v50 = vpack.c.bf16 %v8855_v21, %v8854_v30  ;;  %v8856_v28 = vadd.f32 %v8775_v27, %v17123_v22  ;;  %v17140_v30 = vld [vmem:[#allocation134_spill] sm:$0xff] }
 0xd13   : > { %v8777_v58 = vpop.permute.xlu1 %8776 }
 0xd14   : > { %v8857_v9 = vadd.f32 %v8777_v58, %v17124_v44  ;;  %8927 = vrot.lane.b32.xlu0 %v8884_v50, %s11494_s16 }
 0xd16   : > { %v8885_v7 = vpack.c.bf16 %v8857_v9, %v8856_v28 }
 0xd18   : > { %8929 = vrot.lane.b32.xlu1 %v8885_v7, %s11494_s16 }
 0xd1d   : > { %v8779_v40 = vpop.permute.xlu0 %8778 }
 0xd1e   : > { %v8858_v59 = vadd.f32 %v8779_v40, %v17125_v14 }
 0xd1f   : > { %v8781_v45 = vpop.permute.xlu1 %8780 }
 0xd20   : > { %v8859_v8 = vadd.f32 %v8781_v45, %v17126_v26 }
 0xd22   : > { %v8886_v0 = vpack.c.bf16 %v8859_v8, %v8858_v59 }
 0xd24   : > { %8931 = vrot.lane.b32.xlu0 %v8886_v0, %s11494_s16  ;;  %v8783_v60 = vpop.permute.xlu0 %8782 }
 0xd25   : > { %v8860_v52 = vadd.f32 %v8783_v60, %v17127_v31 }
 0xd28   : > { %v8785_v49 = vpop.permute.xlu1 %8784 }
 0xd29   : > { %v8861_v56 = vadd.f32 %v8785_v49, %v17128_v2  ;;  %v16174_v49 = vld [vmem:[%s16414_s4 + $0x98] ss:$0 sm:$0xff] }
 0xd2b   : > { %v8887_v4 = vpack.c.bf16 %v8861_v56, %v8860_v52 }
 0xd2d   : > { %8933 = vrot.lane.b32.xlu1 %v8887_v4, %s11494_s16 }
 0xd2f   : > { %v8787_v33 = vpop.permute.xlu0 %8786 }
 0xd30   : > { %v8862_v63 = vadd.f32 %v8787_v33, %v17129_v3 }
 0xd33   : > { %v8789_v55 = vpop.permute.xlu1 %8788 }
 0xd34   : > { %v8863_v35 = vadd.f32 %v8789_v55, %v17130_v15 }
 0xd36   : > { %v8888_v43 = vpack.c.bf16 %v8863_v35, %v8862_v63  ;;  %v8791_v57 = vpop.permute.xlu0 %8790 }
 0xd37   : > { %v8864_v61 = vadd.f32 %v8791_v57, %v17131_v39 }
 0xd38   : > { %8935 = vrot.lane.b32.xlu0 %v8888_v43, %s11494_s16 }
 0xd39   : > { %v8793_v24 = vpop.permute.xlu1 %8792 }
 0xd3a   : > { %v8865_v1 = vadd.f32 %v8793_v24, %v17132_v53 }
 0xd3c   : > { %v8889_v23 = vpack.c.bf16 %v8865_v1, %v8864_v61 }
 0xd3e   : > { %8937 = vrot.lane.b32.xlu1 %v8889_v23, %s11494_s16  ;;  %v8795_v25 = vpop.permute.xlu0 %8794 }
 0xd3f   : > { %v8797_v11 = vpop.permute.xlu1 %8796  ;;  %v8866_v62 = vadd.f32 %v8795_v25, %v17133_v20 }
 0xd40   : > { %v8867_v10 = vadd.f32 %v8797_v11, %v17134_v18 }
 0xd42   : > { %v8890_v19 = vpack.c.bf16 %v8867_v10, %v8866_v62  ;;  %v8799_v13 = vpop.permute.xlu0 %8798 }
 0xd43   : > { %v8801_v51 = vpop.permute.xlu1 %8800  ;;  %v8868_v16 = vadd.f32 %v8799_v13, %v17135_v38 }
 0xd44   : > { %v8869_v32 = vadd.f32 %v8801_v51, %v17136_v29  ;;  %8939 = vrot.lane.b32.xlu0 %v8890_v19, %s11494_s16 }
 0xd46   : > { %v8891_v36 = vpack.c.bf16 %v8869_v32, %v8868_v16 }
 0xd48   : > { %8941 = vrot.lane.b32.xlu1 %v8891_v36, %s11494_s16 }
 0xd4b   : > { %v8803_v41 = vpop.permute.xlu0 %8802 }
 0xd4c   : > { %v8870_v47 = vadd.f32 %v8803_v41, %v17137_v6 }
 0xd4d   : > { %v8805_v42 = vpop.permute.xlu1 %8804 }
 0xd4e   : > { %v8871_v46 = vadd.f32 %v8805_v42, %v17138_v34 }
 0xd50   : > { %v8892_v54 = vpack.c.bf16 %v8871_v46, %v8870_v47  ;;  %v8807_v37 = vpop.permute.xlu0 %8806 }
 0xd51   : > { %v8872_v5 = vadd.f32 %v8807_v37, %v17139_v17 }
 0xd52   : > { %v8809_v12 = vpop.permute.xlu1 %8808  ;;  %8943 = vrot.lane.b32.xlu0 %v8892_v54, %s11494_s16 }
 0xd53   : > { %v8873_v48 = vadd.f32 %v8809_v12, %v17140_v30 }
 0xd55   : > { %v8893_v21 = vpack.c.bf16 %v8873_v48, %v8872_v5 }
 0xd57   : > { %8945 = vrot.lane.b32.xlu1 %v8893_v21, %s11494_s16 }
 0xd58   : > { %v8916_v27 = vpop.permute.xlu0 %8915 }
 0xd59   : > { %10679 = vmatprep.mubr.msk.bf16.mxu1 %vm2581_vm7, %v8916_v27 }
 0xd5e   : > { %v8918_v50 = vpop.permute.xlu1 %8917 }
 0xd5f   : > { %10680 = vmatmul.mubr.msk.bf16.vlgmr.msra.gmra.mrb[208].mxu1 %vm2581_vm7, %v8918_v50 }
 0xd67   : > { %v8920_v58 = vpop.permute.xlu0 %8919 }
 0xd68   : > { %10683 = vmatprep.mubr.msk.bf16.mxu1 %vm2581_vm7, %v8920_v58 }
 0xd6f   : > { %v8922_v22 = vpop.permute.xlu1 %8921 }
 0xd70   : > { %10684 = vmatmul.mubr.msk.bf16.gmra.mrb[212].mxu1 %vm2581_vm7, %v8922_v22 }
 0xd78   : > { %v8924_v28 = vpop.permute.xlu0 %8923 }
 0xd79   : > { %10687 = vmatprep.mubr.msk.bf16.mxu1 %vm2581_vm7, %v8924_v28 }
 0xd7e   : > { %v8926_v44 = vpop.permute.xlu1 %8925 }
 0xd7f   : > { %10688 = vmatmul.mubr.msk.bf16.gmra.mrb[216].mxu1 %vm2581_vm7, %v8926_v44 }
 0xd86   : > { %v8928_v9 = vpop.permute.xlu0 %8927 }
 0xd87   : > { %10691 = vmatprep.mubr.msk.bf16.mxu1 %vm2581_vm7, %v8928_v9 }
 0xd8a   : > { %v8930_v7 = vpop.permute.xlu1 %8929 }
 0xd8b   : > { %10692 = vmatmul.mubr.msk.bf16.gmra.mrb[220].mxu1 %vm2581_vm7, %v8930_v7 }
 0xd96   : > { %v8932_v40 = vpop.permute.xlu0 %8931 }
 0xd97   : > { %10695 = vmatprep.mubr.msk.bf16.mxu1 %vm2581_vm7, %v8932_v40 }
 0xd9f   : > { %v8934_v45 = vpop.permute.xlu1 %8933 }
 0xda0   : > { %10696 = vmatmul.mubr.msk.bf16.gmra.mrb[224].mxu1 %vm2581_vm7, %v8934_v45 }
 0xdaa   : > { %v8936_v14 = vpop.permute.xlu0 %8935 }
 0xdab   : > { %10699 = vmatprep.mubr.msk.bf16.mxu1 %vm2581_vm7, %v8936_v14 }
 0xdb0   : > { %v8938_v59 = vpop.permute.xlu1 %8937 }
 0xdb1   : > { %10700 = vmatmul.mubr.msk.bf16.gmra.mrb[228].mxu1 %vm2581_vm7, %v8938_v59 }
 0xdb6   : > { %v8940_v26 = vpop.permute.xlu0 %8939 }
 0xdb7   : > { %10703 = vmatprep.mubr.msk.bf16.mxu1 %vm2581_vm7, %v8940_v26 }
 0xdba   : > { %v8942_v8 = vpop.permute.xlu1 %8941 }
 0xdbb   : > { %10704 = vmatmul.mubr.msk.bf16.gmra.mrb[232].mxu1 %vm2581_vm7, %v8942_v8 }
 0xdc4   : > { %v8944_v0 = vpop.permute.xlu0 %8943 }
 0xdc5   : > { %10707 = vmatprep.mubr.msk.bf16.mxu1 %vm2581_vm7, %v8944_v0 }
 0xdc9   : > { %v8946_v60 = vpop.permute.xlu1 %8945 }
 0xdca   : > { %10708 = vmatmul.mubr.msk.bf16.gmra.mrb[236].mxu1 %vm2581_vm7, %v8946_v60 }
 0xe32   : > { %v10681_v31 = vpop.f32.mrb[208].mxu1 }
 0xe33   : > { %v16177_v52 = vadd.f32 %v10681_v31, %v16174_v49  ;;  %v9041_v2 = vpop.f32.mrb[209].mxu1 }
 0xe34   : > { %v16180_v56 = vadd.f32 %v16174_v49, %v9041_v2  ;;  %v10682_v4 = vpop.f32.mrb[210].mxu1 }
 0xe35   : > { %v9202_v33 = vand.u32 2147483647, %v16177_v52  ;;  %v16184_v55 = vadd.f32 %v10682_v4, %v16174_v49  ;;  %v9044_v3 = vpop.f32.mrb[211].mxu1  ;;  %v9170_v28 = vmax.f32 %v16177_v52, 0.0 }
 0xe36   : > { %v9200_v63 = vand.u32 2147483647, %v16180_v56  ;;  %v16188_v15 = vadd.f32 %v16174_v49, %v9044_v3  ;;  %v9168_v45 = vmax.f32 %v16180_v56, 0.0 }
 0xe37   : > { %v9234_v35 = vsub.f32 0.0, %v9202_v33  ;;  %v9203_v43 = vand.u32 2147483647, %v16184_v55  ;;  %v9171_v60 = vmax.f32 %v16184_v55, 0.0 }
 0xe38   : > { %v9232_v57 = vsub.f32 0.0, %v9200_v63  ;;  %v9201_v24 = vand.u32 2147483647, %v16188_v15  ;;  %v9169_v56 = vmax.f32 %v16188_v15, 0.0 }
 0xe39   : > { %v9268_v39 = vmul.f32 1.442695, %v9234_v35  ;;  %v9235_v61 = vsub.f32 0.0, %v9203_v43 }
 0xe3a   : > { %v9264_v53 = vmul.f32 1.442695, %v9232_v57  ;;  %v9233_v1 = vsub.f32 0.0, %v9201_v24 }
 0xe3b   : > { %11318 = vpow2.f32 %v9268_v39  ;;  %v9270_v23 = vmul.f32 1.442695, %v9235_v61 }
 0xe3c   : > { %11320 = vpow2.f32 %v9264_v53  ;;  %v9266_v25 = vmul.f32 1.442695, %v9233_v1 }
 0xe3d   : > { %11322 = vpow2.f32 %v9270_v23 }
 0xe3e   : > { %11324 = vpow2.f32 %v9266_v25 }
 0xe43   : > { %v10685_v11 = vpop.f32.mrb[212].mxu1 }
 0xe44   : > { %v16193_v20 = vadd.f32 %v10685_v11, %v16174_v49  ;;  %v9057_v62 = vpop.f32.mrb[213].mxu1 }
 0xe45   : > { %v11319_v18 = vpop.eup %11318  ;;  %v16196_v10 = vadd.f32 %v16174_v49, %v9057_v62  ;;  %v10686_v19 = vpop.f32.mrb[214].mxu1 }
 0xe46   : > { %v11321_v13 = vpop.eup %11320  ;;  %v9330_v51 = vadd.f32 1.0, %v11319_v18  ;;  %v9206_v38 = vand.u32 2147483647, %v16193_v20  ;;  %v16200_v16 = vadd.f32 %v10686_v19, %v16174_v49  ;;  %v9060_v29 = vpop.f32.mrb[215].mxu1 }
 0xe47   : > { %v11323_v32 = vpop.eup %11322  ;;  %v9328_v36 = vadd.f32 1.0, %v11321_v13  ;;  %v9204_v41 = vand.u32 2147483647, %v16196_v10  ;;  %v16204_v42 = vadd.f32 %v16174_v49, %v9060_v29 }
 0xe48   : > { %v11325_v6 = vpop.eup %11324  ;;  %11326 = vlog2.f32 %v9330_v51  ;;  %v9331_v47 = vadd.f32 1.0, %v11323_v32  ;;  %v9238_v34 = vsub.f32 0.0, %v9206_v38  ;;  %v9207_v37 = vand.u32 2147483647, %v16200_v16 }
 0xe49   : > { %11328 = vlog2.f32 %v9328_v36  ;;  %v9329_v46 = vadd.f32 1.0, %v11325_v6  ;;  %v9236_v54 = vsub.f32 0.0, %v9204_v41  ;;  %v9205_v17 = vand.u32 2147483647, %v16204_v42 }
 0xe4a   : > { %11330 = vlog2.f32 %v9331_v47  ;;  %v9276_v12 = vmul.f32 1.442695, %v9238_v34  ;;  %v9239_v30 = vsub.f32 0.0, %v9207_v37 }
 0xe4b   : > { %11332 = vlog2.f32 %v9329_v46  ;;  %v9272_v5 = vmul.f32 1.442695, %v9236_v54  ;;  %v9237_v48 = vsub.f32 0.0, %v9205_v17 }
 0xe4c   : > { %11334 = vpow2.f32 %v9276_v12  ;;  %v9278_v21 = vmul.f32 1.442695, %v9239_v30  ;;  %v9174_v30 = vmax.f32 %v16193_v20, 0.0 }
 0xe4d   : > { %11336 = vpow2.f32 %v9272_v5  ;;  %v9274_v27 = vmul.f32 1.442695, %v9237_v48 }
 0xe4e   : > { %11338 = vpow2.f32 %v9278_v21 }
 0xe4f   : > { %11340 = vpow2.f32 %v9274_v27 }
 0xe52   : > { %v11327_v50 = vpop.eup %11326  ;;  %v10689_v58 = vpop.f32.mrb[216].mxu1 }
 0xe53   : > { %v11329_v22 = vpop.eup %11328  ;;  %v9365_v44 = vmul.f32 0.6931472, %v11327_v50  ;;  %v16210_v9 = vadd.f32 %v10689_v58, %v16174_v49  ;;  %v9073_v7 = vpop.f32.mrb[217].mxu1  ;;  %v9172_v58 = vmax.f32 %v16196_v10, 0.0 }
 0xe54   : > { %v11331_v40 = vpop.eup %11330  ;;  %v9361_v14 = vmul.f32 0.6931472, %v11329_v22  ;;  %v16221_v59 = vadd.f32 %v16174_v49, %v9073_v7  ;;  %v10690_v26 = vpop.f32.mrb[218].mxu1 }
 0xe55   : > { %v11333_v8 = vpop.eup %11332  ;;  %v9426_v0 = vadd.f32 %v9365_v44, %v9170_v28  ;;  %v9367_v31 = vmul.f32 0.6931472, %v11331_v40  ;;  %v9210_v52 = vand.u32 2147483647, %v16210_v9  ;;  %v9076_v2 = vpop.f32.mrb[219].mxu1  ;;  %v16230_v55 = vadd.f32 %v10690_v26, %v16174_v49 }
 0xe56   : > { %v11335_v4 = vpop.eup %11334  ;;  %v9424_v33 = vadd.f32 %v9361_v14, %v9168_v45  ;;  %v9363_v3 = vmul.f32 0.6931472, %v11333_v8  ;;  %v9208_v63 = vand.u32 2147483647, %v16221_v59  ;;  %v16235_v15 = vadd.f32 %v16174_v49, %v9076_v2 }
 0xe57   : > { %v11337_v35 = vpop.eup %11336  ;;  %9458 = vst.msk [vmem:[%s16217_s13 + $0x10] sm:$0xff] %vm339_vm1, %v9426_v0  ;;  %v9427_v43 = vadd.f32 %v9367_v31, %v9171_v60  ;;  %v9334_v57 = vadd.f32 1.0, %v11335_v4  ;;  %v9242_v24 = vsub.f32 0.0, %v9210_v52  ;;  %v9211_v25 = vand.u32 2147483647, %v16230_v55 }
 0xe58   : > { %9456 = vst.msk [vmem:[%s16217_s13] sm:$0xff] %vm339_vm1, %v9424_v33  ;;  %v9425_v39 = vadd.f32 %v9363_v3, %v9169_v56  ;;  %v9332_v61 = vadd.f32 1.0, %v11337_v35  ;;  %v9240_v53 = vsub.f32 0.0, %v9208_v63  ;;  %v11339_v1 = vpop.eup %11338  ;;  %v9209_v51 = vand.u32 2147483647, %v16235_v15 }
 0xe59   : > { %9459 = vst.msk [vmem:[%s16217_s13 + $0x18] sm:$0xff] %vm339_vm1, %v9427_v43  ;;  %11342 = vlog2.f32 %v9334_v57  ;;  %v9284_v23 = vmul.f32 1.442695, %v9242_v24  ;;  %v11341_v11 = vpop.eup %11340  ;;  %v9335_v62 = vadd.f32 1.0, %v11339_v1  ;;  %v9243_v13 = vsub.f32 0.0, %v9211_v25 }
 0xe5a   : > { %9457 = vst.msk [vmem:[%s16217_s13 + $0x8] sm:$0xff] %vm339_vm1, %v9425_v39  ;;  %11344 = vlog2.f32 %v9332_v61  ;;  %v9280_v18 = vmul.f32 1.442695, %v9240_v53  ;;  %v9333_v19 = vadd.f32 1.0, %v11341_v11  ;;  %v9241_v29 = vsub.f32 0.0, %v9209_v51 }
 0xe5b   : > { %11346 = vpow2.f32 %v9284_v23  ;;  %v9286_v38 = vmul.f32 1.442695, %v9243_v13  ;;  %v9175_v40 = vmax.f32 %v16200_v16, 0.0  ;;  %v9173_v16 = vmax.f32 %v16204_v42, 0.0 }
 0xe5c   : > { %11348 = vlog2.f32 %v9335_v62  ;;  %v9282_v36 = vmul.f32 1.442695, %v9241_v29  ;;  %v9178_v23 = vmax.f32 %v16210_v9, 0.0  ;;  %v9176_v29 = vmax.f32 %v16221_v59, 0.0 }
 0xe5d   : > { %11350 = vlog2.f32 %v9333_v19  ;;  %v9177_v59 = vmax.f32 %v16235_v15, 0.0 }
 0xe5e   : > { %11352 = vpow2.f32 %v9280_v18  ;;  %v10693_v32 = vpop.f32.mrb[220].mxu1 }
 0xe5f   : > { %11354 = vpow2.f32 %v9286_v38  ;;  %v16244_v41 = vadd.f32 %v10693_v32, %v16174_v49  ;;  %v9089_v6 = vpop.f32.mrb[221].mxu1 }
 0xe60   : > { %v16247_v47 = vadd.f32 %v16174_v49, %v9089_v6  ;;  %v10694_v34 = vpop.f32.mrb[222].mxu1  ;;  %11356 = vpow2.f32 %v9282_v36 }
 0xe61   : > { %v9214_v46 = vand.u32 2147483647, %v16244_v41  ;;  %v16251_v54 = vadd.f32 %v10694_v34, %v16174_v49  ;;  %v9092_v37 = vpop.f32.mrb[223].mxu1 }
 0xe62   : > { %v9212_v12 = vand.u32 2147483647, %v16247_v47  ;;  %v16255_v17 = vadd.f32 %v16174_v49, %v9092_v37 }
 0xe63   : > { %v11343_v5 = vpop.eup %11342  ;;  %v9246_v48 = vsub.f32 0.0, %v9214_v46  ;;  %v9215_v21 = vand.u32 2147483647, %v16251_v54  ;;  %v9179_v46 = vmax.f32 %v16230_v55, 0.0 }
 0xe64   : > { %v11345_v27 = vpop.eup %11344  ;;  %v9373_v50 = vmul.f32 0.6931472, %v11343_v5  ;;  %v9244_v22 = vsub.f32 0.0, %v9212_v12  ;;  %v9213_v28 = vand.u32 2147483647, %v16255_v17 }
 0xe65   : > { %v11347_v44 = vpop.eup %11346  ;;  %v9369_v7 = vmul.f32 0.6931472, %v11345_v27  ;;  %v9292_v45 = vmul.f32 1.442695, %v9246_v48  ;;  %v9247_v14 = vsub.f32 0.0, %v9215_v21 }
 0xe66   : > { %v11349_v26 = vpop.eup %11348  ;;  %v9430_v20 = vadd.f32 %v9373_v50, %v9174_v30  ;;  %v9338_v8 = vadd.f32 1.0, %v11347_v44  ;;  %v9288_v0 = vmul.f32 1.442695, %v9244_v22  ;;  %v9245_v60 = vsub.f32 0.0, %v9213_v28 }
 0xe67   : > { %v11351_v31 = vpop.eup %11350  ;;  %v9428_v52 = vadd.f32 %v9369_v7, %v9172_v58  ;;  %v9375_v2 = vmul.f32 0.6931472, %v11349_v26  ;;  %11358 = vpow2.f32 %v9292_v45  ;;  %v9294_v10 = vmul.f32 1.442695, %v9247_v14 }
 0xe68   : > { %v11353_v4 = vpop.eup %11352  ;;  %9462 = vst.msk [vmem:[%s16217_s13 + $0x30] sm:$0xff] %vm339_vm1, %v9430_v20  ;;  %v9371_v33 = vmul.f32 0.6931472, %v11351_v31  ;;  %11360 = vlog2.f32 %v9338_v8  ;;  %v9290_v35 = vmul.f32 1.442695, %v9245_v60  ;;  %v9182_v31 = vmax.f32 %v16244_v41, 0.0 }
 0xe69   : > { %v11355_v56 = vpop.eup %11354  ;;  %9460 = vst.msk [vmem:[%s16217_s13 + $0x20] sm:$0xff] %vm339_vm1, %v9428_v52  ;;  %v9431_v3 = vadd.f32 %v9375_v2, %v9175_v40  ;;  %v9336_v63 = vadd.f32 1.0, %v11353_v4  ;;  %11362 = vpow2.f32 %v9288_v0 }
 0xe6a   : > { %v9429_v43 = vadd.f32 %v9371_v33, %v9173_v16  ;;  %v9339_v57 = vadd.f32 1.0, %v11355_v56  ;;  %11364 = vpow2.f32 %v9294_v10  ;;  %v11357_v24 = vpop.eup %11356  ;;  %v9180_v33 = vmax.f32 %v16247_v47, 0.0 }
 0xe6b   : > { %9463 = vst.msk [vmem:[%s16217_s13 + $0x38] sm:$0xff] %vm339_vm1, %v9431_v3  ;;  %11366 = vlog2.f32 %v9336_v63  ;;  %v9337_v42 = vadd.f32 1.0, %v11357_v24  ;;  %v9183_v3 = vmax.f32 %v16251_v54, 0.0  ;;  %v9181_v24 = vmax.f32 %v16255_v17, 0.0 }
 0xe6c   : > { %9461 = vst.msk [vmem:[%s16217_s13 + $0x28] sm:$0xff] %vm339_vm1, %v9429_v43  ;;  %11368 = vlog2.f32 %v9339_v57 }
 0xe6d   : > { %11370 = vpow2.f32 %v9290_v35 }
 0xe6e   : > { %11372 = vlog2.f32 %v9337_v42 }
 0xe71   : > { %v11359_v39 = vpop.eup %11358 }
 0xe72   : > { %v11361_v61 = vpop.eup %11360  ;;  %v9342_v53 = vadd.f32 1.0, %v11359_v39 }
 0xe73   : > { %v11363_v1 = vpop.eup %11362  ;;  %v9381_v25 = vmul.f32 0.6931472, %v11361_v61  ;;  %v10697_v11 = vpop.f32.mrb[224].mxu1 }
 0xe74   : > { %v11365_v62 = vpop.eup %11364  ;;  %11374 = vlog2.f32 %v9342_v53  ;;  %v9340_v18 = vadd.f32 1.0, %v11363_v1  ;;  %v16273_v19 = vadd.f32 %v10697_v11, %v16174_v49  ;;  %v9105_v13 = vpop.f32.mrb[225].mxu1 }
 0xe75   : > { %v11367_v51 = vpop.eup %11366  ;;  %v9434_v38 = vadd.f32 %v9381_v25, %v9178_v23  ;;  %v9343_v32 = vadd.f32 1.0, %v11365_v62  ;;  %v16277_v36 = vadd.f32 %v16174_v49, %v9105_v13  ;;  %v10698_v6 = vpop.f32.mrb[226].mxu1 }
 0xe76   : > { %v11369_v9 = vpop.eup %11368  ;;  %v9377_v34 = vmul.f32 0.6931472, %v11367_v51  ;;  %11376 = vlog2.f32 %v9340_v18  ;;  %v9218_v37 = vand.u32 2147483647, %v16273_v19  ;;  %v9108_v12 = vpop.f32.mrb[227].mxu1  ;;  %v16286_v55 = vadd.f32 %v10698_v6, %v16174_v49 }
 0xe77   : > { %v11371_v5 = vpop.eup %11370  ;;  %9466 = vst.msk [vmem:[%s16217_s13 + $0x50] sm:$0xff] %vm339_vm1, %v9434_v38  ;;  %v9383_v30 = vmul.f32 0.6931472, %v11369_v9  ;;  %11378 = vlog2.f32 %v9343_v32  ;;  %v9216_v48 = vand.u32 2147483647, %v16277_v36  ;;  %v16289_v7 = vadd.f32 %v16174_v49, %v9108_v12 }
 0xe78   : > { %v11373_v21 = vpop.eup %11372  ;;  %v9432_v27 = vadd.f32 %v9377_v34, %v9176_v29  ;;  %v9341_v50 = vadd.f32 1.0, %v11371_v5  ;;  %v9250_v58 = vsub.f32 0.0, %v9218_v37  ;;  %v9219_v40 = vand.u32 2147483647, %v16286_v55 }
 0xe79   : > { %v9435_v22 = vadd.f32 %v9383_v30, %v9179_v46  ;;  %v9379_v28 = vmul.f32 0.6931472, %v11373_v21  ;;  %v9248_v44 = vsub.f32 0.0, %v9216_v48  ;;  %v9217_v26 = vand.u32 2147483647, %v16289_v7 }
 0xe7a   : > { %9464 = vst.msk [vmem:[%s16217_s13 + $0x40] sm:$0xff] %vm339_vm1, %v9432_v27  ;;  %11380 = vlog2.f32 %v9341_v50  ;;  %v9300_v15 = vmul.f32 1.442695, %v9250_v58  ;;  %v9251_v20 = vsub.f32 0.0, %v9219_v40 }
 0xe7b   : > { %9467 = vst.msk [vmem:[%s16217_s13 + $0x58] sm:$0xff] %vm339_vm1, %v9435_v22  ;;  %v9433_v45 = vadd.f32 %v9379_v28, %v9177_v59  ;;  %v9296_v14 = vmul.f32 1.442695, %v9248_v44  ;;  %v9249_v8 = vsub.f32 0.0, %v9217_v26 }
 0xe7c   : > { %11382 = vpow2.f32 %v9300_v15  ;;  %v9302_v60 = vmul.f32 1.442695, %v9251_v20 }
 0xe7d   : > { %9465 = vst.msk [vmem:[%s16217_s13 + $0x48] sm:$0xff] %vm339_vm1, %v9433_v45  ;;  %11384 = vpow2.f32 %v9296_v14  ;;  %v9298_v2 = vmul.f32 1.442695, %v9249_v8 }
 0xe7e   : > { %v11375_v0 = vpop.eup %11374  ;;  %11386 = vpow2.f32 %v9302_v60  ;;  %v9186_v60 = vmax.f32 %v16273_v19, 0.0  ;;  %v9187_v19 = vmax.f32 %v16286_v55, 0.0 }
 0xe7f   : > { %v9389_v52 = vmul.f32 0.6931472, %v11375_v0  ;;  %11388 = vpow2.f32 %v9298_v2 }
 0xe80   : > { %v11377_v10 = vpop.eup %11376 }
 0xe81   : > { %v11379_v4 = vpop.eup %11378  ;;  %v9438_v16 = vadd.f32 %v9389_v52, %v9182_v31  ;;  %v9385_v56 = vmul.f32 0.6931472, %v11377_v10  ;;  %v9184_v10 = vmax.f32 %v16277_v36, 0.0 }
 0xe82   : > { %v9391_v63 = vmul.f32 0.6931472, %v11379_v4 }
 0xe83   : > { %9470 = vst.msk [vmem:[%s16217_s13 + $0x70] sm:$0xff] %vm339_vm1, %v9438_v16  ;;  %v9436_v35 = vadd.f32 %v9385_v56, %v9180_v33 }
 0xe84   : > { %v11381_v43 = vpop.eup %11380  ;;  %v9439_v41 = vadd.f32 %v9391_v63, %v9183_v3  ;;  %v10701_v57 = vpop.f32.mrb[228].mxu1 }
 0xe85   : > { %9468 = vst.msk [vmem:[%s16217_s13 + $0x60] sm:$0xff] %vm339_vm1, %v9436_v35  ;;  %v9387_v42 = vmul.f32 0.6931472, %v11381_v43  ;;  %v16308_v47 = vadd.f32 %v10701_v57, %v16174_v49  ;;  %v9121_v39 = vpop.f32.mrb[229].mxu1 }
 0xe86   : > { %v11383_v61 = vpop.eup %11382  ;;  %9471 = vst.msk [vmem:[%s16217_s13 + $0x78] sm:$0xff] %vm339_vm1, %v9439_v41  ;;  %v16313_v54 = vadd.f32 %v16174_v49, %v9121_v39  ;;  %v10702_v53 = vpop.f32.mrb[230].mxu1  ;;  %v9185_v39 = vmax.f32 %v16289_v7, 0.0 }
 0xe87   : > { %v11385_v1 = vpop.eup %11384  ;;  %v9437_v23 = vadd.f32 %v9387_v42, %v9181_v24  ;;  %v9346_v25 = vadd.f32 1.0, %v11383_v61  ;;  %v9222_v11 = vand.u32 2147483647, %v16308_v47  ;;  %v9124_v62 = vpop.f32.mrb[231].mxu1  ;;  %v16318_v13 = vadd.f32 %v10702_v53, %v16174_v49 }
 0xe88   : > { %v9344_v17 = vadd.f32 1.0, %v11385_v1  ;;  %v9220_v18 = vand.u32 2147483647, %v16313_v54  ;;  %v16323_v38 = vadd.f32 %v16174_v49, %v9124_v62  ;;  %v11387_v29 = vpop.eup %11386 }
 0xe89   : > { %9469 = vst.msk [vmem:[%s16217_s13 + $0x68] sm:$0xff] %vm339_vm1, %v9437_v23  ;;  %11390 = vlog2.f32 %v9346_v25  ;;  %v9254_v51 = vsub.f32 0.0, %v9222_v11  ;;  %v9223_v6 = vand.u32 2147483647, %v16318_v13  ;;  %v11389_v9 = vpop.eup %11388  ;;  %v9347_v34 = vadd.f32 1.0, %v11387_v29 }
 0xe8a   : > { %11392 = vlog2.f32 %v9344_v17  ;;  %v9252_v32 = vsub.f32 0.0, %v9220_v18  ;;  %v9221_v37 = vand.u32 2147483647, %v16323_v38  ;;  %v9345_v12 = vadd.f32 1.0, %v11389_v9 }
 0xe8b   : > { %v9308_v46 = vmul.f32 1.442695, %v9254_v51  ;;  %v9255_v30 = vsub.f32 0.0, %v9223_v6  ;;  %11394 = vlog2.f32 %v9347_v34 }
 0xe8c   : > { %v9304_v5 = vmul.f32 1.442695, %v9252_v32  ;;  %v9253_v59 = vsub.f32 0.0, %v9221_v37  ;;  %11396 = vlog2.f32 %v9345_v12 }
 0xe8d   : > { %v9310_v48 = vmul.f32 1.442695, %v9255_v30  ;;  %11398 = vpow2.f32 %v9308_v46 }
 0xe8e   : > { %v10705_v21 = vpop.f32.mrb[232].mxu1  ;;  %v9306_v27 = vmul.f32 1.442695, %v9253_v59  ;;  %11400 = vpow2.f32 %v9304_v5 }
 0xe8f   : > { %v16328_v50 = vadd.f32 %v10705_v21, %v16174_v49  ;;  %v9137_v58 = vpop.f32.mrb[233].mxu1  ;;  %11402 = vpow2.f32 %v9310_v48 }
 0xe90   : > { %v16331_v22 = vadd.f32 %v16174_v49, %v9137_v58  ;;  %v10706_v28 = vpop.f32.mrb[234].mxu1  ;;  %11404 = vpow2.f32 %v9306_v27 }
 0xe91   : > { %v9226_v44 = vand.u32 2147483647, %v16328_v50  ;;  %v16335_v15 = vadd.f32 %v10706_v28, %v16174_v49  ;;  %v9140_v40 = vpop.f32.mrb[235].mxu1 }
 0xe92   : > { %v9224_v45 = vand.u32 2147483647, %v16331_v22  ;;  %v16339_v14 = vadd.f32 %v16174_v49, %v9140_v40 }
 0xe93   : > { %v11391_v26 = vpop.eup %11390  ;;  %v9258_v20 = vsub.f32 0.0, %v9226_v44  ;;  %v9227_v8 = vand.u32 2147483647, %v16335_v15 }
 0xe94   : > { %v11393_v0 = vpop.eup %11392  ;;  %v9397_v31 = vmul.f32 0.6931472, %v11391_v26  ;;  %v9256_v52 = vsub.f32 0.0, %v9224_v45  ;;  %v9225_v2 = vand.u32 2147483647, %v16339_v14 }
 0xe95   : > { %v9393_v4 = vmul.f32 0.6931472, %v11393_v0  ;;  %v9316_v16 = vmul.f32 1.442695, %v9258_v20  ;;  %v9259_v33 = vsub.f32 0.0, %v9227_v8  ;;  %v11395_v35 = vpop.eup %11394 }
 0xe96   : > { %v9442_v56 = vadd.f32 %v9397_v31, %v9186_v60  ;;  %v9312_v3 = vmul.f32 1.442695, %v9256_v52  ;;  %v9257_v63 = vsub.f32 0.0, %v9225_v2  ;;  %v11397_v57 = vpop.eup %11396  ;;  %v9399_v24 = vmul.f32 0.6931472, %v11395_v35 }
 0xe97   : > { %v9440_v43 = vadd.f32 %v9393_v4, %v9184_v10  ;;  %11406 = vpow2.f32 %v9316_v16  ;;  %v9318_v41 = vmul.f32 1.442695, %v9259_v33  ;;  %v11399_v42 = vpop.eup %11398  ;;  %v9395_v61 = vmul.f32 0.6931472, %v11397_v57 }
 0xe98   : > { %9474 = vst.msk [vmem:[%s16217_s13 + $0x90] sm:$0xff] %vm339_vm1, %v9442_v56  ;;  %11408 = vpow2.f32 %v9312_v3  ;;  %v9314_v36 = vmul.f32 1.442695, %v9257_v63  ;;  %v11401_v53 = vpop.eup %11400  ;;  %v9443_v1 = vadd.f32 %v9399_v24, %v9187_v19  ;;  %v9350_v23 = vadd.f32 1.0, %v11399_v42 }
 0xe99   : > { %9472 = vst.msk [vmem:[%s16217_s13 + $0x80] sm:$0xff] %vm339_vm1, %v9440_v43  ;;  %11410 = vpow2.f32 %v9318_v41  ;;  %v11403_v25 = vpop.eup %11402  ;;  %v9441_v11 = vadd.f32 %v9395_v61, %v9185_v39  ;;  %v9348_v62 = vadd.f32 1.0, %v11401_v53  ;;  %v9190_v2 = vmax.f32 %v16308_v47, 0.0 }
 0xe9a   : > { %11412 = vpow2.f32 %v9314_v36  ;;  %v11405_v55 = vpop.eup %11404  ;;  %9475 = vst.msk [vmem:[%s16217_s13 + $0x98] sm:$0xff] %vm339_vm1, %v9443_v1  ;;  %v9351_v17 = vadd.f32 1.0, %v11403_v25  ;;  %v9188_v33 = vmax.f32 %v16313_v54, 0.0  ;;  %v9191_v35 = vmax.f32 %v16318_v13, 0.0 }
 0xe9b   : > { %11414 = vlog2.f32 %v9350_v23  ;;  %9473 = vst.msk [vmem:[%s16217_s13 + $0x88] sm:$0xff] %vm339_vm1, %v9441_v11  ;;  %v9349_v18 = vadd.f32 1.0, %v11405_v55  ;;  %v9189_v47 = vmax.f32 %v16323_v38, 0.0  ;;  %v9194_v36 = vmax.f32 %v16328_v50, 0.0 }
 0xe9c   : > { %11416 = vlog2.f32 %v9348_v62  ;;  %v9192_v39 = vmax.f32 %v16331_v22, 0.0  ;;  %v9195_v23 = vmax.f32 %v16335_v15, 0.0  ;;  %v9193_v55 = vmax.f32 %v16339_v14, 0.0 }
 0xe9d   : > { %v10709_v51 = vpop.f32.mrb[236].mxu1  ;;  %11418 = vlog2.f32 %v9351_v17 }
 0xe9e   : > { %v16356_v7 = vadd.f32 %v10709_v51, %v16174_v49  ;;  %v9153_v29 = vpop.f32.mrb[237].mxu1  ;;  %11420 = vlog2.f32 %v9349_v18 }
 0xe9f   : > { %v16359_v32 = vadd.f32 %v16174_v49, %v9153_v29  ;;  %v10710_v6 = vpop.f32.mrb[238].mxu1 }
 0xea0   : > { %v9230_v9 = vand.u32 2147483647, %v16356_v7  ;;  %v16363_v34 = vadd.f32 %v10710_v6, %v16174_v49  ;;  %v9156_v46 = vpop.f32.mrb[239].mxu1 }
 0xea1   : > { %v11407_v37 = vpop.eup %11406  ;;  %v9228_v12 = vand.u32 2147483647, %v16359_v32  ;;  %v16367_v5 = vadd.f32 %v16174_v49, %v9156_v46 }
 0xea2   : > { %v11409_v30 = vpop.eup %11408  ;;  %v9354_v59 = vadd.f32 1.0, %v11407_v37  ;;  %v9262_v48 = vsub.f32 0.0, %v9230_v9  ;;  %v9231_v21 = vand.u32 2147483647, %v16363_v34 }
 0xea3   : > { %v11411_v27 = vpop.eup %11410  ;;  %v9352_v58 = vadd.f32 1.0, %v11409_v30  ;;  %v9260_v28 = vsub.f32 0.0, %v9228_v12  ;;  %v9229_v44 = vand.u32 2147483647, %v16367_v5  ;;  %v9198_v12 = vmax.f32 %v16356_v7, 0.0 }
 0xea4   : > { %v11413_v40 = vpop.eup %11412  ;;  %11422 = vlog2.f32 %v9354_v59  ;;  %v9355_v45 = vadd.f32 1.0, %v11411_v27  ;;  %v9324_v26 = vmul.f32 1.442695, %v9262_v48  ;;  %v9263_v20 = vsub.f32 0.0, %v9231_v21 }
 0xea5   : > { %11424 = vlog2.f32 %v9352_v58  ;;  %v9353_v8 = vadd.f32 1.0, %v11413_v40  ;;  %v9320_v0 = vmul.f32 1.442695, %v9260_v28  ;;  %v9261_v49 = vsub.f32 0.0, %v9229_v44  ;;  %v11415_v60 = vpop.eup %11414 }
 0xea6   : > { %11426 = vlog2.f32 %v9355_v45  ;;  %v9326_v31 = vmul.f32 1.442695, %v9263_v20  ;;  %v11417_v52 = vpop.eup %11416  ;;  %v9405_v10 = vmul.f32 0.6931472, %v11415_v60  ;;  %v9196_v48 = vmax.f32 %v16359_v32, 0.0 }
 0xea7   : > { %11428 = vlog2.f32 %v9353_v8  ;;  %v9322_v4 = vmul.f32 1.442695, %v9261_v49  ;;  %v11419_v16 = vpop.eup %11418  ;;  %v9401_v56 = vmul.f32 0.6931472, %v11417_v52  ;;  %v9199_v28 = vmax.f32 %v16363_v34, 0.0 }
 0xea8   : > { %11430 = vpow2.f32 %v9324_v26  ;;  %v11421_v3 = vpop.eup %11420  ;;  %v9446_v63 = vadd.f32 %v9405_v10, %v9190_v2  ;;  %v9407_v43 = vmul.f32 0.6931472, %v11419_v16  ;;  %v9197_v45 = vmax.f32 %v16367_v5, 0.0 }
 0xea9   : > { %11432 = vpow2.f32 %v9320_v0  ;;  %v9444_v41 = vadd.f32 %v9401_v56, %v9188_v33  ;;  %v9403_v57 = vmul.f32 0.6931472, %v11421_v3 }
 0xeaa   : > { %11434 = vpow2.f32 %v9326_v31  ;;  %9478 = vst.msk [vmem:[%s16217_s13 + $0xb0] sm:$0xff] %vm339_vm1, %v9446_v63  ;;  %v9447_v19 = vadd.f32 %v9407_v43, %v9191_v35 }
 0xeab   : > { %11436 = vpow2.f32 %v9322_v4  ;;  %9476 = vst.msk [vmem:[%s16217_s13 + $0xa0] sm:$0xff] %vm339_vm1, %v9444_v41  ;;  %v9445_v54 = vadd.f32 %v9403_v57, %v9189_v47 }
 0xeac   : > { %9479 = vst.msk [vmem:[%s16217_s13 + $0xb8] sm:$0xff] %vm339_vm1, %v9447_v19 }
 0xead   : > { %9477 = vst.msk [vmem:[%s16217_s13 + $0xa8] sm:$0xff] %vm339_vm1, %v9445_v54 }
 0xeae   : > { %v11423_v24 = vpop.eup %11422 }
 0xeaf   : > { %v11425_v13 = vpop.eup %11424  ;;  %v9413_v42 = vmul.f32 0.6931472, %v11423_v24 }
 0xeb0   : > { %v11427_v38 = vpop.eup %11426  ;;  %v9409_v61 = vmul.f32 0.6931472, %v11425_v13 }
 0xeb1   : > { %v11429_v53 = vpop.eup %11428  ;;  %v9450_v1 = vadd.f32 %v9413_v42, %v9194_v36  ;;  %v9415_v25 = vmul.f32 0.6931472, %v11427_v38 }
 0xeb2   : > { %v11431_v11 = vpop.eup %11430  ;;  %v9448_v62 = vadd.f32 %v9409_v61, %v9192_v39  ;;  %v9411_v17 = vmul.f32 0.6931472, %v11429_v53 }
 0xeb3   : > { %v11433_v18 = vpop.eup %11432  ;;  %9482 = vst.msk [vmem:[%s16217_s13 + $0xd0] sm:$0xff] %vm339_vm1, %v9450_v1  ;;  %v9451_v50 = vadd.f32 %v9415_v25, %v9195_v23  ;;  %v9358_v51 = vadd.f32 1.0, %v11431_v11 }
 0xeb4   : > { %v11435_v29 = vpop.eup %11434  ;;  %9480 = vst.msk [vmem:[%s16217_s13 + $0xc0] sm:$0xff] %vm339_vm1, %v9448_v62  ;;  %v9449_v22 = vadd.f32 %v9411_v17, %v9193_v55  ;;  %v9356_v6 = vadd.f32 1.0, %v11433_v18 }
 0xeb5   : > { %v11437_v9 = vpop.eup %11436  ;;  %9483 = vst.msk [vmem:[%s16217_s13 + $0xd8] sm:$0xff] %vm339_vm1, %v9451_v50  ;;  %11438 = vlog2.f32 %v9358_v51  ;;  %v9359_v15 = vadd.f32 1.0, %v11435_v29 }
 0xeb6   : > { %9481 = vst.msk [vmem:[%s16217_s13 + $0xc8] sm:$0xff] %vm339_vm1, %v9449_v22  ;;  %11440 = vlog2.f32 %v9356_v6  ;;  %v9357_v14 = vadd.f32 1.0, %v11437_v9 }
 0xeb7   : > { %11442 = vlog2.f32 %v9359_v15 }
 0xeb8   : > { %11444 = vlog2.f32 %v9357_v14 }
 0xebf   : > { %v11439_v46 = vpop.eup %11438 }
 0xec0   : > { %v11441_v37 = vpop.eup %11440  ;;  %v9421_v30 = vmul.f32 0.6931472, %v11439_v46 }
 0xec1   : > { %v11443_v59 = vpop.eup %11442  ;;  %v9417_v21 = vmul.f32 0.6931472, %v11441_v37 }
 0xec2   : > { %v11445_v27 = vpop.eup %11444  ;;  %v9454_v58 = vadd.f32 %v9421_v30, %v9198_v12  ;;  %v9423_v44 = vmul.f32 0.6931472, %v11443_v59 }
 0xec3   : > { %v9452_v40 = vadd.f32 %v9417_v21, %v9196_v48  ;;  %v9419_v26 = vmul.f32 0.6931472, %v11445_v27 }
 0xec4   : > { %9486 = vst.msk [vmem:[%s16217_s13 + $0xf0] sm:$0xff] %vm339_vm1, %v9454_v58  ;;  %v9455_v20 = vadd.f32 %v9423_v44, %v9199_v28 }
 0xec5   : > { %9484 = vst.msk [vmem:[%s16217_s13 + $0xe0] sm:$0xff] %vm339_vm1, %v9452_v40  ;;  %v9453_v7 = vadd.f32 %v9419_v26, %v9197_v45 }
 0xec6   : > { %9487 = vst.msk [vmem:[%s16217_s13 + $0xf8] sm:$0xff] %vm339_vm1, %v9455_v20 }
 0xec7   : > { %9485 = vst.msk [vmem:[%s16217_s13 + $0xe8] sm:$0xff] %vm339_vm1, %v9453_v7 }
 0xec8 PF: > { %s17_s24 = sadd.s32 1, %s11487_s24  }
 0xec9   : > { %p14_p6 = scmp.ge.s32.totalorder %s17_s24, 4  }
 0xecb   :  { %16 = sbr.rel (!%p14_p6) target bundleno = 1 (0x1), region = 84 }

</bundles_post_ra>
